<compile_context>
chip_gen: v7x
topology: tpu7x:2x2x1
jax: 0.10.0
libtpu: 0.0.40
codegen_flags: <defaults>
</compile_context>

<pallas_src>
import functools

import jax
import jax.numpy as jnp
from jax import lax
from jax.experimental import pallas as pl
from jax.experimental.pallas import tpu as pltpu


def _fused_kernel(x_ref, w1_ref, b1_ref, w2_ref, b2_ref, w3_ref, b3_ref,
                  w4_ref, b4_ref, o_ref, p1_ref, p2_ref, p3_ref, p4_ref,
                  *, H, W, dils, slope=0.01):
    """One batch element: conv1..conv4 (+bias, +LeakyReLU) fully in VMEM.

    x_ref  : (1, H, W, 1)            input tile (VMEM)
    w*_ref : (9*Cin, Cout)           im2col-reshaped weights (VMEM)
    b*_ref : (1, Cout)               biases (VMEM)
    o_ref  : (1, H*W, Cout4)         output tile (VMEM)
    p*_ref : (H+2d, W+2d, Cin)       zero-padded per-layer activation scratch
    """
    d1, d2, d3, d4 = dils
    f32 = jnp.float32

    # 'same' zero-padding lives in VMEM scratch (no host-side jnp.pad, no
    # extra HBM traffic).  Re-zeroed every grid step: cheap, and safe under
    # megacore "parallel" sharding (no step-0-only init).
    p1_ref[...] = jnp.zeros_like(p1_ref)
    p2_ref[...] = jnp.zeros_like(p2_ref)
    p3_ref[...] = jnp.zeros_like(p3_ref)
    p4_ref[...] = jnp.zeros_like(p4_ref)

    # ---------------- conv1: Cin=1 -> C1, dilation d1 (VPU path) ----------
    p1_ref[d1:d1 + H, d1:d1 + W, :] = x_ref[0].astype(f32)
    w1 = w1_ref[...]                                   # (9, C1)
    c1 = w1.shape[-1]
    acc = jnp.broadcast_to(b1_ref[...].reshape(1, 1, c1), (H, W, c1)).astype(f32)
    for kh in range(3):
        for kw in range(3):
            xs = p1_ref[kh * d1:kh * d1 + H, kw * d1:kw * d1 + W, :]   # (H, W, 1)
            wrow = w1[kh * 3 + kw:kh * 3 + kw + 1, :].reshape(1, 1, c1)
            acc = acc + xs * wrow                      # broadcast FMA on VPU
    y1 = jnp.where(acc > 0, acc, slope * acc)          # LeakyReLU(0.01)
    p2_ref[d2:d2 + H, d2:d2 + W, :] = y1

    # ------------- conv2..4: single im2col matmul per layer ---------------
    def conv_im2col(p_ref, w_ref, b_ref, d):
        cin = p_ref.shape[-1]
        taps = [p_ref[kh * d:kh * d + H, kw * d:kw * d + W, :]
                for kh in range(3) for kw in range(3)]            # 9 x (H, W, Cin)
        col = jnp.concatenate(taps, axis=-1)                      # (H, W, 9*Cin)
        col = col.reshape(H * W, 9 * cin)                         # leading-dim merge
        y = jnp.dot(col, w_ref[...],
                    preferred_element_type=f32) + b_ref[...]      # (H*W, Cout)
        return jnp.where(y > 0, y, slope * y)

    y2 = conv_im2col(p2_ref, w2_ref, b2_ref, d2)
    p3_ref[d3:d3 + H, d3:d3 + W, :] = y2.reshape(H, W, y2.shape[-1])

    y3 = conv_im2col(p3_ref, w3_ref, b3_ref, d3)
    p4_ref[d4:d4 + H, d4:d4 + W, :] = y3.reshape(H, W, y3.shape[-1])

    y4 = conv_im2col(p4_ref, w4_ref, b4_ref, d4)                  # (H*W, C1)
    o_ref[0] = y4.astype(o_ref.dtype)


def feature_extraction_spatial(x_nchw, params):
    """Forward pass matching the PyTorch module. Input/output are NCHW."""
    N, cin0, H, W = x_nchw.shape
    assert cin0 == 1, "module's conv1 expects a single input channel"
    (w1, b1, d1), (w2, b2, d2), (w3, b3, d3), (w4, b4, d4) = params
    c1, c2, c3, c4 = w1.shape[-1], w2.shape[-1], w3.shape[-1], w4.shape[-1]
    assert w2.shape[2] == c1 and w3.shape[2] == c2 and w4.shape[2] == c3

    # NCHW with C=1 -> NHWC is a pure reshape (no transpose needed).
    x = x_nchw.reshape(N, H, W, 1)

    # im2col weight layout: (3,3,Cin,Cout) -> (9*Cin, Cout); bias -> (1, Cout).
    w1r = w1.reshape(9 * 1, c1)
    w2r = w2.reshape(9 * c1, c2)
    w3r = w3.reshape(9 * c2, c3)
    w4r = w4.reshape(9 * c3, c4)
    b1r, b2r = b1.reshape(1, c1), b2.reshape(1, c2)
    b3r, b4r = b3.reshape(1, c3), b4.reshape(1, c4)

    kernel = functools.partial(_fused_kernel, H=H, W=W, dils=(d1, d2, d3, d4))

    out = pl.pallas_call(
        kernel,
        out_shape=jax.ShapeDtypeStruct((N, H * W, c4), x_nchw.dtype),
        grid_spec=pltpu.PrefetchScalarGridSpec(
            num_scalar_prefetch=0,
            grid=(N,),
            in_specs=[
                pl.BlockSpec((1, H, W, 1), lambda n: (n, 0, 0, 0)),
                pl.BlockSpec(w1r.shape, lambda n: (0, 0)),
                pl.BlockSpec(b1r.shape, lambda n: (0, 0)),
                pl.BlockSpec(w2r.shape, lambda n: (0, 0)),
                pl.BlockSpec(b2r.shape, lambda n: (0, 0)),
                pl.BlockSpec(w3r.shape, lambda n: (0, 0)),
                pl.BlockSpec(b3r.shape, lambda n: (0, 0)),
                pl.BlockSpec(w4r.shape, lambda n: (0, 0)),
                pl.BlockSpec(b4r.shape, lambda n: (0, 0)),
            ],
            out_specs=pl.BlockSpec((1, H * W, c4), lambda n: (n, 0, 0)),
            scratch_shapes=[
                pltpu.VMEM((H + 2 * d1, W + 2 * d1, 1), jnp.float32),
                pltpu.VMEM((H + 2 * d2, W + 2 * d2, c1), jnp.float32),
                pltpu.VMEM((H + 2 * d3, W + 2 * d3, c2), jnp.float32),
                pltpu.VMEM((H + 2 * d4, W + 2 * d4, c3), jnp.float32),
            ]),
        compiler_params=pltpu.CompilerParams(
            dimension_semantics=("parallel",)),
    )(x, w1r, b1r, w2r, b2r, w3r, b3r, w4r, b4r)

    # (N, H*W, Cout) -> (N, H, W, Cout) -> NCHW
    return jnp.transpose(out.reshape(N, H, W, c4), (0, 3, 1, 2))


def init_params(adj_ch, key):
    """Deterministic parameter init (PyTorch-default-like uniform bounds)."""
    layer_io = [
        (1, adj_ch, 1),     # conv1: dilation 1
        (adj_ch, 32, 1),    # conv2: dilation 1
        (32, 64, 3),        # conv3: dilation 3
        (64, adj_ch, 5),    # conv4: dilation 5
    ]
    params = []
    for (cin, cout, dil) in layer_io:
        key, kw, kb = jax.random.split(key, 3)
        bound = 1.0 / jnp.sqrt(cin * 3.0 * 3.0)
        w = jax.random.uniform(kw, (3, 3, cin, cout), jnp.float32, -bound, bound)
        b = jax.random.uniform(kb, (cout,), jnp.float32, -bound, bound)
        params.append((w, b, dil))
    return params


def _reference(x_nchw, params, slope=0.01):
    """Pure-JAX reference (lax conv) for a correctness check."""
    x = x_nchw
    for (w, b, dil) in params:
        y = lax.conv_general_dilated(
            x, w, window_strides=(1, 1), padding=((dil, dil), (dil, dil)),
            rhs_dilation=(dil, dil),
            dimension_numbers=("NCHW", "HWIO", "NCHW"))
        y = y + b.reshape(1, -1, 1, 1)
        x = jnp.where(y > 0, y, slope * y)
    return x


if __name__ == "__main__":
    adj_ch = 4
    key = jax.random.PRNGKey(0)
    key, kx = jax.random.split(key)
    # Module's conv1 expects a single input channel.
    x = jax.random.normal(kx, (2, 1, 16, 16), jnp.float32)   # NCHW

    params = init_params(adj_ch, key)

    out = feature_extraction_spatial(x, params)
    out = jax.block_until_ready(out)
    assert out.shape == (2, adj_ch, 16, 16), out.shape

    ref = jax.block_until_ready(_reference(x, params))
    assert jnp.allclose(out, ref, atol=1e-4, rtol=1e-4), (
        float(jnp.max(jnp.abs(out - ref))))

    print("KERNEL_OK")
</pallas_src>

<mosaic_0001>
module attributes {stable_mosaic.version = 11 : i64} {
  func.func @_fused_kernel(%arg0: i32, %arg1: memref<1x16x16x1xf32, #tpu.memory_space<vmem>>, %arg2: memref<9x4xf32, #tpu.memory_space<vmem>>, %arg3: memref<1x4xf32, #tpu.memory_space<vmem>>, %arg4: memref<36x32xf32, #tpu.memory_space<vmem>>, %arg5: memref<1x32xf32, #tpu.memory_space<vmem>>, %arg6: memref<288x64xf32, #tpu.memory_space<vmem>>, %arg7: memref<1x64xf32, #tpu.memory_space<vmem>>, %arg8: memref<576x4xf32, #tpu.memory_space<vmem>>, %arg9: memref<1x4xf32, #tpu.memory_space<vmem>>, %arg10: memref<1x256x4xf32, #tpu.memory_space<vmem>>, %arg11: memref<18x18x1xf32, #tpu.memory_space<vmem>>, %arg12: memref<18x18x4xf32, #tpu.memory_space<vmem>>, %arg13: memref<22x22x32xf32, #tpu.memory_space<vmem>>, %arg14: memref<26x26x64xf32, #tpu.memory_space<vmem>>) attributes {dimension_semantics = [#tpu.dimension_semantics<parallel>], iteration_bounds = array<i64: 2>, scalar_prefetch = 0 : i64, scratch_operands = 4 : i64, tpu.core_type = #tpu.core_type<tc>, window_params = [{transform_indices = @transform_0, window_bounds = array<i64: 1, 16, 16, 1>}, {pipeline_mode = #tpu.pipeline_mode<synchronous>, transform_indices = @transform_1, window_bounds = array<i64: 9, 4>}, {pipeline_mode = #tpu.pipeline_mode<synchronous>, transform_indices = @transform_2, window_bounds = array<i64: 1, 4>}, {pipeline_mode = #tpu.pipeline_mode<synchronous>, transform_indices = @transform_3, window_bounds = array<i64: 36, 32>}, {pipeline_mode = #tpu.pipeline_mode<synchronous>, transform_indices = @transform_4, window_bounds = array<i64: 1, 32>}, {pipeline_mode = #tpu.pipeline_mode<synchronous>, transform_indices = @transform_5, window_bounds = array<i64: 288, 64>}, {pipeline_mode = #tpu.pipeline_mode<synchronous>, transform_indices = @transform_6, window_bounds = array<i64: 1, 64>}, {pipeline_mode = #tpu.pipeline_mode<synchronous>, transform_indices = @transform_7, window_bounds = array<i64: 576, 4>}, {pipeline_mode = #tpu.pipeline_mode<synchronous>, transform_indices = @transform_8, window_bounds = array<i64: 1, 4>}, {transform_indices = @transform_9, window_bounds = array<i64: 1, 256, 4>}]} {
    %cst = arith.constant 0.000000e+00 : f32
    %0 = vector.broadcast %cst : f32 to vector<18x18x1xf32>
    %c0 = arith.constant 0 : index
    %c0_0 = arith.constant 0 : index
    %c0_1 = arith.constant 0 : index
    %1 = vector.load %arg11[%c0, %c0_0, %c0_1] : memref<18x18x1xf32, #tpu.memory_space<vmem>>, vector<18x18x1xf32>
    tpu.vector_store %arg11[%c0, %c0_0, %c0_1], %0 {strides = array<i32>} : memref<18x18x1xf32, #tpu.memory_space<vmem>>, vector<18x18x1xf32>,
    %cst_2 = arith.constant 0.000000e+00 : f32
    %2 = vector.broadcast %cst_2 : f32 to vector<18x18x4xf32>
    %c0_3 = arith.constant 0 : index
    %c0_4 = arith.constant 0 : index
    %c0_5 = arith.constant 0 : index
    %3 = vector.load %arg12[%c0_3, %c0_4, %c0_5] : memref<18x18x4xf32, #tpu.memory_space<vmem>>, vector<18x18x4xf32>
    tpu.vector_store %arg12[%c0_3, %c0_4, %c0_5], %2 {strides = array<i32>} : memref<18x18x4xf32, #tpu.memory_space<vmem>>, vector<18x18x4xf32>,
    %cst_6 = arith.constant 0.000000e+00 : f32
    %4 = vector.broadcast %cst_6 : f32 to vector<22x22x32xf32>
    %c0_7 = arith.constant 0 : index
    %c0_8 = arith.constant 0 : index
    %c0_9 = arith.constant 0 : index
    %5 = vector.load %arg13[%c0_7, %c0_8, %c0_9] : memref<22x22x32xf32, #tpu.memory_space<vmem>>, vector<22x22x32xf32>
    tpu.vector_store %arg13[%c0_7, %c0_8, %c0_9], %4 {strides = array<i32>} : memref<22x22x32xf32, #tpu.memory_space<vmem>>, vector<22x22x32xf32>,
    %cst_10 = arith.constant 0.000000e+00 : f32
    %6 = vector.broadcast %cst_10 : f32 to vector<26x26x64xf32>
    %c0_11 = arith.constant 0 : index
    %c0_12 = arith.constant 0 : index
    %c0_13 = arith.constant 0 : index
    %7 = vector.load %arg14[%c0_11, %c0_12, %c0_13] : memref<26x26x64xf32, #tpu.memory_space<vmem>>, vector<26x26x64xf32>
    tpu.vector_store %arg14[%c0_11, %c0_12, %c0_13], %6 {strides = array<i32>} : memref<26x26x64xf32, #tpu.memory_space<vmem>>, vector<26x26x64xf32>,
    %c0_14 = arith.constant 0 : index
    %c0_15 = arith.constant 0 : index
    %c0_16 = arith.constant 0 : index
    %c0_17 = arith.constant 0 : index
    %8 = vector.load %arg1[%c0_14, %c0_15, %c0_16, %c0_17] : memref<1x16x16x1xf32, #tpu.memory_space<vmem>>, vector<1x16x16x1xf32>
    %9 = vector.shape_cast %8 : vector<1x16x16x1xf32> to vector<16x16x1xf32>
    %c1 = arith.constant 1 : index
    %c1_18 = arith.constant 1 : index
    %c0_19 = arith.constant 0 : index
    %10 = vector.load %arg11[%c1, %c1_18, %c0_19] : memref<18x18x1xf32, #tpu.memory_space<vmem>>, vector<16x16x1xf32>
    tpu.vector_store %arg11[%c1, %c1_18, %c0_19], %9 {strides = array<i32>} : memref<18x18x1xf32, #tpu.memory_space<vmem>>, vector<16x16x1xf32>,
    %c0_20 = arith.constant 0 : index
    %c0_21 = arith.constant 0 : index
    %11 = vector.load %arg2[%c0_20, %c0_21] : memref<9x4xf32, #tpu.memory_space<vmem>>, vector<9x4xf32>
    %c0_22 = arith.constant 0 : index
    %c0_23 = arith.constant 0 : index
    %12 = vector.load %arg3[%c0_22, %c0_23] : memref<1x4xf32, #tpu.memory_space<vmem>>, vector<1x4xf32>
    %13 = vector.shape_cast %12 : vector<1x4xf32> to vector<1x1x4xf32>
    %14 = vector.shape_cast %13 : vector<1x1x4xf32> to vector<1x1x4xf32>
    %15 = vector.broadcast %14 : vector<1x1x4xf32> to vector<16x16x4xf32>
    %c0_24 = arith.constant 0 : index
    %c0_25 = arith.constant 0 : index
    %c0_26 = arith.constant 0 : index
    %16 = vector.load %arg11[%c0_24, %c0_25, %c0_26] : memref<18x18x1xf32, #tpu.memory_space<vmem>>, vector<16x16x1xf32>
    %17 = vector.extract_strided_slice %11 {offsets = [0, 0], sizes = [1, 4], strides = [1, 1]} : vector<9x4xf32> to vector<1x4xf32>
    %18 = vector.shape_cast %17 : vector<1x4xf32> to vector<1x1x4xf32>
    %19 = vector.broadcast %16 : vector<16x16x1xf32> to vector<16x16x4xf32>
    %20 = vector.broadcast %18 : vector<1x1x4xf32> to vector<16x16x4xf32>
    %21 = arith.mulf %19, %20 : vector<16x16x4xf32>
    %22 = arith.addf %15, %21 : vector<16x16x4xf32>
    %c0_27 = arith.constant 0 : index
    %c1_28 = arith.constant 1 : index
    %c0_29 = arith.constant 0 : index
    %23 = vector.load %arg11[%c0_27, %c1_28, %c0_29] : memref<18x18x1xf32, #tpu.memory_space<vmem>>, vector<16x16x1xf32>
    %24 = vector.extract_strided_slice %11 {offsets = [1, 0], sizes = [1, 4], strides = [1, 1]} : vector<9x4xf32> to vector<1x4xf32>
    %25 = vector.shape_cast %24 : vector<1x4xf32> to vector<1x1x4xf32>
    %26 = vector.broadcast %23 : vector<16x16x1xf32> to vector<16x16x4xf32>
    %27 = vector.broadcast %25 : vector<1x1x4xf32> to vector<16x16x4xf32>
    %28 = arith.mulf %26, %27 : vector<16x16x4xf32>
    %29 = arith.addf %22, %28 : vector<16x16x4xf32>
    %c0_30 = arith.constant 0 : index
    %c2 = arith.constant 2 : index
    %c0_31 = arith.constant 0 : index
    %30 = vector.load %arg11[%c0_30, %c2, %c0_31] : memref<18x18x1xf32, #tpu.memory_space<vmem>>, vector<16x16x1xf32>
    %31 = vector.extract_strided_slice %11 {offsets = [2, 0], sizes = [1, 4], strides = [1, 1]} : vector<9x4xf32> to vector<1x4xf32>
    %32 = vector.shape_cast %31 : vector<1x4xf32> to vector<1x1x4xf32>
    %33 = vector.broadcast %30 : vector<16x16x1xf32> to vector<16x16x4xf32>
    %34 = vector.broadcast %32 : vector<1x1x4xf32> to vector<16x16x4xf32>
    %35 = arith.mulf %33, %34 : vector<16x16x4xf32>
    %36 = arith.addf %29, %35 : vector<16x16x4xf32>
    %c1_32 = arith.constant 1 : index
    %c0_33 = arith.constant 0 : index
    %c0_34 = arith.constant 0 : index
    %37 = vector.load %arg11[%c1_32, %c0_33, %c0_34] : memref<18x18x1xf32, #tpu.memory_space<vmem>>, vector<16x16x1xf32>
    %38 = vector.extract_strided_slice %11 {offsets = [3, 0], sizes = [1, 4], strides = [1, 1]} : vector<9x4xf32> to vector<1x4xf32>
    %39 = vector.shape_cast %38 : vector<1x4xf32> to vector<1x1x4xf32>
    %40 = vector.broadcast %37 : vector<16x16x1xf32> to vector<16x16x4xf32>
    %41 = vector.broadcast %39 : vector<1x1x4xf32> to vector<16x16x4xf32>
    %42 = arith.mulf %40, %41 : vector<16x16x4xf32>
    %43 = arith.addf %36, %42 : vector<16x16x4xf32>
    %c1_35 = arith.constant 1 : index
    %c1_36 = arith.constant 1 : index
    %c0_37 = arith.constant 0 : index
    %44 = vector.load %arg11[%c1_35, %c1_36, %c0_37] : memref<18x18x1xf32, #tpu.memory_space<vmem>>, vector<16x16x1xf32>
    %45 = vector.extract_strided_slice %11 {offsets = [4, 0], sizes = [1, 4], strides = [1, 1]} : vector<9x4xf32> to vector<1x4xf32>
    %46 = vector.shape_cast %45 : vector<1x4xf32> to vector<1x1x4xf32>
    %47 = vector.broadcast %44 : vector<16x16x1xf32> to vector<16x16x4xf32>
    %48 = vector.broadcast %46 : vector<1x1x4xf32> to vector<16x16x4xf32>
    %49 = arith.mulf %47, %48 : vector<16x16x4xf32>
    %50 = arith.addf %43, %49 : vector<16x16x4xf32>
    %c1_38 = arith.constant 1 : index
    %c2_39 = arith.constant 2 : index
    %c0_40 = arith.constant 0 : index
    %51 = vector.load %arg11[%c1_38, %c2_39, %c0_40] : memref<18x18x1xf32, #tpu.memory_space<vmem>>, vector<16x16x1xf32>
    %52 = vector.extract_strided_slice %11 {offsets = [5, 0], sizes = [1, 4], strides = [1, 1]} : vector<9x4xf32> to vector<1x4xf32>
    %53 = vector.shape_cast %52 : vector<1x4xf32> to vector<1x1x4xf32>
    %54 = vector.broadcast %51 : vector<16x16x1xf32> to vector<16x16x4xf32>
    %55 = vector.broadcast %53 : vector<1x1x4xf32> to vector<16x16x4xf32>
    %56 = arith.mulf %54, %55 : vector<16x16x4xf32>
    %57 = arith.addf %50, %56 : vector<16x16x4xf32>
    %c2_41 = arith.constant 2 : index
    %c0_42 = arith.constant 0 : index
    %c0_43 = arith.constant 0 : index
    %58 = vector.load %arg11[%c2_41, %c0_42, %c0_43] : memref<18x18x1xf32, #tpu.memory_space<vmem>>, vector<16x16x1xf32>
    %59 = vector.extract_strided_slice %11 {offsets = [6, 0], sizes = [1, 4], strides = [1, 1]} : vector<9x4xf32> to vector<1x4xf32>
    %60 = vector.shape_cast %59 : vector<1x4xf32> to vector<1x1x4xf32>
    %61 = vector.broadcast %58 : vector<16x16x1xf32> to vector<16x16x4xf32>
    %62 = vector.broadcast %60 : vector<1x1x4xf32> to vector<16x16x4xf32>
    %63 = arith.mulf %61, %62 : vector<16x16x4xf32>
    %64 = arith.addf %57, %63 : vector<16x16x4xf32>
    %c2_44 = arith.constant 2 : index
    %c1_45 = arith.constant 1 : index
    %c0_46 = arith.constant 0 : index
    %65 = vector.load %arg11[%c2_44, %c1_45, %c0_46] : memref<18x18x1xf32, #tpu.memory_space<vmem>>, vector<16x16x1xf32>
    %66 = vector.extract_strided_slice %11 {offsets = [7, 0], sizes = [1, 4], strides = [1, 1]} : vector<9x4xf32> to vector<1x4xf32>
    %67 = vector.shape_cast %66 : vector<1x4xf32> to vector<1x1x4xf32>
    %68 = vector.broadcast %65 : vector<16x16x1xf32> to vector<16x16x4xf32>
    %69 = vector.broadcast %67 : vector<1x1x4xf32> to vector<16x16x4xf32>
    %70 = arith.mulf %68, %69 : vector<16x16x4xf32>
    %71 = arith.addf %64, %70 : vector<16x16x4xf32>
    %c2_47 = arith.constant 2 : index
    %c2_48 = arith.constant 2 : index
    %c0_49 = arith.constant 0 : index
    %72 = vector.load %arg11[%c2_47, %c2_48, %c0_49] : memref<18x18x1xf32, #tpu.memory_space<vmem>>, vector<16x16x1xf32>
    %73 = vector.extract_strided_slice %11 {offsets = [8, 0], sizes = [1, 4], strides = [1, 1]} : vector<9x4xf32> to vector<1x4xf32>
    %74 = vector.shape_cast %73 : vector<1x4xf32> to vector<1x1x4xf32>
    %75 = vector.broadcast %72 : vector<16x16x1xf32> to vector<16x16x4xf32>
    %76 = vector.broadcast %74 : vector<1x1x4xf32> to vector<16x16x4xf32>
    %77 = arith.mulf %75, %76 : vector<16x16x4xf32>
    %78 = arith.addf %71, %77 : vector<16x16x4xf32>
    %cst_50 = arith.constant 0.000000e+00 : f32
    %79 = vector.broadcast %cst_50 : f32 to vector<16x16x4xf32>
    %80 = arith.cmpf ogt, %78, %79 : vector<16x16x4xf32>
    %cst_51 = arith.constant 0.00999999977 : f32
    %81 = vector.broadcast %cst_51 : f32 to vector<16x16x4xf32>
    %82 = arith.mulf %81, %78 : vector<16x16x4xf32>
    %83 = arith.select %80, %78, %82 : vector<16x16x4xi1>, vector<16x16x4xf32>
    %c1_52 = arith.constant 1 : index
    %c1_53 = arith.constant 1 : index
    %c0_54 = arith.constant 0 : index
    %84 = vector.load %arg12[%c1_52, %c1_53, %c0_54] : memref<18x18x4xf32, #tpu.memory_space<vmem>>, vector<16x16x4xf32>
    tpu.vector_store %arg12[%c1_52, %c1_53, %c0_54], %83 {strides = array<i32>} : memref<18x18x4xf32, #tpu.memory_space<vmem>>, vector<16x16x4xf32>,
    %c0_55 = arith.constant 0 : index
    %c0_56 = arith.constant 0 : index
    %c0_57 = arith.constant 0 : index
    %85 = vector.load %arg12[%c0_55, %c0_56, %c0_57] : memref<18x18x4xf32, #tpu.memory_space<vmem>>, vector<16x16x4xf32>
    %c0_58 = arith.constant 0 : index
    %c1_59 = arith.constant 1 : index
    %c0_60 = arith.constant 0 : index
    %86 = vector.load %arg12[%c0_58, %c1_59, %c0_60] : memref<18x18x4xf32, #tpu.memory_space<vmem>>, vector<16x16x4xf32>
    %c0_61 = arith.constant 0 : index
    %c2_62 = arith.constant 2 : index
    %c0_63 = arith.constant 0 : index
    %87 = vector.load %arg12[%c0_61, %c2_62, %c0_63] : memref<18x18x4xf32, #tpu.memory_space<vmem>>, vector<16x16x4xf32>
    %c1_64 = arith.constant 1 : index
    %c0_65 = arith.constant 0 : index
    %c0_66 = arith.constant 0 : index
    %88 = vector.load %arg12[%c1_64, %c0_65, %c0_66] : memref<18x18x4xf32, #tpu.memory_space<vmem>>, vector<16x16x4xf32>
    %c1_67 = arith.constant 1 : index
    %c1_68 = arith.constant 1 : index
    %c0_69 = arith.constant 0 : index
    %89 = vector.load %arg12[%c1_67, %c1_68, %c0_69] : memref<18x18x4xf32, #tpu.memory_space<vmem>>, vector<16x16x4xf32>
    %c1_70 = arith.constant 1 : index
    %c2_71 = arith.constant 2 : index
    %c0_72 = arith.constant 0 : index
    %90 = vector.load %arg12[%c1_70, %c2_71, %c0_72] : memref<18x18x4xf32, #tpu.memory_space<vmem>>, vector<16x16x4xf32>
    %c2_73 = arith.constant 2 : index
    %c0_74 = arith.constant 0 : index
    %c0_75 = arith.constant 0 : index
    %91 = vector.load %arg12[%c2_73, %c0_74, %c0_75] : memref<18x18x4xf32, #tpu.memory_space<vmem>>, vector<16x16x4xf32>
    %c2_76 = arith.constant 2 : index
    %c1_77 = arith.constant 1 : index
    %c0_78 = arith.constant 0 : index
    %92 = vector.load %arg12[%c2_76, %c1_77, %c0_78] : memref<18x18x4xf32, #tpu.memory_space<vmem>>, vector<16x16x4xf32>
    %c2_79 = arith.constant 2 : index
    %c2_80 = arith.constant 2 : index
    %c0_81 = arith.constant 0 : index
    %93 = vector.load %arg12[%c2_79, %c2_80, %c0_81] : memref<18x18x4xf32, #tpu.memory_space<vmem>>, vector<16x16x4xf32>
    %94 = tpu.concatenate %85, %86, %87, %88, %89, %90, %91, %92, %93 in 2 : vector<16x16x4xf32>, vector<16x16x4xf32>, vector<16x16x4xf32>, vector<16x16x4xf32>, vector<16x16x4xf32>, vector<16x16x4xf32>, vector<16x16x4xf32>, vector<16x16x4xf32>, vector<16x16x4xf32> -> vector<16x16x36xf32>
    %95 = vector.shape_cast %94 : vector<16x16x36xf32> to vector<256x36xf32>
    %c0_82 = arith.constant 0 : index
    %c0_83 = arith.constant 0 : index
    %96 = vector.load %arg4[%c0_82, %c0_83] : memref<36x32xf32, #tpu.memory_space<vmem>>, vector<36x32xf32>
    %cst_84 = arith.constant dense<0.000000e+00> : vector<256x32xf32>
    %97 = tpu.matmul %95, %96, %cst_84 {dimension_numbers = #tpu.dot_dimension_numbers<[1], [0], [0], [1], [0, 0, 1, 1], [], []>} : vector<256x36xf32>, vector<36x32xf32>, vector<256x32xf32> -> vector<256x32xf32>
    %c0_85 = arith.constant 0 : index
    %c0_86 = arith.constant 0 : index
    %98 = vector.load %arg5[%c0_85, %c0_86] : memref<1x32xf32, #tpu.memory_space<vmem>>, vector<1x32xf32>
    %99 = vector.broadcast %98 : vector<1x32xf32> to vector<256x32xf32>
    %100 = arith.addf %97, %99 : vector<256x32xf32>
    %cst_87 = arith.constant 0.000000e+00 : f32
    %101 = vector.broadcast %cst_87 : f32 to vector<256x32xf32>
    %102 = arith.cmpf ogt, %100, %101 : vector<256x32xf32>
    %cst_88 = arith.constant 0.00999999977 : f32
    %103 = vector.broadcast %cst_88 : f32 to vector<256x32xf32>
    %104 = arith.mulf %103, %100 : vector<256x32xf32>
    %105 = arith.select %102, %100, %104 : vector<256x32xi1>, vector<256x32xf32>
    %106 = vector.shape_cast %105 : vector<256x32xf32> to vector<16x16x32xf32>
    %c3 = arith.constant 3 : index
    %c3_89 = arith.constant 3 : index
    %c0_90 = arith.constant 0 : index
    %107 = vector.load %arg13[%c3, %c3_89, %c0_90] : memref<22x22x32xf32, #tpu.memory_space<vmem>>, vector<16x16x32xf32>
    tpu.vector_store %arg13[%c3, %c3_89, %c0_90], %106 {strides = array<i32>} : memref<22x22x32xf32, #tpu.memory_space<vmem>>, vector<16x16x32xf32>,
    %c0_91 = arith.constant 0 : index
    %c0_92 = arith.constant 0 : index
    %c0_93 = arith.constant 0 : index
    %108 = vector.load %arg13[%c0_91, %c0_92, %c0_93] : memref<22x22x32xf32, #tpu.memory_space<vmem>>, vector<16x16x32xf32>
    %c0_94 = arith.constant 0 : index
    %c3_95 = arith.constant 3 : index
    %c0_96 = arith.constant 0 : index
    %109 = vector.load %arg13[%c0_94, %c3_95, %c0_96] : memref<22x22x32xf32, #tpu.memory_space<vmem>>, vector<16x16x32xf32>
    %c0_97 = arith.constant 0 : index
    %c6 = arith.constant 6 : index
    %c0_98 = arith.constant 0 : index
    %110 = vector.load %arg13[%c0_97, %c6, %c0_98] : memref<22x22x32xf32, #tpu.memory_space<vmem>>, vector<16x16x32xf32>
    %c3_99 = arith.constant 3 : index
    %c0_100 = arith.constant 0 : index
    %c0_101 = arith.constant 0 : index
    %111 = vector.load %arg13[%c3_99, %c0_100, %c0_101] : memref<22x22x32xf32, #tpu.memory_space<vmem>>, vector<16x16x32xf32>
    %c3_102 = arith.constant 3 : index
    %c3_103 = arith.constant 3 : index
    %c0_104 = arith.constant 0 : index
    %112 = vector.load %arg13[%c3_102, %c3_103, %c0_104] : memref<22x22x32xf32, #tpu.memory_space<vmem>>, vector<16x16x32xf32>
    %c3_105 = arith.constant 3 : index
    %c6_106 = arith.constant 6 : index
    %c0_107 = arith.constant 0 : index
    %113 = vector.load %arg13[%c3_105, %c6_106, %c0_107] : memref<22x22x32xf32, #tpu.memory_space<vmem>>, vector<16x16x32xf32>
    %c6_108 = arith.constant 6 : index
    %c0_109 = arith.constant 0 : index
    %c0_110 = arith.constant 0 : index
    %114 = vector.load %arg13[%c6_108, %c0_109, %c0_110] : memref<22x22x32xf32, #tpu.memory_space<vmem>>, vector<16x16x32xf32>
    %c6_111 = arith.constant 6 : index
    %c3_112 = arith.constant 3 : index
    %c0_113 = arith.constant 0 : index
    %115 = vector.load %arg13[%c6_111, %c3_112, %c0_113] : memref<22x22x32xf32, #tpu.memory_space<vmem>>, vector<16x16x32xf32>
    %c6_114 = arith.constant 6 : index
    %c6_115 = arith.constant 6 : index
    %c0_116 = arith.constant 0 : index
    %116 = vector.load %arg13[%c6_114, %c6_115, %c0_116] : memref<22x22x32xf32, #tpu.memory_space<vmem>>, vector<16x16x32xf32>
    %117 = tpu.concatenate %108, %109, %110, %111, %112, %113, %114, %115, %116 in 2 : vector<16x16x32xf32>, vector<16x16x32xf32>, vector<16x16x32xf32>, vector<16x16x32xf32>, vector<16x16x32xf32>, vector<16x16x32xf32>, vector<16x16x32xf32>, vector<16x16x32xf32>, vector<16x16x32xf32> -> vector<16x16x288xf32>
    %118 = vector.shape_cast %117 : vector<16x16x288xf32> to vector<256x288xf32>
    %c0_117 = arith.constant 0 : index
    %c0_118 = arith.constant 0 : index
    %119 = vector.load %arg6[%c0_117, %c0_118] : memref<288x64xf32, #tpu.memory_space<vmem>>, vector<288x64xf32>
    %cst_119 = arith.constant dense<0.000000e+00> : vector<256x64xf32>
    %120 = tpu.matmul %118, %119, %cst_119 {dimension_numbers = #tpu.dot_dimension_numbers<[1], [0], [0], [1], [0, 0, 1, 1], [], []>} : vector<256x288xf32>, vector<288x64xf32>, vector<256x64xf32> -> vector<256x64xf32>
    %c0_120 = arith.constant 0 : index
    %c0_121 = arith.constant 0 : index
    %121 = vector.load %arg7[%c0_120, %c0_121] : memref<1x64xf32, #tpu.memory_space<vmem>>, vector<1x64xf32>
    %122 = vector.broadcast %121 : vector<1x64xf32> to vector<256x64xf32>
    %123 = arith.addf %120, %122 : vector<256x64xf32>
    %cst_122 = arith.constant 0.000000e+00 : f32
    %124 = vector.broadcast %cst_122 : f32 to vector<256x64xf32>
    %125 = arith.cmpf ogt, %123, %124 : vector<256x64xf32>
    %cst_123 = arith.constant 0.00999999977 : f32
    %126 = vector.broadcast %cst_123 : f32 to vector<256x64xf32>
    %127 = arith.mulf %126, %123 : vector<256x64xf32>
    %128 = arith.select %125, %123, %127 : vector<256x64xi1>, vector<256x64xf32>
    %129 = vector.shape_cast %128 : vector<256x64xf32> to vector<16x16x64xf32>
    %c5 = arith.constant 5 : index
    %c5_124 = arith.constant 5 : index
    %c0_125 = arith.constant 0 : index
    %130 = vector.load %arg14[%c5, %c5_124, %c0_125] : memref<26x26x64xf32, #tpu.memory_space<vmem>>, vector<16x16x64xf32>
    tpu.vector_store %arg14[%c5, %c5_124, %c0_125], %129 {strides = array<i32>} : memref<26x26x64xf32, #tpu.memory_space<vmem>>, vector<16x16x64xf32>,
    %c0_126 = arith.constant 0 : index
    %c0_127 = arith.constant 0 : index
    %c0_128 = arith.constant 0 : index
    %131 = vector.load %arg14[%c0_126, %c0_127, %c0_128] : memref<26x26x64xf32, #tpu.memory_space<vmem>>, vector<16x16x64xf32>
    %c0_129 = arith.constant 0 : index
    %c5_130 = arith.constant 5 : index
    %c0_131 = arith.constant 0 : index
    %132 = vector.load %arg14[%c0_129, %c5_130, %c0_131] : memref<26x26x64xf32, #tpu.memory_space<vmem>>, vector<16x16x64xf32>
    %c0_132 = arith.constant 0 : index
    %c10 = arith.constant 10 : index
    %c0_133 = arith.constant 0 : index
    %133 = vector.load %arg14[%c0_132, %c10, %c0_133] : memref<26x26x64xf32, #tpu.memory_space<vmem>>, vector<16x16x64xf32>
    %c5_134 = arith.constant 5 : index
    %c0_135 = arith.constant 0 : index
    %c0_136 = arith.constant 0 : index
    %134 = vector.load %arg14[%c5_134, %c0_135, %c0_136] : memref<26x26x64xf32, #tpu.memory_space<vmem>>, vector<16x16x64xf32>
    %c5_137 = arith.constant 5 : index
    %c5_138 = arith.constant 5 : index
    %c0_139 = arith.constant 0 : index
    %135 = vector.load %arg14[%c5_137, %c5_138, %c0_139] : memref<26x26x64xf32, #tpu.memory_space<vmem>>, vector<16x16x64xf32>
    %c5_140 = arith.constant 5 : index
    %c10_141 = arith.constant 10 : index
    %c0_142 = arith.constant 0 : index
    %136 = vector.load %arg14[%c5_140, %c10_141, %c0_142] : memref<26x26x64xf32, #tpu.memory_space<vmem>>, vector<16x16x64xf32>
    %c10_143 = arith.constant 10 : index
    %c0_144 = arith.constant 0 : index
    %c0_145 = arith.constant 0 : index
    %137 = vector.load %arg14[%c10_143, %c0_144, %c0_145] : memref<26x26x64xf32, #tpu.memory_space<vmem>>, vector<16x16x64xf32>
    %c10_146 = arith.constant 10 : index
    %c5_147 = arith.constant 5 : index
    %c0_148 = arith.constant 0 : index
    %138 = vector.load %arg14[%c10_146, %c5_147, %c0_148] : memref<26x26x64xf32, #tpu.memory_space<vmem>>, vector<16x16x64xf32>
    %c10_149 = arith.constant 10 : index
    %c10_150 = arith.constant 10 : index
    %c0_151 = arith.constant 0 : index
    %139 = vector.load %arg14[%c10_149, %c10_150, %c0_151] : memref<26x26x64xf32, #tpu.memory_space<vmem>>, vector<16x16x64xf32>
    %140 = tpu.concatenate %131, %132, %133, %134, %135, %136, %137, %138, %139 in 2 : vector<16x16x64xf32>, vector<16x16x64xf32>, vector<16x16x64xf32>, vector<16x16x64xf32>, vector<16x16x64xf32>, vector<16x16x64xf32>, vector<16x16x64xf32>, vector<16x16x64xf32>, vector<16x16x64xf32> -> vector<16x16x576xf32>
    %141 = vector.shape_cast %140 : vector<16x16x576xf32> to vector<256x576xf32>
    %c0_152 = arith.constant 0 : index
    %c0_153 = arith.constant 0 : index
    %142 = vector.load %arg8[%c0_152, %c0_153] : memref<576x4xf32, #tpu.memory_space<vmem>>, vector<576x4xf32>
    %cst_154 = arith.constant dense<0.000000e+00> : vector<256x4xf32>
    %143 = tpu.matmul %141, %142, %cst_154 {dimension_numbers = #tpu.dot_dimension_numbers<[1], [0], [0], [1], [0, 0, 1, 1], [], []>} : vector<256x576xf32>, vector<576x4xf32>, vector<256x4xf32> -> vector<256x4xf32>
    %c0_155 = arith.constant 0 : index
    %c0_156 = arith.constant 0 : index
    %144 = vector.load %arg9[%c0_155, %c0_156] : memref<1x4xf32, #tpu.memory_space<vmem>>, vector<1x4xf32>
    %145 = vector.broadcast %144 : vector<1x4xf32> to vector<256x4xf32>
    %146 = arith.addf %143, %145 : vector<256x4xf32>
    %cst_157 = arith.constant 0.000000e+00 : f32
    %147 = vector.broadcast %cst_157 : f32 to vector<256x4xf32>
    %148 = arith.cmpf ogt, %146, %147 : vector<256x4xf32>
    %cst_158 = arith.constant 0.00999999977 : f32
    %149 = vector.broadcast %cst_158 : f32 to vector<256x4xf32>
    %150 = arith.mulf %149, %146 : vector<256x4xf32>
    %151 = arith.select %148, %146, %150 : vector<256x4xi1>, vector<256x4xf32>
    %c0_159 = arith.constant 0 : index
    %c0_160 = arith.constant 0 : index
    %c0_161 = arith.constant 0 : index
    %152 = vector.load %arg10[%c0_159, %c0_160, %c0_161] : memref<1x256x4xf32, #tpu.memory_space<vmem>>, vector<1x256x4xf32>
    %153 = vector.shape_cast %152 : vector<1x256x4xf32> to vector<256x4xf32>
    %154 = vector.shape_cast %151 : vector<256x4xf32> to vector<1x256x4xf32>
    tpu.vector_store %arg10[%c0_159, %c0_160, %c0_161], %154 {strides = array<i32>} : memref<1x256x4xf32, #tpu.memory_space<vmem>>, vector<1x256x4xf32>,
    return
  }
  func.func @transform_0(%arg0: i32) -> (i32, i32, i32, i32) {
    %c0_i32 = arith.constant 0 : i32
    %c0_i32_0 = arith.constant 0 : i32
    %c0_i32_1 = arith.constant 0 : i32
    %c0_i32_2 = arith.constant 0 : i32
    return %arg0, %c0_i32, %c0_i32_0, %c0_i32_1 : i32, i32, i32, i32
  }
  func.func @transform_1(%arg0: i32) -> (i32, i32) {
    %c0_i32 = arith.constant 0 : i32
    %c0_i32_0 = arith.constant 0 : i32
    %c0_i32_1 = arith.constant 0 : i32
    return %c0_i32, %c0_i32_0 : i32, i32
  }
  func.func @transform_2(%arg0: i32) -> (i32, i32) {
    %c0_i32 = arith.constant 0 : i32
    %c0_i32_0 = arith.constant 0 : i32
    %c0_i32_1 = arith.constant 0 : i32
    return %c0_i32, %c0_i32_0 : i32, i32
  }
  func.func @transform_3(%arg0: i32) -> (i32, i32) {
    %c0_i32 = arith.constant 0 : i32
    %c0_i32_0 = arith.constant 0 : i32
    %c0_i32_1 = arith.constant 0 : i32
    return %c0_i32, %c0_i32_0 : i32, i32
  }
  func.func @transform_4(%arg0: i32) -> (i32, i32) {
    %c0_i32 = arith.constant 0 : i32
    %c0_i32_0 = arith.constant 0 : i32
    %c0_i32_1 = arith.constant 0 : i32
    return %c0_i32, %c0_i32_0 : i32, i32
  }
  func.func @transform_5(%arg0: i32) -> (i32, i32) {
    %c0_i32 = arith.constant 0 : i32
    %c0_i32_0 = arith.constant 0 : i32
    %c0_i32_1 = arith.constant 0 : i32
    return %c0_i32, %c0_i32_0 : i32, i32
  }
  func.func @transform_6(%arg0: i32) -> (i32, i32) {
    %c0_i32 = arith.constant 0 : i32
    %c0_i32_0 = arith.constant 0 : i32
    %c0_i32_1 = arith.constant 0 : i32
    return %c0_i32, %c0_i32_0 : i32, i32
  }
  func.func @transform_7(%arg0: i32) -> (i32, i32) {
    %c0_i32 = arith.constant 0 : i32
    %c0_i32_0 = arith.constant 0 : i32
    %c0_i32_1 = arith.constant 0 : i32
    return %c0_i32, %c0_i32_0 : i32, i32
  }
  func.func @transform_8(%arg0: i32) -> (i32, i32) {
    %c0_i32 = arith.constant 0 : i32
    %c0_i32_0 = arith.constant 0 : i32
    %c0_i32_1 = arith.constant 0 : i32
    return %c0_i32, %c0_i32_0 : i32, i32
  }
  func.func @transform_9(%arg0: i32) -> (i32, i32, i32) {
    %c0_i32 = arith.constant 0 : i32
    %c0_i32_0 = arith.constant 0 : i32
    %c0_i32_1 = arith.constant 0 : i32
    return %arg0, %c0_i32, %c0_i32_0 : i32, i32, i32
  }
}

</mosaic_0001>

<bundles_post_ra>
// kernel: tpu_custom_call.1
= control target key start
LH: loop header
LB: loop body
LE: loop exit
PB: predicated region body
PF: predicated region fallthrough
CT: control target
= control target key end

     0   :  { %s10735_s30 = smov 0   ;;  %s16568_s0 = inlined_call_operand.vmem [shape: f32[2,16,16,1], index: 0, kind: input, shape index: {}]   ;;  %s16569_s1 = inlined_call_operand.vmem [shape: f32[9,4], index: 1, kind: input, shape index: {}]   ;;  %s16570_s2 = inlined_call_operand.vmem [shape: f32[1,4], index: 2, kind: input, shape index: {}]   ;;  %s16571_s3 = inlined_call_operand.vmem [shape: f32[36,32], index: 3, kind: input, shape index: {}]   ;;  %s16572_s4 = inlined_call_operand.vmem [shape: f32[1,32], index: 4, kind: input, shape index: {}]   ;;  %s16573_s5 = inlined_call_operand.vmem [shape: f32[288,64], index: 5, kind: input, shape index: {}]   ;;  %s16574_s6 = inlined_call_operand.vmem [shape: f32[1,64], index: 6, kind: input, shape index: {}]   ;;  %s16575_s7 = inlined_call_operand.vmem [shape: f32[576,4], index: 7, kind: input, shape index: {}]   ;;  %s16576_s8 = inlined_call_operand.vmem [shape: f32[1,4], index: 8, kind: input, shape index: {}]   ;;  %s16577_s9 = inlined_call_operand.vmem [shape: f32[2,256,4], index: 9, kind: output, shape index: {}]  }
   0x1 LB: > { %s9135_s10 = sadd.s32 4294967295, %s10670_s30   ;;  %p9139_p0 = scmp.ge.s32.totalorder %s10670_s30, 1  ;;  %s10670_s30 = sphi %s10735_s30, %s19_s30  }
   0x2   : > { %p287_p1 = scmp.lt.s32.totalorder %s10670_s30, 3 }
   0x4   : > { %p288_p2 = pnand %p9139_p0, %p287_p1 }
   0x6   : > { %291 = sbr.rel (%p288_p2) target bundleno = 2393 (0x959), region = 56 }
   0xd   : > { %vm333_vm0 = vcmask 7168   ;;  %p10745_p3 = scmp.lt.s32.totalorder %s9135_s10, 1  ;;  %vm336_vm1 = vcmask 1024   ;;  %v10672_v0 = vmov 0   ;;  %v16578_v1 = vmov 0.0   ;;  %s10674_s20 = smov 4  }
   0xe   : > { %9849 = vset.pattern.permute.xlu0 %v10672_v0  ;;  %334 = vst.msk [vmem:[#allocation2] sm:$0xff] %vm333_vm0, %v16578_v1  ;;  %335 = vst.msk [vmem:[#allocation2 + $0x8] sm:$0xff] %vm333_vm0, %v16578_v1  ;;  %9850 = vset.pattern.permute.xlu1 %v10672_v0  ;;  %vm389_vm2 = vcmask 31744   ;;  %vm392_vm3 = vcmask 25600   ;;  %s10675_s23 = smov 8   ;;  %s10676_s24 = smov 12  }
   0xf   : > { %338 = vst.msk [vmem:[#allocation2 + $0x18] sm:$0xff] %vm333_vm0, %v16578_v1  ;;  %339 = vst.msk [vmem:[#allocation2 + $0x20] sm:$0xff] %vm333_vm0, %v16578_v1  ;;  %s17161_s10 = smov (!%p10745_p3, %s9135_s10), 1  ;;  %s10677_s25 = smov 16  }
  0x10   : > { %341 = vst.msk [vmem:[#allocation2 + $0x30] sm:$0xff] %vm333_vm0, %v16578_v1  ;;  %342 = vst.msk [vmem:[#allocation2 + $0x38] sm:$0xff] %vm333_vm0, %v16578_v1  ;;  %s9248_s12 = sshll.u32 %s17161_s10, 8  ;;  %s10678_s26 = smov 20  }
  0x11   : > { %344 = vst.msk [vmem:[#allocation2 + $0x48] sm:$0xff] %vm333_vm0, %v16578_v1  ;;  %345 = vst.msk [vmem:[#allocation2 + $0x50] sm:$0xff] %vm333_vm0, %v16578_v1  ;;  %s10869_s15 = scalar_lea.vmem %s16568_s0, %s9248_s12  ;;  %s10679_s27 = smov 24  }
  0x12   : > { %347 = vst.msk [vmem:[#allocation2 + $0x60] sm:$0xff] %vm333_vm0, %v16578_v1  ;;  %348 = vst.msk [vmem:[#allocation2 + $0x68] sm:$0xff] %vm333_vm0, %v16578_v1  ;;  %v619_v2 = vld [vmem:[%s10869_s15] sm:$0xff]  ;;  %v621_v3 = vld [vmem:[%s10869_s15 + $0x10] sm:$0xff]  ;;  %s10680_s18 = smov 28   ;;  %s10681_s22 = smov 32  }
  0x13   : > { %350 = vst.msk [vmem:[#allocation2 + $0x78] sm:$0xff] %vm333_vm0, %v16578_v1  ;;  %351 = vst.msk [vmem:[#allocation2 + $0x80] sm:$0xff] %vm333_vm0, %v16578_v1  ;;  %v620_v4 = vld [vmem:[%s10869_s15 + $0x8] sm:$0xff]  ;;  %v623_v5 = vld [vmem:[%s10869_s15 + $0x20] sm:$0xff]  ;;  %s16450_s11 = scalar_lea.vmem %s16577_s9, %s9248_s12 }
  0x14   : > { %353 = vst.msk [vmem:[#allocation2 + $0x90] sm:$0xff] %vm333_vm0, %v16578_v1  ;;  %354 = vst.msk [vmem:[#allocation2 + $0x98] sm:$0xff] %vm333_vm0, %v16578_v1  ;;  %v622_v6 = vld [vmem:[%s10869_s15 + $0x18] sm:$0xff]  ;;  %v625_v7 = vld [vmem:[%s10869_s15 + $0x30] sm:$0xff] }
  0x15   : > { %356 = vst.msk [vmem:[#allocation2 + $0xa8] sm:$0xff] %vm333_vm0, %v16578_v1  ;;  %357 = vst.msk [vmem:[#allocation2 + $0xb0] sm:$0xff] %vm333_vm0, %v16578_v1  ;;  %v693_v8 = vld [vmem:[#allocation2] sm:$0xff]  ;;  %v694_v9 = vld [vmem:[#allocation2 + $0x8] sm:$0xff] }
  0x16   : > { %359 = vst.msk [vmem:[#allocation2 + $0xc0] sm:$0xff] %vm333_vm0, %v16578_v1  ;;  %360 = vst.msk [vmem:[#allocation2 + $0xc8] sm:$0xff] %vm333_vm0, %v16578_v1  ;;  %v624_v10 = vld [vmem:[%s10869_s15 + $0x28] sm:$0xff]  ;;  %727 = vperm.xlu0 %9849, %v693_v8   ;;  %v627_v11 = vld [vmem:[%s10869_s15 + $0x40] sm:$0xff] }
  0x17   : > { %362 = vst.msk [vmem:[#allocation2 + $0xd8] sm:$0xff] %vm333_vm0, %v16578_v1  ;;  %363 = vst.msk [vmem:[#allocation2 + $0xe0] sm:$0xff] %vm333_vm0, %v16578_v1  ;;  %v626_v12 = vld [vmem:[%s10869_s15 + $0x38] sm:$0xff]  ;;  %v629_v13 = vld [vmem:[%s10869_s15 + $0x50] sm:$0xff] }
  0x18   : > { %365 = vst.msk [vmem:[#allocation2 + $0xf0] sm:$0xff] %vm333_vm0, %v16578_v1  ;;  %366 = vst.msk [vmem:[#allocation2 + $0xf8] sm:$0xff] %vm333_vm0, %v16578_v1  ;;  %v628_v14 = vld [vmem:[%s10869_s15 + $0x48] sm:$0xff]  ;;  %v631_v15 = vld [vmem:[%s10869_s15 + $0x60] sm:$0xff] }
  0x19   : > { %368 = vst.msk [vmem:[#allocation2 + $0x108] sm:$0xff] %vm333_vm0, %v16578_v1  ;;  %369 = vst.msk [vmem:[#allocation2 + $0x110] sm:$0xff] %vm333_vm0, %v16578_v1  ;;  %v630_v16 = vld [vmem:[%s10869_s15 + $0x58] sm:$0xff]  ;;  %v633_v17 = vld [vmem:[%s10869_s15 + $0x70] sm:$0xff] }
  0x1a   : > { %371 = vst.msk [vmem:[#allocation2 + $0x120] sm:$0xff] %vm333_vm0, %v16578_v1  ;;  %372 = vst.msk [vmem:[#allocation2 + $0x128] sm:$0xff] %vm333_vm0, %v16578_v1  ;;  %v632_v18 = vld [vmem:[%s10869_s15 + $0x68] sm:$0xff]  ;;  %v635_v19 = vld [vmem:[%s10869_s15 + $0x80] sm:$0xff]  ;;  %732 = vperm.xlu0 %9849, %v694_v9  }
  0x1b   : > { %374 = vst.msk [vmem:[#allocation2 + $0x138] sm:$0xff] %vm333_vm0, %v16578_v1  ;;  %375 = vst.msk [vmem:[#allocation2 + $0x140] sm:$0xff] %vm333_vm0, %v16578_v1  ;;  %v634_v20 = vld [vmem:[%s10869_s15 + $0x78] sm:$0xff]  ;;  %v637_v21 = vld [vmem:[%s10869_s15 + $0x90] sm:$0xff] }
  0x1c   : > { %377 = vst.msk [vmem:[#allocation2 + $0x150] sm:$0xff] %vm333_vm0, %v16578_v1  ;;  %378 = vst.msk [vmem:[#allocation2 + $0x158] sm:$0xff] %vm333_vm0, %v16578_v1  ;;  %v636_v22 = vld [vmem:[%s10869_s15 + $0x88] sm:$0xff]  ;;  %v639_v23 = vld [vmem:[%s10869_s15 + $0xa0] sm:$0xff] }
  0x1d   : > { %380 = vst.msk [vmem:[#allocation2 + $0x168] sm:$0xff] %vm333_vm0, %v16578_v1  ;;  %381 = vst.msk [vmem:[#allocation2 + $0x170] sm:$0xff] %vm333_vm0, %v16578_v1  ;;  %v638_v24 = vld [vmem:[%s10869_s15 + $0x98] sm:$0xff]  ;;  %v641_v25 = vld [vmem:[%s10869_s15 + $0xb0] sm:$0xff] }
  0x1e   : > { %383 = vst.msk [vmem:[#allocation2 + $0x180] sm:$0xff] %vm333_vm0, %v16578_v1  ;;  %384 = vst.msk [vmem:[#allocation2 + $0x188] sm:$0xff] %vm333_vm0, %v16578_v1  ;;  %v640_v29 = vld [vmem:[%s10869_s15 + $0xa8] sm:$0xff]  ;;  %v643_v30 = vld [vmem:[%s10869_s15 + $0xc0] sm:$0xff] }
  0x1f   : > { %386 = vst.msk [vmem:[#allocation2 + $0x198] sm:$0xff] %vm333_vm0, %v16578_v1  ;;  %387 = vst.msk [vmem:[#allocation2 + $0x1a0] sm:$0xff] %vm333_vm0, %v16578_v1  ;;  %v642_v34 = vld [vmem:[%s10869_s15 + $0xb8] sm:$0xff]  ;;  %v645_v35 = vld [vmem:[%s10869_s15 + $0xd0] sm:$0xff] }
  0x20   : > { %340 = vst.msk [vmem:[#allocation2 + $0x28] sm:$0x3] %vm336_vm1, %v16578_v1  ;;  %337 = vst.msk [vmem:[#allocation2 + $0x10] sm:$0x3] %vm336_vm1, %v16578_v1  ;;  %v644_v36 = vld [vmem:[%s10869_s15 + $0xc8] sm:$0xff]  ;;  %v647_v37 = vld [vmem:[%s10869_s15 + $0xe0] sm:$0xff] }
  0x21   : > { %343 = vst.msk [vmem:[#allocation2 + $0x40] sm:$0x3] %vm336_vm1, %v16578_v1  ;;  %346 = vst.msk [vmem:[#allocation2 + $0x58] sm:$0x3] %vm336_vm1, %v16578_v1  ;;  %v646_v38 = vld [vmem:[%s10869_s15 + $0xd8] sm:$0xff]  ;;  %v648_v40 = vld [vmem:[%s10869_s15 + $0xe8] sm:$0xff] }
  0x22   : > { %349 = vst.msk [vmem:[#allocation2 + $0x70] sm:$0x3] %vm336_vm1, %v16578_v1  ;;  %352 = vst.msk [vmem:[#allocation2 + $0x88] sm:$0x3] %vm336_vm1, %v16578_v1  ;;  %v953_v63 = vld [vmem:[#allocation2 + $0x1] sm:$0xff] }
  0x23   : > { %355 = vst.msk [vmem:[#allocation2 + $0xa0] sm:$0x3] %vm336_vm1, %v16578_v1  ;;  %358 = vst.msk [vmem:[#allocation2 + $0xb8] sm:$0x3] %vm336_vm1, %v16578_v1 }
  0x24   : > { %361 = vst.msk [vmem:[#allocation2 + $0xd0] sm:$0x3] %vm336_vm1, %v16578_v1  ;;  %364 = vst.msk [vmem:[#allocation2 + $0xe8] sm:$0x3] %vm336_vm1, %v16578_v1 }
  0x25   : > { %367 = vst.msk [vmem:[#allocation2 + $0x100] sm:$0x3] %vm336_vm1, %v16578_v1  ;;  %370 = vst.msk [vmem:[#allocation2 + $0x118] sm:$0x3] %vm336_vm1, %v16578_v1 }
  0x26   : > { %373 = vst.msk [vmem:[#allocation2 + $0x130] sm:$0x3] %vm336_vm1, %v16578_v1  ;;  %376 = vst.msk [vmem:[#allocation2 + $0x148] sm:$0x3] %vm336_vm1, %v16578_v1 }
  0x27   : > { %379 = vst.msk [vmem:[#allocation2 + $0x160] sm:$0x3] %vm336_vm1, %v16578_v1  ;;  %382 = vst.msk [vmem:[#allocation2 + $0x178] sm:$0x3] %vm336_vm1, %v16578_v1 }
  0x28   : > { %385 = vst.msk [vmem:[#allocation2 + $0x190] sm:$0x3] %vm336_vm1, %v16578_v1  ;;  %388 = vst.msk [vmem:[#allocation2 + $0x1a8] sm:$0x3] %vm336_vm1, %v16578_v1 }
  0x29   : > { %652 = vst.msk [vmem:[#allocation2 + $0x19] sm:$0xff] %vm333_vm0, %v619_v2  ;;  %654 = vst.msk [vmem:[#allocation2 + $0x31] sm:$0xff] %vm333_vm0, %v621_v3  ;;  %v954_v3 = vld [vmem:[#allocation2 + $0x9] sm:$0xff] }
  0x2a   : > { %653 = vst.msk [vmem:[#allocation2 + $0x21] sm:$0xff] %vm333_vm0, %v620_v4  ;;  %656 = vst.msk [vmem:[#allocation2 + $0x49] sm:$0xff] %vm333_vm0, %v623_v5 }
  0x2b   : > { %655 = vst.msk [vmem:[#allocation2 + $0x39] sm:$0xff] %vm333_vm0, %v622_v6  ;;  %658 = vst.msk [vmem:[#allocation2 + $0x61] sm:$0xff] %vm333_vm0, %v625_v7 }
  0x2c   : > { %657 = vst.msk [vmem:[#allocation2 + $0x51] sm:$0xff] %vm333_vm0, %v624_v10  ;;  %660 = vst.msk [vmem:[#allocation2 + $0x79] sm:$0xff] %vm333_vm0, %v627_v11 }
  0x2d   : > { %659 = vst.msk [vmem:[#allocation2 + $0x69] sm:$0xff] %vm333_vm0, %v626_v12  ;;  %662 = vst.msk [vmem:[#allocation2 + $0x91] sm:$0xff] %vm333_vm0, %v629_v13 }
  0x2e   : > { %661 = vst.msk [vmem:[#allocation2 + $0x81] sm:$0xff] %vm333_vm0, %v628_v14  ;;  %664 = vst.msk [vmem:[#allocation2 + $0xa9] sm:$0xff] %vm333_vm0, %v631_v15 }
  0x2f   : > { %663 = vst.msk [vmem:[#allocation2 + $0x99] sm:$0xff] %vm333_vm0, %v630_v16  ;;  %666 = vst.msk [vmem:[#allocation2 + $0xc1] sm:$0xff] %vm333_vm0, %v633_v17 }
  0x30   : > { %665 = vst.msk [vmem:[#allocation2 + $0xb1] sm:$0xff] %vm333_vm0, %v632_v18  ;;  %668 = vst.msk [vmem:[#allocation2 + $0xd9] sm:$0xff] %vm333_vm0, %v635_v19  ;;  %v10912_v26 = vld [vmem:[#allocation2 + $0x18] sm:$0xff]  ;;  %v10914_v27 = vld [vmem:[#allocation2 + $0x30] sm:$0xff] }
  0x31   : > { %667 = vst.msk [vmem:[#allocation2 + $0xc9] sm:$0xff] %vm333_vm0, %v634_v20  ;;  %670 = vst.msk [vmem:[#allocation2 + $0xf1] sm:$0xff] %vm333_vm0, %v637_v21  ;;  %737 = vperm.xlu1 %9850, %v10912_v26   ;;  %v10920_v28 = vld [vmem:[#allocation2 + $0x20] sm:$0xff]  ;;  %747 = vperm.xlu0 %9849, %v10914_v27   ;;  %v10927_v31 = vld [vmem:[#allocation2 + $0x48] sm:$0xff] }
  0x32   : > { %669 = vst.msk [vmem:[#allocation2 + $0xe1] sm:$0xff] %vm333_vm0, %v636_v22  ;;  %672 = vst.msk [vmem:[#allocation2 + $0x109] sm:$0xff] %vm333_vm0, %v639_v23  ;;  %v10930_v32 = vld [vmem:[#allocation2 + $0x38] sm:$0xff]  ;;  %v10933_v33 = vld [vmem:[#allocation2 + $0x60] sm:$0xff] }
  0x33   : > { %671 = vst.msk [vmem:[#allocation2 + $0xf9] sm:$0xff] %vm333_vm0, %v638_v24  ;;  %674 = vst.msk [vmem:[#allocation2 + $0x121] sm:$0xff] %vm333_vm0, %v641_v25  ;;  %v10944_v39 = vld [vmem:[#allocation2 + $0x50] sm:$0xff]  ;;  %v10951_v41 = vld [vmem:[#allocation2 + $0x78] sm:$0xff] }
  0x34   : > { %673 = vst.msk [vmem:[#allocation2 + $0x111] sm:$0xff] %vm333_vm0, %v640_v29  ;;  %676 = vst.msk [vmem:[#allocation2 + $0x139] sm:$0xff] %vm333_vm0, %v643_v30  ;;  %v10954_v42 = vld [vmem:[#allocation2 + $0x68] sm:$0xff]  ;;  %v10957_v43 = vld [vmem:[#allocation2 + $0x90] sm:$0xff] }
  0x35   : > { %742 = vperm.xlu1 %9850, %v10920_v28   ;;  %757 = vperm.xlu0 %9849, %v10927_v31   ;;  %675 = vst.msk [vmem:[#allocation2 + $0x129] sm:$0xff] %vm333_vm0, %v642_v34  ;;  %678 = vst.msk [vmem:[#allocation2 + $0x151] sm:$0xff] %vm333_vm0, %v645_v35  ;;  %v10960_v44 = vld [vmem:[#allocation2 + $0x80] sm:$0xff]  ;;  %v10963_v45 = vld [vmem:[#allocation2 + $0xa8] sm:$0xff] }
  0x36   : > { %677 = vst.msk [vmem:[#allocation2 + $0x141] sm:$0xff] %vm333_vm0, %v644_v36  ;;  %680 = vst.msk [vmem:[#allocation2 + $0x169] sm:$0xff] %vm333_vm0, %v647_v37  ;;  %v10966_v46 = vld [vmem:[#allocation2 + $0x98] sm:$0xff]  ;;  %v10969_v47 = vld [vmem:[#allocation2 + $0xc0] sm:$0xff] }
  0x37   : > { %679 = vst.msk [vmem:[#allocation2 + $0x159] sm:$0xff] %vm333_vm0, %v646_v38  ;;  %681 = vst.msk [vmem:[#allocation2 + $0x171] sm:$0xff] %vm333_vm0, %v648_v40  ;;  %v10972_v48 = vld [vmem:[#allocation2 + $0xb0] sm:$0xff]  ;;  %v10975_v49 = vld [vmem:[#allocation2 + $0xd8] sm:$0xff] }
  0x38   : > { %v10978_v50 = vld [vmem:[#allocation2 + $0xc8] sm:$0xff]  ;;  %v10981_v51 = vld [vmem:[#allocation2 + $0xf0] sm:$0xff]  ;;  %v11020_v2 = vld [vmem:[#allocation2 + $0x19] sm:$0xff] }
  0x39   : > { %752 = vperm.xlu1 %9850, %v10930_v32   ;;  %767 = vperm.xlu0 %9849, %v10933_v33   ;;  %v10984_v52 = vld [vmem:[#allocation2 + $0xe0] sm:$0xff]  ;;  %v10987_v53 = vld [vmem:[#allocation2 + $0x108] sm:$0xff]  ;;  %v11024_v4 = vld [vmem:[#allocation2 + $0x31] sm:$0xff] }
  0x3a   : > { %v10990_v54 = vld [vmem:[#allocation2 + $0xf8] sm:$0xff]  ;;  %v10993_v55 = vld [vmem:[#allocation2 + $0x120] sm:$0xff]  ;;  %v11029_v6 = vld [vmem:[#allocation2 + $0x49] sm:$0xff] }
  0x3b   : > { %v10996_v56 = vld [vmem:[#allocation2 + $0x110] sm:$0xff]  ;;  %v10999_v57 = vld [vmem:[#allocation2 + $0x138] sm:$0xff]  ;;  %v11026_v5 = vld [vmem:[#allocation2 + $0x21] sm:$0xff] }
  0x3c   : > { %v11002_v58 = vld [vmem:[#allocation2 + $0x128] sm:$0xff]  ;;  %v11005_v59 = vld [vmem:[#allocation2 + $0x150] sm:$0xff]  ;;  %v11032_v7 = vld [vmem:[#allocation2 + $0x39] sm:$0xff] }
  0x3d   : > { %762 = vperm.xlu1 %9850, %v10944_v39   ;;  %777 = vperm.xlu0 %9849, %v10951_v41   ;;  %v11008_v60 = vld [vmem:[#allocation2 + $0x140] sm:$0xff]  ;;  %v11011_v61 = vld [vmem:[#allocation2 + $0x168] sm:$0xff]  ;;  %v11038_v9 = vld [vmem:[#allocation2 + $0x51] sm:$0xff] }
  0x3e   : > { %v11014_v62 = vld [vmem:[#allocation2 + $0x158] sm:$0xff]  ;;  %v11018_v0 = vld [vmem:[#allocation2 + $0x170] sm:$0xff]  ;;  %v11035_v8 = vld [vmem:[#allocation2 + $0x61] sm:$0xff] }
  0x3f   : > { %v11041_v10 = vld [vmem:[#allocation2 + $0x79] sm:$0xff]  ;;  %v11044_v11 = vld [vmem:[#allocation2 + $0x69] sm:$0xff]  ;;  %v11047_v12 = vld [vmem:[#allocation2 + $0x91] sm:$0xff] }
  0x40   : > { %v11050_v13 = vld [vmem:[#allocation2 + $0x81] sm:$0xff]  ;;  %v11053_v14 = vld [vmem:[#allocation2 + $0xa9] sm:$0xff]  ;;  %v11056_v15 = vld [vmem:[#allocation2 + $0x99] sm:$0xff] }
  0x41   : > { %772 = vperm.xlu1 %9850, %v10954_v42   ;;  %787 = vperm.xlu0 %9849, %v10957_v43   ;;  %v11059_v16 = vld [vmem:[#allocation2 + $0xc1] sm:$0xff]  ;;  %v11062_v17 = vld [vmem:[#allocation2 + $0xb1] sm:$0xff]  ;;  %v11065_v18 = vld [vmem:[#allocation2 + $0xd9] sm:$0xff] }
  0x42   : > { %v11068_v19 = vld [vmem:[#allocation2 + $0xc9] sm:$0xff]  ;;  %v11071_v20 = vld [vmem:[#allocation2 + $0xf1] sm:$0xff]  ;;  %v11074_v21 = vld [vmem:[#allocation2 + $0xe1] sm:$0xff] }
  0x43   : > { %v11077_v22 = vld [vmem:[#allocation2 + $0x109] sm:$0xff]  ;;  %v11080_v23 = vld [vmem:[#allocation2 + $0xf9] sm:$0xff]  ;;  %v11083_v24 = vld [vmem:[#allocation2 + $0x121] sm:$0xff] }
  0x44   : > { %v11086_v25 = vld [vmem:[#allocation2 + $0x111] sm:$0xff]  ;;  %v11089_v29 = vld [vmem:[#allocation2 + $0x139] sm:$0xff]  ;;  %v11092_v30 = vld [vmem:[#allocation2 + $0x129] sm:$0xff] }
  0x45   : > { %782 = vperm.xlu1 %9850, %v10960_v44   ;;  %797 = vperm.xlu0 %9849, %v10963_v45   ;;  %16618 = vst [vmem:[#allocation6_spill] sm:$0xff] %v11092_v30  ;;  %v649_v34 = vld [vmem:[%s10869_s15 + $0xf0] sm:$0xff]  ;;  %v11100_v36 = vld [vmem:[#allocation2 + $0x141] sm:$0xff]  ;;  %v650_v38 = vld [vmem:[%s10869_s15 + $0xf8] sm:$0xff] }
  0x46   : > { %682 = vst.msk [vmem:[#allocation2 + $0x181] sm:$0xff] %vm333_vm0, %v649_v34  ;;  %v11097_v35 = vld [vmem:[#allocation2 + $0x151] sm:$0xff]  ;;  %16620 = vst [vmem:[#allocation8_spill] sm:$0xff] %v11100_v36  ;;  %v11103_v37 = vld [vmem:[#allocation2 + $0x169] sm:$0xff] }
  0x47   : > { %16619 = vst [vmem:[#allocation7_spill] sm:$0xff] %v11097_v35  ;;  %16621 = vst [vmem:[#allocation9_spill] sm:$0xff] %v11103_v37  ;;  %v11108_v40 = vld [vmem:[#allocation2 + $0x159] sm:$0xff]  ;;  %v11114_v34 = vld [vmem:[#allocation2 + $0x171] sm:$0xff] }
  0x48   : > { %683 = vst.msk [vmem:[#allocation2 + $0x189] sm:$0xff] %vm333_vm0, %v650_v38  ;;  %16622 = vst [vmem:[#allocation10_spill] sm:$0xff] %v11108_v40  ;;  %v11116_v1 = vld [vmem:[#allocation2 + $0x1a] sm:$0xff] }
  0x49   : > { %792 = vperm.xlu1 %9850, %v10966_v46   ;;  %807 = vperm.xlu0 %9849, %v10969_v47   ;;  %16624 = vst [vmem:[#allocation12_spill] sm:$0xff] %v11116_v1 }
  0x4d   : > { %802 = vperm.xlu1 %9850, %v10972_v48   ;;  %817 = vperm.xlu0 %9849, %v10975_v49  }
  0x51   : > { %812 = vperm.xlu1 %9850, %v10978_v50   ;;  %827 = vperm.xlu0 %9849, %v10981_v51  }
  0x55   : > { %822 = vperm.xlu1 %9850, %v10984_v52   ;;  %837 = vperm.xlu0 %9849, %v10987_v53  }
  0x59   : > { %832 = vperm.xlu1 %9850, %v10990_v54   ;;  %847 = vperm.xlu0 %9849, %v10993_v55  }
  0x5d   : > { %842 = vperm.xlu1 %9850, %v10996_v56   ;;  %857 = vperm.xlu0 %9849, %v10999_v57  }
  0x61   : > { %852 = vperm.xlu1 %9850, %v11002_v58   ;;  %867 = vperm.xlu0 %9849, %v11005_v59  }
  0x65   : > { %862 = vperm.xlu1 %9850, %v11008_v60   ;;  %877 = vperm.xlu0 %9849, %v11011_v61  }
  0x69   : > { %872 = vperm.xlu1 %9850, %v11014_v62   ;;  %987 = vperm.xlu0 %9849, %v953_v63   ;;  %v1213_v63 = vld [vmem:[#allocation2 + $0x2] sm:$0xff] }
  0x6d   : > { %882 = vperm.xlu1 %9850, %v11018_v0   ;;  %997 = vperm.xlu0 %9849, %v11020_v2  }
  0x71   : > { %992 = vperm.xlu1 %9850, %v954_v3   ;;  %1007 = vperm.xlu0 %9849, %v11024_v4  }
  0x75   : > { %1002 = vperm.xlu1 %9850, %v11026_v5   ;;  %1017 = vperm.xlu0 %9849, %v11029_v6  }
  0x79   : > { %1012 = vperm.xlu1 %9850, %v11032_v7   ;;  %1027 = vperm.xlu0 %9849, %v11035_v8  }
  0x7d   : > { %1022 = vperm.xlu1 %9850, %v11038_v9   ;;  %1037 = vperm.xlu0 %9849, %v11041_v10  }
  0x81   : > { %1032 = vperm.xlu1 %9850, %v11044_v11   ;;  %1047 = vperm.xlu0 %9849, %v11047_v12  }
  0x85   : > { %1042 = vperm.xlu1 %9850, %v11050_v13   ;;  %1057 = vperm.xlu0 %9849, %v11053_v14  }
  0x89   : > { %1052 = vperm.xlu1 %9850, %v11056_v15   ;;  %1067 = vperm.xlu0 %9849, %v11059_v16  }
  0x8d   : > { %1062 = vperm.xlu1 %9850, %v11062_v17   ;;  %1077 = vperm.xlu0 %9849, %v11065_v18  }
  0x91   : > { %1072 = vperm.xlu1 %9850, %v11068_v19   ;;  %1087 = vperm.xlu0 %9849, %v11071_v20  }
  0x95   : > { %1082 = vperm.xlu1 %9850, %v11074_v21   ;;  %1097 = vperm.xlu0 %9849, %v11077_v22   ;;  %v11112_v3 = vpop.permute.xlu0 %727 }
  0x96   : > { %16623 = vst [vmem:[#allocation11_spill] sm:$0xff] %v11112_v3  ;;  %v11128_v3 = vld [vmem:[#allocation2 + $0x22] sm:$0xff] }
  0x97   : > { %16629 = vst [vmem:[#allocation17_spill] sm:$0xff] %v11128_v3 }
  0x99   : > { %1092 = vperm.xlu1 %9850, %v11080_v23   ;;  %1107 = vperm.xlu0 %9849, %v11083_v24  }
  0x9d   : > { %1102 = vperm.xlu1 %9850, %v11086_v25   ;;  %1117 = vperm.xlu0 %9849, %v11089_v29  }
  0xa1   : > { %1112 = vperm.xlu1 %9850, %v11092_v30   ;;  %1127 = vperm.xlu0 %9849, %v11097_v35   ;;  %v11119_v35 = vpop.permute.xlu0 %732  ;;  %v11133_v30 = vld [vmem:[#allocation2 + $0x4a] sm:$0xff] }
  0xa2   : > { %16625 = vst [vmem:[#allocation13_spill] sm:$0xff] %v11119_v35  ;;  %16631 = vst [vmem:[#allocation19_spill] sm:$0xff] %v11133_v30 }
  0xa5   : > { %1122 = vperm.xlu1 %9850, %v11100_v36   ;;  %1137 = vperm.xlu0 %9849, %v11103_v37   ;;  %v1214_v36 = vld [vmem:[#allocation2 + $0xa] sm:$0xff]  ;;  %v11124_v37 = vld [vmem:[#allocation2 + $0x32] sm:$0xff] }
  0xa6   : > { %16627 = vst [vmem:[#allocation15_spill] sm:$0xff] %v11124_v37 }
  0xa9   : > { %1132 = vperm.xlu1 %9850, %v11108_v40   ;;  %1247 = vperm.xlu0 %9849, %v1213_v63  }
  0xad   : > { %1142 = vperm.xlu1 %9850, %v11114_v34   ;;  %1257 = vperm.xlu0 %9849, %v11116_v1   ;;  %v11138_v1 = vld [vmem:[#allocation2 + $0x3a] sm:$0xff] }
  0xae   : > { %16633 = vst [vmem:[#allocation21_spill] sm:$0xff] %v11138_v1 }
  0xb0   : > { %v11122_v38 = vpop.permute.xlu1 %737  ;;  %v11126_v40 = vpop.permute.xlu0 %747 }
  0xb1   : > { %16626 = vst [vmem:[#allocation14_spill] sm:$0xff] %v11122_v38  ;;  %1252 = vperm.xlu1 %9850, %v1214_v36   ;;  %16628 = vst [vmem:[#allocation16_spill] sm:$0xff] %v11126_v40  ;;  %1267 = vperm.xlu0 %9849, %v11124_v37   ;;  %v11143_v36 = vld [vmem:[#allocation2 + $0x62] sm:$0xff]  ;;  %v11148_v37 = vld [vmem:[#allocation2 + $0x52] sm:$0xff] }
  0xb2   : > { %16635 = vst [vmem:[#allocation23_spill] sm:$0xff] %v11143_v36  ;;  %16637 = vst [vmem:[#allocation25_spill] sm:$0xff] %v11148_v37 }
  0xb4   : > { %v11131_v63 = vpop.permute.xlu1 %742  ;;  %v11136_v35 = vpop.permute.xlu0 %757 }
  0xb5   : > { %16630 = vst [vmem:[#allocation18_spill] sm:$0xff] %v11131_v63  ;;  %1262 = vperm.xlu1 %9850, %v11128_v3   ;;  %16632 = vst [vmem:[#allocation20_spill] sm:$0xff] %v11136_v35  ;;  %1277 = vperm.xlu0 %9849, %v11133_v30   ;;  %v11153_v3 = vld [vmem:[#allocation2 + $0x7a] sm:$0xff]  ;;  %v11158_v30 = vld [vmem:[#allocation2 + $0x6a] sm:$0xff] }
  0xb6   : > { %16639 = vst [vmem:[#allocation27_spill] sm:$0xff] %v11153_v3  ;;  %16641 = vst [vmem:[#allocation29_spill] sm:$0xff] %v11158_v30 }
  0xb8   : > { %v11141_v38 = vpop.permute.xlu1 %752  ;;  %v11146_v40 = vpop.permute.xlu0 %767 }
  0xb9   : > { %16634 = vst [vmem:[#allocation22_spill] sm:$0xff] %v11141_v38  ;;  %1272 = vperm.xlu1 %9850, %v11138_v1   ;;  %16636 = vst [vmem:[#allocation24_spill] sm:$0xff] %v11146_v40  ;;  %1287 = vperm.xlu0 %9849, %v11143_v36   ;;  %v11163_v1 = vld [vmem:[#allocation2 + $0x92] sm:$0xff]  ;;  %v11168_v36 = vld [vmem:[#allocation2 + $0x82] sm:$0xff] }
  0xba   : > { %16643 = vst [vmem:[#allocation31_spill] sm:$0xff] %v11163_v1  ;;  %16645 = vst [vmem:[#allocation33_spill] sm:$0xff] %v11168_v36 }
  0xbc   : > { %v11151_v63 = vpop.permute.xlu1 %762  ;;  %v11156_v35 = vpop.permute.xlu0 %777 }
  0xbd   : > { %16638 = vst [vmem:[#allocation26_spill] sm:$0xff] %v11151_v63  ;;  %1282 = vperm.xlu1 %9850, %v11148_v37   ;;  %16640 = vst [vmem:[#allocation28_spill] sm:$0xff] %v11156_v35  ;;  %1297 = vperm.xlu0 %9849, %v11153_v3   ;;  %v11173_v37 = vld [vmem:[#allocation2 + $0xaa] sm:$0xff]  ;;  %v11178_v3 = vld [vmem:[#allocation2 + $0x9a] sm:$0xff] }
  0xbe   : > { %16647 = vst [vmem:[#allocation35_spill] sm:$0xff] %v11173_v37  ;;  %16649 = vst [vmem:[#allocation37_spill] sm:$0xff] %v11178_v3 }
  0xc0   : > { %v11161_v38 = vpop.permute.xlu1 %772  ;;  %v11166_v40 = vpop.permute.xlu0 %787 }
  0xc1   : > { %16642 = vst [vmem:[#allocation30_spill] sm:$0xff] %v11161_v38  ;;  %1292 = vperm.xlu1 %9850, %v11158_v30   ;;  %16644 = vst [vmem:[#allocation32_spill] sm:$0xff] %v11166_v40  ;;  %1307 = vperm.xlu0 %9849, %v11163_v1   ;;  %v11183_v30 = vld [vmem:[#allocation2 + $0xc2] sm:$0xff]  ;;  %v11188_v1 = vld [vmem:[#allocation2 + $0xb2] sm:$0xff] }
  0xc2   : > { %16651 = vst [vmem:[#allocation39_spill] sm:$0xff] %v11183_v30  ;;  %16653 = vst [vmem:[#allocation41_spill] sm:$0xff] %v11188_v1 }
  0xc4   : > { %v11171_v63 = vpop.permute.xlu1 %782  ;;  %v11176_v35 = vpop.permute.xlu0 %797 }
  0xc5   : > { %16646 = vst [vmem:[#allocation34_spill] sm:$0xff] %v11171_v63  ;;  %1302 = vperm.xlu1 %9850, %v11168_v36   ;;  %16648 = vst [vmem:[#allocation36_spill] sm:$0xff] %v11176_v35  ;;  %1317 = vperm.xlu0 %9849, %v11173_v37   ;;  %v11193_v36 = vld [vmem:[#allocation2 + $0xda] sm:$0xff]  ;;  %v11198_v37 = vld [vmem:[#allocation2 + $0xca] sm:$0xff] }
  0xc6   : > { %16655 = vst [vmem:[#allocation43_spill] sm:$0xff] %v11193_v36  ;;  %16657 = vst [vmem:[#allocation45_spill] sm:$0xff] %v11198_v37 }
  0xc8   : > { %v11181_v38 = vpop.permute.xlu1 %792  ;;  %v11186_v40 = vpop.permute.xlu0 %807 }
  0xc9   : > { %16650 = vst [vmem:[#allocation38_spill] sm:$0xff] %v11181_v38  ;;  %1312 = vperm.xlu1 %9850, %v11178_v3   ;;  %16652 = vst [vmem:[#allocation40_spill] sm:$0xff] %v11186_v40  ;;  %1327 = vperm.xlu0 %9849, %v11183_v30   ;;  %v11203_v3 = vld [vmem:[#allocation2 + $0xf2] sm:$0xff]  ;;  %v11208_v30 = vld [vmem:[#allocation2 + $0xe2] sm:$0xff] }
  0xca   : > { %16659 = vst [vmem:[#allocation47_spill] sm:$0xff] %v11203_v3  ;;  %16661 = vst [vmem:[#allocation49_spill] sm:$0xff] %v11208_v30 }
  0xcc   : > { %v11191_v63 = vpop.permute.xlu1 %802  ;;  %v11196_v35 = vpop.permute.xlu0 %817 }
  0xcd   : > { %16654 = vst [vmem:[#allocation42_spill] sm:$0xff] %v11191_v63  ;;  %1322 = vperm.xlu1 %9850, %v11188_v1   ;;  %16656 = vst [vmem:[#allocation44_spill] sm:$0xff] %v11196_v35  ;;  %1337 = vperm.xlu0 %9849, %v11193_v36   ;;  %v11213_v1 = vld [vmem:[#allocation2 + $0x10a] sm:$0xff]  ;;  %v11218_v36 = vld [vmem:[#allocation2 + $0xfa] sm:$0xff] }
  0xce   : > { %16663 = vst [vmem:[#allocation51_spill] sm:$0xff] %v11213_v1  ;;  %16665 = vst [vmem:[#allocation53_spill] sm:$0xff] %v11218_v36 }
  0xd0   : > { %v11201_v38 = vpop.permute.xlu1 %812  ;;  %v11206_v40 = vpop.permute.xlu0 %827 }
  0xd1   : > { %16658 = vst [vmem:[#allocation46_spill] sm:$0xff] %v11201_v38  ;;  %1332 = vperm.xlu1 %9850, %v11198_v37   ;;  %16660 = vst [vmem:[#allocation48_spill] sm:$0xff] %v11206_v40  ;;  %1347 = vperm.xlu0 %9849, %v11203_v3   ;;  %v11223_v37 = vld [vmem:[#allocation2 + $0x122] sm:$0xff]  ;;  %v11228_v3 = vld [vmem:[#allocation2 + $0x112] sm:$0xff] }
  0xd2   : > { %16667 = vst [vmem:[#allocation55_spill] sm:$0xff] %v11223_v37  ;;  %16669 = vst [vmem:[#allocation57_spill] sm:$0xff] %v11228_v3 }
  0xd4   : > { %v11211_v63 = vpop.permute.xlu1 %822  ;;  %v11216_v35 = vpop.permute.xlu0 %837 }
  0xd5   : > { %16662 = vst [vmem:[#allocation50_spill] sm:$0xff] %v11211_v63  ;;  %1342 = vperm.xlu1 %9850, %v11208_v30   ;;  %16664 = vst [vmem:[#allocation52_spill] sm:$0xff] %v11216_v35  ;;  %1357 = vperm.xlu0 %9849, %v11213_v1   ;;  %v11233_v30 = vld [vmem:[#allocation2 + $0x13a] sm:$0xff]  ;;  %v11238_v1 = vld [vmem:[#allocation2 + $0x12a] sm:$0xff] }
  0xd6   : > { %16671 = vst [vmem:[#allocation59_spill] sm:$0xff] %v11233_v30  ;;  %16673 = vst [vmem:[#allocation61_spill] sm:$0xff] %v11238_v1 }
  0xd8   : > { %v11221_v38 = vpop.permute.xlu1 %832  ;;  %v11226_v40 = vpop.permute.xlu0 %847 }
  0xd9   : > { %16666 = vst [vmem:[#allocation54_spill] sm:$0xff] %v11221_v38  ;;  %1352 = vperm.xlu1 %9850, %v11218_v36   ;;  %16668 = vst [vmem:[#allocation56_spill] sm:$0xff] %v11226_v40  ;;  %1367 = vperm.xlu0 %9849, %v11223_v37   ;;  %v11243_v36 = vld [vmem:[#allocation2 + $0x152] sm:$0xff]  ;;  %v11248_v37 = vld [vmem:[#allocation2 + $0x142] sm:$0xff] }
  0xda   : > { %16676 = vst [vmem:[#allocation64_spill] sm:$0xff] %v11248_v37 }
  0xdc   : > { %v11231_v63 = vpop.permute.xlu1 %842  ;;  %v11236_v35 = vpop.permute.xlu0 %857 }
  0xdd   : > { %16670 = vst [vmem:[#allocation58_spill] sm:$0xff] %v11231_v63  ;;  %1362 = vperm.xlu1 %9850, %v11228_v3   ;;  %16672 = vst [vmem:[#allocation60_spill] sm:$0xff] %v11236_v35  ;;  %1377 = vperm.xlu0 %9849, %v11233_v30   ;;  %v11253_v3 = vld [vmem:[#allocation2 + $0x16a] sm:$0xff]  ;;  %v11258_v30 = vld [vmem:[#allocation2 + $0x15a] sm:$0xff] }
  0xe0   : > { %v11241_v38 = vpop.permute.xlu1 %852  ;;  %v11246_v40 = vpop.permute.xlu0 %867 }
  0xe1   : > { %16674 = vst [vmem:[#allocation62_spill] sm:$0xff] %v11241_v38  ;;  %1372 = vperm.xlu1 %9850, %v11238_v1   ;;  %16675 = vst [vmem:[#allocation63_spill] sm:$0xff] %v11246_v40  ;;  %1387 = vperm.xlu0 %9849, %v11243_v36   ;;  %v11266_v1 = vld [vmem:[#allocation2 + $0x172] sm:$0xff] }
  0xe4   : > { %v11251_v63 = vpop.permute.xlu1 %862  ;;  %v11256_v35 = vpop.permute.xlu0 %877 }
  0xe5   : > { %16677 = vst [vmem:[#allocation65_spill] sm:$0xff] %v11251_v63  ;;  %1382 = vperm.xlu1 %9850, %v11248_v37   ;;  %16678 = vst [vmem:[#allocation66_spill] sm:$0xff] %v11256_v35  ;;  %1397 = vperm.xlu0 %9849, %v11253_v3  }
  0xe8   : > { %v11261_v38 = vpop.permute.xlu1 %872  ;;  %v11264_v40 = vpop.permute.xlu0 %987 }
  0xe9   : > { %16679 = vst [vmem:[#allocation67_spill] sm:$0xff] %v11261_v38  ;;  %1392 = vperm.xlu1 %9850, %v11258_v30   ;;  %16680 = vst [vmem:[#allocation68_spill] sm:$0xff] %v11264_v40  ;;  %1507 = vperm.xlu0 %9849, %v10912_v26  }
  0xec   : > { %v11269_v63 = vpop.permute.xlu1 %882  ;;  %v11272_v37 = vpop.permute.xlu0 %997 }
  0xed   : > { %16681 = vst [vmem:[#allocation69_spill] sm:$0xff] %v11269_v63  ;;  %1402 = vperm.xlu1 %9850, %v11266_v1   ;;  %1517 = vperm.xlu0 %9849, %v10914_v27  }
  0xf0   : > { %v11275_v35 = vpop.permute.xlu1 %992  ;;  %v11278_v38 = vpop.permute.xlu0 %1007 }
  0xf1   : > { %1512 = vperm.xlu1 %9850, %v10920_v28   ;;  %1527 = vperm.xlu0 %9849, %v10927_v31  }
  0xf4   : > { %v11281_v40 = vpop.permute.xlu1 %1002  ;;  %v11284_v26 = vpop.permute.xlu0 %1017 }
  0xf5   : > { %1522 = vperm.xlu1 %9850, %v10930_v32   ;;  %1537 = vperm.xlu0 %9849, %v10933_v33  }
  0xf8   : > { %v11287_v63 = vpop.permute.xlu1 %1012  ;;  %v11290_v27 = vpop.permute.xlu0 %1027 }
  0xf9   : > { %1532 = vperm.xlu1 %9850, %v10944_v39   ;;  %1547 = vperm.xlu0 %9849, %v10951_v41  }
  0xfc   : > { %v11293_v28 = vpop.permute.xlu1 %1022  ;;  %v11296_v31 = vpop.permute.xlu0 %1037 }
  0xfd   : > { %1542 = vperm.xlu1 %9850, %v10954_v42   ;;  %1557 = vperm.xlu0 %9849, %v10957_v43  }
 0x100   : > { %v11299_v32 = vpop.permute.xlu1 %1032  ;;  %v11302_v33 = vpop.permute.xlu0 %1047 }
 0x101   : > { %1552 = vperm.xlu1 %9850, %v10960_v44   ;;  %1567 = vperm.xlu0 %9849, %v10963_v45  }
 0x104   : > { %v11305_v39 = vpop.permute.xlu1 %1042  ;;  %v11308_v41 = vpop.permute.xlu0 %1057 }
 0x105   : > { %1562 = vperm.xlu1 %9850, %v10966_v46   ;;  %1577 = vperm.xlu0 %9849, %v10969_v47  }
 0x108   : > { %v11311_v42 = vpop.permute.xlu1 %1052  ;;  %v11314_v43 = vpop.permute.xlu0 %1067 }
 0x109   : > { %1572 = vperm.xlu1 %9850, %v10972_v48   ;;  %1587 = vperm.xlu0 %9849, %v10975_v49  }
 0x10c   : > { %v11317_v44 = vpop.permute.xlu1 %1062  ;;  %v11320_v45 = vpop.permute.xlu0 %1077 }
 0x10d   : > { %1582 = vperm.xlu1 %9850, %v10978_v50   ;;  %1597 = vperm.xlu0 %9849, %v10981_v51  }
 0x110   : > { %v11323_v46 = vpop.permute.xlu1 %1072  ;;  %v11326_v47 = vpop.permute.xlu0 %1087 }
 0x111   : > { %1592 = vperm.xlu1 %9850, %v10984_v52   ;;  %1607 = vperm.xlu0 %9849, %v10987_v53  }
 0x114   : > { %v11329_v48 = vpop.permute.xlu1 %1082  ;;  %v11332_v49 = vpop.permute.xlu0 %1097 }
 0x115   : > { %1602 = vperm.xlu1 %9850, %v10990_v54   ;;  %1617 = vperm.xlu0 %9849, %v10993_v55  }
 0x118   : > { %v11335_v50 = vpop.permute.xlu1 %1092  ;;  %v11338_v51 = vpop.permute.xlu0 %1107 }
 0x119   : > { %1612 = vperm.xlu1 %9850, %v10996_v56   ;;  %16682 = vst [vmem:[#allocation70_spill] sm:$0xff] %v11338_v51  ;;  %1627 = vperm.xlu0 %9849, %v10999_v57   ;;  %v11355_v51 = vld [vmem:[#allocation2 + $0x180] sm:$0xff] }
 0x11c   : > { %v11341_v52 = vpop.permute.xlu1 %1102  ;;  %v11344_v53 = vpop.permute.xlu0 %1117 }
 0x11d   : > { %16683 = vst [vmem:[#allocation71_spill] sm:$0xff] %v11341_v52  ;;  %1622 = vperm.xlu1 %9850, %v11002_v58   ;;  %16684 = vst [vmem:[#allocation72_spill] sm:$0xff] %v11344_v53  ;;  %1637 = vperm.xlu0 %9849, %v11005_v59   ;;  %v2791_v53 = vld [vmem:[#allocation2 + $0xfa] sm:$0xff] }
 0x120   : > { %v11347_v54 = vpop.permute.xlu1 %1112  ;;  %v11350_v55 = vpop.permute.xlu0 %1127 }
 0x121   : > { %16685 = vst [vmem:[#allocation73_spill] sm:$0xff] %v11347_v54  ;;  %1632 = vperm.xlu1 %9850, %v11008_v60   ;;  %16686 = vst [vmem:[#allocation74_spill] sm:$0xff] %v11350_v55  ;;  %1647 = vperm.xlu0 %9849, %v11011_v61   ;;  %v11366_v60 = vld [vmem:[#allocation2 + $0x188] sm:$0xff] }
 0x124   : > { %v11353_v56 = vpop.permute.xlu1 %1122  ;;  %v11358_v57 = vpop.permute.xlu0 %1137 }
 0x125   : > { %16687 = vst [vmem:[#allocation75_spill] sm:$0xff] %v11353_v56  ;;  %1642 = vperm.xlu1 %9850, %v11014_v62   ;;  %16688 = vst [vmem:[#allocation76_spill] sm:$0xff] %v11358_v57  ;;  %1657 = vperm.xlu0 %9849, %v11355_v51  }
 0x128   : > { %v11361_v58 = vpop.permute.xlu1 %1132  ;;  %v11364_v59 = vpop.permute.xlu0 %1247 }
 0x129   : > { %16689 = vst [vmem:[#allocation77_spill] sm:$0xff] %v11361_v58  ;;  %1652 = vperm.xlu1 %9850, %v11018_v0   ;;  %16690 = vst [vmem:[#allocation78_spill] sm:$0xff] %v11364_v59  ;;  %1767 = vperm.xlu0 %9849, %v11020_v2  }
 0x12c   : > { %v11369_v61 = vpop.permute.xlu1 %1142  ;;  %v11372_v56 = vpop.permute.xlu0 %1257 }
 0x12d   : > { %16691 = vst [vmem:[#allocation79_spill] sm:$0xff] %v11369_v61  ;;  %1662 = vperm.xlu1 %9850, %v11366_v60   ;;  %16692 = vst [vmem:[#allocation80_spill] sm:$0xff] %v11372_v56  ;;  %1777 = vperm.xlu0 %9849, %v11024_v4   ;;  %v2789_v56 = vld [vmem:[#allocation2 + $0xe2] sm:$0xff] }
 0x130   : > { %v11375_v62 = vpop.permute.xlu1 %1252  ;;  %v11378_v58 = vpop.permute.xlu0 %1267 }
 0x131   : > { %16693 = vst [vmem:[#allocation81_spill] sm:$0xff] %v11375_v62  ;;  %1772 = vperm.xlu1 %9850, %v11026_v5   ;;  %16694 = vst [vmem:[#allocation82_spill] sm:$0xff] %v11378_v58  ;;  %1787 = vperm.xlu0 %9849, %v11029_v6   ;;  %v16888_v58 = vld [vmem:[#allocation46_spill] sm:$0xff] }
 0x134   : > { %v11381_v0 = vpop.permute.xlu1 %1262  ;;  %v11384_v2 = vpop.permute.xlu0 %1277 }
 0x135   : > { %16695 = vst [vmem:[#allocation83_spill] sm:$0xff] %v11381_v0  ;;  %1782 = vperm.xlu1 %9850, %v11032_v7   ;;  %16696 = vst [vmem:[#allocation84_spill] sm:$0xff] %v11384_v2  ;;  %1797 = vperm.xlu0 %9849, %v11035_v8   ;;  %v2790_v2 = vld [vmem:[#allocation2 + $0xf2] sm:$0xff] }
 0x138   : > { %v11387_v61 = vpop.permute.xlu1 %1272  ;;  %v11390_v4 = vpop.permute.xlu0 %1287 }
 0x139   : > { %16697 = vst [vmem:[#allocation85_spill] sm:$0xff] %v11387_v61  ;;  %1792 = vperm.xlu1 %9850, %v11038_v9   ;;  %16698 = vst [vmem:[#allocation86_spill] sm:$0xff] %v11390_v4  ;;  %1807 = vperm.xlu0 %9849, %v11041_v10   ;;  %v16883_v4 = vld [vmem:[#allocation38_spill] sm:$0xff] }
 0x13c   : > { %v11393_v5 = vpop.permute.xlu1 %1282  ;;  %v11396_v6 = vpop.permute.xlu0 %1297 }
 0x13d   : > { %16699 = vst [vmem:[#allocation87_spill] sm:$0xff] %v11393_v5  ;;  %1802 = vperm.xlu1 %9850, %v11044_v11   ;;  %16700 = vst [vmem:[#allocation88_spill] sm:$0xff] %v11396_v6  ;;  %1817 = vperm.xlu0 %9849, %v11047_v12  }
 0x140   : > { %v11399_v7 = vpop.permute.xlu1 %1292  ;;  %v11402_v8 = vpop.permute.xlu0 %1307 }
 0x141   : > { %16701 = vst [vmem:[#allocation89_spill] sm:$0xff] %v11399_v7  ;;  %1812 = vperm.xlu1 %9850, %v11050_v13   ;;  %16702 = vst [vmem:[#allocation90_spill] sm:$0xff] %v11402_v8  ;;  %1827 = vperm.xlu0 %9849, %v11053_v14   ;;  %v2787_v7 = vld [vmem:[#allocation2 + $0xca] sm:$0xff] }
 0x144   : > { %v11405_v9 = vpop.permute.xlu1 %1302  ;;  %v11408_v10 = vpop.permute.xlu0 %1317 }
 0x145   : > { %16703 = vst [vmem:[#allocation91_spill] sm:$0xff] %v11405_v9  ;;  %1822 = vperm.xlu1 %9850, %v11056_v15   ;;  %16704 = vst [vmem:[#allocation92_spill] sm:$0xff] %v11408_v10  ;;  %1837 = vperm.xlu0 %9849, %v11059_v16   ;;  %v2788_v10 = vld [vmem:[#allocation2 + $0xda] sm:$0xff] }
 0x148   : > { %v11411_v11 = vpop.permute.xlu1 %1312  ;;  %v11414_v12 = vpop.permute.xlu0 %1327 }
 0x149   : > { %16705 = vst [vmem:[#allocation93_spill] sm:$0xff] %v11411_v11  ;;  %1832 = vperm.xlu1 %9850, %v11062_v17   ;;  %16706 = vst [vmem:[#allocation94_spill] sm:$0xff] %v11414_v12  ;;  %1847 = vperm.xlu0 %9849, %v11065_v18  }
 0x14c   : > { %v11417_v13 = vpop.permute.xlu1 %1322  ;;  %v11420_v14 = vpop.permute.xlu0 %1337 }
 0x14d   : > { %16707 = vst [vmem:[#allocation95_spill] sm:$0xff] %v11417_v13  ;;  %1842 = vperm.xlu1 %9850, %v11068_v19   ;;  %16708 = vst [vmem:[#allocation96_spill] sm:$0xff] %v11420_v14  ;;  %1857 = vperm.xlu0 %9849, %v11071_v20   ;;  %v16870_v14 = vld [vmem:[#allocation18_spill] sm:$0xff]  ;;  %v16871_v13 = vld [vmem:[#allocation20_spill] sm:$0xff] }
 0x150   : > { %v11423_v15 = vpop.permute.xlu1 %1332  ;;  %v11426_v16 = vpop.permute.xlu0 %1347 }
 0x151   : > { %16709 = vst [vmem:[#allocation97_spill] sm:$0xff] %v11423_v15  ;;  %1852 = vperm.xlu1 %9850, %v11074_v21   ;;  %16710 = vst [vmem:[#allocation98_spill] sm:$0xff] %v11426_v16  ;;  %1867 = vperm.xlu0 %9849, %v11077_v22   ;;  %v16716_v16 = vld [vmem:[#allocation6_spill] sm:$0xff] }
 0x154   : > { %v11429_v17 = vpop.permute.xlu1 %1342  ;;  %v11432_v18 = vpop.permute.xlu0 %1357 }
 0x155   : > { %16711 = vst [vmem:[#allocation99_spill] sm:$0xff] %v11429_v17  ;;  %1862 = vperm.xlu1 %9850, %v11080_v23   ;;  %16712 = vst [vmem:[#allocation100_spill] sm:$0xff] %v11432_v18  ;;  %1877 = vperm.xlu0 %9849, %v11083_v24   ;;  %v16718_v17 = vld [vmem:[#allocation7_spill] sm:$0xff]  ;;  %v16720_v18 = vld [vmem:[#allocation8_spill] sm:$0xff] }
 0x158   : > { %v11435_v19 = vpop.permute.xlu1 %1352  ;;  %v11438_v20 = vpop.permute.xlu0 %1367 }
 0x159   : > { %16713 = vst [vmem:[#allocation101_spill] sm:$0xff] %v11435_v19  ;;  %1872 = vperm.xlu1 %9850, %v11086_v25   ;;  %16714 = vst [vmem:[#allocation102_spill] sm:$0xff] %v11438_v20  ;;  %1887 = vperm.xlu0 %9849, %v11089_v29   ;;  %v16722_v19 = vld [vmem:[#allocation9_spill] sm:$0xff]  ;;  %v16724_v29 = vld [vmem:[#allocation10_spill] sm:$0xff] }
 0x15a   : > { %v11455_v20 = vld [vmem:[#allocation2 + $0x181] sm:$0xff] }
 0x15c   : > { %v11441_v21 = vpop.permute.xlu1 %1362  ;;  %v11444_v22 = vpop.permute.xlu0 %1377 }
 0x15d   : > { %16715 = vst [vmem:[#allocation103_spill] sm:$0xff] %v11441_v21  ;;  %1882 = vperm.xlu1 %9850, %v16716_v16   ;;  %16717 = vst [vmem:[#allocation6_spill] sm:$0xff] %v11444_v22  ;;  %1897 = vperm.xlu0 %9849, %v16718_v17   ;;  %v16737_v22 = vld [vmem:[#allocation21_spill] sm:$0xff] }
 0x160   : > { %v11447_v23 = vpop.permute.xlu1 %1372  ;;  %v11450_v24 = vpop.permute.xlu0 %1387 }
 0x161   : > { %16719 = vst [vmem:[#allocation7_spill] sm:$0xff] %v11447_v23  ;;  %1892 = vperm.xlu1 %9850, %v16720_v18   ;;  %16721 = vst [vmem:[#allocation8_spill] sm:$0xff] %v11450_v24  ;;  %1907 = vperm.xlu0 %9849, %v16722_v19   ;;  %v11466_v18 = vld [vmem:[#allocation2 + $0x189] sm:$0xff]  ;;  %v16728_v24 = vld [vmem:[#allocation12_spill] sm:$0xff] }
 0x162   : > { %v16733_v23 = vld [vmem:[#allocation17_spill] sm:$0xff] }
 0x164   : > { %v11453_v25 = vpop.permute.xlu1 %1382  ;;  %v11458_v21 = vpop.permute.xlu0 %1397 }
 0x165   : > { %16723 = vst [vmem:[#allocation9_spill] sm:$0xff] %v11453_v25  ;;  %1902 = vperm.xlu1 %9850, %v16724_v29   ;;  %16725 = vst [vmem:[#allocation10_spill] sm:$0xff] %v11458_v21  ;;  %1917 = vperm.xlu0 %9849, %v11455_v20   ;;  %v16731_v29 = vld [vmem:[#allocation15_spill] sm:$0xff] }
 0x168   : > { %v11461_v16 = vpop.permute.xlu1 %1392  ;;  %v11464_v17 = vpop.permute.xlu0 %1507 }
 0x169   : > { %16726 = vst [vmem:[#allocation104_spill] sm:$0xff] %v11461_v16  ;;  %1912 = vperm.xlu1 %9850, %v11114_v34   ;;  %16727 = vst [vmem:[#allocation105_spill] sm:$0xff] %v11464_v17  ;;  %2027 = vperm.xlu0 %9849, %v16728_v24   ;;  %v16735_v34 = vld [vmem:[#allocation19_spill] sm:$0xff] }
 0x16c   : > { %v11469_v19 = vpop.permute.xlu1 %1402  ;;  %v11472_v25 = vpop.permute.xlu0 %1517 }
 0x16d   : > { %16729 = vst [vmem:[#allocation12_spill] sm:$0xff] %v11469_v19  ;;  %1922 = vperm.xlu1 %9850, %v11466_v18   ;;  %16730 = vst [vmem:[#allocation106_spill] sm:$0xff] %v11472_v25  ;;  %2037 = vperm.xlu0 %9849, %v16731_v29   ;;  %v16739_v19 = vld [vmem:[#allocation23_spill] sm:$0xff]  ;;  %v16741_v25 = vld [vmem:[#allocation25_spill] sm:$0xff] }
 0x170   : > { %v11475_v21 = vpop.permute.xlu1 %1512  ;;  %v11478_v16 = vpop.permute.xlu0 %1527 }
 0x171   : > { %16732 = vst [vmem:[#allocation15_spill] sm:$0xff] %v11475_v21  ;;  %2032 = vperm.xlu1 %9850, %v16733_v23   ;;  %16734 = vst [vmem:[#allocation17_spill] sm:$0xff] %v11478_v16  ;;  %2047 = vperm.xlu0 %9849, %v16735_v34   ;;  %v16743_v21 = vld [vmem:[#allocation27_spill] sm:$0xff]  ;;  %v16745_v16 = vld [vmem:[#allocation29_spill] sm:$0xff] }
 0x174   : > { %v11481_v17 = vpop.permute.xlu1 %1522  ;;  %v11484_v24 = vpop.permute.xlu0 %1537 }
 0x175   : > { %16736 = vst [vmem:[#allocation19_spill] sm:$0xff] %v11481_v17  ;;  %2042 = vperm.xlu1 %9850, %v16737_v22   ;;  %16738 = vst [vmem:[#allocation21_spill] sm:$0xff] %v11484_v24  ;;  %2057 = vperm.xlu0 %9849, %v16739_v19   ;;  %v16747_v17 = vld [vmem:[#allocation31_spill] sm:$0xff]  ;;  %v16749_v24 = vld [vmem:[#allocation33_spill] sm:$0xff] }
 0x178   : > { %v11487_v15 = vpop.permute.xlu1 %1532  ;;  %v11490_v29 = vpop.permute.xlu0 %1547 }
 0x179   : > { %16740 = vst [vmem:[#allocation23_spill] sm:$0xff] %v11487_v15  ;;  %2052 = vperm.xlu1 %9850, %v16741_v25   ;;  %16742 = vst [vmem:[#allocation25_spill] sm:$0xff] %v11490_v29  ;;  %2067 = vperm.xlu0 %9849, %v16743_v21   ;;  %v16751_v15 = vld [vmem:[#allocation35_spill] sm:$0xff]  ;;  %v16753_v29 = vld [vmem:[#allocation37_spill] sm:$0xff] }
 0x17c   : > { %v11493_v23 = vpop.permute.xlu1 %1542  ;;  %v11496_v34 = vpop.permute.xlu0 %1557 }
 0x17d   : > { %16744 = vst [vmem:[#allocation27_spill] sm:$0xff] %v11493_v23  ;;  %2062 = vperm.xlu1 %9850, %v16745_v16   ;;  %16746 = vst [vmem:[#allocation29_spill] sm:$0xff] %v11496_v34  ;;  %2077 = vperm.xlu0 %9849, %v16747_v17   ;;  %v16755_v23 = vld [vmem:[#allocation39_spill] sm:$0xff]  ;;  %v16757_v34 = vld [vmem:[#allocation41_spill] sm:$0xff] }
 0x180   : > { %v11499_v22 = vpop.permute.xlu1 %1552  ;;  %v11502_v19 = vpop.permute.xlu0 %1567 }
 0x181   : > { %16748 = vst [vmem:[#allocation31_spill] sm:$0xff] %v11499_v22  ;;  %2072 = vperm.xlu1 %9850, %v16749_v24   ;;  %16750 = vst [vmem:[#allocation33_spill] sm:$0xff] %v11502_v19  ;;  %2087 = vperm.xlu0 %9849, %v16751_v15   ;;  %v16759_v22 = vld [vmem:[#allocation43_spill] sm:$0xff]  ;;  %v16761_v19 = vld [vmem:[#allocation45_spill] sm:$0xff] }
 0x184   : > { %v11505_v25 = vpop.permute.xlu1 %1562  ;;  %v11508_v21 = vpop.permute.xlu0 %1577 }
 0x185   : > { %16752 = vst [vmem:[#allocation35_spill] sm:$0xff] %v11505_v25  ;;  %2082 = vperm.xlu1 %9850, %v16753_v29   ;;  %16754 = vst [vmem:[#allocation37_spill] sm:$0xff] %v11508_v21  ;;  %2097 = vperm.xlu0 %9849, %v16755_v23   ;;  %v16763_v25 = vld [vmem:[#allocation47_spill] sm:$0xff]  ;;  %v16765_v21 = vld [vmem:[#allocation49_spill] sm:$0xff] }
 0x188   : > { %v11511_v16 = vpop.permute.xlu1 %1572  ;;  %v11514_v17 = vpop.permute.xlu0 %1587 }
 0x189   : > { %16756 = vst [vmem:[#allocation39_spill] sm:$0xff] %v11511_v16  ;;  %2092 = vperm.xlu1 %9850, %v16757_v34   ;;  %16758 = vst [vmem:[#allocation41_spill] sm:$0xff] %v11514_v17  ;;  %2107 = vperm.xlu0 %9849, %v16759_v22   ;;  %v16767_v16 = vld [vmem:[#allocation51_spill] sm:$0xff]  ;;  %v16769_v17 = vld [vmem:[#allocation53_spill] sm:$0xff] }
 0x18c   : > { %v11517_v24 = vpop.permute.xlu1 %1582  ;;  %v11520_v15 = vpop.permute.xlu0 %1597 }
 0x18d   : > { %16760 = vst [vmem:[#allocation43_spill] sm:$0xff] %v11517_v24  ;;  %2102 = vperm.xlu1 %9850, %v16761_v19   ;;  %16762 = vst [vmem:[#allocation45_spill] sm:$0xff] %v11520_v15  ;;  %2117 = vperm.xlu0 %9849, %v16763_v25   ;;  %v16771_v24 = vld [vmem:[#allocation55_spill] sm:$0xff]  ;;  %v16773_v15 = vld [vmem:[#allocation57_spill] sm:$0xff] }
 0x190   : > { %v11523_v29 = vpop.permute.xlu1 %1592  ;;  %v11526_v23 = vpop.permute.xlu0 %1607 }
 0x191   : > { %16764 = vst [vmem:[#allocation47_spill] sm:$0xff] %v11523_v29  ;;  %2112 = vperm.xlu1 %9850, %v16765_v21   ;;  %16766 = vst [vmem:[#allocation49_spill] sm:$0xff] %v11526_v23  ;;  %2127 = vperm.xlu0 %9849, %v16767_v16   ;;  %v16775_v29 = vld [vmem:[#allocation59_spill] sm:$0xff]  ;;  %v16777_v23 = vld [vmem:[#allocation61_spill] sm:$0xff] }
 0x194   : > { %v11529_v34 = vpop.permute.xlu1 %1602  ;;  %v11532_v22 = vpop.permute.xlu0 %1617 }
 0x195   : > { %16768 = vst [vmem:[#allocation51_spill] sm:$0xff] %v11529_v34  ;;  %2122 = vperm.xlu1 %9850, %v16769_v17   ;;  %16770 = vst [vmem:[#allocation53_spill] sm:$0xff] %v11532_v22  ;;  %2137 = vperm.xlu0 %9849, %v16771_v24   ;;  %v16780_v22 = vld [vmem:[#allocation64_spill] sm:$0xff] }
 0x198   : > { %v11535_v19 = vpop.permute.xlu1 %1612  ;;  %v11538_v25 = vpop.permute.xlu0 %1627 }
 0x199   : > { %16772 = vst [vmem:[#allocation55_spill] sm:$0xff] %v11535_v19  ;;  %2132 = vperm.xlu1 %9850, %v16773_v15   ;;  %16774 = vst [vmem:[#allocation57_spill] sm:$0xff] %v11538_v25  ;;  %2147 = vperm.xlu0 %9849, %v16775_v29   ;;  %v11555_v25 = vld [vmem:[#allocation2 + $0x182] sm:$0xff] }
 0x19a   : > { %16783 = vst [vmem:[#allocation109_spill] sm:$0xff] %v11555_v25 }
 0x19c   : > { %v11541_v21 = vpop.permute.xlu1 %1622  ;;  %v11544_v16 = vpop.permute.xlu0 %1637 }
 0x19d   : > { %16776 = vst [vmem:[#allocation59_spill] sm:$0xff] %v11541_v21  ;;  %2142 = vperm.xlu1 %9850, %v16777_v23   ;;  %16778 = vst [vmem:[#allocation61_spill] sm:$0xff] %v11544_v16  ;;  %2157 = vperm.xlu0 %9849, %v11243_v36   ;;  %v2254_v36 = vld [vmem:[#allocation2 + $0x30] sm:$0xff]  ;;  %v2259_v21 = vld [vmem:[#allocation2 + $0x68] sm:$0xff] }
 0x1a0   : > { %v11547_v17 = vpop.permute.xlu1 %1632  ;;  %v11550_v24 = vpop.permute.xlu0 %1647 }
 0x1a1   : > { %16779 = vst [vmem:[#allocation107_spill] sm:$0xff] %v11547_v17  ;;  %2152 = vperm.xlu1 %9850, %v16780_v22   ;;  %16781 = vst [vmem:[#allocation64_spill] sm:$0xff] %v11550_v24  ;;  %2167 = vperm.xlu0 %9849, %v11253_v3   ;;  %v11566_v24 = vld [vmem:[#allocation2 + $0x18a] sm:$0xff] }
 0x1a2   : > { %16787 = vst [vmem:[#allocation113_spill] sm:$0xff] %v11566_v24 }
 0x1a4   : > { %v11553_v15 = vpop.permute.xlu1 %1642  ;;  %v11558_v29 = vpop.permute.xlu0 %1657 }
 0x1a5   : > { %16782 = vst [vmem:[#allocation108_spill] sm:$0xff] %v11553_v15  ;;  %2162 = vperm.xlu1 %9850, %v11258_v30   ;;  %16784 = vst [vmem:[#allocation110_spill] sm:$0xff] %v11558_v29  ;;  %2177 = vperm.xlu0 %9849, %v11555_v25   ;;  %v2256_v15 = vld [vmem:[#allocation2 + $0x48] sm:$0xff]  ;;  %v2255_v29 = vld [vmem:[#allocation2 + $0x38] sm:$0xff] }
 0x1a6   : > { %v16889_v25 = vld [vmem:[#allocation48_spill] sm:$0xff] }
 0x1a8   : > { %v11561_v23 = vpop.permute.xlu1 %1652  ;;  %v11564_v22 = vpop.permute.xlu0 %1767 }
 0x1a9   : > { %16785 = vst [vmem:[#allocation111_spill] sm:$0xff] %v11561_v23  ;;  %2172 = vperm.xlu1 %9850, %v11266_v1   ;;  %16786 = vst [vmem:[#allocation112_spill] sm:$0xff] %v11564_v22  ;;  %2288 = vperm.xlu0 %9849, %v2254_v36   ;;  %v2258_v23 = vld [vmem:[#allocation2 + $0x60] sm:$0xff]  ;;  %v2257_v1 = vld [vmem:[#allocation2 + $0x50] sm:$0xff] }
 0x1aa   : > { %v2260_v36 = vld [vmem:[#allocation2 + $0x78] sm:$0xff] }
 0x1ac   : > { %v11568_v3 = vpop.permute.xlu1 %1662  ;;  %v11571_v30 = vpop.permute.xlu0 %1777 }
 0x1ad   : > { %16788 = vst [vmem:[#allocation114_spill] sm:$0xff] %v11568_v3  ;;  %2182 = vperm.xlu1 %9850, %v11566_v24   ;;  %16789 = vst [vmem:[#allocation115_spill] sm:$0xff] %v11571_v30  ;;  %2298 = vperm.xlu0 %9849, %v2256_v15   ;;  %v2262_v30 = vld [vmem:[#allocation2 + $0x90] sm:$0xff] }
 0x1ae   : > { %v16872_v24 = vld [vmem:[#allocation22_spill] sm:$0xff] }
 0x1b0   : > { %v11573_v17 = vpop.permute.xlu1 %1772  ;;  %v11575_v16 = vpop.permute.xlu0 %1787 }
 0x1b1   : > { %16790 = vst [vmem:[#allocation116_spill] sm:$0xff] %v11573_v17  ;;  %2293 = vperm.xlu1 %9850, %v2255_v29   ;;  %16791 = vst [vmem:[#allocation117_spill] sm:$0xff] %v11575_v16  ;;  %2308 = vperm.xlu0 %9849, %v2258_v23   ;;  %v2261_v17 = vld [vmem:[#allocation2 + $0x80] sm:$0xff]  ;;  %v2264_v16 = vld [vmem:[#allocation2 + $0xa8] sm:$0xff] }
 0x1b4   : > { %v11577_v22 = vpop.permute.xlu1 %1782  ;;  %v11579_v3 = vpop.permute.xlu0 %1797 }
 0x1b5   : > { %16792 = vst [vmem:[#allocation118_spill] sm:$0xff] %v11577_v22  ;;  %2303 = vperm.xlu1 %9850, %v2257_v1   ;;  %16793 = vst [vmem:[#allocation119_spill] sm:$0xff] %v11579_v3  ;;  %2318 = vperm.xlu0 %9849, %v2260_v36   ;;  %v2263_v22 = vld [vmem:[#allocation2 + $0x98] sm:$0xff]  ;;  %v2266_v3 = vld [vmem:[#allocation2 + $0xc0] sm:$0xff] }
 0x1b8   : > { %v11581_v19 = vpop.permute.xlu1 %1792  ;;  %v11583_v15 = vpop.permute.xlu0 %1807 }
 0x1b9   : > { %16794 = vst [vmem:[#allocation120_spill] sm:$0xff] %v11581_v19  ;;  %2313 = vperm.xlu1 %9850, %v2259_v21   ;;  %16795 = vst [vmem:[#allocation121_spill] sm:$0xff] %v11583_v15  ;;  %2328 = vperm.xlu0 %9849, %v2262_v30   ;;  %v2265_v19 = vld [vmem:[#allocation2 + $0xb0] sm:$0xff]  ;;  %v2268_v15 = vld [vmem:[#allocation2 + $0xd8] sm:$0xff] }
 0x1bc   : > { %v11585_v29 = vpop.permute.xlu1 %1802  ;;  %v11587_v23 = vpop.permute.xlu0 %1817 }
 0x1bd   : > { %16796 = vst [vmem:[#allocation122_spill] sm:$0xff] %v11585_v29  ;;  %2323 = vperm.xlu1 %9850, %v2261_v17   ;;  %16797 = vst [vmem:[#allocation123_spill] sm:$0xff] %v11587_v23  ;;  %2338 = vperm.xlu0 %9849, %v2264_v16   ;;  %v2267_v29 = vld [vmem:[#allocation2 + $0xc8] sm:$0xff]  ;;  %v2270_v23 = vld [vmem:[#allocation2 + $0xf0] sm:$0xff] }
 0x1c0   : > { %v11589_v1 = vpop.permute.xlu1 %1812  ;;  %v11591_v36 = vpop.permute.xlu0 %1827 }
 0x1c1   : > { %16798 = vst [vmem:[#allocation124_spill] sm:$0xff] %v11589_v1  ;;  %2333 = vperm.xlu1 %9850, %v2263_v22   ;;  %16799 = vst [vmem:[#allocation125_spill] sm:$0xff] %v11591_v36  ;;  %2348 = vperm.xlu0 %9849, %v2266_v3   ;;  %v2269_v1 = vld [vmem:[#allocation2 + $0xe0] sm:$0xff]  ;;  %v2272_v36 = vld [vmem:[#allocation2 + $0x108] sm:$0xff] }
 0x1c4   : > { %v11593_v21 = vpop.permute.xlu1 %1822  ;;  %v11595_v30 = vpop.permute.xlu0 %1837 }
 0x1c5   : > { %16800 = vst [vmem:[#allocation126_spill] sm:$0xff] %v11593_v21  ;;  %2343 = vperm.xlu1 %9850, %v2265_v19   ;;  %16801 = vst [vmem:[#allocation127_spill] sm:$0xff] %v11595_v30  ;;  %2358 = vperm.xlu0 %9849, %v2268_v15   ;;  %v2271_v21 = vld [vmem:[#allocation2 + $0xf8] sm:$0xff]  ;;  %v2274_v30 = vld [vmem:[#allocation2 + $0x120] sm:$0xff] }
 0x1c8   : > { %v11597_v17 = vpop.permute.xlu1 %1832  ;;  %v11599_v16 = vpop.permute.xlu0 %1847 }
 0x1c9   : > { %16802 = vst [vmem:[#allocation128_spill] sm:$0xff] %v11597_v17  ;;  %2353 = vperm.xlu1 %9850, %v2267_v29   ;;  %16803 = vst [vmem:[#allocation129_spill] sm:$0xff] %v11599_v16  ;;  %2368 = vperm.xlu0 %9849, %v2270_v23   ;;  %v2273_v17 = vld [vmem:[#allocation2 + $0x110] sm:$0xff]  ;;  %v2276_v16 = vld [vmem:[#allocation2 + $0x138] sm:$0xff] }
 0x1cc   : > { %v11601_v22 = vpop.permute.xlu1 %1842  ;;  %v11603_v3 = vpop.permute.xlu0 %1857 }
 0x1cd   : > { %16804 = vst [vmem:[#allocation130_spill] sm:$0xff] %v11601_v22  ;;  %2363 = vperm.xlu1 %9850, %v2269_v1   ;;  %16805 = vst [vmem:[#allocation131_spill] sm:$0xff] %v11603_v3  ;;  %2378 = vperm.xlu0 %9849, %v2272_v36   ;;  %v2275_v22 = vld [vmem:[#allocation2 + $0x128] sm:$0xff]  ;;  %v2278_v3 = vld [vmem:[#allocation2 + $0x150] sm:$0xff] }
 0x1d0   : > { %v11605_v19 = vpop.permute.xlu1 %1852  ;;  %v11607_v15 = vpop.permute.xlu0 %1867 }
 0x1d1   : > { %16806 = vst [vmem:[#allocation132_spill] sm:$0xff] %v11605_v19  ;;  %2373 = vperm.xlu1 %9850, %v2271_v21   ;;  %16807 = vst [vmem:[#allocation133_spill] sm:$0xff] %v11607_v15  ;;  %2388 = vperm.xlu0 %9849, %v2274_v30   ;;  %v2277_v19 = vld [vmem:[#allocation2 + $0x140] sm:$0xff]  ;;  %v2280_v15 = vld [vmem:[#allocation2 + $0x168] sm:$0xff] }
 0x1d4   : > { %v11609_v29 = vpop.permute.xlu1 %1862  ;;  %v11611_v23 = vpop.permute.xlu0 %1877 }
 0x1d5   : > { %16808 = vst [vmem:[#allocation134_spill] sm:$0xff] %v11609_v29  ;;  %2383 = vperm.xlu1 %9850, %v2273_v17   ;;  %16809 = vst [vmem:[#allocation135_spill] sm:$0xff] %v11611_v23  ;;  %2398 = vperm.xlu0 %9849, %v2276_v16   ;;  %v2279_v29 = vld [vmem:[#allocation2 + $0x158] sm:$0xff]  ;;  %v16868_v23 = vld [vmem:[#allocation16_spill] sm:$0xff] }
 0x1d8   : > { %v11613_v1 = vpop.permute.xlu1 %1872  ;;  %v11615_v36 = vpop.permute.xlu0 %1887 }
 0x1d9   : > { %16810 = vst [vmem:[#allocation136_spill] sm:$0xff] %v11613_v1  ;;  %2393 = vperm.xlu1 %9850, %v2275_v22   ;;  %16811 = vst [vmem:[#allocation137_spill] sm:$0xff] %v11615_v36  ;;  %2408 = vperm.xlu0 %9849, %v2278_v3   ;;  %v2281_v1 = vld [vmem:[#allocation2 + $0x170] sm:$0xff]  ;;  %v2284_v36 = vld [vmem:[#allocation2 + $0x198] sm:$0xff] }
 0x1dc   : > { %v11617_v21 = vpop.permute.xlu1 %1882  ;;  %v11619_v30 = vpop.permute.xlu0 %1897 }
 0x1dd   : > { %16812 = vst [vmem:[#allocation138_spill] sm:$0xff] %v11617_v21  ;;  %2403 = vperm.xlu1 %9850, %v2277_v19   ;;  %16813 = vst [vmem:[#allocation139_spill] sm:$0xff] %v11619_v30  ;;  %2418 = vperm.xlu0 %9849, %v2280_v15   ;;  %v2514_v30 = vld [vmem:[#allocation2 + $0x31] sm:$0xff] }
 0x1de   : > { %v16865_v21 = vld [vmem:[#allocation11_spill] sm:$0xff] }
 0x1e0   : > { %v11621_v17 = vpop.permute.xlu1 %1892  ;;  %v11623_v16 = vpop.permute.xlu0 %1907 }
 0x1e1   : > { %16814 = vst [vmem:[#allocation140_spill] sm:$0xff] %v11621_v17  ;;  %2413 = vperm.xlu1 %9850, %v2279_v29   ;;  %16815 = vst [vmem:[#allocation141_spill] sm:$0xff] %v11623_v16  ;;  %2428 = vperm.xlu0 %9849, %v11355_v51   ;;  %v2285_v29 = vld [vmem:[#allocation2 + $0x1a0] sm:$0xff]  ;;  %v2516_v17 = vld [vmem:[#allocation2 + $0x49] sm:$0xff] }
 0x1e4   : > { %v11626_v22 = vpop.permute.xlu1 %1902  ;;  %v11628_v3 = vpop.permute.xlu0 %1917 }
 0x1e5   : > { %16816 = vst [vmem:[#allocation142_spill] sm:$0xff] %v11626_v22  ;;  %2423 = vperm.xlu1 %9850, %v2281_v1   ;;  %16817 = vst [vmem:[#allocation143_spill] sm:$0xff] %v11628_v3  ;;  %2438 = vperm.xlu0 %9849, %v2284_v36   ;;  %v2515_v22 = vld [vmem:[#allocation2 + $0x39] sm:$0xff]  ;;  %v2518_v36 = vld [vmem:[#allocation2 + $0x61] sm:$0xff] }
 0x1e6   : > { %v2517_v3 = vld [vmem:[#allocation2 + $0x51] sm:$0xff] }
 0x1e8   : > { %v11630_v19 = vpop.permute.xlu1 %1912  ;;  %v11633_v15 = vpop.permute.xlu0 %2027 }
 0x1e9   : > { %16818 = vst [vmem:[#allocation144_spill] sm:$0xff] %v11630_v19  ;;  %2433 = vperm.xlu1 %9850, %v11366_v60   ;;  %16819 = vst [vmem:[#allocation145_spill] sm:$0xff] %v11633_v15  ;;  %2548 = vperm.xlu0 %9849, %v2514_v30   ;;  %v2520_v15 = vld [vmem:[#allocation2 + $0x79] sm:$0xff] }
 0x1ec   : > { %v11635_v16 = vpop.permute.xlu1 %1922  ;;  %v11637_v51 = vpop.permute.xlu0 %2037 }
 0x1ed   : > { %16820 = vst [vmem:[#allocation146_spill] sm:$0xff] %v11635_v16  ;;  %2443 = vperm.xlu1 %9850, %v2285_v29   ;;  %16821 = vst [vmem:[#allocation147_spill] sm:$0xff] %v11637_v51  ;;  %2558 = vperm.xlu0 %9849, %v2516_v17   ;;  %v2519_v16 = vld [vmem:[#allocation2 + $0x69] sm:$0xff]  ;;  %v2522_v51 = vld [vmem:[#allocation2 + $0x91] sm:$0xff] }
 0x1f0   : > { %v11639_v1 = vpop.permute.xlu1 %2032  ;;  %v11641_v19 = vpop.permute.xlu0 %2047 }
 0x1f1   : > { %16822 = vst [vmem:[#allocation148_spill] sm:$0xff] %v11639_v1  ;;  %2553 = vperm.xlu1 %9850, %v2515_v22   ;;  %16823 = vst [vmem:[#allocation149_spill] sm:$0xff] %v11641_v19  ;;  %2568 = vperm.xlu0 %9849, %v2518_v36   ;;  %v2521_v1 = vld [vmem:[#allocation2 + $0x81] sm:$0xff]  ;;  %v2524_v19 = vld [vmem:[#allocation2 + $0xa9] sm:$0xff] }
 0x1f4   : > { %v11643_v60 = vpop.permute.xlu1 %2042  ;;  %v11645_v30 = vpop.permute.xlu0 %2057 }
 0x1f5   : > { %16824 = vst [vmem:[#allocation150_spill] sm:$0xff] %v11643_v60  ;;  %2563 = vperm.xlu1 %9850, %v2517_v3   ;;  %16825 = vst [vmem:[#allocation151_spill] sm:$0xff] %v11645_v30  ;;  %2578 = vperm.xlu0 %9849, %v2520_v15   ;;  %v2523_v60 = vld [vmem:[#allocation2 + $0x99] sm:$0xff]  ;;  %v2526_v30 = vld [vmem:[#allocation2 + $0xc1] sm:$0xff] }
 0x1f8   : > { %v11647_v29 = vpop.permute.xlu1 %2052  ;;  %v11649_v17 = vpop.permute.xlu0 %2067 }
 0x1f9   : > { %16826 = vst [vmem:[#allocation152_spill] sm:$0xff] %v11647_v29  ;;  %2573 = vperm.xlu1 %9850, %v2519_v16   ;;  %16827 = vst [vmem:[#allocation153_spill] sm:$0xff] %v11649_v17  ;;  %2588 = vperm.xlu0 %9849, %v2522_v51   ;;  %v2525_v29 = vld [vmem:[#allocation2 + $0xb1] sm:$0xff]  ;;  %v2528_v17 = vld [vmem:[#allocation2 + $0xd9] sm:$0xff] }
 0x1fc   : > { %v11651_v22 = vpop.permute.xlu1 %2062  ;;  %v11653_v36 = vpop.permute.xlu0 %2077 }
 0x1fd   : > { %16828 = vst [vmem:[#allocation154_spill] sm:$0xff] %v11651_v22  ;;  %2583 = vperm.xlu1 %9850, %v2521_v1   ;;  %16829 = vst [vmem:[#allocation155_spill] sm:$0xff] %v11653_v36  ;;  %2598 = vperm.xlu0 %9849, %v2524_v19   ;;  %v2527_v22 = vld [vmem:[#allocation2 + $0xc9] sm:$0xff]  ;;  %v2530_v36 = vld [vmem:[#allocation2 + $0xf1] sm:$0xff] }
 0x200   : > { %v11655_v3 = vpop.permute.xlu1 %2072  ;;  %v11657_v15 = vpop.permute.xlu0 %2087 }
 0x201   : > { %16830 = vst [vmem:[#allocation156_spill] sm:$0xff] %v11655_v3  ;;  %2593 = vperm.xlu1 %9850, %v2523_v60   ;;  %16831 = vst [vmem:[#allocation157_spill] sm:$0xff] %v11657_v15  ;;  %2608 = vperm.xlu0 %9849, %v2526_v30   ;;  %v2529_v3 = vld [vmem:[#allocation2 + $0xe1] sm:$0xff]  ;;  %v2532_v15 = vld [vmem:[#allocation2 + $0x109] sm:$0xff] }
 0x204   : > { %v11659_v16 = vpop.permute.xlu1 %2082  ;;  %v11661_v51 = vpop.permute.xlu0 %2097 }
 0x205   : > { %16832 = vst [vmem:[#allocation158_spill] sm:$0xff] %v11659_v16  ;;  %2603 = vperm.xlu1 %9850, %v2525_v29   ;;  %16833 = vst [vmem:[#allocation159_spill] sm:$0xff] %v11661_v51  ;;  %2618 = vperm.xlu0 %9849, %v2528_v17   ;;  %v2531_v16 = vld [vmem:[#allocation2 + $0xf9] sm:$0xff]  ;;  %v2534_v51 = vld [vmem:[#allocation2 + $0x121] sm:$0xff] }
 0x208   : > { %v11663_v1 = vpop.permute.xlu1 %2092  ;;  %v11665_v19 = vpop.permute.xlu0 %2107 }
 0x209   : > { %16834 = vst [vmem:[#allocation160_spill] sm:$0xff] %v11663_v1  ;;  %2613 = vperm.xlu1 %9850, %v2527_v22   ;;  %16835 = vst [vmem:[#allocation161_spill] sm:$0xff] %v11665_v19  ;;  %2628 = vperm.xlu0 %9849, %v2530_v36   ;;  %v2533_v1 = vld [vmem:[#allocation2 + $0x111] sm:$0xff]  ;;  %v2536_v19 = vld [vmem:[#allocation2 + $0x139] sm:$0xff] }
 0x20c   : > { %v11667_v60 = vpop.permute.xlu1 %2102  ;;  %v11669_v30 = vpop.permute.xlu0 %2117 }
 0x20d   : > { %16836 = vst [vmem:[#allocation162_spill] sm:$0xff] %v11667_v60  ;;  %2623 = vperm.xlu1 %9850, %v2529_v3   ;;  %16837 = vst [vmem:[#allocation163_spill] sm:$0xff] %v11669_v30  ;;  %2638 = vperm.xlu0 %9849, %v2532_v15   ;;  %v2535_v60 = vld [vmem:[#allocation2 + $0x129] sm:$0xff]  ;;  %v2538_v30 = vld [vmem:[#allocation2 + $0x151] sm:$0xff] }
 0x210   : > { %v11671_v29 = vpop.permute.xlu1 %2112  ;;  %v11673_v17 = vpop.permute.xlu0 %2127 }
 0x211   : > { %16838 = vst [vmem:[#allocation164_spill] sm:$0xff] %v11671_v29  ;;  %2633 = vperm.xlu1 %9850, %v2531_v16   ;;  %16839 = vst [vmem:[#allocation165_spill] sm:$0xff] %v11673_v17  ;;  %2648 = vperm.xlu0 %9849, %v2534_v51   ;;  %v2537_v29 = vld [vmem:[#allocation2 + $0x141] sm:$0xff]  ;;  %v2540_v17 = vld [vmem:[#allocation2 + $0x169] sm:$0xff] }
 0x214   : > { %v11675_v22 = vpop.permute.xlu1 %2122  ;;  %v11677_v36 = vpop.permute.xlu0 %2137 }
 0x215   : > { %16840 = vst [vmem:[#allocation166_spill] sm:$0xff] %v11675_v22  ;;  %2643 = vperm.xlu1 %9850, %v2533_v1   ;;  %16841 = vst [vmem:[#allocation167_spill] sm:$0xff] %v11677_v36  ;;  %2658 = vperm.xlu0 %9849, %v2536_v19   ;;  %v2539_v22 = vld [vmem:[#allocation2 + $0x159] sm:$0xff]  ;;  %v2786_v36 = vld [vmem:[#allocation2 + $0xc2] sm:$0xff] }
 0x218   : > { %v11679_v3 = vpop.permute.xlu1 %2132  ;;  %v11681_v15 = vpop.permute.xlu0 %2147 }
 0x219   : > { %16842 = vst [vmem:[#allocation168_spill] sm:$0xff] %v11679_v3  ;;  %2653 = vperm.xlu1 %9850, %v2535_v60   ;;  %16843 = vst [vmem:[#allocation169_spill] sm:$0xff] %v11681_v15  ;;  %2668 = vperm.xlu0 %9849, %v2538_v30   ;;  %v2541_v3 = vld [vmem:[#allocation2 + $0x171] sm:$0xff]  ;;  %v2544_v15 = vld [vmem:[#allocation2 + $0x199] sm:$0xff] }
 0x21c   : > { %v11683_v16 = vpop.permute.xlu1 %2142  ;;  %v11685_v51 = vpop.permute.xlu0 %2157 }
 0x21d   : > { %16844 = vst [vmem:[#allocation170_spill] sm:$0xff] %v11683_v16  ;;  %2663 = vperm.xlu1 %9850, %v2537_v29   ;;  %16845 = vst [vmem:[#allocation171_spill] sm:$0xff] %v11685_v51  ;;  %2678 = vperm.xlu0 %9849, %v2540_v17   ;;  %v2774_v51 = vld [vmem:[#allocation2 + $0x32] sm:$0xff] }
 0x220   : > { %v11687_v1 = vpop.permute.xlu1 %2152  ;;  %v11689_v19 = vpop.permute.xlu0 %2167 }
 0x221   : > { %16846 = vst [vmem:[#allocation172_spill] sm:$0xff] %v11687_v1  ;;  %2673 = vperm.xlu1 %9850, %v2539_v22   ;;  %16847 = vst [vmem:[#allocation173_spill] sm:$0xff] %v11689_v19  ;;  %2688 = vperm.xlu0 %9849, %v11455_v20   ;;  %v2545_v22 = vld [vmem:[#allocation2 + $0x1a1] sm:$0xff]  ;;  %v2776_v20 = vld [vmem:[#allocation2 + $0x4a] sm:$0xff]  ;;  %v16853_v1 = vmov 0.0  }
 0x222   : > { %394 = vst.msk [vmem:[#allocation3 + $0x18] sm:$0xff] %vm389_vm2, %v16853_v1  ;;  %395 = vst.msk [vmem:[#allocation3 + $0x20] sm:$0xff] %vm389_vm2, %v16853_v1 }
 0x223   : > { %390 = vst.msk [vmem:[#allocation3] sm:$0xff] %vm389_vm2, %v16853_v1  ;;  %391 = vst.msk [vmem:[#allocation3 + $0x8] sm:$0xff] %vm389_vm2, %v16853_v1 }
 0x224   : > { %v11692_v60 = vpop.permute.xlu1 %2162  ;;  %v11694_v30 = vpop.permute.xlu0 %2177  ;;  %397 = vst.msk [vmem:[#allocation3 + $0x30] sm:$0xff] %vm389_vm2, %v16853_v1  ;;  %398 = vst.msk [vmem:[#allocation3 + $0x38] sm:$0xff] %vm389_vm2, %v16853_v1 }
 0x225   : > { %16848 = vst [vmem:[#allocation174_spill] sm:$0xff] %v11692_v60  ;;  %2683 = vperm.xlu1 %9850, %v2541_v3   ;;  %16849 = vst [vmem:[#allocation175_spill] sm:$0xff] %v11694_v30  ;;  %2698 = vperm.xlu0 %9849, %v2544_v15   ;;  %v2775_v3 = vld [vmem:[#allocation2 + $0x3a] sm:$0xff] }
 0x226   : > { %400 = vst.msk [vmem:[#allocation3 + $0x48] sm:$0xff] %vm389_vm2, %v16853_v1  ;;  %401 = vst.msk [vmem:[#allocation3 + $0x50] sm:$0xff] %vm389_vm2, %v16853_v1  ;;  %v2780_v60 = vld [vmem:[#allocation2 + $0x7a] sm:$0xff] }
 0x227   : > { %403 = vst.msk [vmem:[#allocation3 + $0x60] sm:$0xff] %vm389_vm2, %v16853_v1  ;;  %404 = vst.msk [vmem:[#allocation3 + $0x68] sm:$0xff] %vm389_vm2, %v16853_v1 }
 0x228   : > { %v11696_v29 = vpop.permute.xlu1 %2172  ;;  %v11699_v17 = vpop.permute.xlu0 %2288  ;;  %406 = vst.msk [vmem:[#allocation3 + $0x78] sm:$0xff] %vm389_vm2, %v16853_v1  ;;  %407 = vst.msk [vmem:[#allocation3 + $0x80] sm:$0xff] %vm389_vm2, %v16853_v1 }
 0x229   : > { %16850 = vst [vmem:[#allocation176_spill] sm:$0xff] %v11696_v29  ;;  %2693 = vperm.xlu1 %9850, %v11466_v18   ;;  %16851 = vst [vmem:[#allocation177_spill] sm:$0xff] %v11699_v17  ;;  %2808 = vperm.xlu0 %9849, %v2774_v51   ;;  %v2778_v51 = vld [vmem:[#allocation2 + $0x62] sm:$0xff]  ;;  %v2777_v29 = vld [vmem:[#allocation2 + $0x52] sm:$0xff] }
 0x22a   : > { %409 = vst.msk [vmem:[#allocation3 + $0x90] sm:$0xff] %vm389_vm2, %v16853_v1  ;;  %410 = vst.msk [vmem:[#allocation3 + $0x98] sm:$0xff] %vm389_vm2, %v16853_v1 }
 0x22b   : > { %412 = vst.msk [vmem:[#allocation3 + $0xa8] sm:$0xff] %vm389_vm2, %v16853_v1  ;;  %413 = vst.msk [vmem:[#allocation3 + $0xb0] sm:$0xff] %vm389_vm2, %v16853_v1 }
 0x22c   : > { %v11701_v19 = vpop.permute.xlu1 %2182  ;;  %415 = vst.msk [vmem:[#allocation3 + $0xc0] sm:$0xff] %vm389_vm2, %v16853_v1  ;;  %416 = vst.msk [vmem:[#allocation3 + $0xc8] sm:$0xff] %vm389_vm2, %v16853_v1  ;;  %v11775_v18 = vpop.permute.xlu0 %2298 }
 0x22d   : > { %16852 = vst [vmem:[#allocation178_spill] sm:$0xff] %v11701_v19  ;;  %418 = vst.msk [vmem:[#allocation3 + $0xd8] sm:$0xff] %vm389_vm2, %v16853_v1  ;;  %2703 = vperm.xlu1 %9850, %v2545_v22   ;;  %2818 = vperm.xlu0 %9849, %v2776_v20   ;;  %v885_v19 = vlaneseq }
 0x22e   : > { %419 = vst.msk [vmem:[#allocation3 + $0xe0] sm:$0xff] %vm389_vm2, %v16853_v1  ;;  %421 = vst.msk [vmem:[#allocation3 + $0xf0] sm:$0xff] %vm389_vm2, %v16853_v1 }
 0x22f   : > { %422 = vst.msk [vmem:[#allocation3 + $0xf8] sm:$0xff] %vm389_vm2, %v16853_v1  ;;  %424 = vst.msk [vmem:[#allocation3 + $0x108] sm:$0xff] %vm389_vm2, %v16853_v1  ;;  %v11819_v22 = vshrl.u32 %v885_v19, 7  ;;  %v2781_v19 = vld [vmem:[#allocation2 + $0x82] sm:$0xff] }
 0x230   : > { %425 = vst.msk [vmem:[#allocation3 + $0x110] sm:$0xff] %vm389_vm2, %v16853_v1  ;;  %427 = vst.msk [vmem:[#allocation3 + $0x120] sm:$0xff] %vm389_vm2, %v16853_v1  ;;  %v11777_v15 = vpop.permute.xlu1 %2293  ;;  %v11779_v17 = vpop.permute.xlu0 %2308 }
 0x231   : > { %428 = vst.msk [vmem:[#allocation3 + $0x128] sm:$0xff] %vm389_vm2, %v16853_v1  ;;  %430 = vst.msk [vmem:[#allocation3 + $0x138] sm:$0xff] %vm389_vm2, %v16853_v1  ;;  %2813 = vperm.xlu1 %9850, %v2775_v3   ;;  %2828 = vperm.xlu0 %9849, %v2778_v51   ;;  %v2779_v3 = vld [vmem:[#allocation2 + $0x6a] sm:$0xff] }
 0x232   : > { %431 = vst.msk [vmem:[#allocation3 + $0x140] sm:$0xff] %vm389_vm2, %v16853_v1  ;;  %433 = vst.msk [vmem:[#allocation3 + $0x150] sm:$0xff] %vm389_vm2, %v16853_v1 }
 0x233   : > { %434 = vst.msk [vmem:[#allocation3 + $0x158] sm:$0xff] %vm389_vm2, %v16853_v1  ;;  %436 = vst.msk [vmem:[#allocation3 + $0x168] sm:$0xff] %vm389_vm2, %v16853_v1 }
 0x234   : > { %437 = vst.msk [vmem:[#allocation3 + $0x170] sm:$0xff] %vm389_vm2, %v16853_v1  ;;  %439 = vst.msk [vmem:[#allocation3 + $0x180] sm:$0xff] %vm389_vm2, %v16853_v1  ;;  %v11781_v30 = vpop.permute.xlu1 %2303  ;;  %v11821_v20 = vpop.permute.xlu0 %2318 }
 0x235   : > { %440 = vst.msk [vmem:[#allocation3 + $0x188] sm:$0xff] %vm389_vm2, %v16853_v1  ;;  %442 = vst.msk [vmem:[#allocation3 + $0x198] sm:$0xff] %vm389_vm2, %v16853_v1  ;;  %2823 = vperm.xlu1 %9850, %v2777_v29   ;;  %2838 = vperm.xlu0 %9849, %v2780_v60  }
 0x236   : > { %443 = vst.msk [vmem:[#allocation3 + $0x1a0] sm:$0xff] %vm389_vm2, %v16853_v1  ;;  %16854 = vst [vmem:[#allocation179_spill] sm:$0xff] %v11775_v18 }
 0x237   : > { %16855 = vst [vmem:[#allocation180_spill] sm:$0xff] %v11777_v15  ;;  %16856 = vst [vmem:[#allocation181_spill] sm:$0xff] %v11779_v17  ;;  %v887_v17 = vsub.s32 0, %v11819_v22  ;;  %v11829_v15 = vld [vmem:[%s16569_s1] sm:$0xff] }
 0x238   : > { %16857 = vst [vmem:[#allocation182_spill] sm:$0xff] %v11781_v30  ;;  %396 = vst.msk [vmem:[#allocation3 + $0x28] sm:$0x3] %vm392_vm3, %v16853_v1  ;;  %v11823_v51 = vpop.permute.xlu1 %2313  ;;  %v2782_v30 = vld [vmem:[#allocation2 + $0x92] sm:$0xff]  ;;  %v11831_v18 = vpop.permute.xlu0 %2328 }
 0x239   : > { %393 = vst.msk [vmem:[#allocation3 + $0x10] sm:$0x3] %vm392_vm3, %v16853_v1  ;;  %399 = vst.msk [vmem:[#allocation3 + $0x40] sm:$0x3] %vm392_vm3, %v16853_v1  ;;  %2833 = vperm.xlu1 %9850, %v2779_v3   ;;  %2848 = vperm.xlu0 %9849, %v2782_v30   ;;  %v11836_v60 = vrot.slane %v11829_v15, %v887_v17  ;;  %v1147_v3 = vsub.s32 1, %v11819_v22  ;;  %v1407_v30 = vsub.s32 2, %v11819_v22 }
 0x23a   : > { %402 = vst.msk [vmem:[#allocation3 + $0x58] sm:$0x3] %vm392_vm3, %v16853_v1  ;;  %405 = vst.msk [vmem:[#allocation3 + $0x70] sm:$0x3] %vm392_vm3, %v16853_v1  ;;  %v11849_v17 = vld [vmem:[%s16570_s2] ss:$0 sm:$0xff] }
 0x23b   : > { %408 = vst.msk [vmem:[#allocation3 + $0x88] sm:$0x3] %vm392_vm3, %v16853_v1  ;;  %411 = vst.msk [vmem:[#allocation3 + $0xa0] sm:$0x3] %vm392_vm3, %v16853_v1  ;;  %v895_v12 = vmul.f32 %v11836_v60, %v16871_v13  ;;  %v894_v11 = vmul.f32 %v11836_v60, %v16872_v24  ;;  %v11878_v13 = vrot.slane %v11829_v15, %v1407_v30  ;;  %v16879_v30 = vld [vmem:[#allocation30_spill] sm:$0xff] }
 0x23c   : > { %414 = vst.msk [vmem:[#allocation3 + $0xb8] sm:$0x3] %vm392_vm3, %v16853_v1  ;;  %417 = vst.msk [vmem:[#allocation3 + $0xd0] sm:$0x3] %vm392_vm3, %v16853_v1  ;;  %v11833_v29 = vpop.permute.xlu1 %2323  ;;  %v902_v61 = vmul.f32 %v11836_v60, %v16883_v4  ;;  %v16887_v4 = vld [vmem:[#allocation44_spill] sm:$0xff] }
 0x23d   : > { %420 = vst.msk [vmem:[#allocation3 + $0xe8] sm:$0x3] %vm392_vm3, %v16853_v1  ;;  %423 = vst.msk [vmem:[#allocation3 + $0x100] sm:$0x3] %vm392_vm3, %v16853_v1  ;;  %2843 = vperm.xlu1 %9850, %v2781_v19   ;;  %v16866_v19 = vld [vmem:[#allocation13_spill] sm:$0xff] }
 0x23e   : > { %426 = vst.msk [vmem:[#allocation3 + $0x118] sm:$0x3] %vm392_vm3, %v16853_v1  ;;  %429 = vst.msk [vmem:[#allocation3 + $0x130] sm:$0x3] %vm392_vm3, %v16853_v1 }
 0x23f   : > { %432 = vst.msk [vmem:[#allocation3 + $0x148] sm:$0x3] %vm392_vm3, %v16853_v1  ;;  %435 = vst.msk [vmem:[#allocation3 + $0x160] sm:$0x3] %vm392_vm3, %v16853_v1 }
 0x240   : > { %438 = vst.msk [vmem:[#allocation3 + $0x178] sm:$0x3] %vm392_vm3, %v16853_v1  ;;  %441 = vst.msk [vmem:[#allocation3 + $0x190] sm:$0x3] %vm392_vm3, %v16853_v1  ;;  %v11841_v16 = vpop.permute.xlu1 %2333 }
 0x241   : > { %444 = vst.msk [vmem:[#allocation3 + $0x1a8] sm:$0x3] %vm392_vm3, %v16853_v1  ;;  %16858 = vst [vmem:[#allocation183_spill] sm:$0xff] %v11819_v22  ;;  %v2784_v1 = vld [vmem:[#allocation2 + $0xaa] sm:$0xff] }
 0x242   : > { %16859 = vst [vmem:[#allocation184_spill] sm:$0xff] %v11821_v20  ;;  %16860 = vst [vmem:[#allocation185_spill] sm:$0xff] %v11823_v51  ;;  %v11838_v51 = vpop.permute.xlu0 %2338  ;;  %v2783_v20 = vld [vmem:[#allocation2 + $0x9a] sm:$0xff]  ;;  %2858 = vperm.xlu0 %9849, %v2784_v1   ;;  %v16867_v1 = vld [vmem:[#allocation14_spill] sm:$0xff] }
 0x243   : > { %16861 = vst [vmem:[#allocation186_spill] sm:$0xff] %v11831_v18  ;;  %16862 = vst [vmem:[#allocation187_spill] sm:$0xff] %v11833_v29  ;;  %v889_v18 = vmul.f32 %v11836_v60, %v16865_v21  ;;  %2853 = vperm.xlu1 %9850, %v2783_v20   ;;  %v891_v29 = vmul.f32 %v11836_v60, %v16867_v1  ;;  %v2785_v21 = vld [vmem:[#allocation2 + $0xb2] sm:$0xff]  ;;  %v892_v20 = vmul.f32 %v11836_v60, %v16870_v14 }
 0x244   : > { %16863 = vst [vmem:[#allocation188_spill] sm:$0xff] %v11838_v51  ;;  %16864 = vst [vmem:[#allocation189_spill] sm:$0xff] %v11841_v16  ;;  %v890_v51 = vmul.f32 %v11836_v60, %v16866_v19  ;;  %v893_v16 = vmul.f32 %v11836_v60, %v16868_v23  ;;  %v11866_v19 = vrot.slane %v11829_v15, %v1147_v3  ;;  %v11868_v1 = vpop.permute.xlu1 %2343  ;;  %v16875_v14 = vld [vmem:[#allocation26_spill] sm:$0xff] }
 0x245   : > { %16873 = vst [vmem:[#allocation13_spill] sm:$0xff] %v11868_v1  ;;  %v11871_v23 = vadd.f32 %v11849_v17, %v889_v18  ;;  %16876 = vst [vmem:[#allocation14_spill] sm:$0xff] %v11878_v13  ;;  %v11884_v3 = vadd.f32 %v11849_v17, %v891_v29  ;;  %v16877_v18 = vld [vmem:[#allocation28_spill] sm:$0xff]  ;;  %v16881_v29 = vld [vmem:[#allocation34_spill] sm:$0xff] }
 0x246   : > { %v11857_v34 = vpop.permute.xlu0 %2348  ;;  %2868 = vperm.xlu0 %9849, %v2786_v36   ;;  %v896_v36 = vmul.f32 %v11836_v60, %v16875_v14  ;;  %v11881_v24 = vadd.f32 %v11849_v17, %v890_v51  ;;  %v11887_v1 = vadd.f32 %v11849_v17, %v893_v16  ;;  %v899_v8 = vmul.f32 %v11836_v60, %v16877_v18  ;;  %v16880_v51 = vld [vmem:[#allocation32_spill] sm:$0xff]  ;;  %v16893_v13 = vld [vmem:[#allocation54_spill] sm:$0xff] }
 0x247   : > { %16869 = vst [vmem:[#allocation11_spill] sm:$0xff] %v11857_v34  ;;  %v16874_v34 = vld [vmem:[#allocation24_spill] sm:$0xff]  ;;  %2863 = vperm.xlu1 %9850, %v2785_v21   ;;  %v11894_v14 = vadd.f32 %v11849_v17, %v892_v20  ;;  %v898_v21 = vmul.f32 %v11836_v60, %v16879_v30  ;;  %v901_v6 = vmul.f32 %v11836_v60, %v16880_v51 }
 0x248   : > { %v897_v9 = vmul.f32 %v11836_v60, %v16874_v34  ;;  %v900_v5 = vmul.f32 %v11836_v60, %v16881_v29  ;;  %v11903_v16 = vadd.f32 %v11849_v17, %v895_v12  ;;  %v11906_v18 = vadd.f32 %v11849_v17, %v894_v11  ;;  %v11912_v30 = vpop.permute.xlu1 %2353  ;;  %v16885_v12 = vld [vmem:[#allocation40_spill] sm:$0xff]  ;;  %v16886_v11 = vld [vmem:[#allocation42_spill] sm:$0xff] }
 0x249   : > { %16884 = vst [vmem:[#allocation18_spill] sm:$0xff] %v11912_v30  ;;  %v905_v29 = vmul.f32 %v11836_v60, %v16885_v12  ;;  %v904_v0 = vmul.f32 %v11836_v60, %v16886_v11  ;;  %v907_v30 = vmul.f32 %v11836_v60, %v16887_v4  ;;  %v11936_v12 = vadd.f32 %v11849_v17, %v898_v21  ;;  %v16891_v11 = vld [vmem:[#allocation50_spill] sm:$0xff] }
 0x24a   : > { %v11891_v34 = vpop.permute.xlu0 %2358  ;;  %2878 = vperm.xlu0 %9849, %v2788_v10   ;;  %v11915_v51 = vadd.f32 %v11849_v17, %v897_v9  ;;  %v11918_v10 = vadd.f32 %v11849_v17, %v896_v36  ;;  %v906_v9 = vmul.f32 %v11836_v60, %v16888_v58  ;;  %v909_v36 = vmul.f32 %v11836_v60, %v16889_v25 }
 0x24b   : > { %16878 = vst [vmem:[#allocation16_spill] sm:$0xff] %v11891_v34  ;;  %v16882_v34 = vld [vmem:[#allocation36_spill] sm:$0xff]  ;;  %2873 = vperm.xlu1 %9850, %v2787_v7   ;;  %v11939_v7 = vadd.f32 %v11849_v17, %v901_v6  ;;  %v908_v4 = vmul.f32 %v11836_v60, %v16891_v11  ;;  %v11950_v25 = vadd.f32 %v11849_v17, %v902_v61  ;;  %v16896_v61 = vld [vmem:[#allocation58_spill] sm:$0xff] }
 0x24c   : > { %v903_v20 = vmul.f32 %v11836_v60, %v16882_v34  ;;  %v11925_v34 = vadd.f32 %v11849_v17, %v899_v8  ;;  %v11942_v8 = vadd.f32 %v11849_v17, %v900_v5  ;;  %v910_v6 = vmul.f32 %v11836_v60, %v16893_v13  ;;  %v11956_v59 = vpop.permute.xlu1 %2363  ;;  %v2792_v5 = vld [vmem:[#allocation2 + $0x10a] sm:$0xff] }
 0x24d   : > { %16894 = vst [vmem:[#allocation22_spill] sm:$0xff] %v11956_v59  ;;  %v11959_v57 = vadd.f32 %v11849_v17, %v905_v29  ;;  %v912_v55 = vmul.f32 %v11836_v60, %v16896_v61  ;;  %v11972_v13 = vadd.f32 %v11849_v17, %v906_v9  ;;  %v11975_v59 = vadd.f32 %v11849_v17, %v909_v36  ;;  %v16899_v29 = vld [vmem:[#allocation60_spill] sm:$0xff]  ;;  %v16902_v61 = vld [vmem:[#allocation62_spill] sm:$0xff]  ;;  %v16904_v9 = vld [vmem:[#allocation65_spill] sm:$0xff] }
 0x24e   : > { %v11933_v62 = vpop.permute.xlu0 %2368  ;;  %2888 = vperm.xlu0 %9849, %v2790_v2   ;;  %v11947_v58 = vadd.f32 %v11849_v17, %v903_v20  ;;  %v11962_v2 = vadd.f32 %v11849_v17, %v904_v0  ;;  %v16895_v20 = vld [vmem:[#allocation56_spill] sm:$0xff]  ;;  %v915_v0 = vmul.f32 %v11836_v60, %v16899_v29  ;;  %v11994_v29 = vadd.f32 %v11849_v17, %v910_v6 }
 0x24f   : > { %16890 = vst [vmem:[#allocation20_spill] sm:$0xff] %v11933_v62  ;;  %v16892_v62 = vld [vmem:[#allocation52_spill] sm:$0xff]  ;;  %v913_v11 = vmul.f32 %v11836_v60, %v16895_v20  ;;  %2883 = vperm.xlu1 %9850, %v2789_v56   ;;  %16897 = vst [vmem:[#allocation24_spill] sm:$0xff] %v11972_v13  ;;  %v11982_v20 = vadd.f32 %v11849_v17, %v908_v4  ;;  %v914_v56 = vmul.f32 %v11836_v60, %v16902_v61 }
 0x250   : > { %v911_v21 = vmul.f32 %v11836_v60, %v16892_v62  ;;  %v11969_v62 = vadd.f32 %v11849_v17, %v907_v30  ;;  %16898 = vst [vmem:[#allocation26_spill] sm:$0xff] %v11975_v59  ;;  %v16903_v30 = vld [vmem:[#allocation63_spill] sm:$0xff]  ;;  %v916_v13 = vmul.f32 %v11836_v60, %v16904_v9  ;;  %v11999_v59 = vpop.permute.xlu1 %2373  ;;  %v2794_v61 = vld [vmem:[#allocation2 + $0x122] sm:$0xff]  ;;  %v12005_v9 = vadd.f32 %v11849_v17, %v912_v55 }
 0x251   : > { %16901 = vst [vmem:[#allocation30_spill] sm:$0xff] %v11982_v20  ;;  %v917_v52 = vmul.f32 %v11836_v60, %v16903_v30  ;;  %v1667_v20 = vsub.s32 3, %v11819_v22  ;;  %16907 = vst [vmem:[#allocation34_spill] sm:$0xff] %v11999_v59  ;;  %v12002_v30 = vadd.f32 %v11849_v17, %v913_v11  ;;  %v16912_v22 = vld [vmem:[#allocation69_spill] sm:$0xff]  ;;  %v1151_v11 = vmul.f32 %v11866_v19, %v11272_v37 }
 0x252   : > { %v11979_v54 = vpop.permute.xlu0 %2378  ;;  %2898 = vperm.xlu0 %9849, %v2792_v5   ;;  %v11991_v36 = vadd.f32 %v11849_v17, %v911_v21  ;;  %16909 = vst [vmem:[#allocation38_spill] sm:$0xff] %v12005_v9  ;;  %v16910_v5 = vld [vmem:[#allocation67_spill] sm:$0xff]  ;;  %v920_v59 = vmul.f32 %v11836_v60, %v16912_v22  ;;  %v1150_v55 = vmul.f32 %v11866_v19, %v11275_v35 }
 0x253   : > { %16900 = vst [vmem:[#allocation28_spill] sm:$0xff] %v11979_v54  ;;  %v16906_v54 = vld [vmem:[#allocation66_spill] sm:$0xff]  ;;  %16908 = vst [vmem:[#allocation36_spill] sm:$0xff] %v12002_v30  ;;  %v918_v21 = vmul.f32 %v11836_v60, %v16910_v5  ;;  %2893 = vperm.xlu1 %9850, %v2791_v53   ;;  %v12023_v5 = vadd.f32 %v11849_v17, %v914_v56  ;;  %v12026_v53 = vadd.f32 %v11849_v17, %v917_v52 }
 0x254   : > { %16905 = vst [vmem:[#allocation32_spill] sm:$0xff] %v11991_v36  ;;  %v919_v4 = vmul.f32 %v11836_v60, %v16906_v54  ;;  %v16911_v36 = vld [vmem:[#allocation68_spill] sm:$0xff]  ;;  %v12012_v54 = vadd.f32 %v11849_v17, %v915_v0  ;;  %v2793_v30 = vld [vmem:[#allocation2 + $0x112] sm:$0xff]  ;;  %v12029_v0 = vadd.f32 %v11849_v17, %v916_v13  ;;  %v1153_v22 = vmul.f32 %v11866_v19, %v11278_v38  ;;  %v12043_v52 = vpop.permute.xlu1 %2383 }
 0x255   : > { %v1149_v6 = vmul.f32 %v11866_v19, %v16911_v36  ;;  %v1152_v35 = vmul.f32 %v11866_v19, %v11281_v40  ;;  %v1155_v60 = vmul.f32 %v11866_v19, %v11284_v26  ;;  %v12041_v56 = vrot.slane %v11829_v15, %v1667_v20  ;;  %16914 = vst [vmem:[#allocation42_spill] sm:$0xff] %v12043_v52  ;;  %v2796_v13 = vld [vmem:[#allocation2 + $0x13a] sm:$0xff] }
 0x256   : > { %v12020_v9 = vpop.permute.xlu0 %2388  ;;  %2908 = vperm.xlu0 %9849, %v2794_v61   ;;  %v12034_v37 = vadd.f32 %v11849_v17, %v919_v4  ;;  %v12046_v36 = vadd.f32 %v11849_v17, %v918_v21  ;;  %v1154_v4 = vmul.f32 %v11866_v19, %v11287_v63  ;;  %v1157_v40 = vmul.f32 %v11866_v19, %v11290_v27 }
 0x257   : > { %16913 = vst [vmem:[#allocation40_spill] sm:$0xff] %v12020_v9  ;;  %v12049_v38 = vadd.f32 %v1149_v6, %v11871_v23  ;;  %2903 = vperm.xlu1 %9850, %v2793_v30   ;;  %v12056_v26 = vadd.f32 %v11849_v17, %v920_v59  ;;  %v12059_v20 = vadd.f32 %v1151_v11, %v11884_v3  ;;  %v2795_v6 = vld [vmem:[#allocation2 + $0x12a] sm:$0xff]  ;;  %v2798_v30 = vld [vmem:[#allocation2 + $0x152] sm:$0xff] }
 0x258   : > { %v12062_v61 = vadd.f32 %v1150_v55, %v11881_v24  ;;  %v1156_v23 = vmul.f32 %v11866_v19, %v11293_v28  ;;  %v12069_v63 = vadd.f32 %v1153_v22, %v11887_v1  ;;  %v1159_v27 = vmul.f32 %v11866_v19, %v11296_v31  ;;  %v12087_v31 = vpop.permute.xlu1 %2393  ;;  %v2797_v55 = vld [vmem:[#allocation2 + $0x142] sm:$0xff] }
 0x259   : > { %v1158_v59 = vmul.f32 %v11866_v19, %v11299_v32  ;;  %v1161_v17 = vmul.f32 %v11866_v19, %v11302_v33  ;;  %v12078_v24 = vadd.f32 %v1152_v35, %v11894_v14  ;;  %v12081_v28 = vadd.f32 %v1155_v60, %v11903_v16  ;;  %16916 = vst [vmem:[#allocation46_spill] sm:$0xff] %v12087_v31 }
 0x25a   : > { %v12066_v21 = vpop.permute.xlu0 %2398  ;;  %2918 = vperm.xlu0 %9849, %v2796_v13   ;;  %v1160_v1 = vmul.f32 %v11866_v19, %v11305_v39  ;;  %v1163_v3 = vmul.f32 %v11866_v19, %v11308_v41  ;;  %v12090_v32 = vadd.f32 %v1154_v4, %v11906_v18  ;;  %v12093_v33 = vadd.f32 %v1157_v40, %v11915_v51  ;;  %v16920_v13 = vld [vmem:[#allocation24_spill] sm:$0xff] }
 0x25b   : > { %16915 = vst [vmem:[#allocation44_spill] sm:$0xff] %v12066_v21  ;;  %v1162_v14 = vmul.f32 %v11866_v19, %v11311_v42  ;;  %v1165_v16 = vmul.f32 %v11866_v19, %v11314_v43  ;;  %2913 = vperm.xlu1 %9850, %v2795_v6   ;;  %v12100_v39 = vadd.f32 %v1156_v23, %v11918_v10  ;;  %v2799_v23 = vld [vmem:[#allocation2 + $0x15a] sm:$0xff]  ;;  %v16992_v21 = vld [vmem:[#allocation41_spill] sm:$0xff] }
 0x25c   : > { %v1164_v41 = vmul.f32 %v11866_v19, %v11317_v44  ;;  %v1167_v18 = vmul.f32 %v11866_v19, %v11320_v45  ;;  %v1166_v51 = vmul.f32 %v11866_v19, %v11323_v46  ;;  %v12111_v42 = vadd.f32 %v1159_v27, %v11925_v34  ;;  %v12131_v22 = vpop.permute.xlu1 %2403  ;;  %v16924_v27 = vld [vmem:[#allocation72_spill] sm:$0xff] }
 0x25d   : > { %v12114_v43 = vadd.f32 %v1158_v59, %v11936_v12  ;;  %v12117_v10 = vadd.f32 %v1161_v17, %v11939_v7  ;;  %v1169_v44 = vmul.f32 %v11866_v19, %v11326_v47  ;;  %v12122_v45 = vadd.f32 %v1160_v1, %v11942_v8  ;;  %16918 = vst [vmem:[#allocation50_spill] sm:$0xff] %v12131_v22  ;;  %v2800_v7 = vld [vmem:[#allocation2 + $0x16a] sm:$0xff] }
 0x25e   : > { %v12108_v11 = vpop.permute.xlu0 %2408  ;;  %2928 = vperm.xlu0 %9849, %v2798_v30   ;;  %v12125_v46 = vadd.f32 %v1163_v3, %v11947_v58  ;;  %v1168_v34 = vmul.f32 %v11866_v19, %v11329_v48  ;;  %v1171_v12 = vmul.f32 %v11866_v19, %v11332_v49  ;;  %v12134_v35 = vadd.f32 %v1162_v14, %v11950_v25  ;;  %v16919_v58 = vld [vmem:[#allocation70_spill] sm:$0xff]  ;;  %v16921_v25 = vld [vmem:[#allocation71_spill] sm:$0xff]  ;;  %v16928_v14 = vld [vmem:[#allocation32_spill] sm:$0xff] }
 0x25f   : > { %16917 = vst [vmem:[#allocation48_spill] sm:$0xff] %v12108_v11  ;;  %v12137_v47 = vadd.f32 %v1165_v16, %v11959_v57  ;;  %v1170_v8 = vmul.f32 %v11866_v19, %v11335_v50  ;;  %v1173_v60 = vmul.f32 %v11866_v19, %v16919_v58  ;;  %2923 = vperm.xlu1 %9850, %v2797_v55   ;;  %v16923_v50 = vld [vmem:[#allocation26_spill] sm:$0xff]  ;;  %v16985_v11 = vld [vmem:[#allocation27_spill] sm:$0xff] }
 0x260   : > { %v12144_v48 = vadd.f32 %v1164_v41, %v11962_v2  ;;  %v12147_v49 = vadd.f32 %v1167_v18, %v11969_v62  ;;  %v12150_v4 = vadd.f32 %v1166_v51, %v16920_v13  ;;  %v1172_v57 = vmul.f32 %v11866_v19, %v16921_v25  ;;  %v16925_v2 = vld [vmem:[#allocation73_spill] sm:$0xff]  ;;  %v16926_v62 = vld [vmem:[#allocation74_spill] sm:$0xff]  ;;  %v16929_v41 = vld [vmem:[#allocation75_spill] sm:$0xff] }
 0x261   : > { %v12157_v6 = vadd.f32 %v1169_v44, %v16923_v50  ;;  %v1175_v59 = vmul.f32 %v11866_v19, %v16924_v27  ;;  %v1174_v17 = vmul.f32 %v11866_v19, %v16925_v2  ;;  %v1177_v1 = vmul.f32 %v11866_v19, %v16926_v62  ;;  %v16927_v3 = vld [vmem:[#allocation30_spill] sm:$0xff]  ;;  %v16930_v51 = vld [vmem:[#allocation76_spill] sm:$0xff]  ;;  %v12175_v44 = vpop.permute.xlu1 %2413  ;;  %v16934_v50 = vld [vmem:[#allocation183_spill] sm:$0xff] }
 0x262   : > { %v12154_v40 = vpop.permute.xlu0 %2418  ;;  %2938 = vperm.xlu0 %9849, %v2800_v7   ;;  %v12166_v30 = vadd.f32 %v1168_v34, %v16927_v3  ;;  %v12169_v16 = vadd.f32 %v1171_v12, %v16928_v14  ;;  %v1176_v18 = vmul.f32 %v11866_v19, %v16929_v41  ;;  %v1179_v55 = vmul.f32 %v11866_v19, %v16930_v51  ;;  %v16932_v13 = vld [vmem:[#allocation36_spill] sm:$0xff]  ;;  %v16933_v7 = vld [vmem:[#allocation77_spill] sm:$0xff]  ;;  %v16935_v27 = vld [vmem:[#allocation38_spill] sm:$0xff] }
 0x263   : > { %16922 = vst [vmem:[#allocation52_spill] sm:$0xff] %v12154_v40  ;;  %16931 = vst [vmem:[#allocation54_spill] sm:$0xff] %v12175_v44  ;;  %v12178_v58 = vadd.f32 %v1170_v8, %v11994_v29  ;;  %v12181_v25 = vadd.f32 %v1173_v60, %v16932_v13  ;;  %v1178_v34 = vmul.f32 %v11866_v19, %v16933_v7  ;;  %v1927_v12 = vsub.s32 4, %v16934_v50  ;;  %v16936_v62 = vld [vmem:[#allocation78_spill] sm:$0xff]  ;;  %v16938_v41 = vld [vmem:[#allocation79_spill] sm:$0xff] }
 0x264   : > { %2933 = vperm.xlu1 %9850, %v2799_v23   ;;  %v12187_v2 = vadd.f32 %v1172_v57, %v16935_v27  ;;  %v16937_v3 = vld [vmem:[#allocation14_spill] sm:$0xff]  ;;  %v1180_v51 = vmul.f32 %v11866_v19, %v16938_v41  ;;  %v16939_v29 = vld [vmem:[#allocation80_spill] sm:$0xff]  ;;  %v12198_v7 = vadd.f32 %v1175_v59, %v12012_v54  ;;  %v12201_v23 = vadd.f32 %v1174_v17, %v12023_v5  ;;  %v16941_v27 = vld [vmem:[#allocation81_spill] sm:$0xff] }
 0x265   : > { %v1409_v14 = vmul.f32 %v16937_v3, %v16936_v62  ;;  %v1411_v8 = vmul.f32 %v16937_v3, %v16939_v29  ;;  %v2801_v13 = vld [vmem:[#allocation2 + $0x172] sm:$0xff]  ;;  %v12204_v57 = vadd.f32 %v1177_v1, %v12026_v53  ;;  %v1410_v62 = vmul.f32 %v16937_v3, %v16941_v27  ;;  %v16942_v44 = vld [vmem:[#allocation109_spill] sm:$0xff]  ;;  %v12219_v17 = vpop.permute.xlu1 %2423  ;;  %v2804_v53 = vld [vmem:[#allocation2 + $0x19a] sm:$0xff] }
 0x266   : > { %v12195_v60 = vpop.permute.xlu0 %2428  ;;  %2948 = vperm.xlu0 %9849, %v16942_v44   ;;  %v12210_v19 = vadd.f32 %v1176_v18, %v12029_v0  ;;  %v12213_v41 = vadd.f32 %v1179_v55, %v12034_v37  ;;  %v16943_v29 = vld [vmem:[#allocation82_spill] sm:$0xff]  ;;  %v16944_v59 = vld [vmem:[#allocation83_spill] sm:$0xff]  ;;  %16945 = vst [vmem:[#allocation58_spill] sm:$0xff] %v12219_v17  ;;  %v12222_v1 = vadd.f32 %v1178_v34, %v12046_v36  ;;  %v16946_v27 = vld [vmem:[#allocation84_spill] sm:$0xff] }
 0x267   : > { %16940 = vst [vmem:[#allocation56_spill] sm:$0xff] %v12195_v60  ;;  %v1413_v54 = vmul.f32 %v16937_v3, %v16943_v29  ;;  %v1412_v5 = vmul.f32 %v16937_v3, %v16944_v59  ;;  %v1415_v44 = vmul.f32 %v16937_v3, %v16946_v27  ;;  %v16947_v0 = vld [vmem:[#allocation85_spill] sm:$0xff]  ;;  %v12229_v37 = vrot.slane %v11829_v15, %v1927_v12  ;;  %v16948_v36 = vld [vmem:[#allocation86_spill] sm:$0xff]  ;;  %v16950_v12 = vld [vmem:[#allocation87_spill] sm:$0xff] }
 0x268   : > { %v1414_v18 = vmul.f32 %v16937_v3, %v16947_v0  ;;  %2943 = vperm.xlu1 %9850, %v2801_v13   ;;  %v12232_v55 = vadd.f32 %v1409_v14, %v12049_v38  ;;  %v12235_v29 = vadd.f32 %v1180_v51, %v12056_v26  ;;  %v12238_v59 = vadd.f32 %v1411_v8, %v12059_v20  ;;  %v16951_v17 = vld [vmem:[#allocation88_spill] sm:$0xff]  ;;  %v16952_v14 = vld [vmem:[#allocation89_spill] sm:$0xff]  ;;  %v16953_v8 = vld [vmem:[#allocation90_spill] sm:$0xff] }
 0x269   : > { %v1417_v34 = vmul.f32 %v16937_v3, %v16948_v36  ;;  %v12245_v0 = vadd.f32 %v1410_v62, %v12062_v61  ;;  %v1416_v13 = vmul.f32 %v16937_v3, %v16950_v12  ;;  %v1419_v38 = vmul.f32 %v16937_v3, %v16951_v17  ;;  %v16954_v62 = vld [vmem:[#allocation91_spill] sm:$0xff]  ;;  %v12263_v12 = vpop.permute.xlu1 %2433 }
 0x26a   : > { %v12242_v27 = vpop.permute.xlu0 %2438  ;;  %v1418_v26 = vmul.f32 %v16937_v3, %v16952_v14  ;;  %2958 = vperm.xlu0 %9849, %v2804_v53   ;;  %v12254_v20 = vadd.f32 %v1413_v54, %v12069_v63  ;;  %v12257_v51 = vadd.f32 %v1412_v5, %v12078_v24  ;;  %v1421_v61 = vmul.f32 %v16937_v3, %v16953_v8  ;;  %v16956_v63 = vld [vmem:[#allocation92_spill] sm:$0xff]  ;;  %v16957_v24 = vld [vmem:[#allocation93_spill] sm:$0xff]  ;;  %v16960_v60 = vld [vmem:[#allocation95_spill] sm:$0xff] }
 0x26b   : > { %16949 = vst [vmem:[#allocation60_spill] sm:$0xff] %v12242_v27  ;;  %v1420_v36 = vmul.f32 %v16937_v3, %v16954_v62  ;;  %16955 = vst [vmem:[#allocation62_spill] sm:$0xff] %v12263_v12  ;;  %v3195_v27 = vld [vmem:[#allocation3 + $0x1] sm:$0xff]  ;;  %v12266_v17 = vadd.f32 %v1415_v44, %v12081_v28  ;;  %v12269_v53 = vadd.f32 %v1414_v18, %v12090_v32  ;;  %v16958_v14 = vld [vmem:[#allocation113_spill] sm:$0xff] }
 0x26c   : > { %v1423_v54 = vmul.f32 %v16937_v3, %v16956_v63  ;;  %v1422_v5 = vmul.f32 %v16937_v3, %v16957_v24  ;;  %2953 = vperm.xlu1 %9850, %v16958_v14   ;;  %v12277_v8 = vadd.f32 %v1417_v34, %v12093_v33  ;;  %v16959_v62 = vld [vmem:[#allocation94_spill] sm:$0xff]  ;;  %v1424_v28 = vmul.f32 %v16937_v3, %v16960_v60  ;;  %v16961_v44 = vld [vmem:[#allocation96_spill] sm:$0xff]  ;;  %v16962_v34 = vld [vmem:[#allocation97_spill] sm:$0xff] }
 0x26d   : > { %v1425_v12 = vmul.f32 %v16937_v3, %v16959_v62  ;;  %v1427_v32 = vmul.f32 %v16937_v3, %v16961_v44  ;;  %v2805_v63 = vld [vmem:[#allocation2 + $0x1a2] sm:$0xff]  ;;  %v12288_v40 = vadd.f32 %v1416_v13, %v12100_v39  ;;  %v12291_v24 = vadd.f32 %v1419_v38, %v12111_v42  ;;  %v16963_v39 = vld [vmem:[#allocation98_spill] sm:$0xff]  ;;  %v16964_v42 = vld [vmem:[#allocation99_spill] sm:$0xff] }
 0x26e   : > { %v12285_v18 = vpop.permute.xlu0 %2548  ;;  %v12294_v33 = vadd.f32 %v1418_v26, %v12114_v43  ;;  %v1426_v14 = vmul.f32 %v16937_v3, %v16962_v34  ;;  %3484 = vrot.lane.b32.xlu0 %v3195_v27, %s10674_s20  ;;  %v12300_v60 = vadd.f32 %v1421_v61, %v12117_v10  ;;  %v12303_v62 = vadd.f32 %v1420_v36, %v12122_v45  ;;  %v12309_v43 = vpop.permute.xlu1 %2443  ;;  %v16966_v27 = vld [vmem:[#allocation100_spill] sm:$0xff]  ;;  %v16967_v61 = vld [vmem:[#allocation101_spill] sm:$0xff] }
 0x26f   : > { %v1429_v13 = vmul.f32 %v16937_v3, %v16963_v39  ;;  %v1428_v38 = vmul.f32 %v16937_v3, %v16964_v42  ;;  %16965 = vst [vmem:[#allocation63_spill] sm:$0xff] %v12309_v43  ;;  %v12312_v26 = vadd.f32 %v1423_v54, %v12125_v46  ;;  %v12315_v44 = vadd.f32 %v1422_v5, %v12134_v35  ;;  %v16968_v46 = vld [vmem:[#allocation102_spill] sm:$0xff]  ;;  %v3196_v5 = vld [vmem:[#allocation3 + $0x9] sm:$0xff] }
 0x270   : > { %v1431_v10 = vmul.f32 %v16937_v3, %v16966_v27  ;;  %v1430_v45 = vmul.f32 %v16937_v3, %v16967_v61  ;;  %2963 = vperm.xlu1 %9850, %v2805_v63   ;;  %v12322_v36 = vadd.f32 %v1425_v12, %v12137_v47  ;;  %v12325_v34 = vadd.f32 %v1424_v28, %v12144_v48  ;;  %v16969_v27 = vld [vmem:[#allocation103_spill] sm:$0xff]  ;;  %v16970_v47 = vld [vmem:[#allocation6_spill] sm:$0xff]  ;;  %v16972_v61 = vld [vmem:[#allocation8_spill] sm:$0xff] }
 0x271   : > { %v12328_v39 = vadd.f32 %v1427_v32, %v12147_v49  ;;  %v1433_v35 = vmul.f32 %v16937_v3, %v16968_v46  ;;  %v12335_v42 = vadd.f32 %v1426_v14, %v12150_v4  ;;  %v1432_v63 = vmul.f32 %v16937_v3, %v16969_v27  ;;  %v16971_v48 = vld [vmem:[#allocation7_spill] sm:$0xff]  ;;  %v16973_v4 = vld [vmem:[#allocation9_spill] sm:$0xff] }
 0x272   : > { %v12332_v54 = vpop.permute.xlu0 %2558  ;;  %v1435_v12 = vmul.f32 %v16937_v3, %v16970_v47  ;;  %v1434_v28 = vmul.f32 %v16937_v3, %v16971_v48  ;;  %v12344_v49 = vadd.f32 %v1429_v13, %v12157_v6  ;;  %v12347_v32 = vadd.f32 %v1428_v38, %v12166_v30  ;;  %v12353_v43 = vpop.permute.xlu1 %2553  ;;  %v16974_v48 = vld [vmem:[#allocation10_spill] sm:$0xff]  ;;  %v16975_v38 = vld [vmem:[#allocation104_spill] sm:$0xff] }
 0x273   : > { %v1437_v46 = vmul.f32 %v16937_v3, %v16972_v61  ;;  %v1436_v14 = vmul.f32 %v16937_v3, %v16973_v4  ;;  %v12356_v27 = vadd.f32 %v1431_v10, %v12169_v16  ;;  %v12359_v47 = vadd.f32 %v1430_v45, %v12178_v58  ;;  %v16976_v4 = vld [vmem:[#allocation105_spill] sm:$0xff]  ;;  %v16977_v10 = vld [vmem:[#allocation12_spill] sm:$0xff] }
 0x274   : > { %v1439_v6 = vmul.f32 %v16937_v3, %v16974_v48  ;;  %v2187_v30 = vsub.s32 5, %v16934_v50  ;;  %3486 = vrot.lane.b32.xlu1 %v3196_v5, %s10674_s20  ;;  %v12366_v13 = vadd.f32 %v1433_v35, %v12181_v25  ;;  %v1438_v61 = vmul.f32 %v16937_v3, %v16975_v38  ;;  %v16978_v35 = vld [vmem:[#allocation106_spill] sm:$0xff] }
 0x275   : > { %v1669_v16 = vmul.f32 %v12041_v56, %v16976_v4  ;;  %v1440_v58 = vmul.f32 %v16937_v3, %v16977_v10  ;;  %v12377_v48 = vadd.f32 %v1432_v63, %v12187_v2  ;;  %v12380_v22 = vadd.f32 %v1435_v12, %v12198_v7  ;;  %v16979_v3 = vld [vmem:[#allocation15_spill] sm:$0xff]  ;;  %v16980_v2 = vld [vmem:[#allocation17_spill] sm:$0xff] }
 0x276   : > { %v12374_v45 = vpop.permute.xlu0 %2568  ;;  %v12383_v25 = vadd.f32 %v1434_v28, %v12201_v23  ;;  %v1671_v5 = vmul.f32 %v12041_v56, %v16978_v35  ;;  %v12388_v38 = vadd.f32 %v1437_v46, %v12204_v57  ;;  %v12391_v4 = vadd.f32 %v1436_v14, %v12210_v19  ;;  %v12397_v7 = vpop.permute.xlu1 %2563  ;;  %v16981_v12 = vld [vmem:[#allocation19_spill] sm:$0xff]  ;;  %v16982_v35 = vld [vmem:[#allocation21_spill] sm:$0xff] }
 0x277   : > { %v1670_v10 = vmul.f32 %v12041_v56, %v16979_v3  ;;  %v1673_v63 = vmul.f32 %v12041_v56, %v16980_v2  ;;  %v12400_v23 = vadd.f32 %v1439_v6, %v12213_v41  ;;  %v1672_v28 = vmul.f32 %v12041_v56, %v16981_v12  ;;  %v16983_v41 = vld [vmem:[#allocation23_spill] sm:$0xff] }
 0x278   : > { %v1675_v57 = vmul.f32 %v12041_v56, %v16982_v35  ;;  %v12407_v19 = vrot.slane %v11829_v15, %v2187_v30  ;;  %v12410_v46 = vadd.f32 %v1438_v61, %v12222_v1  ;;  %v12413_v14 = vadd.f32 %v1669_v16, %v12232_v55  ;;  %v16984_v35 = vld [vmem:[#allocation25_spill] sm:$0xff] }
 0x279   : > { %v12416_v3 = vadd.f32 %v1440_v58, %v12235_v29  ;;  %v1674_v6 = vmul.f32 %v12041_v56, %v16983_v41  ;;  %v12423_v12 = vadd.f32 %v1671_v5, %v12238_v59  ;;  %v1677_v30 = vmul.f32 %v12041_v56, %v16984_v35  ;;  %v16986_v61 = vld [vmem:[#allocation29_spill] sm:$0xff]  ;;  %v16987_v58 = vld [vmem:[#allocation31_spill] sm:$0xff] }
 0x27a   : > { %v12420_v2 = vpop.permute.xlu0 %2578  ;;  %v1676_v1 = vmul.f32 %v12041_v56, %v16985_v11  ;;  %v1679_v55 = vmul.f32 %v12041_v56, %v16986_v61  ;;  %v12432_v29 = vadd.f32 %v1670_v10, %v12245_v0  ;;  %v12435_v16 = vadd.f32 %v1673_v63, %v12254_v20  ;;  %v16988_v59 = vld [vmem:[#allocation33_spill] sm:$0xff]  ;;  %v12441_v31 = vpop.permute.xlu1 %2573  ;;  %v16989_v61 = vld [vmem:[#allocation35_spill] sm:$0xff] }
 0x27b   : > { %v1678_v41 = vmul.f32 %v12041_v56, %v16987_v58  ;;  %v1681_v5 = vmul.f32 %v12041_v56, %v16988_v59  ;;  %v12444_v35 = vadd.f32 %v1672_v28, %v12257_v51  ;;  %v12447_v11 = vadd.f32 %v1675_v57, %v12266_v17  ;;  %v16990_v10 = vld [vmem:[#allocation37_spill] sm:$0xff]  ;;  %v16991_v58 = vld [vmem:[#allocation39_spill] sm:$0xff] }
 0x27c   : > { %v1680_v0 = vmul.f32 %v12041_v56, %v16989_v61  ;;  %v1683_v20 = vmul.f32 %v12041_v56, %v16990_v10  ;;  %v12454_v63 = vadd.f32 %v1674_v6, %v12269_v53  ;;  %v1682_v59 = vmul.f32 %v12041_v56, %v16991_v58  ;;  %v16993_v51 = vld [vmem:[#allocation43_spill] sm:$0xff]  ;;  %v16994_v6 = vld [vmem:[#allocation45_spill] sm:$0xff] }
 0x27d   : > { %v1685_v52 = vmul.f32 %v12041_v56, %v16992_v21  ;;  %v1684_v28 = vmul.f32 %v12041_v56, %v16993_v51  ;;  %v12465_v57 = vadd.f32 %v1677_v30, %v12277_v8  ;;  %v12468_v61 = vadd.f32 %v1676_v1, %v12288_v40  ;;  %v16995_v51 = vld [vmem:[#allocation47_spill] sm:$0xff]  ;;  %v16996_v8 = vld [vmem:[#allocation49_spill] sm:$0xff] }
 0x27e   : > { %v12462_v17 = vpop.permute.xlu0 %2588  ;;  %v12471_v53 = vadd.f32 %v1679_v55, %v12291_v24  ;;  %v1687_v10 = vmul.f32 %v12041_v56, %v16994_v6  ;;  %v12476_v58 = vadd.f32 %v1678_v41, %v12294_v33  ;;  %v12479_v21 = vadd.f32 %v1681_v5, %v12300_v60  ;;  %v12485_v40 = vpop.permute.xlu1 %2583  ;;  %v16998_v55 = vld [vmem:[#allocation51_spill] sm:$0xff]  ;;  %v16999_v41 = vld [vmem:[#allocation53_spill] sm:$0xff] }
 0x27f   : > { %v1686_v9 = vmul.f32 %v12041_v56, %v16995_v51  ;;  %v1689_v30 = vmul.f32 %v12041_v56, %v16996_v8  ;;  %16997 = vst [vmem:[#allocation65_spill] sm:$0xff] %v12485_v40  ;;  %v12488_v24 = vadd.f32 %v1680_v0, %v12303_v62  ;;  %v12491_v1 = vadd.f32 %v1683_v20, %v12312_v26  ;;  %v17000_v62 = vld [vmem:[#allocation55_spill] sm:$0xff]  ;;  %v17002_v8 = vld [vmem:[#allocation57_spill] sm:$0xff]  ;;  %v17011_v40 = vld [vmem:[#allocation112_spill] sm:$0xff] }
 0x280   : > { %v1688_v33 = vmul.f32 %v12041_v56, %v16998_v55  ;;  %v1691_v60 = vmul.f32 %v12041_v56, %v16999_v41  ;;  %v12498_v5 = vadd.f32 %v1682_v59, %v12315_v44  ;;  %v12501_v6 = vadd.f32 %v1685_v52, %v12322_v36  ;;  %v17003_v41 = vld [vmem:[#allocation59_spill] sm:$0xff]  ;;  %v17004_v59 = vld [vmem:[#allocation61_spill] sm:$0xff] }
 0x281   : > { %v12504_v51 = vadd.f32 %v1684_v28, %v12325_v34  ;;  %v1690_v0 = vmul.f32 %v12041_v56, %v17000_v62  ;;  %v12511_v20 = vadd.f32 %v1687_v10, %v12328_v39  ;;  %v1693_v55 = vmul.f32 %v12041_v56, %v17002_v8  ;;  %v17005_v28 = vld [vmem:[#allocation107_spill] sm:$0xff]  ;;  %v17006_v39 = vld [vmem:[#allocation64_spill] sm:$0xff] }
 0x282   : > { %v12508_v26 = vpop.permute.xlu0 %2598  ;;  %v1692_v44 = vmul.f32 %v12041_v56, %v17003_v41  ;;  %v1695_v52 = vmul.f32 %v12041_v56, %v17004_v59  ;;  %v12520_v36 = vadd.f32 %v1686_v9, %v12335_v42  ;;  %v12523_v34 = vadd.f32 %v1689_v30, %v12344_v49  ;;  %v17008_v59 = vld [vmem:[#allocation108_spill] sm:$0xff]  ;;  %v17009_v42 = vld [vmem:[#allocation110_spill] sm:$0xff] }
 0x283   : > { %17001 = vst [vmem:[#allocation66_spill] sm:$0xff] %v12508_v26  ;;  %v1694_v62 = vmul.f32 %v12041_v56, %v17005_v28  ;;  %v1697_v10 = vmul.f32 %v12041_v56, %v17006_v39  ;;  %v12529_v26 = vpop.permute.xlu1 %2593  ;;  %v12532_v8 = vadd.f32 %v1688_v33, %v12347_v32  ;;  %v12535_v41 = vadd.f32 %v1691_v60, %v12356_v27  ;;  %v17010_v28 = vld [vmem:[#allocation111_spill] sm:$0xff] }
 0x284   : > { %17007 = vst [vmem:[#allocation67_spill] sm:$0xff] %v12529_v26  ;;  %v1696_v9 = vmul.f32 %v12041_v56, %v17008_v59  ;;  %v1699_v49 = vmul.f32 %v12041_v56, %v17009_v42  ;;  %v12542_v30 = vadd.f32 %v1690_v0, %v12359_v47  ;;  %v1698_v39 = vmul.f32 %v12041_v56, %v17010_v28  ;;  %v17013_v47 = vld [vmem:[#allocation114_spill] sm:$0xff]  ;;  %v17014_v28 = vld [vmem:[#allocation115_spill] sm:$0xff] }
 0x285   : > { %v1929_v26 = vmul.f32 %v12229_v37, %v17011_v40  ;;  %v2448_v32 = vsub.s32 6, %v16934_v50  ;;  %v12552_v27 = vadd.f32 %v1693_v55, %v12366_v13  ;;  %v12555_v60 = vadd.f32 %v1692_v44, %v12377_v48  ;;  %v17015_v13 = vld [vmem:[#allocation116_spill] sm:$0xff] }
 0x286   : > { %v12549_v33 = vpop.permute.xlu0 %2608  ;;  %v12558_v59 = vadd.f32 %v1695_v52, %v12380_v22  ;;  %v1700_v0 = vmul.f32 %v12041_v56, %v17013_v47  ;;  %v12563_v42 = vadd.f32 %v1694_v62, %v12383_v25  ;;  %v12566_v40 = vadd.f32 %v1697_v10, %v12388_v38  ;;  %v17017_v56 = vld [vmem:[#allocation117_spill] sm:$0xff]  ;;  %v17018_v52 = vld [vmem:[#allocation118_spill] sm:$0xff]  ;;  %v17019_v47 = vld [vmem:[#allocation119_spill] sm:$0xff] }
 0x287   : > { %17012 = vst [vmem:[#allocation68_spill] sm:$0xff] %v12549_v33  ;;  %v1931_v33 = vmul.f32 %v12229_v37, %v17014_v28  ;;  %v1930_v55 = vmul.f32 %v12229_v37, %v17015_v13  ;;  %v12572_v48 = vpop.permute.xlu1 %2603  ;;  %v12575_v22 = vadd.f32 %v1696_v9, %v12391_v4  ;;  %v12578_v44 = vadd.f32 %v1699_v49, %v12400_v23  ;;  %v17021_v49 = vld [vmem:[#allocation120_spill] sm:$0xff] }
 0x288   : > { %17016 = vst [vmem:[#allocation69_spill] sm:$0xff] %v12572_v48  ;;  %v1933_v25 = vmul.f32 %v12229_v37, %v17017_v56  ;;  %v1932_v38 = vmul.f32 %v12229_v37, %v17018_v52  ;;  %v12585_v62 = vadd.f32 %v1698_v39, %v12410_v46  ;;  %v12588_v10 = vadd.f32 %v1929_v26, %v12413_v14  ;;  %v17022_v56 = vld [vmem:[#allocation121_spill] sm:$0xff]  ;;  %v17023_v39 = vld [vmem:[#allocation122_spill] sm:$0xff]  ;;  %v17024_v52 = vld [vmem:[#allocation123_spill] sm:$0xff] }
 0x289   : > { %v1935_v28 = vmul.f32 %v12229_v37, %v17019_v47  ;;  %v12593_v4 = vrot.slane %v11829_v15, %v2448_v32  ;;  %v12598_v9 = vadd.f32 %v1700_v0, %v12416_v3  ;;  %v1934_v13 = vmul.f32 %v12229_v37, %v17021_v49  ;;  %v17025_v3 = vld [vmem:[#allocation124_spill] sm:$0xff] }
 0x28a   : > { %v12595_v23 = vpop.permute.xlu0 %2618  ;;  %v1937_v46 = vmul.f32 %v12229_v37, %v17022_v56  ;;  %v1936_v14 = vmul.f32 %v12229_v37, %v17023_v39  ;;  %v12607_v26 = vadd.f32 %v1931_v33, %v12423_v12  ;;  %v12610_v32 = vadd.f32 %v1930_v55, %v12432_v29  ;;  %v17027_v39 = vld [vmem:[#allocation125_spill] sm:$0xff]  ;;  %v17028_v33 = vld [vmem:[#allocation126_spill] sm:$0xff]  ;;  %v17030_v48 = vld [vmem:[#allocation128_spill] sm:$0xff] }
 0x28b   : > { %17020 = vst [vmem:[#allocation70_spill] sm:$0xff] %v12595_v23  ;;  %v1939_v47 = vmul.f32 %v12229_v37, %v17024_v52  ;;  %v1938_v0 = vmul.f32 %v12229_v37, %v17025_v3  ;;  %v12616_v23 = vpop.permute.xlu1 %2613  ;;  %v12619_v49 = vadd.f32 %v1933_v25, %v12435_v16  ;;  %v12622_v56 = vadd.f32 %v1932_v38, %v12444_v35  ;;  %v17029_v52 = vld [vmem:[#allocation127_spill] sm:$0xff]  ;;  %v17031_v16 = vld [vmem:[#allocation129_spill] sm:$0xff] }
 0x28c   : > { %17026 = vst [vmem:[#allocation24_spill] sm:$0xff] %v12616_v23  ;;  %v1941_v12 = vmul.f32 %v12229_v37, %v17027_v39  ;;  %v1940_v29 = vmul.f32 %v12229_v37, %v17028_v33  ;;  %v12629_v55 = vadd.f32 %v1935_v28, %v12447_v11  ;;  %v1943_v3 = vmul.f32 %v12229_v37, %v17029_v52  ;;  %v17033_v28 = vld [vmem:[#allocation130_spill] sm:$0xff] }
 0x28d   : > { %v1942_v23 = vmul.f32 %v12229_v37, %v17030_v48  ;;  %v1945_v25 = vmul.f32 %v12229_v37, %v17031_v16  ;;  %v12640_v38 = vadd.f32 %v1934_v13, %v12454_v63  ;;  %v12643_v39 = vadd.f32 %v1937_v46, %v12465_v57  ;;  %v17034_v16 = vld [vmem:[#allocation131_spill] sm:$0xff]  ;;  %v17035_v63 = vld [vmem:[#allocation132_spill] sm:$0xff] }
 0x28e   : > { %v12637_v35 = vpop.permute.xlu0 %2628  ;;  %v12646_v11 = vadd.f32 %v1936_v14, %v12468_v61  ;;  %v1944_v33 = vmul.f32 %v12229_v37, %v17033_v28  ;;  %v12651_v52 = vadd.f32 %v1939_v47, %v12471_v53  ;;  %v12654_v48 = vadd.f32 %v1938_v0, %v12476_v58  ;;  %v17037_v14 = vld [vmem:[#allocation133_spill] sm:$0xff]  ;;  %v17038_v47 = vld [vmem:[#allocation134_spill] sm:$0xff] }
 0x28f   : > { %17032 = vst [vmem:[#allocation71_spill] sm:$0xff] %v12637_v35  ;;  %v1947_v35 = vmul.f32 %v12229_v37, %v17034_v16  ;;  %v1946_v13 = vmul.f32 %v12229_v37, %v17035_v63  ;;  %v12660_v57 = vpop.permute.xlu1 %2623  ;;  %v12663_v61 = vadd.f32 %v1941_v12, %v12479_v21  ;;  %v12666_v46 = vadd.f32 %v1940_v29, %v12488_v24  ;;  %v17039_v21 = vld [vmem:[#allocation135_spill] sm:$0xff]  ;;  %v17041_v63 = vld [vmem:[#allocation136_spill] sm:$0xff] }
 0x290   : > { %17036 = vst [vmem:[#allocation26_spill] sm:$0xff] %v12660_v57  ;;  %v1949_v53 = vmul.f32 %v12229_v37, %v17037_v14  ;;  %v1948_v58 = vmul.f32 %v12229_v37, %v17038_v47  ;;  %v12673_v0 = vadd.f32 %v1943_v3, %v12491_v1  ;;  %v12676_v28 = vadd.f32 %v1942_v23, %v12498_v5  ;;  %v17042_v47 = vld [vmem:[#allocation137_spill] sm:$0xff]  ;;  %v17043_v3 = vld [vmem:[#allocation138_spill] sm:$0xff]  ;;  %v17050_v57 = vld [vmem:[#allocation144_spill] sm:$0xff] }
 0x291   : > { %v12679_v16 = vadd.f32 %v1945_v25, %v12501_v6  ;;  %v1951_v12 = vmul.f32 %v12229_v37, %v17039_v21  ;;  %v12686_v29 = vadd.f32 %v1944_v33, %v12504_v51  ;;  %v1950_v14 = vmul.f32 %v12229_v37, %v17041_v63  ;;  %v17044_v25 = vld [vmem:[#allocation139_spill] sm:$0xff]  ;;  %v17045_v51 = vld [vmem:[#allocation140_spill] sm:$0xff] }
 0x292   : > { %v12683_v24 = vpop.permute.xlu0 %2638  ;;  %v1953_v1 = vmul.f32 %v12229_v37, %v17042_v47  ;;  %v1952_v5 = vmul.f32 %v12229_v37, %v17043_v3  ;;  %v12695_v6 = vadd.f32 %v1947_v35, %v12511_v20  ;;  %v12698_v23 = vadd.f32 %v1946_v13, %v12520_v36  ;;  %v17047_v3 = vld [vmem:[#allocation141_spill] sm:$0xff]  ;;  %v17048_v35 = vld [vmem:[#allocation142_spill] sm:$0xff] }
 0x293   : > { %17040 = vst [vmem:[#allocation72_spill] sm:$0xff] %v12683_v24  ;;  %v1955_v21 = vmul.f32 %v12229_v37, %v17044_v25  ;;  %v1954_v33 = vmul.f32 %v12229_v37, %v17045_v51  ;;  %v12704_v24 = vpop.permute.xlu1 %2633  ;;  %v12707_v63 = vadd.f32 %v1949_v53, %v12523_v34  ;;  %v12710_v47 = vadd.f32 %v1948_v58, %v12532_v8  ;;  %v17049_v25 = vld [vmem:[#allocation143_spill] sm:$0xff] }
 0x294   : > { %17046 = vst [vmem:[#allocation73_spill] sm:$0xff] %v12704_v24  ;;  %v1957_v20 = vmul.f32 %v12229_v37, %v17047_v3  ;;  %v1956_v36 = vmul.f32 %v12229_v37, %v17048_v35  ;;  %v12717_v13 = vadd.f32 %v1951_v12, %v12535_v41  ;;  %v1959_v51 = vmul.f32 %v12229_v37, %v17049_v25  ;;  %v17051_v41 = vld [vmem:[#allocation145_spill] sm:$0xff] }
 0x295   : > { %v1958_v24 = vmul.f32 %v12229_v37, %v17050_v57  ;;  %v2708_v34 = vsub.s32 7, %v16934_v50  ;;  %v12727_v8 = vadd.f32 %v1950_v14, %v12542_v30  ;;  %v12730_v58 = vadd.f32 %v1953_v1, %v12552_v27  ;;  %v17052_v50 = vld [vmem:[#allocation146_spill] sm:$0xff]  ;;  %v17053_v30 = vld [vmem:[#allocation147_spill] sm:$0xff] }
 0x296   : > { %v12724_v53 = vpop.permute.xlu0 %2648  ;;  %v12733_v3 = vadd.f32 %v1952_v5, %v12555_v60  ;;  %v2189_v12 = vmul.f32 %v12407_v19, %v17051_v41  ;;  %v12738_v35 = vadd.f32 %v1955_v21, %v12558_v59  ;;  %v12741_v57 = vadd.f32 %v1954_v33, %v12563_v42  ;;  %v17054_v5 = vld [vmem:[#allocation148_spill] sm:$0xff]  ;;  %v17055_v21 = vld [vmem:[#allocation149_spill] sm:$0xff]  ;;  %v17056_v41 = vld [vmem:[#allocation150_spill] sm:$0xff] }
 0x297   : > { %v1960_v25 = vmul.f32 %v12229_v37, %v17052_v50  ;;  %v2191_v14 = vmul.f32 %v12407_v19, %v17053_v30  ;;  %v12747_v27 = vpop.permute.xlu1 %2643  ;;  %v12750_v60 = vadd.f32 %v1957_v20, %v12566_v40  ;;  %v12753_v1 = vadd.f32 %v1956_v36, %v12575_v22  ;;  %v17057_v36 = vld [vmem:[#allocation151_spill] sm:$0xff] }
 0x298   : > { %v2190_v59 = vmul.f32 %v12407_v19, %v17054_v5  ;;  %v2193_v42 = vmul.f32 %v12407_v19, %v17055_v21  ;;  %v12760_v33 = vadd.f32 %v1959_v51, %v12578_v44  ;;  %v12763_v37 = vadd.f32 %v1958_v24, %v12585_v62  ;;  %v17058_v5 = vld [vmem:[#allocation152_spill] sm:$0xff]  ;;  %v17059_v51 = vld [vmem:[#allocation153_spill] sm:$0xff] }
 0x299   : > { %v2192_v50 = vmul.f32 %v12407_v19, %v17056_v41  ;;  %v12768_v40 = vrot.slane %v11829_v15, %v2708_v34  ;;  %v12773_v20 = vadd.f32 %v2189_v12, %v12588_v10  ;;  %v2195_v30 = vmul.f32 %v12407_v19, %v17057_v36  ;;  %v17061_v34 = vld [vmem:[#allocation154_spill] sm:$0xff]  ;;  %v17062_v10 = vld [vmem:[#allocation155_spill] sm:$0xff] }
 0x29a   : > { %v12770_v22 = vpop.permute.xlu0 %2658  ;;  %v2194_v44 = vmul.f32 %v12407_v19, %v17058_v5  ;;  %v2197_v62 = vmul.f32 %v12407_v19, %v17059_v51  ;;  %v12782_v24 = vadd.f32 %v1960_v25, %v12598_v9  ;;  %v12785_v15 = vadd.f32 %v2191_v14, %v12607_v26  ;;  %v17064_v51 = vld [vmem:[#allocation156_spill] sm:$0xff]  ;;  %v17065_v25 = vld [vmem:[#allocation157_spill] sm:$0xff] }
 0x29b   : > { %v2196_v21 = vmul.f32 %v12407_v19, %v17061_v34  ;;  %v2199_v12 = vmul.f32 %v12407_v19, %v17062_v10  ;;  %v12791_v41 = vpop.permute.xlu1 %2653  ;;  %v12794_v36 = vadd.f32 %v2190_v59, %v12610_v32  ;;  %v12797_v5 = vadd.f32 %v2193_v42, %v12619_v49  ;;  %v17066_v34 = vld [vmem:[#allocation158_spill] sm:$0xff]  ;;  %v17068_v32 = vld [vmem:[#allocation160_spill] sm:$0xff] }
 0x29c   : > { %17060 = vst [vmem:[#allocation74_spill] sm:$0xff] %v12782_v24  ;;  %17063 = vst [vmem:[#allocation30_spill] sm:$0xff] %v12791_v41  ;;  %v2198_v9 = vmul.f32 %v12407_v19, %v17064_v51  ;;  %v2201_v26 = vmul.f32 %v12407_v19, %v17065_v25  ;;  %v12804_v14 = vadd.f32 %v2192_v50, %v12622_v56  ;;  %v17067_v24 = vld [vmem:[#allocation159_spill] sm:$0xff]  ;;  %v17070_v50 = vld [vmem:[#allocation161_spill] sm:$0xff] }
 0x29d   : > { %v2200_v10 = vmul.f32 %v12407_v19, %v17066_v34  ;;  %v2203_v41 = vmul.f32 %v12407_v19, %v17067_v24  ;;  %v2202_v59 = vmul.f32 %v12407_v19, %v17068_v32  ;;  %v12815_v42 = vadd.f32 %v2195_v30, %v12629_v55  ;;  %v17071_v32 = vld [vmem:[#allocation162_spill] sm:$0xff]  ;;  %v17072_v55 = vld [vmem:[#allocation163_spill] sm:$0xff] }
 0x29e   : > { %v12812_v49 = vpop.permute.xlu0 %2668  ;;  %v12818_v51 = vadd.f32 %v2194_v44, %v12640_v38  ;;  %v12821_v56 = vadd.f32 %v2197_v62, %v12643_v39  ;;  %v2205_v25 = vmul.f32 %v12407_v19, %v17070_v50  ;;  %v12826_v34 = vadd.f32 %v2196_v21, %v12646_v11  ;;  %v17074_v62 = vld [vmem:[#allocation164_spill] sm:$0xff]  ;;  %v17075_v21 = vld [vmem:[#allocation165_spill] sm:$0xff] }
 0x29f   : > { %17069 = vst [vmem:[#allocation32_spill] sm:$0xff] %v12812_v49  ;;  %v12829_v24 = vadd.f32 %v2199_v12, %v12651_v52  ;;  %v2204_v49 = vmul.f32 %v12407_v19, %v17071_v32  ;;  %v2207_v30 = vmul.f32 %v12407_v19, %v17072_v55  ;;  %v12835_v38 = vpop.permute.xlu1 %2663  ;;  %v12838_v39 = vadd.f32 %v2198_v9, %v12654_v48  ;;  %v17076_v48 = vld [vmem:[#allocation166_spill] sm:$0xff]  ;;  %v17078_v55 = vld [vmem:[#allocation167_spill] sm:$0xff] }
 0x2a0   : > { %17073 = vst [vmem:[#allocation75_spill] sm:$0xff] %v12835_v38  ;;  %v12841_v44 = vadd.f32 %v2201_v26, %v12663_v61  ;;  %v2206_v11 = vmul.f32 %v12407_v19, %v17074_v62  ;;  %v2209_v52 = vmul.f32 %v12407_v19, %v17075_v21  ;;  %v12848_v12 = vadd.f32 %v2200_v10, %v12666_v46  ;;  %v17079_v21 = vld [vmem:[#allocation168_spill] sm:$0xff]  ;;  %v17080_v10 = vld [vmem:[#allocation169_spill] sm:$0xff]  ;;  %v17087_v38 = vld [vmem:[#allocation175_spill] sm:$0xff] }
 0x2a1   : > { %v12851_v50 = vadd.f32 %v2203_v41, %v12673_v0  ;;  %v12854_v32 = vadd.f32 %v2202_v59, %v12676_v28  ;;  %v2208_v9 = vmul.f32 %v12407_v19, %v17076_v48  ;;  %v12861_v26 = vadd.f32 %v2205_v25, %v12679_v16  ;;  %v17081_v59 = vld [vmem:[#allocation170_spill] sm:$0xff]  ;;  %v17082_v16 = vld [vmem:[#allocation171_spill] sm:$0xff] }
 0x2a2   : > { %v12858_v61 = vpop.permute.xlu0 %2678  ;;  %v2211_v62 = vmul.f32 %v12407_v19, %v17078_v55  ;;  %v2210_v46 = vmul.f32 %v12407_v19, %v17079_v21  ;;  %v2213_v0 = vmul.f32 %v12407_v19, %v17080_v10  ;;  %v12870_v28 = vadd.f32 %v2204_v49, %v12686_v29  ;;  %v17084_v10 = vld [vmem:[#allocation172_spill] sm:$0xff]  ;;  %v17085_v49 = vld [vmem:[#allocation173_spill] sm:$0xff] }
 0x2a3   : > { %17077 = vst [vmem:[#allocation76_spill] sm:$0xff] %v12858_v61  ;;  %v12873_v41 = vadd.f32 %v2207_v30, %v12695_v6  ;;  %v2212_v48 = vmul.f32 %v12407_v19, %v17081_v59  ;;  %v2215_v25 = vmul.f32 %v12407_v19, %v17082_v16  ;;  %v12879_v61 = vpop.permute.xlu1 %2673  ;;  %v12882_v55 = vadd.f32 %v2206_v11, %v12698_v23  ;;  %v17086_v59 = vld [vmem:[#allocation174_spill] sm:$0xff]  ;;  %v17088_v23 = vld [vmem:[#allocation176_spill] sm:$0xff] }
 0x2a4   : > { %17083 = vst [vmem:[#allocation36_spill] sm:$0xff] %v12879_v61  ;;  %v12885_v21 = vadd.f32 %v2209_v52, %v12707_v63  ;;  %v2214_v29 = vmul.f32 %v12407_v19, %v17084_v10  ;;  %v2217_v6 = vmul.f32 %v12407_v19, %v17085_v49  ;;  %v12892_v30 = vadd.f32 %v2208_v9, %v12710_v47  ;;  %v17090_v9 = vld [vmem:[#allocation177_spill] sm:$0xff] }
 0x2a5   : > { %v2216_v16 = vmul.f32 %v12407_v19, %v17086_v59  ;;  %v2219_v61 = vmul.f32 %v12407_v19, %v17087_v38  ;;  %v2218_v11 = vmul.f32 %v12407_v19, %v17088_v23  ;;  %v12903_v52 = vadd.f32 %v2211_v62, %v12717_v13  ;;  %v17091_v23 = vld [vmem:[#allocation179_spill] sm:$0xff]  ;;  %v17092_v13 = vld [vmem:[#allocation180_spill] sm:$0xff] }
 0x2a6   : > { %v12900_v63 = vpop.permute.xlu0 %2688  ;;  %v12906_v10 = vadd.f32 %v2210_v46, %v12727_v8  ;;  %v12909_v47 = vadd.f32 %v2213_v0, %v12730_v58  ;;  %v2450_v49 = vmul.f32 %v12593_v4, %v17090_v9  ;;  %v12914_v59 = vadd.f32 %v2212_v48, %v12733_v3  ;;  %v17093_v0 = vld [vmem:[#allocation181_spill] sm:$0xff]  ;;  %v17094_v48 = vld [vmem:[#allocation182_spill] sm:$0xff] }
 0x2a7   : > { %17089 = vst [vmem:[#allocation77_spill] sm:$0xff] %v12900_v63  ;;  %v12917_v38 = vadd.f32 %v2215_v25, %v12738_v35  ;;  %v2452_v63 = vmul.f32 %v12593_v4, %v17091_v23  ;;  %v2451_v62 = vmul.f32 %v12593_v4, %v17092_v13  ;;  %v12923_v8 = vpop.permute.xlu1 %2683  ;;  %v12926_v58 = vadd.f32 %v2214_v29, %v12741_v57  ;;  %v17097_v57 = vld [vmem:[#allocation184_spill] sm:$0xff]  ;;  %v17099_v13 = vld [vmem:[#allocation178_spill] sm:$0xff] }
 0x2a8   : > { %v12929_v46 = vadd.f32 %v2217_v6, %v12750_v60  ;;  %v2454_v3 = vmul.f32 %v12593_v4, %v17093_v0  ;;  %v2453_v35 = vmul.f32 %v12593_v4, %v17094_v48  ;;  %v12936_v25 = vadd.f32 %v2216_v16, %v12753_v1  ;;  %v17101_v48 = vld [vmem:[#allocation185_spill] sm:$0xff]  ;;  %v17102_v16 = vld [vmem:[#allocation186_spill] sm:$0xff] }
 0x2a9   : > { %v12939_v9 = vadd.f32 %v2219_v61, %v12760_v33  ;;  %v12942_v23 = vadd.f32 %v2218_v11, %v12763_v37  ;;  %v2456_v29 = vmul.f32 %v12593_v4, %v17097_v57  ;;  %v2482_v6 = vadd.f32 %v2450_v49, %v12773_v20  ;;  %v17103_v57 = vld [vmem:[#allocation187_spill] sm:$0xff] }
 0x2aa   : > { %v12946_v60 = vpop.permute.xlu0 %2698  ;;  %v12951_v0 = vmul.f32 %v12407_v19, %v17099_v13  ;;  %v2455_v1 = vmul.f32 %v12593_v4, %v17101_v48  ;;  %v2710_v33 = vmul.f32 %v12768_v40, %v12285_v18  ;;  %v2484_v37 = vadd.f32 %v2452_v63, %v12785_v15  ;;  %v12968_v19 = vld [vmem:[%s16569_s1 + $0x8] ss:$0 sm:$0xff]  ;;  %v17105_v15 = vld [vmem:[#allocation188_spill] sm:$0xff] }
 0x2ab   : > { %17095 = vst [vmem:[#allocation183_spill] sm:$0xff] %v12939_v9  ;;  %17096 = vst [vmem:[#allocation38_spill] sm:$0xff] %v12942_v23  ;;  %v2483_v61 = vadd.f32 %v2451_v62, %v12794_v36  ;;  %v2458_v11 = vmul.f32 %v12593_v4, %v17102_v16  ;;  %v2457_v20 = vmul.f32 %v12593_v4, %v17103_v57  ;;  %v12963_v49 = vpop.permute.xlu1 %2693  ;;  %v17106_v63 = vld [vmem:[#allocation189_spill] sm:$0xff]  ;;  %v17107_v16 = vld [vmem:[#allocation11_spill] sm:$0xff] }
 0x2ac   : > { %17098 = vst [vmem:[#allocation78_spill] sm:$0xff] %v12946_v60  ;;  %17100 = vst [vmem:[#allocation14_spill] sm:$0xff] %v12951_v0  ;;  %v2486_v13 = vadd.f32 %v2454_v3, %v12797_v5  ;;  %v2485_v18 = vadd.f32 %v2453_v35, %v12804_v14  ;;  %v2460_v36 = vmul.f32 %v12593_v4, %v17105_v15  ;;  %v17108_v0 = vld [vmem:[#allocation13_spill] sm:$0xff]  ;;  %v17109_v23 = vld [vmem:[#allocation16_spill] sm:$0xff] }
 0x2ad   : > { %17104 = vst [vmem:[#allocation79_spill] sm:$0xff] %v12963_v49  ;;  %v2459_v62 = vmul.f32 %v12593_v4, %v17106_v63  ;;  %v2488_v48 = vadd.f32 %v2456_v29, %v12815_v42  ;;  %v2462_v57 = vmul.f32 %v12593_v4, %v17107_v16  ;;  %v2461_v49 = vmul.f32 %v12593_v4, %v17108_v0  ;;  %v17110_v63 = vld [vmem:[#allocation18_spill] sm:$0xff]  ;;  %v17111_v16 = vld [vmem:[#allocation20_spill] sm:$0xff] }
 0x2ae   : > { %v2464_v9 = vmul.f32 %v12593_v4, %v17109_v23  ;;  %v2809_v5 = vpop.permute.xlu0 %2808  ;;  %v2487_v14 = vadd.f32 %v2455_v1, %v12818_v51  ;;  %v2742_v3 = vadd.f32 %v2710_v33, %v2482_v6  ;;  %v2712_v35 = vmul.f32 %v12768_v40, %v12332_v54 }
 0x2af   : > { %v2970_v15 = vmul.f32 %v12968_v19, %v2809_v5  ;;  %v2490_v42 = vadd.f32 %v2458_v11, %v12821_v56  ;;  %v12989_v29 = vadd.f32 %v2457_v20, %v12826_v34  ;;  %v2463_v0 = vmul.f32 %v12593_v4, %v17110_v63  ;;  %v12995_v60 = vpop.permute.xlu1 %2703 }
 0x2b0   : > { %v2466_v23 = vmul.f32 %v12593_v4, %v17111_v16  ;;  %v12998_v51 = vadd.f32 %v2460_v36, %v12829_v24  ;;  %v13001_v54 = vadd.f32 %v2459_v62, %v12838_v39  ;;  %v2711_v56 = vmul.f32 %v12768_v40, %v12353_v43 }
 0x2b1   : > { %v3002_v6 = vadd.f32 %v2970_v15, %v2742_v3  ;;  %v13006_v34 = vadd.f32 %v2462_v57, %v12841_v44  ;;  %v13009_v1 = vadd.f32 %v2461_v49, %v12848_v12  ;;  %v13012_v33 = vadd.f32 %v2464_v9, %v12851_v50  ;;  %v17112_v12 = vld [vmem:[#allocation22_spill] sm:$0xff]  ;;  %v17113_v50 = vld [vmem:[#allocation28_spill] sm:$0xff] }
 0x2b2   : > { %v2714_v24 = vmul.f32 %v12768_v40, %v12374_v45  ;;  %v2819_v11 = vpop.permute.xlu0 %2818  ;;  %v2744_v20 = vadd.f32 %v2712_v35, %v2484_v37  ;;  %v13018_v43 = vadd.f32 %v2463_v0, %v12854_v32  ;;  %v13021_v44 = vadd.f32 %v2466_v23, %v12861_v26  ;;  %v17114_v3 = vld [vmem:[#allocation34_spill] sm:$0xff] }
 0x2b3   : > { %vm3034_vm4 = vcmp.gt.f32.partialorder %v3002_v6, 0.0  ;;  %v3066_v39 = vmul.f32 0.01, %v3002_v6  ;;  %v2972_v36 = vmul.f32 %v12968_v19, %v2819_v11  ;;  %v2465_v49 = vmul.f32 %v12593_v4, %v17112_v12  ;;  %v2814_v62 = vpop.permute.xlu1 %2813 }
 0x2b4   : > { %v2468_v9 = vmul.f32 %v12593_v4, %v17113_v50  ;;  %v2743_v45 = vadd.f32 %v2711_v56, %v2483_v61  ;;  %v2971_v5 = vmul.f32 %v12968_v19, %v2814_v62  ;;  %v2467_v35 = vmul.f32 %v12593_v4, %v17114_v3 }
 0x2b5   : > { %v3098_v57 = vsel %vm3034_vm4, %v3002_v6, %v3066_v39  ;;  %v3004_v37 = vadd.f32 %v2972_v36, %v2744_v20  ;;  %v2746_v32 = vadd.f32 %v2714_v24, %v2486_v13  ;;  %v2713_v26 = vmul.f32 %v12768_v40, %v12397_v7 }
 0x2b6   : > { %v2716_v15 = vmul.f32 %v12768_v40, %v12420_v2  ;;  %3131 = vst.msk [vmem:[#allocation3 + $0x19] sm:$0xff] %vm389_vm2, %v3098_v57  ;;  %v2829_v63 = vpop.permute.xlu0 %2828  ;;  %v3003_v61 = vadd.f32 %v2971_v5, %v2743_v45  ;;  %v13037_v23 = vadd.f32 %v2465_v49, %v12870_v28  ;;  %v13040_v56 = vadd.f32 %v2468_v9, %v12873_v41  ;;  %v17115_v49 = vld [vmem:[#allocation40_spill] sm:$0xff]  ;;  %v17116_v9 = vld [vmem:[#allocation42_spill] sm:$0xff] }
 0x2b7   : > { %vm3036_vm5 = vcmp.gt.f32.partialorder %v3004_v37, 0.0  ;;  %v3068_v0 = vmul.f32 0.01, %v3004_v37  ;;  %v2974_v16 = vmul.f32 %v12968_v19, %v2829_v63  ;;  %v2715_v7 = vmul.f32 %v12768_v40, %v12441_v31  ;;  %v2824_v13 = vpop.permute.xlu1 %2823 }
 0x2b8   : > { %v2718_v2 = vmul.f32 %v12768_v40, %v12462_v17  ;;  %vm3035_vm6 = vcmp.gt.f32.partialorder %v3003_v61, 0.0  ;;  %v3067_v24 = vmul.f32 0.01, %v3003_v61  ;;  %v13047_v20 = vadd.f32 %v2467_v35, %v12882_v55  ;;  %v17117_v35 = vld [vmem:[#allocation65_spill] sm:$0xff] }
 0x2b9   : > { %v3100_v6 = vsel %vm3036_vm5, %v3004_v37, %v3068_v0  ;;  %v3006_v11 = vadd.f32 %v2974_v16, %v2746_v32  ;;  %v2745_v39 = vadd.f32 %v2713_v26, %v2485_v18  ;;  %v2748_v28 = vadd.f32 %v2716_v15, %v2488_v48  ;;  %v17118_v26 = vld [vmem:[#allocation66_spill] sm:$0xff] }
 0x2ba   : > { %3133 = vst.msk [vmem:[#allocation3 + $0x31] sm:$0xff] %vm389_vm2, %v3100_v6  ;;  %v2973_v41 = vmul.f32 %v12968_v19, %v2824_v13  ;;  %v2839_v36 = vpop.permute.xlu0 %2838  ;;  %v3099_v12 = vsel %vm3035_vm6, %v3003_v61, %v3067_v24  ;;  %v2470_v50 = vmul.f32 %v12593_v4, %v17115_v49  ;;  %v2469_v62 = vmul.f32 %v12593_v4, %v17116_v9  ;;  %v17120_v13 = vld [vmem:[#allocation68_spill] sm:$0xff] }
 0x2bb   : > { %vm3038_vm7 = vcmp.gt.f32.partialorder %v3006_v11, 0.0  ;;  %v3070_v31 = vmul.f32 0.01, %v3006_v11  ;;  %v2976_v17 = vmul.f32 %v12968_v19, %v2839_v36  ;;  %v2747_v55 = vadd.f32 %v2715_v7, %v2487_v14  ;;  %3132 = vst.msk [vmem:[#allocation3 + $0x21] sm:$0xff] %vm389_vm2, %v3099_v12  ;;  %v2834_v48 = vpop.permute.xlu1 %2833  ;;  %v17119_v7 = vld [vmem:[#allocation67_spill] sm:$0xff] }
 0x2bc   : > { %v3005_v18 = vadd.f32 %v2973_v41, %v2745_v39  ;;  %v2750_v45 = vadd.f32 %v2718_v2, %v2490_v42  ;;  %v2975_v5 = vmul.f32 %v12968_v19, %v2834_v48  ;;  %v2717_v32 = vmul.f32 %v12768_v40, %v17117_v35 }
 0x2bd   : > { %v3102_v57 = vsel %vm3038_vm7, %v3006_v11, %v3070_v31  ;;  %v3008_v37 = vadd.f32 %v2976_v17, %v2748_v28  ;;  %v13058_v3 = vld [vmem:[#allocation3 + $0x19] sm:$0xff]  ;;  %v2720_v15 = vmul.f32 %v12768_v40, %v17118_v26  ;;  %v13069_v16 = vadd.f32 %v2470_v50, %v12885_v21 }
 0x2be   : > { %3135 = vst.msk [vmem:[#allocation3 + $0x49] sm:$0xff] %vm389_vm2, %v3102_v57  ;;  %vm3037_vm8 = vcmp.gt.f32.partialorder %v3005_v18, 0.0  ;;  %v3069_v14 = vmul.f32 0.01, %v3005_v18  ;;  %3488 = vrot.lane.b32.xlu0 %v13058_v3, %s10674_s20  ;;  %v2849_v42 = vpop.permute.xlu0 %2848  ;;  %v3007_v0 = vadd.f32 %v2975_v5, %v2747_v55  ;;  %v2719_v2 = vmul.f32 %v12768_v40, %v17119_v7 }
 0x2bf   : > { %vm3040_vm9 = vcmp.gt.f32.partialorder %v3008_v37, 0.0  ;;  %v3072_v63 = vmul.f32 0.01, %v3008_v37  ;;  %v2978_v61 = vmul.f32 %v12968_v19, %v2849_v42  ;;  %v2722_v6 = vmul.f32 %v12768_v40, %v17120_v13  ;;  %v2844_v11 = vpop.permute.xlu1 %2843  ;;  %v17124_v42 = vld [vmem:[#allocation70_spill] sm:$0xff]  ;;  %v17125_v13 = vld [vmem:[#allocation24_spill] sm:$0xff] }
 0x2c0   : > { %v3101_v24 = vsel %vm3037_vm8, %v3005_v18, %v3069_v14  ;;  %vm3039_vm10 = vcmp.gt.f32.partialorder %v3007_v0, 0.0  ;;  %v3071_v28 = vmul.f32 0.01, %v3007_v0  ;;  %v13079_v12 = vadd.f32 %v2469_v62, %v12892_v30  ;;  %v17121_v30 = vld [vmem:[#allocation44_spill] sm:$0xff]  ;;  %v17122_v62 = vld [vmem:[#allocation46_spill] sm:$0xff] }
 0x2c1   : > { %3134 = vst.msk [vmem:[#allocation3 + $0x39] sm:$0xff] %vm389_vm2, %v3101_v24  ;;  %v3104_v39 = vsel %vm3040_vm9, %v3008_v37, %v3072_v63  ;;  %v3010_v41 = vadd.f32 %v2978_v61, %v2750_v45  ;;  %v13076_v36 = vld [vmem:[#allocation3 + $0x31] sm:$0xff]  ;;  %v2749_v21 = vadd.f32 %v2717_v32, %v12989_v29  ;;  %v2752_v31 = vadd.f32 %v2720_v15, %v12998_v51  ;;  %v17126_v24 = vld [vmem:[#allocation71_spill] sm:$0xff] }
 0x2c2   : > { %3137 = vst.msk [vmem:[#allocation3 + $0x61] sm:$0xff] %vm389_vm2, %v3104_v39  ;;  %v2977_v17 = vmul.f32 %v12968_v19, %v2844_v11  ;;  %v2859_v49 = vpop.permute.xlu0 %2858  ;;  %3492 = vrot.lane.b32.xlu0 %v13076_v36, %s10674_s20  ;;  %v3103_v50 = vsel %vm3039_vm10, %v3007_v0, %v3071_v28  ;;  %v13088_v18 = vld [vmem:[#allocation3 + $0x21] sm:$0xff]  ;;  %v2472_v29 = vmul.f32 %v12593_v4, %v17121_v30  ;;  %v17123_v15 = vld [vmem:[#allocation69_spill] sm:$0xff] }
 0x2c3   : > { %vm3042_vm11 = vcmp.gt.f32.partialorder %v3010_v41, 0.0  ;;  %v3074_v9 = vmul.f32 0.01, %v3010_v41  ;;  %v2980_v55 = vmul.f32 %v12968_v19, %v2859_v49  ;;  %v2471_v51 = vmul.f32 %v12593_v4, %v17122_v62  ;;  %3136 = vst.msk [vmem:[#allocation3 + $0x51] sm:$0xff] %vm389_vm2, %v3103_v50  ;;  %3490 = vrot.lane.b32.xlu1 %v13088_v18, %s10674_s20  ;;  %v2854_v57 = vpop.permute.xlu1 %2853 }
 0x2c4   : > { %v2751_v48 = vadd.f32 %v2719_v2, %v13001_v54  ;;  %v3009_v45 = vadd.f32 %v2977_v17, %v2749_v21  ;;  %v2754_v37 = vadd.f32 %v2722_v6, %v13006_v34  ;;  %v2979_v32 = vmul.f32 %v12968_v19, %v2854_v57 }
 0x2c5   : > { %v3106_v5 = vsel %vm3042_vm11, %v3010_v41, %v3074_v9  ;;  %v3012_v35 = vadd.f32 %v2980_v55, %v2752_v31  ;;  %v13100_v26 = vld [vmem:[#allocation3 + $0x49] sm:$0xff]  ;;  %v2721_v14 = vmul.f32 %v12768_v40, %v17123_v15  ;;  %v2724_v54 = vmul.f32 %v12768_v40, %v17124_v42 }
 0x2c6   : > { %3139 = vst.msk [vmem:[#allocation3 + $0x79] sm:$0xff] %vm389_vm2, %v3106_v5  ;;  %vm3041_vm12 = vcmp.gt.f32.partialorder %v3009_v45, 0.0  ;;  %v3073_v63 = vmul.f32 0.01, %v3009_v45  ;;  %v2869_v0 = vpop.permute.xlu0 %2868  ;;  %3496 = vrot.lane.b32.xlu0 %v13100_v26, %s10674_s20  ;;  %v3011_v61 = vadd.f32 %v2979_v32, %v2751_v48  ;;  %v13111_v2 = vadd.f32 %v2472_v29, %v12903_v52 }
 0x2c7   : > { %vm3044_vm13 = vcmp.gt.f32.partialorder %v3012_v35, 0.0  ;;  %v3076_v34 = vmul.f32 0.01, %v3012_v35  ;;  %v2982_v7 = vmul.f32 %v12968_v19, %v2869_v0  ;;  %v2723_v6 = vmul.f32 %v12768_v40, %v17125_v13  ;;  %v2864_v41 = vpop.permute.xlu1 %2863  ;;  %v17130_v0 = vld [vmem:[#allocation72_spill] sm:$0xff] }
 0x2c8   : > { %v2726_v11 = vmul.f32 %v12768_v40, %v17126_v24  ;;  %v3105_v39 = vsel %vm3041_vm12, %v3009_v45, %v3073_v63  ;;  %v13117_v28 = vld [vmem:[#allocation3 + $0x39] sm:$0xff]  ;;  %vm3043_vm14 = vcmp.gt.f32.partialorder %v3011_v61, 0.0  ;;  %v3075_v31 = vmul.f32 0.01, %v3011_v61 }
 0x2c9   : > { %3138 = vst.msk [vmem:[#allocation3 + $0x69] sm:$0xff] %vm389_vm2, %v3105_v39  ;;  %v3108_v21 = vsel %vm3044_vm13, %v3012_v35, %v3076_v34  ;;  %v3014_v17 = vadd.f32 %v2982_v7, %v2754_v37  ;;  %3494 = vrot.lane.b32.xlu1 %v13117_v28, %s10674_s20  ;;  %v13122_v52 = vld [vmem:[#allocation3 + $0x61] sm:$0xff]  ;;  %v13125_v49 = vadd.f32 %v2471_v51, %v12906_v10  ;;  %v17127_v10 = vld [vmem:[#allocation48_spill] sm:$0xff]  ;;  %v17131_v24 = vld [vmem:[#allocation73_spill] sm:$0xff] }
 0x2ca   : > { %v2753_v50 = vadd.f32 %v2721_v14, %v13009_v1  ;;  %v2756_v9 = vadd.f32 %v2724_v54, %v13012_v33  ;;  %3141 = vst.msk [vmem:[#allocation3 + $0x91] sm:$0xff] %vm389_vm2, %v3108_v21  ;;  %v2981_v55 = vmul.f32 %v12968_v19, %v2864_v41  ;;  %v2879_v30 = vpop.permute.xlu0 %2878  ;;  %3500 = vrot.lane.b32.xlu0 %v13122_v52, %s10674_s20  ;;  %v13134_v45 = vld [vmem:[#allocation3 + $0x51] sm:$0xff]  ;;  %v17128_v51 = vld [vmem:[#allocation50_spill] sm:$0xff] }
 0x2cb   : > { %v3107_v29 = vsel %vm3043_vm14, %v3011_v61, %v3075_v31  ;;  %vm3046_vm15 = vcmp.gt.f32.partialorder %v3014_v17, 0.0  ;;  %v3078_v62 = vmul.f32 0.01, %v3014_v17  ;;  %v2984_v48 = vmul.f32 %v12968_v19, %v2879_v30  ;;  %v2874_v5 = vpop.permute.xlu1 %2873  ;;  %v17129_v54 = vld [vmem:[#allocation26_spill] sm:$0xff] }
 0x2cc   : > { %v2474_v1 = vmul.f32 %v12593_v4, %v17127_v10  ;;  %v2473_v33 = vmul.f32 %v12593_v4, %v17128_v51  ;;  %v2755_v57 = vadd.f32 %v2723_v6, %v13018_v43  ;;  %3140 = vst.msk [vmem:[#allocation3 + $0x81] sm:$0xff] %vm389_vm2, %v3107_v29  ;;  %v3013_v37 = vadd.f32 %v2981_v55, %v2753_v50 }
 0x2cd   : > { %v2758_v35 = vadd.f32 %v2726_v11, %v13021_v44  ;;  %v3110_v32 = vsel %vm3046_vm15, %v3014_v17, %v3078_v62  ;;  %v3016_v15 = vadd.f32 %v2984_v48, %v2756_v9  ;;  %3498 = vrot.lane.b32.xlu1 %v13134_v45, %s10674_s20  ;;  %v2983_v14 = vmul.f32 %v12968_v19, %v2874_v5  ;;  %v13146_v42 = vld [vmem:[#allocation3 + $0x79] sm:$0xff] }
 0x2ce   : > { %v2725_v63 = vmul.f32 %v12768_v40, %v17129_v54  ;;  %v2728_v43 = vmul.f32 %v12768_v40, %v17130_v0  ;;  %3143 = vst.msk [vmem:[#allocation3 + $0xa9] sm:$0xff] %vm389_vm2, %v3110_v32  ;;  %vm3045_vm0 = vcmp.gt.f32.partialorder %v3013_v37, 0.0  ;;  %v3077_v34 = vmul.f32 0.01, %v3013_v37  ;;  %v2889_v44 = vpop.permute.xlu0 %2888  ;;  %3504 = vrot.lane.b32.xlu0 %v13146_v42, %s10674_s20 }
 0x2cf   : > { %vm3048_vm1 = vcmp.gt.f32.partialorder %v3016_v15, 0.0  ;;  %v3080_v61 = vmul.f32 0.01, %v3016_v15  ;;  %v3015_v7 = vadd.f32 %v2983_v14, %v2755_v57  ;;  %v2986_v13 = vmul.f32 %v12968_v19, %v2889_v44  ;;  %v2884_v31 = vpop.permute.xlu1 %2883 }
 0x2d0   : > { %v13157_v6 = vadd.f32 %v2474_v1, %v12909_v47  ;;  %v2727_v11 = vmul.f32 %v12768_v40, %v17131_v24  ;;  %v2730_v39 = vmul.f32 %v12768_v40, %v12724_v53  ;;  %v3109_v41 = vsel %vm3045_vm0, %v3013_v37, %v3077_v34  ;;  %v13163_v21 = vld [vmem:[#allocation3 + $0x69] sm:$0xff] }
 0x2d1   : > { %3142 = vst.msk [vmem:[#allocation3 + $0x99] sm:$0xff] %vm389_vm2, %v3109_v41  ;;  %v3112_v17 = vsel %vm3048_vm1, %v3016_v15, %v3080_v61  ;;  %vm3047_vm3 = vcmp.gt.f32.partialorder %v3015_v7, 0.0  ;;  %v3079_v50 = vmul.f32 0.01, %v3015_v7  ;;  %v3018_v9 = vadd.f32 %v2986_v13, %v2758_v35  ;;  %3502 = vrot.lane.b32.xlu1 %v13163_v21, %s10674_s20  ;;  %v13168_v47 = vld [vmem:[#allocation3 + $0x91] sm:$0xff] }
 0x2d2   : > { %v13171_v55 = vadd.f32 %v2473_v33, %v12914_v59  ;;  %v2757_v53 = vadd.f32 %v2725_v63, %v13037_v23  ;;  %v2760_v30 = vadd.f32 %v2728_v43, %v13040_v56  ;;  %3145 = vst.msk [vmem:[#allocation3 + $0xc1] sm:$0xff] %vm389_vm2, %v3112_v17  ;;  %v2985_v29 = vmul.f32 %v12968_v19, %v2884_v31  ;;  %v2899_v62 = vpop.permute.xlu0 %2898  ;;  %v17132_v59 = vld [vmem:[#allocation52_spill] sm:$0xff]  ;;  %v17133_v33 = vld [vmem:[#allocation54_spill] sm:$0xff] }
 0x2d3   : > { %3508 = vrot.lane.b32.xlu0 %v13168_v47, %s10674_s20  ;;  %v3111_v48 = vsel %vm3047_vm3, %v3015_v7, %v3079_v50  ;;  %vm3050_vm4 = vcmp.gt.f32.partialorder %v3018_v9, 0.0  ;;  %v3082_v10 = vmul.f32 0.01, %v3018_v9  ;;  %v2988_v1 = vmul.f32 %v12968_v19, %v2899_v62  ;;  %v13180_v51 = vld [vmem:[#allocation3 + $0x81] sm:$0xff]  ;;  %v2894_v5 = vpop.permute.xlu1 %2893 }
 0x2d4   : > { %v2476_v23 = vmul.f32 %v12593_v4, %v17132_v59  ;;  %v2475_v56 = vmul.f32 %v12593_v4, %v17133_v33  ;;  %v2759_v57 = vadd.f32 %v2727_v11, %v13047_v20  ;;  %3144 = vst.msk [vmem:[#allocation3 + $0xb1] sm:$0xff] %vm389_vm2, %v3111_v48  ;;  %v3017_v37 = vadd.f32 %v2985_v29, %v2757_v53  ;;  %v17136_v59 = vld [vmem:[#allocation56_spill] sm:$0xff] }
 0x2d5   : > { %v2762_v35 = vadd.f32 %v2730_v39, %v13069_v16  ;;  %v3114_v32 = vsel %vm3050_vm4, %v3018_v9, %v3082_v10  ;;  %v3020_v15 = vadd.f32 %v2988_v1, %v2760_v30  ;;  %3506 = vrot.lane.b32.xlu1 %v13180_v51, %s10674_s20  ;;  %v2987_v14 = vmul.f32 %v12968_v19, %v2894_v5  ;;  %v13192_v54 = vld [vmem:[#allocation3 + $0xa9] sm:$0xff] }
 0x2d6   : > { %v2729_v63 = vmul.f32 %v12768_v40, %v12747_v27  ;;  %v2732_v20 = vmul.f32 %v12768_v40, %v12770_v22  ;;  %3147 = vst.msk [vmem:[#allocation3 + $0xd9] sm:$0xff] %vm389_vm2, %v3114_v32  ;;  %vm3049_vm5 = vcmp.gt.f32.partialorder %v3017_v37, 0.0  ;;  %v3081_v0 = vmul.f32 0.01, %v3017_v37  ;;  %v2909_v16 = vpop.permute.xlu0 %2908  ;;  %v17134_v27 = vld [vmem:[#allocation30_spill] sm:$0xff]  ;;  %v17135_v22 = vld [vmem:[#allocation32_spill] sm:$0xff] }
 0x2d7   : > { %3512 = vrot.lane.b32.xlu0 %v13192_v54, %s10674_s20  ;;  %vm3052_vm6 = vcmp.gt.f32.partialorder %v3020_v15, 0.0  ;;  %v3084_v43 = vmul.f32 0.01, %v3020_v15  ;;  %v3019_v34 = vadd.f32 %v2987_v14, %v2759_v57  ;;  %v2990_v44 = vmul.f32 %v12968_v19, %v2909_v16  ;;  %v2904_v39 = vpop.permute.xlu1 %2903 }
 0x2d8   : > { %v13203_v61 = vadd.f32 %v2476_v23, %v12917_v38  ;;  %v2731_v7 = vmul.f32 %v12768_v40, %v17134_v27  ;;  %v2734_v13 = vmul.f32 %v12768_v40, %v17135_v22  ;;  %v3113_v24 = vsel %vm3049_vm5, %v3017_v37, %v3081_v0  ;;  %v13209_v11 = vld [vmem:[#allocation3 + $0x99] sm:$0xff] }
 0x2d9   : > { %3146 = vst.msk [vmem:[#allocation3 + $0xc9] sm:$0xff] %vm389_vm2, %v3113_v24  ;;  %v3116_v41 = vsel %vm3052_vm6, %v3020_v15, %v3084_v43  ;;  %vm3051_vm7 = vcmp.gt.f32.partialorder %v3019_v34, 0.0  ;;  %v3083_v31 = vmul.f32 0.01, %v3019_v34  ;;  %v3022_v17 = vadd.f32 %v2990_v44, %v2762_v35  ;;  %3510 = vrot.lane.b32.xlu1 %v13209_v11, %s10674_s20  ;;  %v3211_v38 = vld [vmem:[#allocation3 + $0xc1] sm:$0xff]  ;;  %v17140_v44 = vld [vmem:[#allocation36_spill] sm:$0xff] }
 0x2da   : > { %v2507_v50 = vadd.f32 %v2475_v56, %v12926_v58  ;;  %v2761_v9 = vadd.f32 %v2729_v63, %v13079_v12  ;;  %v2764_v53 = vadd.f32 %v2732_v20, %v13111_v2  ;;  %3149 = vst.msk [vmem:[#allocation3 + $0xf1] sm:$0xff] %vm389_vm2, %v3116_v41  ;;  %v2989_v30 = vmul.f32 %v12968_v19, %v2904_v39  ;;  %v2919_v29 = vpop.permute.xlu0 %2918  ;;  %v17137_v12 = vld [vmem:[#allocation58_spill] sm:$0xff]  ;;  %v17138_v15 = vld [vmem:[#allocation75_spill] sm:$0xff]  ;;  %v17139_v63 = vld [vmem:[#allocation76_spill] sm:$0xff] }
 0x2db   : > { %3516 = vrot.lane.b32.xlu0 %v3211_v38, %s10674_s20  ;;  %v3115_v62 = vsel %vm3051_vm7, %v3019_v34, %v3083_v31  ;;  %vm3054_vm8 = vcmp.gt.f32.partialorder %v3022_v17, 0.0  ;;  %v3086_v48 = vmul.f32 0.01, %v3022_v17  ;;  %v2992_v10 = vmul.f32 %v12968_v19, %v2919_v29  ;;  %v13221_v1 = vld [vmem:[#allocation3 + $0xb1] sm:$0xff]  ;;  %v2914_v56 = vpop.permute.xlu1 %2913 }
 0x2dc   : > { %v2478_v58 = vmul.f32 %v12593_v4, %v17136_v59  ;;  %v2477_v2 = vmul.f32 %v12593_v4, %v17137_v12  ;;  %v2763_v23 = vadd.f32 %v2731_v7, %v13125_v49  ;;  %3148 = vst.msk [vmem:[#allocation3 + $0xe1] sm:$0xff] %vm389_vm2, %v3115_v62  ;;  %v3021_v33 = vadd.f32 %v2989_v30, %v2761_v9  ;;  %v17141_v7 = vld [vmem:[#allocation77_spill] sm:$0xff]  ;;  %v17143_v12 = vld [vmem:[#allocation62_spill] sm:$0xff] }
 0x2dd   : > { %v2766_v57 = vadd.f32 %v2734_v13, %v13157_v6  ;;  %v3118_v37 = vsel %vm3054_vm8, %v3022_v17, %v3086_v48  ;;  %v3024_v5 = vadd.f32 %v2992_v10, %v2764_v53  ;;  %3514 = vrot.lane.b32.xlu1 %v13221_v1, %s10674_s20  ;;  %v2991_v35 = vmul.f32 %v12968_v19, %v2914_v56  ;;  %v3213_v32 = vld [vmem:[#allocation3 + $0xd9] sm:$0xff] }
 0x2de   : > { %v2733_v14 = vmul.f32 %v12768_v40, %v17138_v15  ;;  %v2736_v49 = vmul.f32 %v12768_v40, %v17139_v63  ;;  %3151 = vst.msk [vmem:[#allocation3 + $0x109] sm:$0xff] %vm389_vm2, %v3118_v37  ;;  %vm3053_vm9 = vcmp.gt.f32.partialorder %v3021_v33, 0.0  ;;  %v3085_v20 = vmul.f32 0.01, %v3021_v33  ;;  %v2929_v0 = vpop.permute.xlu0 %2928 }
 0x2df   : > { %3520 = vrot.lane.b32.xlu0 %v3213_v32, %s10674_s20  ;;  %vm3056_vm10 = vcmp.gt.f32.partialorder %v3024_v5, 0.0  ;;  %v3088_v6 = vmul.f32 0.01, %v3024_v5  ;;  %v3023_v16 = vadd.f32 %v2991_v35, %v2763_v23  ;;  %v2994_v43 = vmul.f32 %v12968_v19, %v2929_v0  ;;  %v2924_v39 = vpop.permute.xlu1 %2923  ;;  %v17144_v32 = vld [vmem:[#allocation78_spill] sm:$0xff]  ;;  %v17145_v0 = vld [vmem:[#allocation183_spill] sm:$0xff] }
 0x2e0   : > { %v2510_v34 = vadd.f32 %v2478_v58, %v12929_v46  ;;  %v2735_v27 = vmul.f32 %v12768_v40, %v17140_v44  ;;  %v2738_v22 = vmul.f32 %v12768_v40, %v17141_v7  ;;  %v3117_v13 = vsel %vm3053_vm9, %v3021_v33, %v3085_v20  ;;  %v13245_v24 = vld [vmem:[#allocation3 + $0xc9] sm:$0xff] }
 0x2e1   : > { %3150 = vst.msk [vmem:[#allocation3 + $0xf9] sm:$0xff] %vm389_vm2, %v3117_v13  ;;  %v3120_v41 = vsel %vm3056_vm10, %v3024_v5, %v3088_v6  ;;  %vm3055_vm11 = vcmp.gt.f32.partialorder %v3023_v16, 0.0  ;;  %v3087_v31 = vmul.f32 0.01, %v3023_v16  ;;  %v3026_v17 = vadd.f32 %v2994_v43, %v2766_v57  ;;  %3518 = vrot.lane.b32.xlu1 %v13245_v24, %s10674_s20  ;;  %v3215_v46 = vld [vmem:[#allocation3 + $0xf1] sm:$0xff] }
 0x2e2   : > { %v2509_v38 = vadd.f32 %v2477_v2, %v12936_v25  ;;  %v2765_v9 = vadd.f32 %v2733_v14, %v13171_v55  ;;  %v2768_v53 = vadd.f32 %v2736_v49, %v13203_v61  ;;  %3153 = vst.msk [vmem:[#allocation3 + $0x121] sm:$0xff] %vm389_vm2, %v3120_v41  ;;  %v2993_v30 = vmul.f32 %v12968_v19, %v2924_v39  ;;  %v2939_v29 = vpop.permute.xlu0 %2938  ;;  %v17142_v58 = vld [vmem:[#allocation60_spill] sm:$0xff] }
 0x2e3   : > { %3524 = vrot.lane.b32.xlu0 %v3215_v46, %s10674_s20  ;;  %v3119_v62 = vsel %vm3055_vm11, %v3023_v16, %v3087_v31  ;;  %vm3058_vm12 = vcmp.gt.f32.partialorder %v3026_v17, 0.0  ;;  %v3090_v48 = vmul.f32 0.01, %v3026_v17  ;;  %v2996_v10 = vmul.f32 %v12968_v19, %v2939_v29  ;;  %v3214_v59 = vld [vmem:[#allocation3 + $0xe1] sm:$0xff]  ;;  %v2934_v23 = vpop.permute.xlu1 %2933 }
 0x2e4   : > { %v2480_v25 = vmul.f32 %v12593_v4, %v17142_v58  ;;  %v2479_v55 = vmul.f32 %v12593_v4, %v17143_v12  ;;  %v2767_v61 = vadd.f32 %v2735_v27, %v2507_v50  ;;  %3152 = vst.msk [vmem:[#allocation3 + $0x111] sm:$0xff] %vm389_vm2, %v3119_v62  ;;  %v3025_v2 = vadd.f32 %v2993_v30, %v2765_v9  ;;  %v17146_v16 = vld [vmem:[#allocation38_spill] sm:$0xff]  ;;  %v17148_v31 = vld [vmem:[#allocation63_spill] sm:$0xff] }
 0x2e5   : > { %v2770_v33 = vadd.f32 %v2738_v22, %v2510_v34  ;;  %v3122_v56 = vsel %vm3058_vm12, %v3026_v17, %v3090_v48  ;;  %v3028_v57 = vadd.f32 %v2996_v10, %v2768_v53  ;;  %3522 = vrot.lane.b32.xlu1 %v3214_v59, %s10674_s20  ;;  %v2995_v37 = vmul.f32 %v12968_v19, %v2934_v23  ;;  %v3217_v5 = vld [vmem:[#allocation3 + $0x109] sm:$0xff]  ;;  %v17149_v59 = vld [vmem:[#allocation74_spill] sm:$0xff] }
 0x2e6   : > { %v2737_v35 = vmul.f32 %v12768_v40, %v12923_v8  ;;  %v2740_v15 = vmul.f32 %v12768_v40, %v17144_v32  ;;  %3155 = vst.msk [vmem:[#allocation3 + $0x139] sm:$0xff] %vm389_vm2, %v3122_v56  ;;  %vm3057_vm13 = vcmp.gt.f32.partialorder %v3025_v2, 0.0  ;;  %v3089_v50 = vmul.f32 0.01, %v3025_v2  ;;  %v2949_v14 = vpop.permute.xlu0 %2948  ;;  %v17147_v8 = vld [vmem:[#allocation79_spill] sm:$0xff]  ;;  %v17150_v58 = vld [vmem:[#allocation14_spill] sm:$0xff] }
 0x2e7   : > { %3528 = vrot.lane.b32.xlu0 %v3217_v5, %s10674_s20  ;;  %vm3060_vm14 = vcmp.gt.f32.partialorder %v3028_v57, 0.0  ;;  %v3092_v63 = vmul.f32 0.01, %v3028_v57  ;;  %v3027_v49 = vadd.f32 %v2995_v37, %v2767_v61  ;;  %v2998_v20 = vmul.f32 %v12968_v19, %v2949_v14  ;;  %v2944_v7 = vpop.permute.xlu1 %2943  ;;  %v3228_v37 = vld [vmem:[#allocation3 + $0xa] sm:$0xff] }
 0x2e8   : > { %v2512_v6 = vadd.f32 %v2480_v25, %v17145_v0  ;;  %v2511_v43 = vadd.f32 %v2479_v55, %v17146_v16  ;;  %v2739_v34 = vmul.f32 %v12768_v40, %v17147_v8  ;;  %v3121_v44 = vsel %vm3057_vm13, %v3025_v2, %v3089_v50  ;;  %v3216_v27 = vld [vmem:[#allocation3 + $0xf9] sm:$0xff] }
 0x2e9   : > { %3154 = vst.msk [vmem:[#allocation3 + $0x129] sm:$0xff] %vm389_vm2, %v3121_v44  ;;  %v3124_v22 = vsel %vm3060_vm14, %v3028_v57, %v3092_v63  ;;  %vm3059_vm15 = vcmp.gt.f32.partialorder %v3027_v49, 0.0  ;;  %v3091_v13 = vmul.f32 0.01, %v3027_v49  ;;  %v3030_v39 = vadd.f32 %v2998_v20, %v2770_v33  ;;  %3526 = vrot.lane.b32.xlu1 %v3216_v27, %s10674_s20  ;;  %v3219_v41 = vld [vmem:[#allocation3 + $0x121] sm:$0xff] }
 0x2ea   : > { %v2481_v17 = vmul.f32 %v12593_v4, %v17148_v31  ;;  %v2769_v46 = vadd.f32 %v2737_v35, %v2509_v38  ;;  %v2772_v9 = vadd.f32 %v2740_v15, %v2512_v6  ;;  %3157 = vst.msk [vmem:[#allocation3 + $0x151] sm:$0xff] %vm389_vm2, %v3124_v22  ;;  %v2997_v53 = vmul.f32 %v12968_v19, %v2944_v7  ;;  %v2959_v30 = vpop.permute.xlu0 %2958  ;;  %v13299_v16 = vld [vmem:[#allocation3 + $0x20] sm:$0xff]  ;;  %v4742_v31 = vld [vmem:[%s16571_s3 + $0x20] sm:$0xf] }
 0x2eb   : > { %3532 = vrot.lane.b32.xlu0 %v3219_v41, %s10674_s20  ;;  %v3123_v29 = vsel %vm3059_vm15, %v3027_v49, %v3091_v13  ;;  %vm3062_vm0 = vcmp.gt.f32.partialorder %v3030_v39, 0.0  ;;  %v3094_v62 = vmul.f32 0.01, %v3030_v39  ;;  %v3000_v48 = vmul.f32 %v12968_v19, %v2959_v30  ;;  %v3218_v10 = vld [vmem:[#allocation3 + $0x111] sm:$0xff]  ;;  %v2954_v12 = vpop.permute.xlu1 %2953  ;;  %v3227_v49 = vld [vmem:[#allocation3 + $0x2] sm:$0xff]  ;;  %v3229_v8 = vld [vmem:[#allocation3 + $0x1a] sm:$0xff] }
 0x2ec   : > { %v2252_v25 = vadd.f32 %v17150_v58, %v17149_v59  ;;  %v2741_v4 = vmul.f32 %v12768_v40, %v12995_v60  ;;  %3156 = vst.msk [vmem:[#allocation3 + $0x141] sm:$0xff] %vm389_vm2, %v3123_v29  ;;  %v3029_v38 = vadd.f32 %v2997_v53, %v2769_v46  ;;  %v2771_v55 = vadd.f32 %v2739_v34, %v2511_v43  ;;  %v13304_v43 = vld [vmem:[#allocation3 + $0x18] sm:$0xff]  ;;  %v13314_v34 = vld [vmem:[#allocation3 + $0x30] sm:$0xff]  ;;  %v3324_v44 = vld [vmem:[#allocation3 + $0x22] sm:$0xff] }
 0x2ed   : > { %v3126_v61 = vsel %vm3062_vm0, %v3030_v39, %v3094_v62  ;;  %v3032_v2 = vadd.f32 %v3000_v48, %v2772_v9  ;;  %3530 = vrot.lane.b32.xlu1 %v3218_v10, %s10674_s20  ;;  %v2999_v23 = vmul.f32 %v12968_v19, %v2954_v12  ;;  %v3221_v33 = vld [vmem:[#allocation3 + $0x139] sm:$0xff]  ;;  %vm445_vm6 = vcmask 261120   ;;  %v4741_v13 = vld [vmem:[%s16571_s3 + $0x18] sm:$0xff] }
 0x2ee   : > { %v2513_v56 = vadd.f32 %v2481_v17, %v2252_v25  ;;  %3159 = vst.msk [vmem:[#allocation3 + $0x169] sm:$0xff] %vm389_vm2, %v3126_v61  ;;  %vm3061_vm1 = vcmp.gt.f32.partialorder %v3029_v38, 0.0  ;;  %v3093_v57 = vmul.f32 0.01, %v3029_v38  ;;  %v17151_v7 = vmov 0.0   ;;  %v4740_v22 = vld [vmem:[%s16571_s3 + $0x10] sm:$0xff]  ;;  %v13459_v9 = vpop.permute.xlu0 %3484 }
 0x2ef   : > { %3536 = vrot.lane.b32.xlu0 %v3221_v33, %s10674_s20  ;;  %vm3064_vm3 = vcmp.gt.f32.partialorder %v3032_v2, 0.0  ;;  %v3096_v40 = vmul.f32 0.01, %v3032_v2  ;;  %v3031_v60 = vadd.f32 %v2999_v23, %v2771_v55  ;;  %v2964_v15 = vpop.permute.xlu1 %2963  ;;  %446 = vst.msk [vmem:[#allocation4] sm:$0xff] %vm445_vm6, %v17151_v7  ;;  %447 = vst.msk [vmem:[#allocation4 + $0x8] sm:$0xff] %vm445_vm6, %v17151_v7  ;;  %v9545_v39 = vpack.c.bf16 %v4741_v13, %v4740_v22  ;;  %v13424_v41 = vld [vmem:[#allocation3 + $0x38] sm:$0xff] }
 0x2f0   : > { %v2773_v5 = vadd.f32 %v2741_v4, %v2513_v56  ;;  %v3125_v35 = vsel %vm3061_vm1, %v3029_v38, %v3093_v57  ;;  %v3220_v32 = vld [vmem:[#allocation3 + $0x129] sm:$0xff]  ;;  %v3001_v63 = vmul.f32 %v12968_v19, %v2964_v15  ;;  %450 = vst.msk [vmem:[#allocation4 + $0x18] sm:$0xff] %vm445_vm6, %v17151_v7  ;;  %451 = vst.msk [vmem:[#allocation4 + $0x20] sm:$0xff] %vm445_vm6, %v17151_v7  ;;  %vm4847_vm7 = vcmask 1043456   ;;  %v3420_v17 = vld [vmem:[#allocation3 + $0x32] sm:$0xff] }
 0x2f1   : > { %3158 = vst.msk [vmem:[#allocation3 + $0x159] sm:$0xff] %vm389_vm2, %v3125_v35  ;;  %v3128_v50 = vsel %vm3064_vm3, %v3032_v2, %v3096_v40  ;;  %vm3063_vm4 = vcmp.gt.f32.partialorder %v3031_v60, 0.0  ;;  %v3095_v14 = vmul.f32 0.01, %v3031_v60  ;;  %3534 = vrot.lane.b32.xlu1 %v3220_v32, %s10674_s20  ;;  %v13443_v46 = vld [vmem:[#allocation3 + $0x48] sm:$0xff]  ;;  %v3423_v10 = vld [vmem:[#allocation3 + $0x52] sm:$0xff] }
 0x2f2   : > { %3161 = vst.msk [vmem:[#allocation3 + $0x181] sm:$0xff] %vm389_vm2, %v3128_v50  ;;  %v3033_v0 = vadd.f32 %v3001_v63, %v2773_v5  ;;  %v3422_v53 = vld [vmem:[#allocation3 + $0x4a] sm:$0xff]  ;;  %v13481_v59 = vld [vmem:[#allocation3 + $0x60] sm:$0xff]  ;;  %v13541_v32 = vld [vmem:[#allocation3 + $0x78] sm:$0xff]  ;;  %vm4508_vm8 = vcmask 64512   ;;  %vm4541_vm9 = vcmask 97280  }
 0x2f3   : > { %3614 = vrot.lane.b32.xlu0 %v3228_v37, %s10675_s23  ;;  %v3127_v20 = vsel %vm3063_vm4, %v3031_v60, %v3095_v14  ;;  %453 = vst.msk [vmem:[#allocation4 + $0x30] sm:$0xff] %vm445_vm6, %v17151_v7  ;;  %454 = vst.msk [vmem:[#allocation4 + $0x38] sm:$0xff] %vm445_vm6, %v17151_v7  ;;  %v13466_v29 = vpop.permute.xlu1 %3486  ;;  %v13501_v12 = vld [vmem:[#allocation3 + $0x68] sm:$0xff]  ;;  %v13534_v5 = vld [vmem:[#allocation3 + $0x80] sm:$0xff]  ;;  %vm4607_vm10 = vcmask 162816   ;;  %vm4574_vm11 = vcmask 130048  }
 0x2f4   : > { %3160 = vst.msk [vmem:[#allocation3 + $0x171] sm:$0xff] %vm389_vm2, %v3127_v20  ;;  %vm3065_vm5 = vcmp.gt.f32.partialorder %v3033_v0, 0.0  ;;  %v3097_v6 = vmul.f32 0.01, %v3033_v0  ;;  %v3424_v23 = vld [vmem:[#allocation3 + $0x62] sm:$0xff]  ;;  %v3330_v40 = vld [vmem:[#allocation3 + $0x6a] sm:$0xff] }
 0x2f5   : > { %3612 = vrot.lane.b32.xlu1 %v3227_v49, %s10675_s23  ;;  %456 = vst.msk [vmem:[#allocation4 + $0x48] sm:$0xff] %vm445_vm6, %v17151_v7  ;;  %457 = vst.msk [vmem:[#allocation4 + $0x50] sm:$0xff] %vm445_vm6, %v17151_v7  ;;  %v3427_v14 = vld [vmem:[#allocation3 + $0x82] sm:$0xff]  ;;  %v3426_v20 = vld [vmem:[#allocation3 + $0x7a] sm:$0xff]  ;;  %vm4640_vm12 = vcmask 195584   ;;  %vm4673_vm13 = vcmask 228352  }
 0x2f6   : > { %v3129_v19 = vsel %vm3065_vm5, %v3033_v0, %v3097_v6  ;;  %459 = vst.msk [vmem:[#allocation4 + $0x60] sm:$0xff] %vm445_vm6, %v17151_v7  ;;  %460 = vst.msk [vmem:[#allocation4 + $0x68] sm:$0xff] %vm445_vm6, %v17151_v7  ;;  %v13576_v22 = vld [vmem:[#allocation3 + $0x98] sm:$0xff]  ;;  %vm4750_vm14 = vcmask 293888   ;;  %vm448_vm15 = vcmask 259072  }
 0x2f7   : > { %3742 = vrot.lane.b32.xlu0 %v13299_v16, %s10676_s24  ;;  %3162 = vst.msk [vmem:[#allocation3 + $0x189] sm:$0xff] %vm389_vm2, %v3129_v19 }
 0x2f8   : > { %462 = vst.msk [vmem:[#allocation4 + $0x78] sm:$0xff] %vm445_vm6, %v17151_v7  ;;  %463 = vst.msk [vmem:[#allocation4 + $0x80] sm:$0xff] %vm445_vm6, %v17151_v7 }
 0x2f9   : > { %3740 = vrot.lane.b32.xlu1 %v13304_v43, %s10676_s24  ;;  %465 = vst.msk [vmem:[#allocation4 + $0x90] sm:$0xff] %vm445_vm6, %v17151_v7  ;;  %466 = vst.msk [vmem:[#allocation4 + $0x98] sm:$0xff] %vm445_vm6, %v17151_v7 }
 0x2fa   : > { %468 = vst.msk [vmem:[#allocation4 + $0xa8] sm:$0xff] %vm445_vm6, %v17151_v7  ;;  %469 = vst.msk [vmem:[#allocation4 + $0xb0] sm:$0xff] %vm445_vm6, %v17151_v7 }
 0x2fb   : > { %3870 = vrot.lane.b32.xlu0 %v13088_v18, %s10677_s25  ;;  %v4738_v18 = vld [vmem:[%s16571_s3] sm:$0xff]  ;;  %471 = vst.msk [vmem:[#allocation4 + $0xc0] sm:$0xff] %vm445_vm6, %v17151_v7  ;;  %472 = vst.msk [vmem:[#allocation4 + $0xc8] sm:$0xff] %vm445_vm6, %v17151_v7 }
 0x2fc   : > { %474 = vst.msk [vmem:[#allocation4 + $0xd8] sm:$0xff] %vm445_vm6, %v17151_v7  ;;  %475 = vst.msk [vmem:[#allocation4 + $0xe0] sm:$0xff] %vm445_vm6, %v17151_v7 }
 0x2fd   : > { %3868 = vrot.lane.b32.xlu1 %v13058_v3, %s10677_s25  ;;  %v4739_v3 = vld [vmem:[%s16571_s3 + $0x8] sm:$0xff]  ;;  %477 = vst.msk [vmem:[#allocation4 + $0xf0] sm:$0xff] %vm445_vm6, %v17151_v7  ;;  %478 = vst.msk [vmem:[#allocation4 + $0xf8] sm:$0xff] %vm445_vm6, %v17151_v7 }
 0x2fe   : > { %v9541_v27 = vpack.c.bf16 %v4739_v3, %v4738_v18  ;;  %480 = vst.msk [vmem:[#allocation4 + $0x108] sm:$0xff] %vm445_vm6, %v17151_v7  ;;  %481 = vst.msk [vmem:[#allocation4 + $0x110] sm:$0xff] %vm445_vm6, %v17151_v7 }
 0x2ff   : > { %3616 = vrot.lane.b32.xlu0 %v3229_v8, %s10675_s23  ;;  %483 = vst.msk [vmem:[#allocation4 + $0x120] sm:$0xff] %vm445_vm6, %v17151_v7  ;;  %484 = vst.msk [vmem:[#allocation4 + $0x128] sm:$0xff] %vm445_vm6, %v17151_v7 }
 0x300   : > { %486 = vst.msk [vmem:[#allocation4 + $0x138] sm:$0xff] %vm445_vm6, %v17151_v7  ;;  %487 = vst.msk [vmem:[#allocation4 + $0x140] sm:$0xff] %vm445_vm6, %v17151_v7  ;;  %9542 = vmatprep.subr.bf16.mxu0 %v9541_v27 }
 0x301   : > { %3996 = vrot.lane.b32.xlu1 %v3229_v8, %s10678_s26  ;;  %489 = vst.msk [vmem:[#allocation4 + $0x150] sm:$0xff] %vm445_vm6, %v17151_v7  ;;  %490 = vst.msk [vmem:[#allocation4 + $0x158] sm:$0xff] %vm445_vm6, %v17151_v7  ;;  %9544 = vmatpush3.bf16.msra.mxu0 %v9541_v27 }
 0x302   : > { %492 = vst.msk [vmem:[#allocation4 + $0x168] sm:$0xff] %vm445_vm6, %v17151_v7  ;;  %493 = vst.msk [vmem:[#allocation4 + $0x170] sm:$0xff] %vm445_vm6, %v17151_v7  ;;  %9546 = vmatprep.subr.bf16.mxu0 %v9545_v39 }
 0x303   : > { %4124 = vrot.lane.b32.xlu0 %v13314_v34, %s10679_s27  ;;  %495 = vst.msk [vmem:[#allocation4 + $0x180] sm:$0xff] %vm445_vm6, %v17151_v7  ;;  %496 = vst.msk [vmem:[#allocation4 + $0x188] sm:$0xff] %vm445_vm6, %v17151_v7 }
 0x304   : > { %498 = vst.msk [vmem:[#allocation4 + $0x198] sm:$0xff] %vm445_vm6, %v17151_v7  ;;  %499 = vst.msk [vmem:[#allocation4 + $0x1a0] sm:$0xff] %vm445_vm6, %v17151_v7 }
 0x305   : > { %3998 = vrot.lane.b32.xlu1 %v3324_v44, %s10678_s26  ;;  %501 = vst.msk [vmem:[#allocation4 + $0x1b0] sm:$0xff] %vm445_vm6, %v17151_v7  ;;  %502 = vst.msk [vmem:[#allocation4 + $0x1b8] sm:$0xff] %vm445_vm6, %v17151_v7  ;;  %9548 = vmatpush3.bf16.msra.mxu0 %v9545_v39  ;;  %v13581_v39 = vld [vmem:[#allocation3 + $0x90] sm:$0xff] }
 0x306   : > { %504 = vst.msk [vmem:[#allocation4 + $0x1c8] sm:$0xff] %vm445_vm6, %v17151_v7  ;;  %505 = vst.msk [vmem:[#allocation4 + $0x1d0] sm:$0xff] %vm445_vm6, %v17151_v7  ;;  %9371 = vmatprep.subr.msk.mxu0 %vm4847_vm7, %v4742_v31 }
 0x307   : > { %3744 = vrot.lane.b32.xlu0 %v13314_v34, %s10676_s24  ;;  %507 = vst.msk [vmem:[#allocation4 + $0x1e0] sm:$0xff] %vm445_vm6, %v17151_v7  ;;  %508 = vst.msk [vmem:[#allocation4 + $0x1e8] sm:$0xff] %vm445_vm6, %v17151_v7 }
 0x308   : > { %510 = vst.msk [vmem:[#allocation4 + $0x1f8] sm:$0xff] %vm445_vm6, %v17151_v7  ;;  %511 = vst.msk [vmem:[#allocation4 + $0x200] sm:$0xff] %vm445_vm6, %v17151_v7 }
 0x309   : > { %3618 = vrot.lane.b32.xlu1 %v3324_v44, %s10675_s23  ;;  %9372 = vmatpush3.msk.msra.mxu0 %vm4847_vm7, %v4742_v31  ;;  %458 = vst.msk [vmem:[#allocation4 + $0x58] sm:$0x3f] %vm448_vm15, %v17151_v7  ;;  %449 = vst.msk [vmem:[#allocation4 + $0x10] sm:$0x3f] %vm448_vm15, %v17151_v7 }
 0x30a   : > { %452 = vst.msk [vmem:[#allocation4 + $0x28] sm:$0x3f] %vm448_vm15, %v17151_v7  ;;  %455 = vst.msk [vmem:[#allocation4 + $0x40] sm:$0x3f] %vm448_vm15, %v17151_v7 }
 0x30b   : > { %4252 = vrot.lane.b32.xlu0 %v13076_v36, %s10680_s18  ;;  %461 = vst.msk [vmem:[#allocation4 + $0x70] sm:$0x3f] %vm448_vm15, %v17151_v7  ;;  %464 = vst.msk [vmem:[#allocation4 + $0x88] sm:$0x3f] %vm448_vm15, %v17151_v7 }
 0x30c   : > { %467 = vst.msk [vmem:[#allocation4 + $0xa0] sm:$0x3f] %vm448_vm15, %v17151_v7  ;;  %470 = vst.msk [vmem:[#allocation4 + $0xb8] sm:$0x3f] %vm448_vm15, %v17151_v7 }
 0x30d   : > { %4126 = vrot.lane.b32.xlu1 %v13424_v41, %s10679_s27  ;;  %473 = vst.msk [vmem:[#allocation4 + $0xd0] sm:$0x3f] %vm448_vm15, %v17151_v7  ;;  %476 = vst.msk [vmem:[#allocation4 + $0xe8] sm:$0x3f] %vm448_vm15, %v17151_v7 }
 0x30e   : > { %479 = vst.msk [vmem:[#allocation4 + $0x100] sm:$0x3f] %vm448_vm15, %v17151_v7  ;;  %482 = vst.msk [vmem:[#allocation4 + $0x118] sm:$0x3f] %vm448_vm15, %v17151_v7 }
 0x30f   : > { %3872 = vrot.lane.b32.xlu0 %v13076_v36, %s10677_s25  ;;  %v3421_v36 = vld [vmem:[#allocation3 + $0x3a] sm:$0xff]  ;;  %485 = vst.msk [vmem:[#allocation4 + $0x130] sm:$0x3f] %vm448_vm15, %v17151_v7  ;;  %488 = vst.msk [vmem:[#allocation4 + $0x148] sm:$0x3f] %vm448_vm15, %v17151_v7 }
 0x310   : > { %491 = vst.msk [vmem:[#allocation4 + $0x160] sm:$0x3f] %vm448_vm15, %v17151_v7  ;;  %494 = vst.msk [vmem:[#allocation4 + $0x178] sm:$0x3f] %vm448_vm15, %v17151_v7 }
 0x311   : > { %3746 = vrot.lane.b32.xlu1 %v13424_v41, %s10676_s24  ;;  %497 = vst.msk [vmem:[#allocation4 + $0x190] sm:$0x3f] %vm448_vm15, %v17151_v7  ;;  %500 = vst.msk [vmem:[#allocation4 + $0x1a8] sm:$0x3f] %vm448_vm15, %v17151_v7 }
 0x312   : > { %503 = vst.msk [vmem:[#allocation4 + $0x1c0] sm:$0x3f] %vm448_vm15, %v17151_v7  ;;  %506 = vst.msk [vmem:[#allocation4 + $0x1d8] sm:$0x3f] %vm448_vm15, %v17151_v7 }
 0x313   : > { %4380 = vrot.lane.b32.xlu0 %v3420_v17, %s10681_s22  ;;  %509 = vst.msk [vmem:[#allocation4 + $0x1f0] sm:$0x3f] %vm448_vm15, %v17151_v7  ;;  %512 = vst.msk [vmem:[#allocation4 + $0x208] sm:$0x3f] %vm448_vm15, %v17151_v7 }
 0x315   : > { %4254 = vrot.lane.b32.xlu1 %v13117_v28, %s10680_s18 }
 0x317   : > { %4000 = vrot.lane.b32.xlu0 %v3420_v17, %s10678_s26 }
 0x319   : > { %3874 = vrot.lane.b32.xlu1 %v13117_v28, %s10677_s25  ;;  %v13453_v28 = vld [vmem:[#allocation3 + $0x50] sm:$0xff] }
 0x31b   : > { %3620 = vrot.lane.b32.xlu0 %v3420_v17, %s10675_s23  ;;  %v3163_v17 = vld [vmem:[#allocation3] sm:$0xff] }
 0x31d   : > { %4382 = vrot.lane.b32.xlu1 %v3421_v36, %s10681_s22 }
 0x31f   : > { %4128 = vrot.lane.b32.xlu0 %v13443_v46, %s10679_s27 }
 0x321   : > { %4002 = vrot.lane.b32.xlu1 %v3421_v36, %s10678_s26 }
 0x323   : > { %3748 = vrot.lane.b32.xlu0 %v13443_v46, %s10676_s24 }
 0x325   : > { %3622 = vrot.lane.b32.xlu1 %v3421_v36, %s10675_s23  ;;  %v13591_v36 = vld [vmem:[#allocation3 + $0x9a] sm:$0xff] }
 0x327   : > { %4256 = vrot.lane.b32.xlu0 %v13100_v26, %s10680_s18 }
 0x329   : > { %4130 = vrot.lane.b32.xlu1 %v13453_v28, %s10679_s27 }
 0x32b   : > { %3876 = vrot.lane.b32.xlu0 %v13100_v26, %s10677_s25 }
 0x32d   : > { %3750 = vrot.lane.b32.xlu1 %v13453_v28, %s10676_s24 }
 0x32f   : > { %4384 = vrot.lane.b32.xlu0 %v3422_v53, %s10681_s22 }
 0x330   : > { %v13464_v30 = vpop.permute.xlu0 %3488 }
 0x331   : > { %4258 = vrot.lane.b32.xlu1 %v13134_v45, %s10680_s18 }
 0x333   : > { %4004 = vrot.lane.b32.xlu0 %v3422_v53, %s10678_s26 }
 0x334   : > { %v13471_v62 = vpop.permute.xlu0 %3492 }
 0x335   : > { %3878 = vrot.lane.b32.xlu1 %v13134_v45, %s10677_s25  ;;  %v13476_v26 = vpop.permute.xlu1 %3490 }
 0x337   : > { %3624 = vrot.lane.b32.xlu0 %v3422_v53, %s10675_s23 }
 0x338   : > { %v13478_v48 = vpop.permute.xlu0 %3496 }
 0x339   : > { %4386 = vrot.lane.b32.xlu1 %v3423_v10, %s10681_s22 }
 0x33b   : > { %4132 = vrot.lane.b32.xlu0 %v13481_v59, %s10679_s27  ;;  %v13485_v58 = vpop.permute.xlu1 %3494 }
 0x33c   : > { %v13487_v25 = vpop.permute.xlu0 %3500 }
 0x33d   : > { %4006 = vrot.lane.b32.xlu1 %v3423_v10, %s10678_s26 }
 0x33f   : > { %3752 = vrot.lane.b32.xlu0 %v13481_v59, %s10676_s24  ;;  %v13492_v45 = vpop.permute.xlu1 %3498 }
 0x340   : > { %v13494_v4 = vpop.permute.xlu0 %3504 }
 0x341   : > { %3626 = vrot.lane.b32.xlu1 %v3423_v10, %s10675_s23  ;;  %v4476_v10 = vsel %vm389_vm2, %v3163_v17, %v13459_v9 }
 0x343   : > { %4260 = vrot.lane.b32.xlu0 %v13122_v52, %s10680_s18  ;;  %v13499_v38 = vpop.permute.xlu1 %3502 }
 0x345   : > { %v13503_v55 = vpop.permute.xlu0 %3508  ;;  %4134 = vrot.lane.b32.xlu1 %v13501_v12, %s10679_s27 }
 0x347   : > { %3880 = vrot.lane.b32.xlu0 %v13122_v52, %s10677_s25  ;;  %v13509_v61 = vpop.permute.xlu1 %3506 }
 0x349   : > { %v13511_v2 = vpop.permute.xlu0 %3512  ;;  %3754 = vrot.lane.b32.xlu1 %v13501_v12, %s10676_s24 }
 0x34b   : > { %4388 = vrot.lane.b32.xlu0 %v3424_v23, %s10681_s22  ;;  %v13516_v33 = vpop.permute.xlu1 %3510 }
 0x34d   : > { %v13518_v56 = vpop.permute.xlu0 %3516  ;;  %4262 = vrot.lane.b32.xlu1 %v13163_v21, %s10680_s18 }
 0x34f   : > { %4008 = vrot.lane.b32.xlu0 %v3424_v23, %s10678_s26  ;;  %v13523_v52 = vpop.permute.xlu1 %3514 }
 0x351   : > { %v13525_v57 = vpop.permute.xlu0 %3520  ;;  %3882 = vrot.lane.b32.xlu1 %v13163_v21, %s10677_s25 }
 0x353   : > { %4010 = vrot.lane.b32.xlu0 %v3330_v40, %s10678_s26  ;;  %v13530_v60 = vpop.permute.xlu1 %3518 }
 0x355   : > { %v13532_v37 = vpop.permute.xlu0 %3524  ;;  %4390 = vrot.lane.b32.xlu1 %v3330_v40, %s10681_s22 }
 0x357   : > { %4138 = vrot.lane.b32.xlu0 %v13534_v5, %s10679_s27  ;;  %v13539_v35 = vpop.permute.xlu1 %3522 }
 0x359   : > { %v13543_v15 = vpop.permute.xlu0 %3528  ;;  %4136 = vrot.lane.b32.xlu1 %v13541_v32, %s10679_s27 }
 0x35b   : > { %4266 = vrot.lane.b32.xlu0 %v13180_v51, %s10680_s18  ;;  %v13549_v21 = vpop.permute.xlu1 %3526 }
 0x35d   : > { %v13551_v50 = vpop.permute.xlu0 %3532  ;;  %4264 = vrot.lane.b32.xlu1 %v13146_v42, %s10680_s18 }
 0x35e   : > { %17152 = vst [vmem:[#allocation80_spill] sm:$0xff] %v13551_v50 }
 0x35f   : > { %4394 = vrot.lane.b32.xlu0 %v3427_v14, %s10681_s22  ;;  %v13556_v63 = vpop.permute.xlu1 %3530 }
 0x360   : > { %17153 = vst [vmem:[#allocation81_spill] sm:$0xff] %v13556_v63 }
 0x361   : > { %v13558_v49 = vpop.permute.xlu0 %3536  ;;  %4392 = vrot.lane.b32.xlu1 %v3426_v20, %s10681_s22 }
 0x362   : > { %17154 = vst [vmem:[#allocation109_spill] sm:$0xff] %v13558_v49 }
 0x363   : > { %3630 = vrot.lane.b32.xlu0 %v3330_v40, %s10675_s23  ;;  %v13562_v0 = vpop.permute.xlu1 %3534  ;;  %v13599_v40 = vld [vmem:[#allocation3 + $0x92] sm:$0xff] }
 0x364   : > { %17155 = vst [vmem:[#allocation82_spill] sm:$0xff] %v13562_v0 }
 0x365   : > { %v3615_v6 = vpop.permute.xlu0 %3614  ;;  %3628 = vrot.lane.b32.xlu1 %v3424_v23, %s10675_s23 }
 0x367   : > { %3758 = vrot.lane.b32.xlu0 %v13534_v5, %s10676_s24  ;;  %v3613_v19 = vpop.permute.xlu1 %3612 }
 0x368   : > { %v4509_v49 = vsel %vm4508_vm8, %v4476_v10, %v3613_v19 }
 0x369   : > { %v3743_v8 = vpop.permute.xlu0 %3742  ;;  %3756 = vrot.lane.b32.xlu1 %v13541_v32, %s10676_s24 }
 0x36b   : > { %3886 = vrot.lane.b32.xlu0 %v13180_v51, %s10677_s25  ;;  %v3741_v44 = vpop.permute.xlu1 %3740 }
 0x36c   : > { %v4542_v0 = vsel %vm4541_vm9, %v4509_v49, %v3741_v44 }
 0x36d   : > { %v3871_v18 = vpop.permute.xlu0 %3870  ;;  %3884 = vrot.lane.b32.xlu1 %v13146_v42, %s10677_s25 }
 0x36f   : > { %4014 = vrot.lane.b32.xlu0 %v3427_v14, %s10678_s26  ;;  %v3869_v3 = vpop.permute.xlu1 %3868 }
 0x370   : > { %v4575_v50 = vsel %vm4574_vm11, %v4542_v0, %v3869_v3  ;;  %v3164_v0 = vld [vmem:[#allocation3 + $0x8] sm:$0xff] }
 0x371   : > { %v13574_v27 = vpop.permute.xlu0 %3616  ;;  %4012 = vrot.lane.b32.xlu1 %v3426_v20, %s10678_s26  ;;  %v4477_v3 = vsel %vm389_vm2, %v3164_v0, %v13466_v29 }
 0x373   : > { %4142 = vrot.lane.b32.xlu0 %v13576_v22, %s10679_s27  ;;  %v3997_v13 = vpop.permute.xlu1 %3996 }
 0x374   : > { %v4608_v9 = vsel %vm4607_vm10, %v4575_v50, %v3997_v13  ;;  %v4510_v13 = vsel %vm4508_vm8, %v4477_v3, %v3615_v6  ;;  %v3430_v3 = vld [vmem:[#allocation3 + $0xaa] sm:$0xff] }
 0x375   : > { %v4125_v51 = vpop.permute.xlu0 %4124  ;;  %4140 = vrot.lane.b32.xlu1 %v13581_v39, %s10679_s27 }
 0x376   : > { %v4641_v19 = vsel %vm4640_vm12, %v4608_v9, %v4125_v51  ;;  %v4543_v51 = vsel %vm4541_vm9, %v4510_v13, %v3743_v8  ;;  %v13641_v8 = vld [vmem:[#allocation3 + $0xa8] sm:$0xff]  ;;  %v4478_v13 = vsel %vm389_vm2, %v13304_v43, %v13464_v30 }
 0x377   : > { %4270 = vrot.lane.b32.xlu0 %v13209_v11, %s10680_s18  ;;  %v3999_v42 = vpop.permute.xlu1 %3998 }
 0x379   : > { %v13587_v31 = vpop.permute.xlu0 %3744  ;;  %4268 = vrot.lane.b32.xlu1 %v13168_v47, %s10680_s18 }
 0x37b   : > { %4398 = vrot.lane.b32.xlu0 %v13591_v36, %s10681_s22  ;;  %v13595_v53 = vpop.permute.xlu1 %3618 }
 0x37d   : > { %v4253_v23 = vpop.permute.xlu0 %4252  ;;  %4396 = vrot.lane.b32.xlu1 %v13599_v40, %s10681_s22 }
 0x37f   : > { %3634 = vrot.lane.b32.xlu0 %v3427_v14, %s10675_s23  ;;  %v4127_v63 = vpop.permute.xlu1 %4126  ;;  %v4674_v14 = vsel %vm4673_vm13, %v4641_v19, %v4253_v23  ;;  %v13632_v19 = vld [vmem:[#allocation3 + $0xb0] sm:$0xff] }
 0x381   : > { %v3873_v17 = vpop.permute.xlu0 %3872  ;;  %3632 = vrot.lane.b32.xlu1 %v3426_v20, %s10675_s23 }
 0x383   : > { %3762 = vrot.lane.b32.xlu0 %v13576_v22, %s10676_s24  ;;  %v13612_v10 = vpop.permute.xlu1 %3746 }
 0x385   : > { %v4381_v49 = vpop.permute.xlu0 %4380  ;;  %3760 = vrot.lane.b32.xlu1 %v13581_v39, %s10676_s24 }
 0x386   : > { %v4706_v50 = vsel %vm445_vm6, %v4674_v14, %v4381_v49 }
 0x387   : > { %3890 = vrot.lane.b32.xlu0 %v13209_v11, %s10677_s25  ;;  %9373 = vmatprep.mubr.msk.f32.mxu0 %vm4750_vm14, %v4706_v50  ;;  %v4255_v20 = vpop.permute.xlu1 %4254  ;;  %v4576_v11 = vsel %vm4574_vm11, %v4543_v51, %v3871_v18  ;;  %v3431_v50 = vld [vmem:[#allocation3 + $0xb2] sm:$0xff]  ;;  %v4511_v51 = vsel %vm4508_vm8, %v4478_v13, %v13574_v27 }
 0x388   : > { %v4609_v14 = vsel %vm4607_vm10, %v4576_v11, %v3999_v42  ;;  %v4544_v11 = vsel %vm4541_vm9, %v4511_v51, %v13587_v31  ;;  %v13694_v51 = vld [vmem:[#allocation3 + $0xc8] sm:$0xff] }
 0x389   : > { %v4001_v44 = vpop.permute.xlu0 %4000  ;;  %3888 = vrot.lane.b32.xlu1 %v13168_v47, %s10677_s25  ;;  %v4642_v47 = vsel %vm4640_vm12, %v4609_v14, %v4127_v63 }
 0x38a   : > { %v4675_v29 = vsel %vm4673_vm13, %v4642_v47, %v4255_v20  ;;  %v4577_v47 = vsel %vm4574_vm11, %v4544_v11, %v3873_v17 }
 0x38b   : > { %4018 = vrot.lane.b32.xlu0 %v13591_v36, %s10678_s26  ;;  %v3875_v23 = vpop.permute.xlu1 %3874 }
 0x38d   : > { %v13630_v9 = vpop.permute.xlu0 %3620  ;;  %4016 = vrot.lane.b32.xlu1 %v13599_v40, %s10678_s26 }
 0x38f   : > { %4146 = vrot.lane.b32.xlu0 %v13632_v19, %s10679_s27  ;;  %v4383_v6 = vpop.permute.xlu1 %4382 }
 0x390   : > { %v4707_v18 = vsel %vm445_vm6, %v4675_v29, %v4383_v6  ;;  %v4610_v29 = vsel %vm4607_vm10, %v4577_v47, %v4001_v44  ;;  %v3303_v44 = vld [vmem:[#allocation3 + $0xa9] sm:$0xff]  ;;  %v4479_v6 = vsel %vm389_vm2, %v13299_v16, %v13476_v26 }
 0x391   : > { %v4129_v49 = vpop.permute.xlu0 %4128  ;;  %4144 = vrot.lane.b32.xlu1 %v13641_v8, %s10679_s27  ;;  %9374 = vmatmul.mubr.msk.f32.vlgmr.msra.gmra.mrb[0].mxu0 %vm4750_vm14, %v4707_v18  ;;  %v4512_v18 = vsel %vm4508_vm8, %v4479_v6, %v13595_v53 }
 0x392   : > { %v4643_v43 = vsel %vm4640_vm12, %v4610_v29, %v4129_v49  ;;  %v4545_v49 = vsel %vm4541_vm9, %v4512_v18, %v13612_v10  ;;  %v13702_v10 = vld [vmem:[#allocation3 + $0xc0] sm:$0xff] }
 0x393   : > { %4274 = vrot.lane.b32.xlu0 %v13221_v1, %s10680_s18  ;;  %v4003_v63 = vpop.permute.xlu1 %4002  ;;  %v3400_v29 = vld [vmem:[#allocation3 + $0xc1] sm:$0xff] }
 0x395   : > { %v13649_v42 = vpop.permute.xlu0 %3748  ;;  %4272 = vrot.lane.b32.xlu1 %v13192_v54, %s10680_s18 }
 0x397   : > { %4402 = vrot.lane.b32.xlu0 %v3431_v50, %s10681_s22  ;;  %v13654_v0 = vpop.permute.xlu1 %3622 }
 0x399   : > { %v4257_v20 = vpop.permute.xlu0 %4256  ;;  %4400 = vrot.lane.b32.xlu1 %v3430_v3, %s10681_s22 }
 0x39a   : > { %v4676_v27 = vsel %vm4673_vm13, %v4643_v43, %v4257_v20  ;;  %v4578_v20 = vsel %vm4574_vm11, %v4545_v49, %v3875_v23  ;;  %v13713_v43 = vld [vmem:[#allocation3 + $0xca] sm:$0xff] }
 0x39b   : > { %3638 = vrot.lane.b32.xlu0 %v13591_v36, %s10675_s23  ;;  %v4131_v54 = vpop.permute.xlu1 %4130  ;;  %v4611_v11 = vsel %vm4607_vm10, %v4578_v20, %v4003_v63 }
 0x39c   : > { %v4644_v16 = vsel %vm4640_vm12, %v4611_v11, %v4131_v54 }
 0x39d   : > { %v3877_v14 = vpop.permute.xlu0 %3876  ;;  %3636 = vrot.lane.b32.xlu1 %v13599_v40, %s10675_s23 }
 0x39f   : > { %3766 = vrot.lane.b32.xlu0 %v13632_v19, %s10676_s24  ;;  %v13673_v30 = vpop.permute.xlu1 %3750 }
 0x3a1   : > { %v4385_v36 = vpop.permute.xlu0 %4384  ;;  %3764 = vrot.lane.b32.xlu1 %v13641_v8, %s10676_s24 }
 0x3a2   : > { %v4708_v31 = vsel %vm445_vm6, %v4676_v27, %v4385_v36 }
 0x3a3   : > { %3894 = vrot.lane.b32.xlu0 %v13221_v1, %s10677_s25  ;;  %9376 = vmatprep.mubr.msk.f32.mxu0 %vm4750_vm14, %v4708_v31  ;;  %v4259_v40 = vpop.permute.xlu1 %4258  ;;  %v13717_v31 = vld [vmem:[#allocation3 + $0xc2] sm:$0xff] }
 0x3a4   : > { %v4677_v26 = vsel %vm4673_vm13, %v4644_v16, %v4259_v40 }
 0x3a5   : > { %v4005_v17 = vpop.permute.xlu0 %4004  ;;  %3892 = vrot.lane.b32.xlu1 %v3303_v44, %s10677_s25 }
 0x3a7   : > { %4022 = vrot.lane.b32.xlu0 %v3431_v50, %s10678_s26  ;;  %v3879_v1 = vpop.permute.xlu1 %3878 }
 0x3a9   : > { %v13692_v13 = vpop.permute.xlu0 %3624  ;;  %4020 = vrot.lane.b32.xlu1 %v3430_v3, %s10678_s26 }
 0x3ab   : > { %4150 = vrot.lane.b32.xlu0 %v13694_v51, %s10679_s27  ;;  %v4387_v53 = vpop.permute.xlu1 %4386 }
 0x3ac   : > { %v4709_v23 = vsel %vm445_vm6, %v4677_v26, %v4387_v53 }
 0x3ad   : > { %v4133_v47 = vpop.permute.xlu0 %4132  ;;  %4148 = vrot.lane.b32.xlu1 %v13702_v10, %s10679_s27  ;;  %9377 = vmatmul.mubr.msk.f32.gmra.mrb[2].mxu0 %vm4750_vm14, %v4709_v23 }
 0x3af   : > { %4278 = vrot.lane.b32.xlu0 %v13245_v24, %s10680_s18  ;;  %v4007_v63 = vpop.permute.xlu1 %4006  ;;  %v4480_v24 = vsel %vm389_vm2, %v13314_v34, %v13471_v62 }
 0x3b0   : > { %v4513_v40 = vsel %vm4508_vm8, %v4480_v24, %v13630_v9 }
 0x3b1   : > { %v13710_v54 = vpop.permute.xlu0 %3752  ;;  %4276 = vrot.lane.b32.xlu1 %v3400_v29, %s10680_s18  ;;  %v4546_v6 = vsel %vm4541_vm9, %v4513_v40, %v13649_v42  ;;  %v3306_v42 = vld [vmem:[#allocation3 + $0xc9] sm:$0xff] }
 0x3b2   : > { %v4579_v49 = vsel %vm4574_vm11, %v4546_v6, %v3877_v14 }
 0x3b3   : > { %4406 = vrot.lane.b32.xlu0 %v13713_v43, %s10681_s22  ;;  %v3627_v27 = vpop.permute.xlu1 %3626  ;;  %v4612_v20 = vsel %vm4607_vm10, %v4579_v49, %v4005_v17  ;;  %v4481_v17 = vsel %vm389_vm2, %v13424_v41, %v13485_v58  ;;  %v3402_v49 = vld [vmem:[#allocation3 + $0xd9] sm:$0xff] }
 0x3b4   : > { %v4645_v34 = vsel %vm4640_vm12, %v4612_v20, %v4133_v47  ;;  %v4514_v16 = vsel %vm4508_vm8, %v4481_v17, %v13654_v0  ;;  %v4482_v20 = vsel %vm389_vm2, %v13443_v46, %v13478_v48 }
 0x3b5   : > { %v4261_v36 = vpop.permute.xlu0 %4260  ;;  %4404 = vrot.lane.b32.xlu1 %v13717_v31, %s10681_s22  ;;  %v4547_v26 = vsel %vm4541_vm9, %v4514_v16, %v13673_v30  ;;  %v13761_v30 = vld [vmem:[#allocation3 + $0xd8] sm:$0xff] }
 0x3b6   : > { %v4580_v23 = vsel %vm4574_vm11, %v4547_v26, %v3879_v1 }
 0x3b7   : > { %3642 = vrot.lane.b32.xlu0 %v3431_v50, %s10675_s23  ;;  %v4135_v44 = vpop.permute.xlu1 %4134  ;;  %v4678_v50 = vsel %vm4673_vm13, %v4645_v34, %v4261_v36  ;;  %v13752_v36 = vld [vmem:[#allocation3 + $0xe0] sm:$0xff]  ;;  %v4613_v24 = vsel %vm4607_vm10, %v4580_v23, %v4007_v63 }
 0x3b8   : > { %v4646_v41 = vsel %vm4640_vm12, %v4613_v24, %v4135_v44  ;;  %v3403_v63 = vld [vmem:[#allocation3 + $0xe1] sm:$0xff]  ;;  %v4483_v44 = vsel %vm389_vm2, %v13453_v28, %v13492_v45 }
 0x3b9   : > { %v3881_v18 = vpop.permute.xlu0 %3880  ;;  %3640 = vrot.lane.b32.xlu1 %v3430_v3, %s10675_s23  ;;  %v4516_v34 = vsel %vm4508_vm8, %v4483_v44, %v3627_v27 }
 0x3bb   : > { %3770 = vrot.lane.b32.xlu0 %v13694_v51, %s10676_s24  ;;  %v3755_v62 = vpop.permute.xlu1 %3754 }
 0x3bd   : > { %v4389_v9 = vpop.permute.xlu0 %4388  ;;  %3768 = vrot.lane.b32.xlu1 %v13702_v10, %s10676_s24 }
 0x3be   : > { %v4710_v11 = vsel %vm445_vm6, %v4678_v50, %v4389_v9  ;;  %v13776_v50 = vld [vmem:[#allocation3 + $0xe2] sm:$0xff]  ;;  %v4515_v9 = vsel %vm4508_vm8, %v4482_v20, %v13692_v13  ;;  %v13872_v20 = vld [vmem:[#allocation3 + $0xfa] sm:$0xff] }
 0x3bf   : > { %3898 = vrot.lane.b32.xlu0 %v3306_v42, %s10677_s25  ;;  %9379 = vmatprep.mubr.msk.f32.mxu0 %vm4750_vm14, %v4710_v11  ;;  %v4263_v3 = vpop.permute.xlu1 %4262  ;;  %v4549_v11 = vsel %vm4541_vm9, %v4516_v34, %v3755_v62  ;;  %v4548_v28 = vsel %vm4541_vm9, %v4515_v9, %v13710_v54  ;;  %v13787_v42 = vld [vmem:[#allocation3 + $0xda] sm:$0xff]  ;;  %v4485_v34 = vsel %vm389_vm2, %v13501_v12, %v13499_v38 }
 0x3c0   : > { %v4679_v58 = vsel %vm4673_vm13, %v4646_v41, %v4263_v3  ;;  %v4581_v48 = vsel %vm4574_vm11, %v4548_v28, %v3881_v18 }
 0x3c1   : > { %v4009_v14 = vpop.permute.xlu0 %4008  ;;  %3896 = vrot.lane.b32.xlu1 %v3400_v29, %s10677_s25 }
 0x3c2   : > { %v4614_v3 = vsel %vm4607_vm10, %v4581_v48, %v4009_v14  ;;  %v13884_v48 = vld [vmem:[#allocation3 + $0xf2] sm:$0xff] }
 0x3c3   : > { %4026 = vrot.lane.b32.xlu0 %v13713_v43, %s10678_s26  ;;  %v3883_v53 = vpop.permute.xlu1 %3882 }
 0x3c4   : > { %v4582_v45 = vsel %vm4574_vm11, %v4549_v11, %v3883_v53 }
 0x3c5   : > { %v4011_v47 = vpop.permute.xlu0 %4010  ;;  %4024 = vrot.lane.b32.xlu1 %v13717_v31, %s10678_s26 }
 0x3c6   : > { %v4615_v13 = vsel %vm4607_vm10, %v4582_v45, %v4011_v47 }
 0x3c7   : > { %4154 = vrot.lane.b32.xlu0 %v13752_v36, %s10679_s27  ;;  %v4391_v0 = vpop.permute.xlu1 %4390 }
 0x3c8   : > { %v4711_v1 = vsel %vm445_vm6, %v4679_v58, %v4391_v0  ;;  %v13813_v58 = vld [vmem:[#allocation3 + $0xf8] sm:$0xff] }
 0x3c9   : > { %v4139_v29 = vpop.permute.xlu0 %4138  ;;  %4152 = vrot.lane.b32.xlu1 %v13761_v30, %s10679_s27  ;;  %9380 = vmatmul.mubr.msk.f32.gmra.mrb[4].mxu0 %vm4750_vm14, %v4711_v1  ;;  %v13819_v1 = vld [vmem:[#allocation3 + $0xf0] sm:$0xff] }
 0x3ca   : > { %v4648_v54 = vsel %vm4640_vm12, %v4615_v13, %v4139_v29 }
 0x3cb   : > { %4282 = vrot.lane.b32.xlu0 %v3403_v63, %s10680_s18  ;;  %v4137_v40 = vpop.permute.xlu1 %4136 }
 0x3cc   : > { %v4647_v62 = vsel %vm4640_vm12, %v4614_v3, %v4137_v40 }
 0x3cd   : > { %v4267_v6 = vpop.permute.xlu0 %4266  ;;  %4280 = vrot.lane.b32.xlu1 %v3402_v49, %s10680_s18 }
 0x3ce   : > { %v4681_v16 = vsel %vm4673_vm13, %v4648_v54, %v4267_v6  ;;  %v3404_v6 = vld [vmem:[#allocation3 + $0xf1] sm:$0xff] }
 0x3cf   : > { %4410 = vrot.lane.b32.xlu0 %v13776_v50, %s10681_s22  ;;  %v4265_v46 = vpop.permute.xlu1 %4264 }
 0x3d0   : > { %v4680_v17 = vsel %vm4673_vm13, %v4647_v62, %v4265_v46 }
 0x3d1   : > { %v4395_v27 = vpop.permute.xlu0 %4394  ;;  %4408 = vrot.lane.b32.xlu1 %v13787_v42, %s10681_s22 }
 0x3d2   : > { %v4713_v53 = vsel %vm445_vm6, %v4681_v16, %v4395_v27 }
 0x3d3   : > { %3646 = vrot.lane.b32.xlu0 %v13713_v43, %s10675_s23  ;;  %v4393_v18 = vpop.permute.xlu1 %4392 }
 0x3d4   : > { %v4712_v26 = vsel %vm445_vm6, %v4680_v17, %v4393_v18 }
 0x3d5   : > { %v3631_v14 = vpop.permute.xlu0 %3630  ;;  %3644 = vrot.lane.b32.xlu1 %v13717_v31, %s10675_s23  ;;  %9382 = vmatprep.mubr.msk.f32.mxu0 %vm4750_vm14, %v4712_v26 }
 0x3d6   : > { %9383 = vmatmul.mubr.msk.f32.gmra.mrb[6].mxu0 %vm4750_vm14, %v4713_v53  ;;  %v4518_v11 = vsel %vm4508_vm8, %v4485_v34, %v3631_v14 }
 0x3d7   : > { %3774 = vrot.lane.b32.xlu0 %v13752_v36, %s10676_s24  ;;  %v3629_v43 = vpop.permute.xlu1 %3628 }
 0x3d9   : > { %v3759_v23 = vpop.permute.xlu0 %3758  ;;  %3772 = vrot.lane.b32.xlu1 %v13761_v30, %s10676_s24 }
 0x3db   : > { %3902 = vrot.lane.b32.xlu0 %v3403_v63, %s10677_s25  ;;  %v3757_v47 = vpop.permute.xlu1 %3756  ;;  %v3405_v63 = vld [vmem:[#allocation3 + $0xf9] sm:$0xff] }
 0x3dd   : > { %v3887_v24 = vpop.permute.xlu0 %3886  ;;  %3900 = vrot.lane.b32.xlu1 %v3402_v49, %s10677_s25  ;;  %v4484_v49 = vsel %vm389_vm2, %v13481_v59, %v13487_v25  ;;  %v4551_v59 = vsel %vm4541_vm9, %v4518_v11, %v3759_v23 }
 0x3de   : > { %v4517_v9 = vsel %vm4508_vm8, %v4484_v49, %v3629_v43  ;;  %v4584_v27 = vsel %vm4574_vm11, %v4551_v59, %v3887_v24  ;;  %v4487_v49 = vsel %vm389_vm2, %v13534_v5, %v13509_v61  ;;  %v13938_v59 = vld [vmem:[#allocation3 + $0x10a] sm:$0xff] }
 0x3df   : > { %4030 = vrot.lane.b32.xlu0 %v13776_v50, %s10678_s26  ;;  %v3885_v31 = vpop.permute.xlu1 %3884  ;;  %v4550_v28 = vsel %vm4541_vm9, %v4517_v9, %v3757_v47  ;;  %v13911_v47 = vld [vmem:[#allocation3 + $0x110] sm:$0xff] }
 0x3e0   : > { %v4583_v25 = vsel %vm4574_vm11, %v4550_v28, %v3885_v31  ;;  %v13917_v31 = vld [vmem:[#allocation3 + $0x108] sm:$0xff] }
 0x3e1   : > { %v4015_v41 = vpop.permute.xlu0 %4014  ;;  %4028 = vrot.lane.b32.xlu1 %v13787_v42, %s10678_s26 }
 0x3e2   : > { %v4617_v12 = vsel %vm4607_vm10, %v4584_v27, %v4015_v41 }
 0x3e3   : > { %4158 = vrot.lane.b32.xlu0 %v13813_v58, %s10679_s27  ;;  %v4013_v0 = vpop.permute.xlu1 %4012 }
 0x3e4   : > { %v4616_v38 = vsel %vm4607_vm10, %v4583_v25, %v4013_v0  ;;  %v3407_v0 = vld [vmem:[#allocation3 + $0x111] sm:$0xff] }
 0x3e5   : > { %v4143_v29 = vpop.permute.xlu0 %4142  ;;  %4156 = vrot.lane.b32.xlu1 %v13819_v1, %s10679_s27 }
 0x3e6   : > { %v4650_v13 = vsel %vm4640_vm12, %v4617_v12, %v4143_v29 }
 0x3e7   : > { %4286 = vrot.lane.b32.xlu0 %v3405_v63, %s10680_s18  ;;  %v4141_v40 = vpop.permute.xlu1 %4140 }
 0x3e8   : > { %v4649_v3 = vsel %vm4640_vm12, %v4616_v38, %v4141_v40  ;;  %v3406_v40 = vld [vmem:[#allocation3 + $0x109] sm:$0xff] }
 0x3e9   : > { %v4271_v44 = vpop.permute.xlu0 %4270  ;;  %4284 = vrot.lane.b32.xlu1 %v3404_v6, %s10680_s18 }
 0x3ea   : > { %v4683_v17 = vsel %vm4673_vm13, %v4650_v13, %v4271_v44  ;;  %v4486_v44 = vsel %vm389_vm2, %v13541_v32, %v13494_v4 }
 0x3eb   : > { %4414 = vrot.lane.b32.xlu0 %v13872_v20, %s10681_s22  ;;  %v4269_v45 = vpop.permute.xlu1 %4268 }
 0x3ec   : > { %v4682_v62 = vsel %vm4673_vm13, %v4649_v3, %v4269_v45 }
 0x3ed   : > { %v4399_v46 = vpop.permute.xlu0 %4398  ;;  %4412 = vrot.lane.b32.xlu1 %v13884_v48, %s10681_s22 }
 0x3ee   : > { %v4715_v26 = vsel %vm445_vm6, %v4683_v17, %v4399_v46 }
 0x3ef   : > { %3650 = vrot.lane.b32.xlu0 %v13776_v50, %s10675_s23  ;;  %v4397_v54 = vpop.permute.xlu1 %4396 }
 0x3f0   : > { %v4714_v18 = vsel %vm445_vm6, %v4682_v62, %v4397_v54 }
 0x3f1   : > { %v3635_v16 = vpop.permute.xlu0 %3634  ;;  %3648 = vrot.lane.b32.xlu1 %v13787_v42, %s10675_s23  ;;  %9385 = vmatprep.mubr.msk.f32.mxu0 %vm4750_vm14, %v4714_v18 }
 0x3f2   : > { %9386 = vmatmul.mubr.msk.f32.gmra.mrb[8].mxu0 %vm4750_vm14, %v4715_v26  ;;  %v4520_v9 = vsel %vm4508_vm8, %v4487_v49, %v3635_v16 }
 0x3f3   : > { %3778 = vrot.lane.b32.xlu0 %v13813_v58, %s10676_s24  ;;  %v3633_v50 = vpop.permute.xlu1 %3632 }
 0x3f4   : > { %v4519_v34 = vsel %vm4508_vm8, %v4486_v44, %v3633_v50  ;;  %v3188_v50 = vld [vmem:[#allocation3 + $0x128] sm:$0xff] }
 0x3f5   : > { %v3763_v14 = vpop.permute.xlu0 %3762  ;;  %3776 = vrot.lane.b32.xlu1 %v13819_v1, %s10676_s24 }
 0x3f6   : > { %v4553_v4 = vsel %vm4541_vm9, %v4520_v9, %v3763_v14 }
 0x3f7   : > { %3906 = vrot.lane.b32.xlu0 %v3405_v63, %s10677_s25  ;;  %v3761_v53 = vpop.permute.xlu1 %3760 }
 0x3f8   : > { %v4552_v11 = vsel %vm4541_vm9, %v4519_v34, %v3761_v53  ;;  %v3187_v53 = vld [vmem:[#allocation3 + $0x120] sm:$0xff] }
 0x3f9   : > { %v3891_v43 = vpop.permute.xlu0 %3890  ;;  %3904 = vrot.lane.b32.xlu1 %v3404_v6, %s10677_s25  ;;  %v13926_v6 = vld [vmem:[#allocation3 + $0x112] sm:$0xff] }
 0x3fa   : > { %v4586_v25 = vsel %vm4574_vm11, %v4553_v4, %v3891_v43 }
 0x3fb   : > { %4034 = vrot.lane.b32.xlu0 %v13872_v20, %s10678_s26  ;;  %v3889_v42 = vpop.permute.xlu1 %3888 }
 0x3fc   : > { %v4585_v32 = vsel %vm4574_vm11, %v4552_v11, %v3889_v42  ;;  %v3409_v42 = vld [vmem:[#allocation3 + $0x129] sm:$0xff] }
 0x3fd   : > { %v4019_v23 = vpop.permute.xlu0 %4018  ;;  %4032 = vrot.lane.b32.xlu1 %v13884_v48, %s10678_s26  ;;  %v13986_v11 = vld [vmem:[#allocation3 + $0x122] sm:$0xff] }
 0x3fe   : > { %v4619_v5 = vsel %vm4607_vm10, %v4586_v25, %v4019_v23 }
 0x3ff   : > { %4162 = vrot.lane.b32.xlu0 %v13911_v47, %s10679_s27  ;;  %v4017_v24 = vpop.permute.xlu1 %4016 }
 0x400   : > { %v4618_v61 = vsel %vm4607_vm10, %v4585_v32, %v4017_v24 }
 0x401   : > { %v4147_v41 = vpop.permute.xlu0 %4146  ;;  %4160 = vrot.lane.b32.xlu1 %v13917_v31, %s10679_s27 }
 0x402   : > { %v4652_v27 = vsel %vm4640_vm12, %v4619_v5, %v4147_v41  ;;  %v3408_v41 = vld [vmem:[#allocation3 + $0x121] sm:$0xff] }
 0x403   : > { %4290 = vrot.lane.b32.xlu0 %v3407_v0, %s10680_s18  ;;  %v4145_v29 = vpop.permute.xlu1 %4144 }
 0x404   : > { %v4651_v46 = vsel %vm4640_vm12, %v4618_v61, %v4145_v29  ;;  %v13974_v29 = vld [vmem:[#allocation3 + $0x12a] sm:$0xff] }
 0x405   : > { %v4275_v63 = vpop.permute.xlu0 %4274  ;;  %4288 = vrot.lane.b32.xlu1 %v3406_v40, %s10680_s18 }
 0x406   : > { %v4685_v3 = vsel %vm4673_vm13, %v4652_v27, %v4275_v63  ;;  %v4489_v63 = vsel %vm389_vm2, %v13576_v22, %v13516_v33 }
 0x407   : > { %4418 = vrot.lane.b32.xlu0 %v13926_v6, %s10681_s22  ;;  %v4273_v28 = vpop.permute.xlu1 %4272 }
 0x408   : > { %v4684_v38 = vsel %vm4673_vm13, %v4651_v46, %v4273_v28 }
 0x409   : > { %v4403_v45 = vpop.permute.xlu0 %4402  ;;  %4416 = vrot.lane.b32.xlu1 %v13938_v59, %s10681_s22 }
 0x40a   : > { %v4717_v54 = vsel %vm445_vm6, %v4685_v3, %v4403_v45 }
 0x40b   : > { %3654 = vrot.lane.b32.xlu0 %v13872_v20, %s10675_s23  ;;  %v4401_v12 = vpop.permute.xlu1 %4400 }
 0x40c   : > { %v4716_v13 = vsel %vm445_vm6, %v4684_v38, %v4401_v12 }
 0x40d   : > { %v3639_v62 = vpop.permute.xlu0 %3638  ;;  %3652 = vrot.lane.b32.xlu1 %v13884_v48, %s10675_s23  ;;  %9388 = vmatprep.mubr.msk.f32.mxu0 %vm4750_vm14, %v4716_v13 }
 0x40e   : > { %9389 = vmatmul.mubr.msk.f32.gmra.mrb[10].mxu0 %vm4750_vm14, %v4717_v54  ;;  %v4522_v44 = vsel %vm4508_vm8, %v4489_v63, %v3639_v62  ;;  %v3379_v62 = vld [vmem:[#allocation3 + $0x140] sm:$0xff] }
 0x40f   : > { %3782 = vrot.lane.b32.xlu0 %v13911_v47, %s10676_s24  ;;  %v3637_v20 = vpop.permute.xlu1 %3636 }
 0x411   : > { %v3767_v17 = vpop.permute.xlu0 %3766  ;;  %3780 = vrot.lane.b32.xlu1 %v13917_v31, %s10676_s24 }
 0x413   : > { %3910 = vrot.lane.b32.xlu0 %v3407_v0, %s10677_s25  ;;  %v3765_v18 = vpop.permute.xlu1 %3764  ;;  %v4488_v0 = vsel %vm389_vm2, %v13581_v39, %v13503_v55  ;;  %v4555_v55 = vsel %vm4541_vm9, %v4522_v44, %v3767_v17  ;;  %v3378_v17 = vld [vmem:[#allocation3 + $0x138] sm:$0xff] }
 0x415   : > { %v3895_v16 = vpop.permute.xlu0 %3894  ;;  %3908 = vrot.lane.b32.xlu1 %v3406_v40, %s10677_s25  ;;  %v4521_v40 = vsel %vm4508_vm8, %v4488_v0, %v3637_v20  ;;  %v3442_v0 = vld [vmem:[#allocation3 + $0x13a] sm:$0xff] }
 0x416   : > { %v4554_v49 = vsel %vm4541_vm9, %v4521_v40, %v3765_v18  ;;  %v4588_v28 = vsel %vm4574_vm11, %v4555_v55, %v3895_v16  ;;  %v14015_v18 = vld [vmem:[#allocation3 + $0x141] sm:$0xff] }
 0x417   : > { %4038 = vrot.lane.b32.xlu0 %v13926_v6, %s10678_s26  ;;  %v3893_v48 = vpop.permute.xlu1 %3892 }
 0x418   : > { %v4587_v39 = vsel %vm4574_vm11, %v4554_v49, %v3893_v48 }
 0x419   : > { %v4023_v26 = vpop.permute.xlu0 %4022  ;;  %4036 = vrot.lane.b32.xlu1 %v13938_v59, %s10678_s26 }
 0x41a   : > { %v4621_v22 = vsel %vm4607_vm10, %v4588_v28, %v4023_v26  ;;  %v3410_v26 = vld [vmem:[#allocation3 + $0x139] sm:$0xff] }
 0x41b   : > { %4166 = vrot.lane.b32.xlu0 %v3188_v50, %s10679_s27  ;;  %v4021_v14 = vpop.permute.xlu1 %4020 }
 0x41c   : > { %v4620_v33 = vsel %vm4607_vm10, %v4587_v39, %v4021_v14  ;;  %v14023_v14 = vld [vmem:[#allocation3 + $0x142] sm:$0xff] }
 0x41d   : > { %v4151_v43 = vpop.permute.xlu0 %4150  ;;  %4164 = vrot.lane.b32.xlu1 %v3187_v53, %s10679_s27 }
 0x41e   : > { %v4654_v32 = vsel %vm4640_vm12, %v4621_v22, %v4151_v43 }
 0x41f   : > { %4294 = vrot.lane.b32.xlu0 %v3409_v42, %s10680_s18  ;;  %v4149_v23 = vpop.permute.xlu1 %4148 }
 0x420   : > { %v4653_v4 = vsel %vm4640_vm12, %v4620_v33, %v4149_v23 }
 0x421   : > { %v4279_v24 = vpop.permute.xlu0 %4278  ;;  %4292 = vrot.lane.b32.xlu1 %v3408_v41, %s10680_s18 }
 0x422   : > { %v4687_v61 = vsel %vm4673_vm13, %v4654_v32, %v4279_v24 }
 0x423   : > { %4422 = vrot.lane.b32.xlu0 %v13974_v29, %s10681_s22  ;;  %v4277_v34 = vpop.permute.xlu1 %4276 }
 0x424   : > { %v4686_v45 = vsel %vm4673_vm13, %v4653_v4, %v4277_v34 }
 0x425   : > { %v4407_v9 = vpop.permute.xlu0 %4406  ;;  %4420 = vrot.lane.b32.xlu1 %v13986_v11, %s10681_s22 }
 0x426   : > { %v4719_v27 = vsel %vm445_vm6, %v4687_v61, %v4407_v9 }
 0x427   : > { %3658 = vrot.lane.b32.xlu0 %v13926_v6, %s10675_s23  ;;  %v4405_v25 = vpop.permute.xlu1 %4404 }
 0x428   : > { %v4718_v5 = vsel %vm445_vm6, %v4686_v45, %v4405_v25  ;;  %v3381_v45 = vld [vmem:[#allocation3 + $0x158] sm:$0xff] }
 0x429   : > { %v3643_v46 = vpop.permute.xlu0 %3642  ;;  %3656 = vrot.lane.b32.xlu1 %v13938_v59, %s10675_s23  ;;  %9391 = vmatprep.mubr.msk.f32.mxu0 %vm4750_vm14, %v4718_v5  ;;  %v3380_v5 = vld [vmem:[#allocation3 + $0x150] sm:$0xff] }
 0x42a   : > { %9392 = vmatmul.mubr.msk.f32.gmra.mrb[12].mxu0 %vm4750_vm14, %v4719_v27 }
 0x42b   : > { %3786 = vrot.lane.b32.xlu0 %v3188_v50, %s10676_s24  ;;  %v3641_v6 = vpop.permute.xlu1 %3640  ;;  %v4490_v50 = vsel %vm389_vm2, %v13641_v8, %v13511_v2 }
 0x42c   : > { %v4523_v43 = vsel %vm4508_vm8, %v4490_v50, %v3641_v6 }
 0x42d   : > { %v3771_v38 = vpop.permute.xlu0 %3770  ;;  %3784 = vrot.lane.b32.xlu1 %v3187_v53, %s10676_s24  ;;  %v4491_v53 = vsel %vm389_vm2, %v13632_v19, %v13523_v52 }
 0x42f   : > { %3914 = vrot.lane.b32.xlu0 %v3409_v42, %s10677_s25  ;;  %v3769_v12 = vpop.permute.xlu1 %3768  ;;  %v4524_v42 = vsel %vm4508_vm8, %v4491_v53, %v3643_v46  ;;  %v14061_v46 = vld [vmem:[#allocation3 + $0x159] sm:$0xff] }
 0x430   : > { %v4556_v23 = vsel %vm4541_vm9, %v4523_v43, %v3769_v12  ;;  %v4557_v2 = vsel %vm4541_vm9, %v4524_v42, %v3771_v38  ;;  %v14065_v38 = vld [vmem:[#allocation3 + $0x151] sm:$0xff]  ;;  %v4492_v12 = vsel %vm389_vm2, %v13702_v10, %v13518_v56 }
 0x431   : > { %v3899_v3 = vpop.permute.xlu0 %3898  ;;  %3912 = vrot.lane.b32.xlu1 %v3408_v41, %s10677_s25 }
 0x432   : > { %v4590_v63 = vsel %vm4574_vm11, %v4557_v2, %v3899_v3  ;;  %v14072_v3 = vld [vmem:[#allocation3 + $0x15a] sm:$0xff] }
 0x433   : > { %4042 = vrot.lane.b32.xlu0 %v13974_v29, %s10678_s26  ;;  %v3897_v59 = vpop.permute.xlu1 %3896 }
 0x434   : > { %v4589_v8 = vsel %vm4574_vm11, %v4556_v23, %v3897_v59  ;;  %v4493_v59 = vsel %vm389_vm2, %v13694_v51, %v13530_v60 }
 0x435   : > { %v4027_v13 = vpop.permute.xlu0 %4026  ;;  %4040 = vrot.lane.b32.xlu1 %v13986_v11, %s10678_s26 }
 0x436   : > { %v4623_v19 = vsel %vm4607_vm10, %v4590_v63, %v4027_v13 }
 0x437   : > { %4170 = vrot.lane.b32.xlu0 %v3379_v62, %s10679_s27  ;;  %v4025_v54 = vpop.permute.xlu1 %4024 }
 0x438   : > { %v4622_v52 = vsel %vm4607_vm10, %v4589_v8, %v4025_v54  ;;  %v14106_v8 = vld [vmem:[%s16572_s4] ss:$0 sm:$0xff] }
 0x439   : > { %v4155_v20 = vpop.permute.xlu0 %4154  ;;  %4168 = vrot.lane.b32.xlu1 %v3378_v17, %s10679_s27 }
 0x43a   : > { %v4656_v44 = vsel %vm4640_vm12, %v4623_v19, %v4155_v20 }
 0x43b   : > { %4298 = vrot.lane.b32.xlu0 %v14015_v18, %s10680_s18  ;;  %v4153_v16 = vpop.permute.xlu1 %4152 }
 0x43c   : > { %v4655_v40 = vsel %vm4640_vm12, %v4622_v52, %v4153_v16  ;;  %v14084_v16 = vld [vmem:[#allocation3 + $0x152] sm:$0xff] }
 0x43d   : > { %v4283_v48 = vpop.permute.xlu0 %4282  ;;  %4296 = vrot.lane.b32.xlu1 %v3410_v26, %s10680_s18 }
 0x43e   : > { %v4689_v55 = vsel %vm4673_vm13, %v4656_v44, %v4283_v48 }
 0x43f   : > { %4426 = vrot.lane.b32.xlu0 %v14023_v14, %s10681_s22  ;;  %v4281_v24 = vpop.permute.xlu1 %4280 }
 0x440   : > { %v4688_v49 = vsel %vm4673_vm13, %v4655_v40, %v4281_v24 }
 0x441   : > { %v4411_v41 = vpop.permute.xlu0 %4410  ;;  %4424 = vrot.lane.b32.xlu1 %v3442_v0, %s10681_s22 }
 0x442   : > { %v4721_v28 = vsel %vm445_vm6, %v4689_v55, %v4411_v41 }
 0x443   : > { %3662 = vrot.lane.b32.xlu0 %v13974_v29, %s10675_s23  ;;  %v4409_v34 = vpop.permute.xlu1 %4408 }
 0x444   : > { %v4720_v39 = vsel %vm445_vm6, %v4688_v49, %v4409_v34 }
 0x445   : > { %v3647_v9 = vpop.permute.xlu0 %3646  ;;  %3660 = vrot.lane.b32.xlu1 %v13986_v11, %s10675_s23  ;;  %9394 = vmatprep.mubr.msk.f32.mxu0 %vm4750_vm14, %v4720_v39 }
 0x446   : > { %9395 = vmatmul.mubr.msk.f32.gmra.mrb[14].mxu0 %vm4750_vm14, %v4721_v28  ;;  %v3382_v28 = vld [vmem:[#allocation3 + $0x168] sm:$0xff] }
 0x447   : > { %3790 = vrot.lane.b32.xlu0 %v3379_v62, %s10676_s24  ;;  %v3645_v29 = vpop.permute.xlu1 %3644  ;;  %v4526_v62 = vsel %vm4508_vm8, %v4493_v59, %v3647_v9 }
 0x448   : > { %v4525_v13 = vsel %vm4508_vm8, %v4492_v12, %v3645_v29 }
 0x449   : > { %v3775_v33 = vpop.permute.xlu0 %3774  ;;  %3788 = vrot.lane.b32.xlu1 %v3378_v17, %s10676_s24 }
 0x44a   : > { %v4559_v56 = vsel %vm4541_vm9, %v4526_v62, %v3775_v33 }
 0x44b   : > { %3918 = vrot.lane.b32.xlu0 %v14015_v18, %s10677_s25  ;;  %v3773_v22 = vpop.permute.xlu1 %3772 }
 0x44c   : > { %v4558_v54 = vsel %vm4541_vm9, %v4525_v13, %v3773_v22  ;;  %v14124_v22 = vld [vmem:[#allocation3 + $0x169] sm:$0xff]  ;;  %v14147_v13 = vld [vmem:[#allocation3 + $0x171] sm:$0xff] }
 0x44d   : > { %v3903_v4 = vpop.permute.xlu0 %3902  ;;  %3916 = vrot.lane.b32.xlu1 %v3410_v26, %s10677_s25 }
 0x44e   : > { %v4592_v48 = vsel %vm4574_vm11, %v4559_v56, %v3903_v4  ;;  %v6456_v56 = vld [vmem:[%s16573_s5 + $0x8] sm:$0xff] }
 0x44f   : > { %4046 = vrot.lane.b32.xlu0 %v14023_v14, %s10678_s26  ;;  %v3901_v11 = vpop.permute.xlu1 %3900 }
 0x450   : > { %v4591_v10 = vsel %vm4574_vm11, %v4558_v54, %v3901_v11  ;;  %v10682_v54 = vmov 0.0|0.0  }
 0x451   : > { %v4031_v32 = vpop.permute.xlu0 %4030  ;;  %4044 = vrot.lane.b32.xlu1 %v3442_v0, %s10678_s26  ;;  %9549 = vmatprep.subr.bf16.mxu1 %v10682_v54 }
 0x452   : > { %v4625_v51 = vsel %vm4607_vm10, %v4592_v48, %v4031_v32  ;;  %v14128_v32 = vld [vmem:[#allocation3 + $0x170] sm:$0xff] }
 0x453   : > { %4174 = vrot.lane.b32.xlu0 %v3381_v45, %s10679_s27  ;;  %v4029_v25 = vpop.permute.xlu1 %4028 }
 0x454   : > { %v4624_v60 = vsel %vm4607_vm10, %v4591_v10, %v4029_v25  ;;  %v14135_v25 = vld [vmem:[#allocation3 + $0x16a] sm:$0xff] }
 0x455   : > { %v4159_v61 = vpop.permute.xlu0 %4158  ;;  %4172 = vrot.lane.b32.xlu1 %v3380_v5, %s10679_s27 }
 0x456   : > { %v4658_v50 = vsel %vm4640_vm12, %v4625_v51, %v4159_v61  ;;  %v4495_v61 = vsel %vm389_vm2, %v13752_v36, %v13539_v35  ;;  %v14153_v36 = vld [vmem:[#allocation3 + $0x172] sm:$0xff] }
 0x457   : > { %4302 = vrot.lane.b32.xlu0 %v14061_v46, %s10680_s18  ;;  %v4157_v27 = vpop.permute.xlu1 %4156 }
 0x458   : > { %v4657_v26 = vsel %vm4640_vm12, %v4624_v60, %v4157_v27 }
 0x459   : > { %v4287_v6 = vpop.permute.xlu0 %4286  ;;  %4300 = vrot.lane.b32.xlu1 %v14065_v38, %s10680_s18 }
 0x45a   : > { %v4691_v42 = vsel %vm4673_vm13, %v4658_v50, %v4287_v6 }
 0x45b   : > { %4430 = vrot.lane.b32.xlu0 %v14072_v3, %s10681_s22  ;;  %v4285_v20 = vpop.permute.xlu1 %4284 }
 0x45c   : > { %v4690_v53 = vsel %vm4673_vm13, %v4657_v26, %v4285_v20  ;;  %v6455_v20 = vld [vmem:[%s16573_s5] sm:$0xff] }
 0x45d   : > { %v4415_v17 = vpop.permute.xlu0 %4414  ;;  %4428 = vrot.lane.b32.xlu1 %v14084_v16, %s10681_s22  ;;  %v9550_v48 = vpack.c.bf16 %v6456_v56, %v6455_v20  ;;  %v4497_v20 = vsel %vm389_vm2, %v13813_v58, %v13549_v21 }
 0x45e   : > { %v4723_v2 = vsel %vm445_vm6, %v4691_v42, %v4415_v17 }
 0x45f   : > { %3664 = vrot.lane.b32.xlu0 %v3442_v0, %s10675_s23  ;;  %v4413_v43 = vpop.permute.xlu1 %4412  ;;  %9551 = vmatpush1.bf16.msra.mxu1 %v9550_v48 }
 0x460   : > { %v4722_v23 = vsel %vm445_vm6, %v4690_v53, %v4413_v43  ;;  %9552 = vmatprep.subr.bf16.mxu1 %v10682_v54 }
 0x461   : > { %v3651_v24 = vpop.permute.xlu0 %3650  ;;  %3538 = vrot.lane.b32.xlu1 %v14015_v18, %s10674_s20  ;;  %9397 = vmatprep.mubr.msk.f32.mxu0 %vm4750_vm14, %v4722_v23  ;;  %v6457_v23 = vld [vmem:[%s16573_s5 + $0x10] sm:$0xff] }
 0x462   : > { %9398 = vmatmul.mubr.msk.f32.gmra.mrb[16].mxu0 %vm4750_vm14, %v4723_v2  ;;  %v4528_v27 = vsel %vm4508_vm8, %v4495_v61, %v3651_v24  ;;  %v6458_v24 = vld [vmem:[%s16573_s5 + $0x18] sm:$0xff] }
 0x463   : > { %3792 = vrot.lane.b32.xlu0 %v3380_v5, %s10676_s24  ;;  %v3649_v41 = vpop.permute.xlu1 %3648  ;;  %v9553_v2 = vpack.c.bf16 %v6458_v24, %v6457_v23 }
 0x464   : > { %v9375_v0 = vpop.f32.mrb[0].mxu0 }
 0x465   : > { %v3779_v63 = vpop.permute.xlu0 %3778  ;;  %v4923_v52 = vadd.f32 %v9375_v0, %v14106_v8  ;;  %v4917_v19 = vpop.f32.mrb[1].mxu0  ;;  %3666 = vrot.lane.b32.xlu1 %v14023_v14, %s10675_s23  ;;  %9554 = vmatpush1.bf16.msra.mxu1 %v9553_v2 }
 0x466   : > { %v4918_v18 = vadd.f32 %v14106_v8, %v4917_v19  ;;  %9555 = vmatprep.subr.bf16.mxu1 %v10682_v54  ;;  %v6460_v19 = vld [vmem:[%s16573_s5 + $0x28] sm:$0xff] }
 0x467   : > { %3920 = vrot.lane.b32.xlu0 %v14065_v38, %s10677_s25  ;;  %vm5077_vm0 = vcmp.gt.f32.partialorder %v4923_v52, 0.0  ;;  %v5109_v40 = vmul.f32 0.01, %v4923_v52  ;;  %v3777_v44 = vpop.permute.xlu1 %3776 }
 0x468   : > { %vm5076_vm1 = vcmp.gt.f32.partialorder %v4918_v18, 0.0  ;;  %v5108_v49 = vmul.f32 0.01, %v4918_v18 }
 0x469   : > { %v3907_v34 = vpop.permute.xlu0 %3906  ;;  %v5141_v55 = vsel %vm5077_vm0, %v4923_v52, %v5109_v40  ;;  %3794 = vrot.lane.b32.xlu1 %v3381_v45, %s10676_s24  ;;  %v4494_v45 = vsel %vm389_vm2, %v13761_v30, %v13525_v57  ;;  %v4561_v57 = vsel %vm4541_vm9, %v4528_v27, %v3779_v63  ;;  %v6466_v27 = vld [vmem:[%s16573_s5 + $0x58] sm:$0xff] }
 0x46a   : > { %5174 = vst.msk [vmem:[#allocation4 + $0x53] sm:$0xff] %vm445_vm6, %v5141_v55  ;;  %v5140_v39 = vsel %vm5076_vm1, %v4918_v18, %v5108_v49  ;;  %v4527_v5 = vsel %vm4508_vm8, %v4494_v45, %v3649_v41  ;;  %v4594_v62 = vsel %vm4574_vm11, %v4561_v57, %v3907_v34  ;;  %vm513_vm1 = vcmask 523264  }
 0x46b   : > { %4048 = vrot.lane.b32.xlu0 %v14084_v16, %s10678_s26  ;;  %5173 = vst.msk [vmem:[#allocation4 + $0x4b] sm:$0xff] %vm445_vm6, %v5140_v39  ;;  %v3905_v14 = vpop.permute.xlu1 %3904  ;;  %v4560_v6 = vsel %vm4541_vm9, %v4527_v5, %v3777_v44  ;;  %v6461_v39 = vld [vmem:[%s16573_s5 + $0x30] sm:$0xff] }
 0x46c   : > { %v4593_v30 = vsel %vm4574_vm11, %v4560_v6, %v3905_v14  ;;  %v6462_v14 = vld [vmem:[%s16573_s5 + $0x38] sm:$0xff]  ;;  %v6465_v5 = vld [vmem:[%s16573_s5 + $0x50] sm:$0xff]  ;;  %514 = vst.msk [vmem:[#allocation5] sm:$0xff] %vm513_vm1, %v17151_v7  ;;  %515 = vst.msk [vmem:[#allocation5 + $0x8] sm:$0xff] %vm513_vm1, %v17151_v7 }
 0x46d   : > { %v4035_v9 = vpop.permute.xlu0 %4034  ;;  %3922 = vrot.lane.b32.xlu1 %v14061_v46, %s10677_s25  ;;  %v9565_v6 = vpack.c.bf16 %v6466_v27, %v6465_v5  ;;  %516 = vst.msk [vmem:[#allocation5 + $0x10] sm:$0xff] %vm513_vm1, %v17151_v7  ;;  %519 = vst.msk [vmem:[#allocation5 + $0x20] sm:$0xff] %vm513_vm1, %v17151_v7 }
 0x46e   : > { %v4627_v10 = vsel %vm4607_vm10, %v4594_v62, %v4035_v9  ;;  %v6467_v62 = vld [vmem:[%s16573_s5 + $0x60] sm:$0xff]  ;;  %520 = vst.msk [vmem:[#allocation5 + $0x28] sm:$0xff] %vm513_vm1, %v17151_v7  ;;  %521 = vst.msk [vmem:[#allocation5 + $0x30] sm:$0xff] %vm513_vm1, %v17151_v7 }
 0x46f   : > { %4176 = vrot.lane.b32.xlu0 %v3382_v28, %s10679_s27  ;;  %v4033_v29 = vpop.permute.xlu1 %4032  ;;  %523 = vst.msk [vmem:[#allocation5 + $0x40] sm:$0xff] %vm513_vm1, %v17151_v7  ;;  %524 = vst.msk [vmem:[#allocation5 + $0x48] sm:$0xff] %vm513_vm1, %v17151_v7 }
 0x470   : > { %v4626_v35 = vsel %vm4607_vm10, %v4593_v30, %v4033_v29  ;;  %v4496_v30 = vsel %vm389_vm2, %v13819_v1, %v13532_v37  ;;  %525 = vst.msk [vmem:[#allocation5 + $0x50] sm:$0xff] %vm513_vm1, %v17151_v7  ;;  %527 = vst.msk [vmem:[#allocation5 + $0x60] sm:$0xff] %vm513_vm1, %v17151_v7 }
 0x471   : > { %v4163_v33 = vpop.permute.xlu0 %4162  ;;  %4050 = vrot.lane.b32.xlu1 %v14072_v3, %s10678_s26  ;;  %528 = vst.msk [vmem:[#allocation5 + $0x68] sm:$0xff] %vm513_vm1, %v17151_v7  ;;  %529 = vst.msk [vmem:[#allocation5 + $0x70] sm:$0xff] %vm513_vm1, %v17151_v7 }
 0x472   : > { %v4660_v60 = vsel %vm4640_vm12, %v4627_v10, %v4163_v33  ;;  %v6463_v33 = vld [vmem:[%s16573_s5 + $0x40] sm:$0xff]  ;;  %531 = vst.msk [vmem:[#allocation5 + $0x80] sm:$0xff] %vm513_vm1, %v17151_v7  ;;  %532 = vst.msk [vmem:[#allocation5 + $0x88] sm:$0xff] %vm513_vm1, %v17151_v7 }
 0x473   : > { %4304 = vrot.lane.b32.xlu0 %v14124_v22, %s10680_s18  ;;  %v4161_v4 = vpop.permute.xlu1 %4160  ;;  %533 = vst.msk [vmem:[#allocation5 + $0x90] sm:$0xff] %vm513_vm1, %v17151_v7  ;;  %535 = vst.msk [vmem:[#allocation5 + $0xa0] sm:$0xff] %vm513_vm1, %v17151_v7 }
 0x474   : > { %v4659_v17 = vsel %vm4640_vm12, %v4626_v35, %v4161_v4  ;;  %v6464_v4 = vld [vmem:[%s16573_s5 + $0x48] sm:$0xff]  ;;  %536 = vst.msk [vmem:[#allocation5 + $0xa8] sm:$0xff] %vm513_vm1, %v17151_v7  ;;  %537 = vst.msk [vmem:[#allocation5 + $0xb0] sm:$0xff] %vm513_vm1, %v17151_v7 }
 0x475   : > { %v4291_v11 = vpop.permute.xlu0 %4290  ;;  %4178 = vrot.lane.b32.xlu1 %v14128_v32, %s10679_s27  ;;  %v6468_v35 = vld [vmem:[%s16573_s5 + $0x68] sm:$0xff]  ;;  %539 = vst.msk [vmem:[#allocation5 + $0xc0] sm:$0xff] %vm513_vm1, %v17151_v7  ;;  %540 = vst.msk [vmem:[#allocation5 + $0xc8] sm:$0xff] %vm513_vm1, %v17151_v7 }
 0x476   : > { %v4693_v50 = vsel %vm4673_vm13, %v4660_v60, %v4291_v11  ;;  %v9562_v11 = vpack.c.bf16 %v6464_v4, %v6463_v33  ;;  %v9568_v1 = vpack.c.bf16 %v6468_v35, %v6467_v62  ;;  %541 = vst.msk [vmem:[#allocation5 + $0xd0] sm:$0xff] %vm513_vm1, %v17151_v7  ;;  %543 = vst.msk [vmem:[#allocation5 + $0xe0] sm:$0xff] %vm513_vm1, %v17151_v7 }
 0x477   : > { %4432 = vrot.lane.b32.xlu0 %v14135_v25, %s10681_s22  ;;  %v4289_v12 = vpop.permute.xlu1 %4288  ;;  %544 = vst.msk [vmem:[#allocation5 + $0xe8] sm:$0xff] %vm513_vm1, %v17151_v7  ;;  %545 = vst.msk [vmem:[#allocation5 + $0xf0] sm:$0xff] %vm513_vm1, %v17151_v7 }
 0x478   : > { %v4692_v51 = vsel %vm4673_vm13, %v4659_v17, %v4289_v12  ;;  %547 = vst.msk [vmem:[#allocation5 + $0x100] sm:$0xff] %vm513_vm1, %v17151_v7  ;;  %548 = vst.msk [vmem:[#allocation5 + $0x108] sm:$0xff] %vm513_vm1, %v17151_v7 }
 0x479   : > { %v4419_v59 = vpop.permute.xlu0 %4418  ;;  %4306 = vrot.lane.b32.xlu1 %v14147_v13, %s10680_s18  ;;  %549 = vst.msk [vmem:[#allocation5 + $0x110] sm:$0xff] %vm513_vm1, %v17151_v7  ;;  %551 = vst.msk [vmem:[#allocation5 + $0x120] sm:$0xff] %vm513_vm1, %v17151_v7 }
 0x47a   : > { %v4725_v42 = vsel %vm445_vm6, %v4693_v50, %v4419_v59  ;;  %v14242_v59 = vld [vmem:[#allocation3 + $0x181] sm:$0xff]  ;;  %552 = vst.msk [vmem:[#allocation5 + $0x128] sm:$0xff] %vm513_vm1, %v17151_v7  ;;  %553 = vst.msk [vmem:[#allocation5 + $0x130] sm:$0xff] %vm513_vm1, %v17151_v7 }
 0x47b   : > { %4434 = vrot.lane.b32.xlu0 %v14153_v36, %s10681_s22  ;;  %v4417_v26 = vpop.permute.xlu1 %4416  ;;  %v14269_v50 = vld [vmem:[#allocation3 + $0x182] sm:$0xff]  ;;  %555 = vst.msk [vmem:[#allocation5 + $0x140] sm:$0xff] %vm513_vm1, %v17151_v7  ;;  %556 = vst.msk [vmem:[#allocation5 + $0x148] sm:$0xff] %vm513_vm1, %v17151_v7 }
 0x47c   : > { %v4724_v53 = vsel %vm445_vm6, %v4692_v51, %v4417_v26  ;;  %v14263_v26 = vld [vmem:[#allocation3 + $0x188] sm:$0xff]  ;;  %557 = vst.msk [vmem:[#allocation5 + $0x150] sm:$0xff] %vm513_vm1, %v17151_v7  ;;  %559 = vst.msk [vmem:[#allocation5 + $0x160] sm:$0xff] %vm513_vm1, %v17151_v7 }
 0x47d   : > { %v14170_v43 = vpop.permute.xlu0 %3654  ;;  %3540 = vrot.lane.b32.xlu1 %v14065_v38, %s10674_s20  ;;  %9400 = vmatprep.mubr.msk.f32.mxu0 %vm4750_vm14, %v4724_v53  ;;  %v6469_v53 = vld [vmem:[%s16573_s5 + $0x70] sm:$0xff]  ;;  %560 = vst.msk [vmem:[#allocation5 + $0x168] sm:$0xff] %vm513_vm1, %v17151_v7  ;;  %561 = vst.msk [vmem:[#allocation5 + $0x170] sm:$0xff] %vm513_vm1, %v17151_v7 }
 0x47e   : > { %9401 = vmatmul.mubr.msk.f32.gmra.mrb[18].mxu0 %vm4750_vm14, %v4725_v42  ;;  %v4530_v56 = vsel %vm4508_vm8, %v4497_v20, %v14170_v43  ;;  %v6470_v43 = vld [vmem:[%s16573_s5 + $0x78] sm:$0xff]  ;;  %v6480_v20 = vld [vmem:[%s16573_s5 + $0xc8] sm:$0xff]  ;;  %563 = vst.msk [vmem:[#allocation5 + $0x180] sm:$0xff] %vm513_vm1, %v17151_v7  ;;  %564 = vst.msk [vmem:[#allocation5 + $0x188] sm:$0xff] %vm513_vm1, %v17151_v7 }
 0x47f   : > { %3668 = vrot.lane.b32.xlu0 %v14084_v16, %s10675_s23  ;;  %v3653_v41 = vpop.permute.xlu1 %3652  ;;  %v6459_v16 = vld [vmem:[%s16573_s5 + $0x20] sm:$0xff]  ;;  %v9571_v24 = vpack.c.bf16 %v6470_v43, %v6469_v53  ;;  %v6481_v53 = vld [vmem:[%s16573_s5 + $0xd0] sm:$0xff]  ;;  %v6482_v43 = vld [vmem:[%s16573_s5 + $0xd8] sm:$0xff]  ;;  %565 = vst.msk [vmem:[#allocation5 + $0x190] sm:$0xff] %vm513_vm1, %v17151_v7 }
 0x480   : > { %v9378_v38 = vpop.f32.mrb[2].mxu0  ;;  %v9556_v40 = vpack.c.bf16 %v6460_v19, %v6459_v16  ;;  %v4529_v37 = vsel %vm4508_vm8, %v4496_v30, %v3653_v41  ;;  %v14288_v16 = vld [vmem:[#allocation3 + $0x189] sm:$0xff]  ;;  %567 = vst.msk [vmem:[#allocation5 + $0x1a0] sm:$0xff] %vm513_vm1, %v17151_v7  ;;  %568 = vst.msk [vmem:[#allocation5 + $0x1a8] sm:$0xff] %vm513_vm1, %v17151_v7 }
 0x481   : > { %v14186_v0 = vpop.permute.xlu0 %3782  ;;  %v4933_v63 = vadd.f32 %v9378_v38, %v14106_v8  ;;  %v4927_v52 = vpop.f32.mrb[3].mxu0  ;;  %3542 = vrot.lane.b32.xlu1 %v14061_v46, %s10674_s20  ;;  %569 = vst.msk [vmem:[#allocation5 + $0x1b0] sm:$0xff] %vm513_vm1, %v17151_v7  ;;  %571 = vst.msk [vmem:[#allocation5 + $0x1c0] sm:$0xff] %vm513_vm1, %v17151_v7 }
 0x482   : > { %v4928_v18 = vadd.f32 %v14106_v8, %v4927_v52  ;;  %9557 = vmatpush1.bf16.msra.mxu1 %v9556_v40  ;;  %v4563_v48 = vsel %vm4541_vm9, %v4530_v56, %v14186_v0  ;;  %v6471_v40 = vld [vmem:[%s16573_s5 + $0x80] sm:$0xff]  ;;  %572 = vst.msk [vmem:[#allocation5 + $0x1c8] sm:$0xff] %vm513_vm1, %v17151_v7  ;;  %573 = vst.msk [vmem:[#allocation5 + $0x1d0] sm:$0xff] %vm513_vm1, %v17151_v7 }
 0x483   : > { %3796 = vrot.lane.b32.xlu0 %v3382_v28, %s10676_s24  ;;  %vm5079_vm3 = vcmp.gt.f32.partialorder %v4933_v63, 0.0  ;;  %v5111_v44 = vmul.f32 0.01, %v4933_v63  ;;  %v3781_v49 = vpop.permute.xlu1 %3780  ;;  %9558 = vmatprep.subr.bf16.mxu1 %v10682_v54  ;;  %v9559_v28 = vpack.c.bf16 %v6462_v14, %v6461_v39  ;;  %575 = vst.msk [vmem:[#allocation5 + $0x1e0] sm:$0xff] %vm513_vm1, %v17151_v7  ;;  %576 = vst.msk [vmem:[#allocation5 + $0x1e8] sm:$0xff] %vm513_vm1, %v17151_v7 }
 0x484   : > { %vm5078_vm4 = vcmp.gt.f32.partialorder %v4928_v18, 0.0  ;;  %v5110_v46 = vmul.f32 0.01, %v4928_v18  ;;  %v4562_v10 = vsel %vm4541_vm9, %v4529_v37, %v3781_v49  ;;  %577 = vst.msk [vmem:[#allocation5 + $0x1f0] sm:$0xff] %vm513_vm1, %v17151_v7  ;;  %579 = vst.msk [vmem:[#allocation5 + $0x200] sm:$0xff] %vm513_vm1, %v17151_v7 }
 0x485   : > { %v3911_v34 = vpop.permute.xlu0 %3910  ;;  %v5143_v55 = vsel %vm5079_vm3, %v4933_v63, %v5111_v44  ;;  %3670 = vrot.lane.b32.xlu1 %v14072_v3, %s10675_s23  ;;  %v6472_v44 = vld [vmem:[%s16573_s5 + $0x88] sm:$0xff]  ;;  %580 = vst.msk [vmem:[#allocation5 + $0x208] sm:$0xff] %vm513_vm1, %v17151_v7  ;;  %581 = vst.msk [vmem:[#allocation5 + $0x210] sm:$0xff] %vm513_vm1, %v17151_v7 }
 0x486   : > { %5176 = vst.msk [vmem:[#allocation4 + $0x6b] sm:$0xff] %vm445_vm6, %v5143_v55  ;;  %v5142_v9 = vsel %vm5078_vm4, %v4928_v18, %v5110_v46  ;;  %9560 = vmatpush1.bf16.msra.mxu1 %v9559_v28  ;;  %v4596_v21 = vsel %vm4574_vm11, %v4563_v48, %v3911_v34  ;;  %v14294_v18 = vld [vmem:[#allocation3 + $0x18a] sm:$0xff]  ;;  %v9574_v49 = vpack.c.bf16 %v6472_v44, %v6471_v40 }
 0x487   : > { %3924 = vrot.lane.b32.xlu0 %v14124_v22, %s10677_s25  ;;  %5175 = vst.msk [vmem:[#allocation4 + $0x63] sm:$0xff] %vm445_vm6, %v5142_v9  ;;  %v3909_v3 = vpop.permute.xlu1 %3908  ;;  %9561 = vmatprep.subr.bf16.mxu1 %v10682_v54  ;;  %v6473_v9 = vld [vmem:[%s16573_s5 + $0x90] sm:$0xff]  ;;  %v6474_v28 = vld [vmem:[%s16573_s5 + $0x98] sm:$0xff] }
 0x488   : > { %v4595_v60 = vsel %vm4574_vm11, %v4562_v10, %v3909_v3  ;;  %v6490_v40 = vld [vmem:[%s16573_s5 + $0x118] sm:$0xff]  ;;  %583 = vst.msk [vmem:[#allocation5 + $0x220] sm:$0xff] %vm513_vm1, %v17151_v7  ;;  %584 = vst.msk [vmem:[#allocation5 + $0x228] sm:$0xff] %vm513_vm1, %v17151_v7 }
 0x489   : > { %v4039_v29 = vpop.permute.xlu0 %4038  ;;  %3798 = vrot.lane.b32.xlu1 %v14128_v32, %s10676_s24  ;;  %v14226_v32 = vld [vmem:[#allocation3 + $0x180] sm:$0xff]  ;;  %585 = vst.msk [vmem:[#allocation5 + $0x230] sm:$0xff] %vm513_vm1, %v17151_v7  ;;  %587 = vst.msk [vmem:[#allocation5 + $0x240] sm:$0xff] %vm513_vm1, %v17151_v7 }
 0x48a   : > { %9563 = vmatpush1.bf16.msra.mxu1 %v9562_v11  ;;  %v4629_v42 = vsel %vm4607_vm10, %v4596_v21, %v4039_v29  ;;  %v9577_v29 = vpack.c.bf16 %v6474_v28, %v6473_v9  ;;  %v4498_v21 = vsel %vm389_vm2, %v13917_v31, %v13543_v15  ;;  %v3387_v9 = vld [vmem:[#allocation3 + $0x1a0] sm:$0xff]  ;;  %588 = vst.msk [vmem:[#allocation5 + $0x248] sm:$0xff] %vm513_vm1, %v17151_v7  ;;  %589 = vst.msk [vmem:[#allocation5 + $0x250] sm:$0xff] %vm513_vm1, %v17151_v7 }
 0x48b   : > { %4052 = vrot.lane.b32.xlu0 %v14135_v25, %s10678_s26  ;;  %v4037_v45 = vpop.permute.xlu1 %4036  ;;  %9564 = vmatprep.subr.bf16.mxu1 %v10682_v54  ;;  %591 = vst.msk [vmem:[#allocation5 + $0x260] sm:$0xff] %vm513_vm1, %v17151_v7  ;;  %592 = vst.msk [vmem:[#allocation5 + $0x268] sm:$0xff] %vm513_vm1, %v17151_v7 }
 0x48c   : > { %v4628_v58 = vsel %vm4607_vm10, %v4595_v60, %v4037_v45  ;;  %593 = vst.msk [vmem:[#allocation5 + $0x270] sm:$0xff] %vm513_vm1, %v17151_v7  ;;  %595 = vst.msk [vmem:[#allocation5 + $0x280] sm:$0xff] %vm513_vm1, %v17151_v7 }
 0x48d   : > { %v4167_v61 = vpop.permute.xlu0 %4166  ;;  %3926 = vrot.lane.b32.xlu1 %v14147_v13, %s10677_s25  ;;  %596 = vst.msk [vmem:[#allocation5 + $0x288] sm:$0xff] %vm513_vm1, %v17151_v7  ;;  %597 = vst.msk [vmem:[#allocation5 + $0x290] sm:$0xff] %vm513_vm1, %v17151_v7 }
 0x48e   : > { %9566 = vmatpush1.bf16.msra.mxu1 %v9565_v6  ;;  %v4662_v2 = vsel %vm4640_vm12, %v4629_v42, %v4167_v61  ;;  %v6475_v61 = vld [vmem:[%s16573_s5 + $0xa0] sm:$0xff]  ;;  %v17156_v42 = vld [vmem:[#allocation81_spill] sm:$0xff]  ;;  %599 = vst.msk [vmem:[#allocation5 + $0x2a0] sm:$0xff] %vm513_vm1, %v17151_v7  ;;  %600 = vst.msk [vmem:[#allocation5 + $0x2a8] sm:$0xff] %vm513_vm1, %v17151_v7 }
 0x48f   : > { %4180 = vrot.lane.b32.xlu0 %v14226_v32, %s10679_s27  ;;  %v4165_v12 = vpop.permute.xlu1 %4164  ;;  %9567 = vmatprep.subr.bf16.mxu1 %v10682_v54  ;;  %v4499_v15 = vsel %vm389_vm2, %v13911_v47, %v17156_v42  ;;  %601 = vst.msk [vmem:[#allocation5 + $0x2b0] sm:$0xff] %vm513_vm1, %v17151_v7  ;;  %603 = vst.msk [vmem:[#allocation5 + $0x2c0] sm:$0xff] %vm513_vm1, %v17151_v7 }
 0x490   : > { %v4661_v23 = vsel %vm4640_vm12, %v4628_v58, %v4165_v12  ;;  %v6477_v12 = vld [vmem:[%s16573_s5 + $0xb0] sm:$0xff]  ;;  %604 = vst.msk [vmem:[#allocation5 + $0x2c8] sm:$0xff] %vm513_vm1, %v17151_v7  ;;  %605 = vst.msk [vmem:[#allocation5 + $0x2d0] sm:$0xff] %vm513_vm1, %v17151_v7 }
 0x491   : > { %v4295_v57 = vpop.permute.xlu0 %4294  ;;  %4054 = vrot.lane.b32.xlu1 %v14153_v36, %s10678_s26  ;;  %607 = vst.msk [vmem:[#allocation5 + $0x2e0] sm:$0xff] %vm513_vm1, %v17151_v7  ;;  %608 = vst.msk [vmem:[#allocation5 + $0x2e8] sm:$0xff] %vm513_vm1, %v17151_v7 }
 0x492   : > { %9569 = vmatpush1.bf16.msra.mxu1 %v9568_v1  ;;  %v4695_v0 = vsel %vm4673_vm13, %v4662_v2, %v4295_v57  ;;  %609 = vst.msk [vmem:[#allocation5 + $0x2f0] sm:$0xff] %vm513_vm1, %v17151_v7  ;;  %611 = vst.msk [vmem:[#allocation5 + $0x300] sm:$0xff] %vm513_vm1, %v17151_v7 }
 0x493   : > { %4308 = vrot.lane.b32.xlu0 %v14242_v59, %s10680_s18  ;;  %v4293_v17 = vpop.permute.xlu1 %4292  ;;  %9570 = vmatprep.subr.bf16.mxu1 %v10682_v54  ;;  %612 = vst.msk [vmem:[#allocation5 + $0x308] sm:$0xff] %vm513_vm1, %v17151_v7  ;;  %613 = vst.msk [vmem:[#allocation5 + $0x310] sm:$0xff] %vm513_vm1, %v17151_v7 }
 0x494   : > { %v4694_v41 = vsel %vm4673_vm13, %v4661_v23, %v4293_v17  ;;  %v3386_v17 = vld [vmem:[#allocation3 + $0x198] sm:$0xff]  ;;  %615 = vst.msk [vmem:[#allocation5 + $0x320] sm:$0xff] %vm513_vm1, %v17151_v7  ;;  %616 = vst.msk [vmem:[#allocation5 + $0x328] sm:$0xff] %vm513_vm1, %v17151_v7 }
 0x495   : > { %v4423_v51 = vpop.permute.xlu0 %4422  ;;  %4182 = vrot.lane.b32.xlu1 %v14263_v26, %s10679_s27  ;;  %617 = vst.msk [vmem:[#allocation5 + $0x330] sm:$0xff] %vm513_vm1, %v17151_v7 }
 0x496   : > { %9572 = vmatpush1.bf16.msra.mxu1 %v9571_v24  ;;  %v4727_v19 = vsel %vm445_vm6, %v4695_v0, %v4423_v51  ;;  %v6487_v51 = vld [vmem:[%s16573_s5 + $0x100] sm:$0xff]  ;;  %v9589_v24 = vpack.c.bf16 %v6482_v43, %v6481_v53 }
 0x497   : > { %4436 = vrot.lane.b32.xlu0 %v14269_v50, %s10681_s22  ;;  %v4421_v38 = vpop.permute.xlu1 %4420  ;;  %9573 = vmatprep.subr.bf16.mxu1 %v10682_v54 }
 0x498   : > { %v4726_v63 = vsel %vm445_vm6, %v4694_v41, %v4421_v38 }
 0x499   : > { %v14286_v52 = vpop.permute.xlu0 %3658  ;;  %4310 = vrot.lane.b32.xlu1 %v14288_v16, %s10680_s18  ;;  %9403 = vmatprep.mubr.msk.f32.mxu0 %vm4750_vm14, %v4726_v63  ;;  %v3418_v63 = vld [vmem:[#allocation3 + $0x199] sm:$0xff] }
 0x49a   : > { %9404 = vmatmul.mubr.msk.f32.gmra.mrb[20].mxu0 %vm4750_vm14, %v4727_v19  ;;  %9575 = vmatpush1.bf16.msra.mxu1 %v9574_v49  ;;  %v4532_v2 = vsel %vm4508_vm8, %v4499_v15, %v14286_v52  ;;  %v6489_v52 = vld [vmem:[%s16573_s5 + $0x110] sm:$0xff] }
 0x49b   : > { %4438 = vrot.lane.b32.xlu0 %v14294_v18, %s10681_s22  ;;  %v14305_v46 = vpop.permute.xlu1 %3656  ;;  %9576 = vmatprep.subr.bf16.mxu1 %v10682_v54 }
 0x49c   : > { %v9381_v34 = vpop.f32.mrb[4].mxu0  ;;  %v4531_v31 = vsel %vm4508_vm8, %v4498_v21, %v14305_v46  ;;  %v9601_v46 = vpack.c.bf16 %v6490_v40, %v6489_v52  ;;  %v14621_v21 = vld [vmem:[#allocation4 + $0x56] sm:$0xff]  ;;  %v17157_v52 = vld [vmem:[#allocation80_spill] sm:$0xff] }
 0x49d   : > { %v14308_v55 = vpop.permute.xlu0 %3786  ;;  %v4943_v39 = vadd.f32 %v9381_v34, %v14106_v8  ;;  %v4937_v14 = vpop.f32.mrb[5].mxu0  ;;  %3544 = vrot.lane.b32.xlu1 %v14124_v22, %s10674_s20  ;;  %v6483_v34 = vld [vmem:[%s16573_s5 + $0xe0] sm:$0xff] }
 0x49e   : > { %v4938_v3 = vadd.f32 %v14106_v8, %v4937_v14  ;;  %9578 = vmatpush1.bf16.msra.mxu1 %v9577_v29  ;;  %v4565_v47 = vsel %vm4541_vm9, %v4532_v2, %v14308_v55  ;;  %v6484_v55 = vld [vmem:[%s16573_s5 + $0xe8] sm:$0xff] }
 0x49f   : > { %3672 = vrot.lane.b32.xlu0 %v14135_v25, %s10675_s23  ;;  %vm5081_vm5 = vcmp.gt.f32.partialorder %v4943_v39, 0.0  ;;  %v5113_v33 = vmul.f32 0.01, %v4943_v39  ;;  %v3785_v4 = vpop.permute.xlu1 %3784  ;;  %9579 = vmatprep.subr.bf16.mxu1 %v10682_v54  ;;  %v6476_v25 = vld [vmem:[%s16573_s5 + $0xa8] sm:$0xff] }
 0x4a0   : > { %vm5080_vm7 = vcmp.gt.f32.partialorder %v4938_v3, 0.0  ;;  %v5112_v22 = vmul.f32 0.01, %v4938_v3  ;;  %v9580_v27 = vpack.c.bf16 %v6476_v25, %v6475_v61  ;;  %v4564_v41 = vsel %vm4541_vm9, %v4531_v31, %v3785_v4  ;;  %v14430_v25 = vld [vmem:[#allocation4 + $0x4e] sm:$0xff] }
 0x4a1   : > { %v14323_v11 = vpop.permute.xlu0 %3914  ;;  %v5145_v45 = vsel %vm5081_vm5, %v4943_v39, %v5113_v33  ;;  %3546 = vrot.lane.b32.xlu1 %v14147_v13, %s10674_s20  ;;  %v3450_v33 = vld [vmem:[#allocation3 + $0x19a] sm:$0xff] }
 0x4a2   : > { %5178 = vst.msk [vmem:[#allocation4 + $0x83] sm:$0xff] %vm445_vm6, %v5145_v45  ;;  %v5144_v5 = vsel %vm5080_vm7, %v4938_v3, %v5112_v22  ;;  %9581 = vmatpush1.bf16.msra.mxu1 %v9580_v27  ;;  %v4598_v44 = vsel %vm4574_vm11, %v4565_v47, %v14323_v11  ;;  %v14425_v45 = vld [vmem:[#allocation4 + $0x3] sm:$0xff]  ;;  %v6486_v27 = vld [vmem:[%s16573_s5 + $0xf8] sm:$0xff] }
 0x4a3   : > { %3800 = vrot.lane.b32.xlu0 %v14226_v32, %s10676_s24  ;;  %5177 = vst.msk [vmem:[#allocation4 + $0x7b] sm:$0xff] %vm445_vm6, %v5144_v5  ;;  %v3913_v13 = vpop.permute.xlu1 %3912  ;;  %9582 = vmatprep.subr.bf16.mxu1 %v10682_v54  ;;  %v6478_v32 = vld [vmem:[%s16573_s5 + $0xb8] sm:$0xff]  ;;  %v6485_v5 = vld [vmem:[%s16573_s5 + $0xf0] sm:$0xff] }
 0x4a4   : > { %v9583_v57 = vpack.c.bf16 %v6478_v32, %v6477_v12 }
 0x4a5   : > { %v14338_v6 = vpop.permute.xlu0 %4042  ;;  %3674 = vrot.lane.b32.xlu1 %v14153_v36, %s10675_s23  ;;  %v6479_v36 = vld [vmem:[%s16573_s5 + $0xc0] sm:$0xff] }
 0x4a6   : > { %9584 = vmatpush1.bf16.msra.mxu1 %v9583_v57  ;;  %v9586_v1 = vpack.c.bf16 %v6480_v20, %v6479_v36  ;;  %v4631_v39 = vsel %vm4607_vm10, %v4598_v44, %v14338_v6  ;;  %v9595_v6 = vpack.c.bf16 %v6486_v27, %v6485_v5  ;;  %v9851_v57 = vpack.i.bf16 %v14425_v45, %v14430_v25  ;;  %v5301_v36 = vld [vmem:[#allocation4 + $0x48] sm:$0xff] }
 0x4a7   : > { %3928 = vrot.lane.b32.xlu0 %v14242_v59, %s10677_s25  ;;  %v4041_v30 = vpop.permute.xlu1 %4040  ;;  %9585 = vmatprep.subr.bf16.mxu1 %v10682_v54 }
 0x4a9   : > { %v4171_v62 = vpop.permute.xlu0 %4170  ;;  %v9384_v35 = vpop.f32.mrb[6].mxu0  ;;  %3802 = vrot.lane.b32.xlu1 %v14263_v26, %s10676_s24  ;;  %v6488_v26 = vld [vmem:[%s16573_s5 + $0x108] sm:$0xff] }
 0x4aa   : > { %v4953_v59 = vadd.f32 %v9384_v35, %v14106_v8  ;;  %v4947_v37 = vpop.f32.mrb[7].mxu0  ;;  %9587 = vmatpush1.bf16.msra.mxu1 %v9586_v1  ;;  %v4664_v28 = vsel %vm4640_vm12, %v4631_v39, %v4171_v62  ;;  %v3451_v62 = vld [vmem:[#allocation3 + $0x1a2] sm:$0xff] }
 0x4ab   : > { %4056 = vrot.lane.b32.xlu0 %v14269_v50, %s10678_s26  ;;  %v4948_v56 = vadd.f32 %v14106_v8, %v4947_v37  ;;  %v4169_v10 = vpop.permute.xlu1 %4168  ;;  %9588 = vmatprep.subr.bf16.mxu1 %v10682_v54  ;;  %v9597_v50 = vpack.c.bf16 %v6488_v26, %v6487_v51  ;;  %v5269_v37 = vld [vmem:[#allocation4 + $0x6] sm:$0xff] }
 0x4ac   : > { %vm5083_vm15 = vcmp.gt.f32.partialorder %v4953_v59, 0.0  ;;  %v5115_v48 = vmul.f32 0.01, %v4953_v59  ;;  %v5238_v26 = vld [vmem:[#allocation4 + $0xb] sm:$0xff] }
 0x4ad   : > { %v4299_v60 = vpop.permute.xlu0 %4298  ;;  %vm5082_vm0 = vcmp.gt.f32.partialorder %v4948_v56, 0.0  ;;  %v5114_v58 = vmul.f32 0.01, %v4948_v56  ;;  %3930 = vrot.lane.b32.xlu1 %v14288_v16, %s10677_s25  ;;  %9598 = vmatprep.subr.bf16.mxu0 %v9597_v50  ;;  %v4597_v16 = vsel %vm4574_vm11, %v4564_v41, %v3913_v13  ;;  %v14440_v13 = vld [vmem:[#allocation3 + $0x1a1] sm:$0xff]  ;;  %v9866_v43 = vpack.i.bf16 %v5238_v26, %v14621_v21 }
 0x4ae   : > { %v5147_v23 = vsel %vm5083_vm15, %v4953_v59, %v5115_v48  ;;  %9590 = vmatpush1.bf16.msra.mxu1 %v9589_v24  ;;  %9600 = vmatpush3.bf16.msra.mxu0 %v9597_v50  ;;  %v4630_v49 = vsel %vm4607_vm10, %v4597_v16, %v4041_v30  ;;  %v4697_v4 = vsel %vm4673_vm13, %v4664_v28, %v4299_v60  ;;  %v14624_v50 = vld [vmem:[#allocation4 + $0x66] sm:$0xff]  ;;  %v5302_v41 = vld [vmem:[#allocation4 + $0x50] sm:$0xff] }
 0x4af   : > { %4184 = vrot.lane.b32.xlu0 %v3386_v17, %s10679_s27  ;;  %5180 = vst.msk [vmem:[#allocation4 + $0x9b] sm:$0xff] %vm445_vm6, %v5147_v23  ;;  %v5146_v38 = vsel %vm5082_vm0, %v4948_v56, %v5114_v58  ;;  %v4297_v0 = vpop.permute.xlu1 %4296  ;;  %9591 = vmatprep.subr.bf16.mxu1 %v10682_v54  ;;  %v4663_v14 = vsel %vm4640_vm12, %v4630_v49, %v4169_v10  ;;  %v5270_v56 = vld [vmem:[#allocation4 + $0xe] sm:$0xff]  ;;  %v5239_v58 = vld [vmem:[#allocation4 + $0x1b] sm:$0xff] }
 0x4b0   : > { %5179 = vst.msk [vmem:[#allocation4 + $0x93] sm:$0xff] %vm445_vm6, %v5146_v38  ;;  %v4696_v3 = vsel %vm4673_vm13, %v4663_v14, %v4297_v0  ;;  %9602 = vmatprep.subr.bf16.mxu0 %v9601_v46  ;;  %v9881_v15 = vpack.i.bf16 %v5239_v58, %v14624_v50  ;;  %v10652_v49 = vld [vmem:[#allocation3 + $0x128] sm:$0xff] }
 0x4b1   : > { %v4427_v19 = vpop.permute.xlu0 %4426  ;;  %4058 = vrot.lane.b32.xlu1 %v14294_v18, %s10678_s26  ;;  %v9592_v18 = vpack.c.bf16 %v6484_v55, %v6483_v34 }
 0x4b2   : > { %9604 = vmatpush3.bf16.msra.mxu0 %v9601_v46  ;;  %v4729_v61 = vsel %vm445_vm6, %v4697_v4, %v4427_v19  ;;  %v10651_v19 = vld [vmem:[#allocation3 + $0x120] sm:$0xff] }
 0x4b3   : > { %4312 = vrot.lane.b32.xlu0 %v3418_v63, %s10680_s18  ;;  %v4425_v29 = vpop.permute.xlu1 %4424  ;;  %9593 = vmatpush1.bf16.msra.mxu1 %v9592_v18  ;;  %v4500_v40 = vsel %vm389_vm2, %v10651_v19, %v17157_v52  ;;  %v17158_v46 = vld [vmem:[#allocation82_spill] sm:$0xff] }
 0x4b4   : > { %v4728_v22 = vsel %vm445_vm6, %v4696_v3, %v4425_v29  ;;  %9594 = vmatprep.subr.bf16.mxu1 %v10682_v54  ;;  %9605 = vmatprep.subr.bf16.mxu0 %v10682_v54  ;;  %v4501_v34 = vsel %vm389_vm2, %v10652_v49, %v17158_v46 }
 0x4b5   : > { %v14423_v11 = vpop.permute.xlu0 %3662  ;;  %4186 = vrot.lane.b32.xlu1 %v3387_v9, %s10679_s27  ;;  %9406 = vmatprep.mubr.msk.f32.mxu0 %vm4750_vm14, %v4728_v22  ;;  %s10683_s27 = smov 96  }
 0x4b6   : > { %9407 = vmatmul.mubr.msk.f32.gmra.mrb[22].mxu0 %vm4750_vm14, %v4729_v61  ;;  %v5431_v31 = vld [vmem:[#allocation4 + $0x9b] sm:$0xff]  ;;  %v4534_v14 = vsel %vm4508_vm8, %v4501_v34, %v14423_v11 }
 0x4b7   : > { %4440 = vrot.lane.b32.xlu0 %v3450_v33, %s10681_s22  ;;  %v14442_v12 = vpop.permute.xlu1 %3660  ;;  %9596 = vmatpush1.bf16.msra.mxu1 %v9595_v6  ;;  %v5430_v30 = vld [vmem:[#allocation4 + $0x93] sm:$0xff]  ;;  %v9876_v63 = vpack.i.bf16 %v5302_v41, %v5431_v31 }
 0x4b8   : > { %9717 = vmatprep.subr.bf16.mxu1 %v10682_v54  ;;  %v9861_v59 = vpack.i.bf16 %v5301_v36, %v5430_v30  ;;  %v14613_v1 = vld [vmem:[#allocation4 + $0x90] sm:$0xff]  ;;  %v14616_v10 = vld [vmem:[#allocation4 + $0x98] sm:$0xff]  ;;  %v4533_v55 = vsel %vm4508_vm8, %v4500_v40, %v14442_v12 }
 0x4b9   : > { %v14446_v32 = vpop.permute.xlu0 %3790  ;;  %4314 = vrot.lane.b32.xlu1 %v14440_v13, %s10680_s18  ;;  %v9856_v48 = vpack.i.bf16 %v5269_v37, %v14613_v1  ;;  %v9871_v51 = vpack.i.bf16 %v5270_v56, %v14616_v10  ;;  %s10684_s18 = smov 64   ;;  %v5240_v56 = vld [vmem:[#allocation4 + $0x23] sm:$0xff] }
 0x4ba   : > { %v4567_v3 = vsel %vm4541_vm9, %v4534_v14, %v14446_v32 }
 0x4bb   : > { %9852 = vrot.lane.b32.xlu0 %v9851_v57, %s10681_s22  ;;  %v3789_v35 = vpop.permute.xlu1 %3788  ;;  %v5271_v57 = vld [vmem:[#allocation4 + $0x1e] sm:$0xff] }
 0x4bc   : > { %v4566_v9 = vsel %vm4541_vm9, %v4533_v55, %v3789_v35 }
 0x4bd   : > { %v3919_v20 = vpop.permute.xlu0 %3918  ;;  %4442 = vrot.lane.b32.xlu1 %v3451_v62, %s10681_s22  ;;  %v5303_v62 = vld [vmem:[#allocation4 + $0x60] sm:$0xff] }
 0x4be   : > { %v4600_v4 = vsel %vm4574_vm11, %v4567_v3, %v3919_v20 }
 0x4bf   : > { %9862 = vrot.lane.b32.xlu0 %v9861_v59, %s10683_s27  ;;  %v3917_v17 = vpop.permute.xlu1 %3916 }
 0x4c0   : > { %v4599_v29 = vsel %vm4574_vm11, %v4566_v9, %v3917_v17  ;;  %v5272_v17 = vld [vmem:[#allocation4 + $0x26] sm:$0xff] }
 0x4c1   : > { %v4047_v60 = vpop.permute.xlu0 %4046  ;;  %9857 = vrot.lane.b32.xlu1 %v9856_v48, %s10684_s18 }
 0x4c2   : > { %v4633_v11 = vsel %vm4607_vm10, %v4600_v4, %v4047_v60  ;;  %v14664_v60 = vld [vmem:[#allocation4 + $0x6e] sm:$0xff] }
 0x4c3   : > { %9872 = vrot.lane.b32.xlu0 %v9871_v51, %s10684_s18  ;;  %v4045_v53 = vpop.permute.xlu1 %4044 }
 0x4c4   : > { %v4632_v22 = vsel %vm4607_vm10, %v4599_v29, %v4045_v53  ;;  %v9896_v53 = vpack.i.bf16 %v5240_v56, %v14664_v60 }
 0x4c5   : > { %v4175_v42 = vpop.permute.xlu0 %4174  ;;  %v9387_v23 = vpop.f32.mrb[8].mxu0  ;;  %9867 = vrot.lane.b32.xlu1 %v9866_v43, %s10681_s22  ;;  %v5241_v43 = vld [vmem:[#allocation4 + $0x33] sm:$0xff] }
 0x4c6   : > { %v4963_v24 = vadd.f32 %v9387_v23, %v14106_v8  ;;  %v4957_v2 = vpop.f32.mrb[9].mxu0  ;;  %v4666_v61 = vsel %vm4640_vm12, %v4633_v11, %v4175_v42  ;;  %v14670_v42 = vld [vmem:[#allocation4 + $0x7e] sm:$0xff]  ;;  %v5304_v23 = vld [vmem:[#allocation4 + $0x68] sm:$0xff] }
 0x4c7   : > { %9882 = vrot.lane.b32.xlu0 %v9881_v15, %s10681_s22  ;;  %v4958_v38 = vadd.f32 %v14106_v8, %v4957_v2  ;;  %v4173_v0 = vpop.permute.xlu1 %4172  ;;  %v9911_v2 = vpack.i.bf16 %v5241_v43, %v14670_v42  ;;  %v14705_v43 = vld [vmem:[#allocation4 + $0x86] sm:$0xff] }
 0x4c8   : > { %vm5085_vm3 = vcmp.gt.f32.partialorder %v4963_v24, 0.0  ;;  %v5117_v47 = vmul.f32 0.01, %v4963_v24  ;;  %v4665_v45 = vsel %vm4640_vm12, %v4632_v22, %v4173_v0 }
 0x4c9   : > { %v4303_v16 = vpop.permute.xlu0 %4302  ;;  %vm5084_vm4 = vcmp.gt.f32.partialorder %v4958_v38, 0.0  ;;  %v5116_v44 = vmul.f32 0.01, %v4958_v38  ;;  %9877 = vrot.lane.b32.xlu1 %v9876_v63, %s10683_s27  ;;  %v3189_v63 = vld [vmem:[#allocation3 + $0x138] sm:$0xff] }
 0x4ca   : > { %v5149_v39 = vsel %vm5085_vm3, %v4963_v24, %v5117_v47  ;;  %v4699_v13 = vsel %vm4673_vm13, %v4666_v61, %v4303_v16  ;;  %v17159_v16 = vld [vmem:[#allocation109_spill] sm:$0xff] }
 0x4cb   : > { %5182 = vst.msk [vmem:[#allocation4 + $0xb3] sm:$0xff] %vm445_vm6, %v5149_v39  ;;  %v5148_v18 = vsel %vm5084_vm4, %v4958_v38, %v5116_v44  ;;  %v4301_v28 = vpop.permute.xlu1 %4300  ;;  %v4502_v19 = vsel %vm389_vm2, %v3189_v63, %v17159_v16  ;;  %v5306_v63 = vld [vmem:[#allocation4 + $0x80] sm:$0xff] }
 0x4cc   : > { %5181 = vst.msk [vmem:[#allocation4 + $0xab] sm:$0xff] %vm445_vm6, %v5148_v18  ;;  %v4698_v5 = vsel %vm4673_vm13, %v4665_v45, %v4301_v28  ;;  %v10653_v18 = vld [vmem:[#allocation3 + $0x140] sm:$0xff] }
 0x4cd   : > { %v4431_v33 = vpop.permute.xlu0 %4430 }
 0x4ce   : > { %v4731_v32 = vsel %vm445_vm6, %v4699_v13, %v4431_v33 }
 0x4cf   : > { %v4429_v27 = vpop.permute.xlu1 %4428 }
 0x4d0   : > { %v4730_v6 = vsel %vm445_vm6, %v4698_v5, %v4429_v27 }
 0x4d1   : > { %v3665_v12 = vpop.permute.xlu0 %3664  ;;  %9409 = vmatprep.mubr.msk.f32.mxu0 %vm4750_vm14, %v4730_v6 }
 0x4d2   : > { %9410 = vmatmul.mubr.msk.f32.gmra.mrb[24].mxu0 %vm4750_vm14, %v4731_v32  ;;  %v5433_v15 = vld [vmem:[#allocation4 + $0xb3] sm:$0xff]  ;;  %v4535_v44 = vsel %vm4508_vm8, %v4502_v19, %v3665_v12 }
 0x4d3   : > { %v3539_v30 = vpop.permute.xlu1 %3538  ;;  %v5432_v35 = vld [vmem:[#allocation4 + $0xab] sm:$0xff]  ;;  %v9906_v41 = vpack.i.bf16 %v5304_v23, %v5433_v15 }
 0x4d4   : > { %v14659_v36 = vld [vmem:[#allocation4 + $0xa8] sm:$0xff]  ;;  %v9891_v59 = vpack.i.bf16 %v5303_v62, %v5432_v35  ;;  %v14662_v48 = vld [vmem:[#allocation4 + $0xb0] sm:$0xff]  ;;  %v4503_v28 = vsel %vm389_vm2, %v10653_v18, %v3539_v30 }
 0x4d5   : > { %v3793_v20 = vpop.permute.xlu0 %3792  ;;  %v9886_v37 = vpack.i.bf16 %v5271_v57, %v14659_v36  ;;  %v9901_v58 = vpack.i.bf16 %v5272_v17, %v14662_v48  ;;  %v5273_v62 = vld [vmem:[#allocation4 + $0x36] sm:$0xff] }
 0x4d6   : > { %9892 = vrot.lane.b32.xlu0 %v9891_v59, %s10683_s27  ;;  %v4568_v34 = vsel %vm4541_vm9, %v4535_v44, %v3793_v20  ;;  %v5305_v20 = vld [vmem:[#allocation4 + $0x78] sm:$0xff] }
 0x4d7   : > { %9887 = vrot.lane.b32.xlu1 %v9886_v37, %s10684_s18  ;;  %v3667_v51 = vpop.permute.xlu1 %3666 }
 0x4d8   : > { %v4536_v33 = vsel %vm4508_vm8, %v4503_v28, %v3667_v51 }
 0x4d9   : > { %v3921_v26 = vpop.permute.xlu0 %3920 }
 0x4da   : > { %9902 = vrot.lane.b32.xlu0 %v9901_v58, %s10684_s18  ;;  %v4601_v14 = vsel %vm4574_vm11, %v4568_v34, %v3921_v26  ;;  %v5242_v26 = vld [vmem:[#allocation4 + $0x3b] sm:$0xff] }
 0x4db   : > { %9897 = vrot.lane.b32.xlu1 %v9896_v53, %s10681_s22  ;;  %v3795_v31 = vpop.permute.xlu1 %3794  ;;  %v5274_v58 = vld [vmem:[#allocation4 + $0x3e] sm:$0xff] }
 0x4dc   : > { %v4569_v11 = vsel %vm4541_vm9, %v4536_v33, %v3795_v31 }
 0x4dd   : > { %v4049_v24 = vpop.permute.xlu0 %4048 }
 0x4de   : > { %9912 = vrot.lane.b32.xlu0 %v9911_v2, %s10681_s22  ;;  %v4634_v3 = vsel %vm4607_vm10, %v4601_v14, %v4049_v24  ;;  %v9926_v24 = vpack.i.bf16 %v5242_v26, %v14705_v43  ;;  %v14711_v2 = vld [vmem:[#allocation4 + $0x96] sm:$0xff]  ;;  %v10655_v14 = vld [vmem:[#allocation3 + $0x150] sm:$0xff] }
 0x4df   : > { %9907 = vrot.lane.b32.xlu1 %v9906_v41, %s10683_s27  ;;  %v3923_v38 = vpop.permute.xlu1 %3922 }
 0x4e0   : > { %v4602_v5 = vsel %vm4574_vm11, %v4569_v11, %v3923_v38 }
 0x4e1   : > { %v4177_v0 = vpop.permute.xlu0 %4176  ;;  %v9390_v47 = vpop.f32.mrb[10].mxu0 }
 0x4e2   : > { %v4973_v52 = vadd.f32 %v9390_v47, %v14106_v8  ;;  %v4967_v40 = vpop.f32.mrb[11].mxu0 }
 0x4e3   : > { %v4968_v49 = vadd.f32 %v14106_v8, %v4967_v40  ;;  %v4051_v46 = vpop.permute.xlu1 %4050  ;;  %v4667_v8 = vsel %vm4640_vm12, %v4634_v3, %v4177_v0  ;;  %v14715_v0 = vld [vmem:[#allocation4 + $0x4b] sm:$0xff] }
 0x4e4   : > { %vm5087_vm5 = vcmp.gt.f32.partialorder %v4973_v52, 0.0  ;;  %v5119_v55 = vmul.f32 0.01, %v4973_v52  ;;  %v4635_v13 = vsel %vm4607_vm10, %v4602_v5, %v4051_v46  ;;  %v9941_v16 = vpack.i.bf16 %v14715_v0, %v14711_v2 }
 0x4e5   : > { %v4305_v39 = vpop.permute.xlu0 %4304  ;;  %vm5086_vm7 = vcmp.gt.f32.partialorder %v4968_v49, 0.0  ;;  %v5118_v9 = vmul.f32 0.01, %v4968_v49 }
 0x4e6   : > { %v5151_v29 = vsel %vm5087_vm5, %v4973_v52, %v5119_v55  ;;  %v4700_v45 = vsel %vm4673_vm13, %v4667_v8, %v4305_v39 }
 0x4e7   : > { %5184 = vst.msk [vmem:[#allocation4 + $0xcb] sm:$0xff] %vm445_vm6, %v5151_v29  ;;  %v5150_v4 = vsel %vm5086_vm7, %v4968_v49, %v5118_v9  ;;  %v4179_v22 = vpop.permute.xlu1 %4178  ;;  %v14724_v49 = vld [vmem:[%s16572_s4] ss:$0 sm:$0xff] }
 0x4e8   : > { %5183 = vst.msk [vmem:[#allocation4 + $0xc3] sm:$0xff] %vm445_vm6, %v5150_v4  ;;  %v4668_v6 = vsel %vm4640_vm12, %v4635_v13, %v4179_v22 }
 0x4e9   : > { %v4433_v61 = vpop.permute.xlu0 %4432 }
 0x4ea   : > { %v4732_v27 = vsel %vm445_vm6, %v4700_v45, %v4433_v61  ;;  %v10656_v61 = vld [vmem:[#allocation3 + $0x158] sm:$0xff] }
 0x4eb   : > { %9412 = vmatprep.mubr.msk.f32.mxu0 %vm4750_vm14, %v4732_v27  ;;  %v4307_v12 = vpop.permute.xlu1 %4306 }
 0x4ec   : > { %v4701_v32 = vsel %vm4673_vm13, %v4668_v6, %v4307_v12 }
 0x4ed   : > { %v4435_v57 = vpop.permute.xlu0 %4434 }
 0x4ee   : > { %v4733_v30 = vsel %vm445_vm6, %v4701_v32, %v4435_v57  ;;  %v5435_v41 = vld [vmem:[#allocation4 + $0xcb] sm:$0xff] }
 0x4ef   : > { %9413 = vmatmul.mubr.msk.f32.gmra.mrb[26].mxu0 %vm4750_vm14, %v4733_v30  ;;  %v3541_v35 = vpop.permute.xlu1 %3540  ;;  %v5434_v59 = vld [vmem:[#allocation4 + $0xc3] sm:$0xff]  ;;  %v9936_v19 = vpack.i.bf16 %v5306_v63, %v5435_v41  ;;  %v14759_v63 = vld [vmem:[#allocation4 + $0x53] sm:$0xff] }
 0x4f0   : > { %v14700_v37 = vld [vmem:[#allocation4 + $0xc0] sm:$0xff]  ;;  %v9921_v17 = vpack.i.bf16 %v5305_v20, %v5434_v59  ;;  %v14703_v53 = vld [vmem:[#allocation4 + $0xc8] sm:$0xff]  ;;  %v4504_v9 = vsel %vm389_vm2, %v10655_v14, %v3541_v35 }
 0x4f1   : > { %v3669_v56 = vpop.permute.xlu0 %3668  ;;  %v9916_v51 = vpack.i.bf16 %v5273_v62, %v14700_v37  ;;  %v9931_v23 = vpack.i.bf16 %v5274_v58, %v14703_v53  ;;  %v14754_v41 = vld [vmem:[#allocation4 + $0x9e] sm:$0xff] }
 0x4f2   : > { %9922 = vrot.lane.b32.xlu0 %v9921_v17, %s10683_s27  ;;  %v4537_v33 = vsel %vm4508_vm8, %v4504_v9, %v3669_v56 }
 0x4f3   : > { %9917 = vrot.lane.b32.xlu1 %v9916_v51, %s10684_s18  ;;  %v3543_v15 = vpop.permute.xlu1 %3542 }
 0x4f4   : > { %v4505_v5 = vsel %vm389_vm2, %v10656_v61, %v3543_v15 }
 0x4f5   : > { %v3797_v31 = vpop.permute.xlu0 %3796 }
 0x4f6   : > { %9932 = vrot.lane.b32.xlu0 %v9931_v23, %s10684_s18  ;;  %v4570_v22 = vsel %vm4541_vm9, %v4537_v33, %v3797_v31 }
 0x4f7   : > { %9927 = vrot.lane.b32.xlu1 %v9926_v24, %s10681_s22  ;;  %v3671_v38 = vpop.permute.xlu1 %3670 }
 0x4f8   : > { %v4538_v13 = vsel %vm4508_vm8, %v4505_v5, %v3671_v38 }
 0x4f9   : > { %v3925_v47 = vpop.permute.xlu0 %3924 }
 0x4fa   : > { %9942 = vrot.lane.b32.xlu0 %v9941_v16, %s10681_s22  ;;  %v4603_v45 = vsel %vm4574_vm11, %v4570_v22, %v3925_v47  ;;  %v14765_v16 = vld [vmem:[#allocation4 + $0xae] sm:$0xff]  ;;  %v10657_v22 = vld [vmem:[#allocation3 + $0x168] sm:$0xff] }
 0x4fb   : > { %9937 = vrot.lane.b32.xlu1 %v9936_v19, %s10683_s27  ;;  %v3799_v52 = vpop.permute.xlu1 %3798 }
 0x4fc   : > { %v4571_v32 = vsel %vm4541_vm9, %v4538_v13, %v3799_v52 }
 0x4fd   : > { %v4053_v40 = vpop.permute.xlu0 %4052  ;;  %v9393_v44 = vpop.f32.mrb[12].mxu0 }
 0x4fe   : > { %v4983_v46 = vadd.f32 %v14724_v49, %v9393_v44  ;;  %v4977_v34 = vpop.f32.mrb[13].mxu0  ;;  %v4636_v27 = vsel %vm4607_vm10, %v4603_v45, %v4053_v40  ;;  %v14769_v40 = vld [vmem:[#allocation4 + $0x63] sm:$0xff] }
 0x4ff   : > { %v4978_v55 = vadd.f32 %v14724_v49, %v4977_v34  ;;  %v3927_v39 = vpop.permute.xlu1 %3926 }
 0x500   : > { %vm5089_vm15 = vcmp.gt.f32.partialorder %v4983_v46, 0.0  ;;  %v5121_v18 = vmul.f32 0.01, %v4983_v46  ;;  %v4604_v62 = vsel %vm4574_vm11, %v4571_v32, %v3927_v39 }
 0x501   : > { %v4181_v28 = vpop.permute.xlu0 %4180  ;;  %vm5088_vm0 = vcmp.gt.f32.partialorder %v4978_v55, 0.0  ;;  %v5120_v3 = vmul.f32 0.01, %v4978_v55 }
 0x502   : > { %v5153_v29 = vsel %vm5089_vm15, %v4983_v46, %v5121_v18  ;;  %v4669_v6 = vsel %vm4640_vm12, %v4636_v27, %v4181_v28  ;;  %v9971_v46 = vpack.i.bf16 %v14769_v40, %v14765_v16  ;;  %vm517_vm15 = vcmask 517120  }
 0x503   : > { %5186 = vst.msk [vmem:[#allocation4 + $0xe3] sm:$0xff] %vm445_vm6, %v5153_v29  ;;  %v5152_v8 = vsel %vm5088_vm0, %v4978_v55, %v5120_v3  ;;  %v4055_v4 = vpop.permute.xlu1 %4054 }
 0x504   : > { %5185 = vst.msk [vmem:[#allocation4 + $0xdb] sm:$0xff] %vm445_vm6, %v5152_v8  ;;  %v4637_v20 = vsel %vm4607_vm10, %v4604_v62, %v4055_v4 }
 0x505   : > { %v4309_v11 = vpop.permute.xlu0 %4308  ;;  %518 = vst.msk [vmem:[#allocation5 + $0x18] sm:$0x3] %vm517_vm15, %v17151_v7  ;;  %522 = vst.msk [vmem:[#allocation5 + $0x38] sm:$0x3] %vm517_vm15, %v17151_v7 }
 0x506   : > { %v4702_v57 = vsel %vm4673_vm13, %v4669_v6, %v4309_v11  ;;  %526 = vst.msk [vmem:[#allocation5 + $0x58] sm:$0x3] %vm517_vm15, %v17151_v7  ;;  %530 = vst.msk [vmem:[#allocation5 + $0x78] sm:$0x3] %vm517_vm15, %v17151_v7 }
 0x507   : > { %v4183_v12 = vpop.permute.xlu1 %4182  ;;  %534 = vst.msk [vmem:[#allocation5 + $0x98] sm:$0x3] %vm517_vm15, %v17151_v7  ;;  %538 = vst.msk [vmem:[#allocation5 + $0xb8] sm:$0x3] %vm517_vm15, %v17151_v7 }
 0x508   : > { %v4670_v59 = vsel %vm4640_vm12, %v4637_v20, %v4183_v12  ;;  %542 = vst.msk [vmem:[#allocation5 + $0xd8] sm:$0x3] %vm517_vm15, %v17151_v7  ;;  %546 = vst.msk [vmem:[#allocation5 + $0xf8] sm:$0x3] %vm517_vm15, %v17151_v7 }
 0x509   : > { %v4437_v30 = vpop.permute.xlu0 %4436  ;;  %550 = vst.msk [vmem:[#allocation5 + $0x118] sm:$0x3] %vm517_vm15, %v17151_v7  ;;  %554 = vst.msk [vmem:[#allocation5 + $0x138] sm:$0x3] %vm517_vm15, %v17151_v7 }
 0x50a   : > { %v4734_v35 = vsel %vm445_vm6, %v4702_v57, %v4437_v30  ;;  %v5437_v19 = vld [vmem:[#allocation4 + $0xe3] sm:$0xff]  ;;  %558 = vst.msk [vmem:[#allocation5 + $0x158] sm:$0x3] %vm517_vm15, %v17151_v7  ;;  %562 = vst.msk [vmem:[#allocation5 + $0x178] sm:$0x3] %vm517_vm15, %v17151_v7 }
 0x50b   : > { %9415 = vmatprep.mubr.msk.f32.mxu0 %vm4750_vm14, %v4734_v35  ;;  %v4311_v56 = vpop.permute.xlu1 %4310  ;;  %v5436_v17 = vld [vmem:[#allocation4 + $0xdb] sm:$0xff]  ;;  %v9966_v34 = vpack.i.bf16 %v14616_v10, %v5437_v19  ;;  %566 = vst.msk [vmem:[#allocation5 + $0x198] sm:$0x3] %vm517_vm15, %v17151_v7  ;;  %570 = vst.msk [vmem:[#allocation5 + $0x1b8] sm:$0x3] %vm517_vm15, %v17151_v7 }
 0x50c   : > { %v14745_v51 = vld [vmem:[#allocation4 + $0xd8] sm:$0xff]  ;;  %v4703_v26 = vsel %vm4673_vm13, %v4670_v59, %v4311_v56  ;;  %v9951_v15 = vpack.i.bf16 %v14613_v1, %v5436_v17  ;;  %v14752_v24 = vld [vmem:[#allocation4 + $0xe0] sm:$0xff]  ;;  %574 = vst.msk [vmem:[#allocation5 + $0x1d8] sm:$0x3] %vm517_vm15, %v17151_v7  ;;  %578 = vst.msk [vmem:[#allocation5 + $0x1f8] sm:$0x3] %vm517_vm15, %v17151_v7 }
 0x50d   : > { %v4439_v58 = vpop.permute.xlu0 %4438  ;;  %v9946_v31 = vpack.i.bf16 %v14430_v25, %v14745_v51  ;;  %v9961_v1 = vpack.i.bf16 %v14621_v21, %v14752_v24  ;;  %v9956_v25 = vpack.i.bf16 %v14759_v63, %v14754_v41  ;;  %v10658_v17 = vld [vmem:[#allocation3 + $0x170] sm:$0xff]  ;;  %582 = vst.msk [vmem:[#allocation5 + $0x218] sm:$0x3] %vm517_vm15, %v17151_v7  ;;  %586 = vst.msk [vmem:[#allocation5 + $0x238] sm:$0x3] %vm517_vm15, %v17151_v7 }
 0x50e   : > { %v4735_v23 = vsel %vm445_vm6, %v4703_v26, %v4439_v58  ;;  %9952 = vrot.lane.b32.xlu0 %v9951_v15, %s10683_s27  ;;  %590 = vst.msk [vmem:[#allocation5 + $0x258] sm:$0x3] %vm517_vm15, %v17151_v7  ;;  %594 = vst.msk [vmem:[#allocation5 + $0x278] sm:$0x3] %vm517_vm15, %v17151_v7 }
 0x50f   : > { %9947 = vrot.lane.b32.xlu1 %v9946_v31, %s10684_s18  ;;  %9416 = vmatmul.mubr.msk.f32.gmra.mrb[28].mxu0 %vm4750_vm14, %v4735_v23  ;;  %v3545_v38 = vpop.permute.xlu1 %3544  ;;  %v14796_v31 = vld [vmem:[#allocation4 + $0xb6] sm:$0xff]  ;;  %598 = vst.msk [vmem:[#allocation5 + $0x298] sm:$0x3] %vm517_vm15, %v17151_v7  ;;  %602 = vst.msk [vmem:[#allocation5 + $0x2b8] sm:$0x3] %vm517_vm15, %v17151_v7 }
 0x510   : > { %v4506_v11 = vsel %vm389_vm2, %v10657_v22, %v3545_v38  ;;  %v14803_v38 = vld [vmem:[#allocation4 + $0x6b] sm:$0xff]  ;;  %606 = vst.msk [vmem:[#allocation5 + $0x2d8] sm:$0x3] %vm517_vm15, %v17151_v7  ;;  %610 = vst.msk [vmem:[#allocation5 + $0x2f8] sm:$0x3] %vm517_vm15, %v17151_v7 }
 0x511   : > { %v3673_v47 = vpop.permute.xlu0 %3672  ;;  %v9986_v19 = vpack.i.bf16 %v14803_v38, %v14796_v31  ;;  %614 = vst.msk [vmem:[#allocation5 + $0x318] sm:$0x3] %vm517_vm15, %v17151_v7  ;;  %618 = vst.msk [vmem:[#allocation5 + $0x338] sm:$0x3] %vm517_vm15, %v17151_v7 }
 0x512   : > { %9962 = vrot.lane.b32.xlu0 %v9961_v1, %s10684_s18  ;;  %v4539_v61 = vsel %vm4508_vm8, %v4506_v11, %v3673_v47 }
 0x513   : > { %9957 = vrot.lane.b32.xlu1 %v9956_v25, %s10681_s22  ;;  %v3547_v52 = vpop.permute.xlu1 %3546 }
 0x514   : > { %v4507_v26 = vsel %vm389_vm2, %v10658_v17, %v3547_v52 }
 0x515   : > { %v3801_v44 = vpop.permute.xlu0 %3800 }
 0x516   : > { %9972 = vrot.lane.b32.xlu0 %v9971_v46, %s10681_s22  ;;  %v4572_v27 = vsel %vm4541_vm9, %v4539_v61, %v3801_v44  ;;  %v14811_v44 = vld [vmem:[#allocation4 + $0xc6] sm:$0xff] }
 0x517   : > { %9967 = vrot.lane.b32.xlu1 %v9966_v34, %s10683_s27  ;;  %v3675_v21 = vpop.permute.xlu1 %3674 }
 0x518   : > { %v4540_v23 = vsel %vm4508_vm8, %v4507_v26, %v3675_v21  ;;  %vm6326_vm8 = vcmask 785408  }
 0x519   : > { %v3929_v55 = vpop.permute.xlu0 %3928  ;;  %v9396_v39 = vpop.f32.mrb[14].mxu0 }
 0x51a   : > { %v4993_v14 = vadd.f32 %v14724_v49, %v9396_v39  ;;  %v4987_v9 = vpop.f32.mrb[15].mxu0  ;;  %v4605_v6 = vsel %vm4574_vm11, %v4572_v27, %v3929_v55  ;;  %v14817_v39 = vld [vmem:[#allocation4 + $0x7b] sm:$0xff] }
 0x51b   : > { %v4988_v18 = vadd.f32 %v14724_v49, %v4987_v9  ;;  %v3803_v28 = vpop.permute.xlu1 %3802 }
 0x51c   : > { %vm5091_vm3 = vcmp.gt.f32.partialorder %v4993_v14, 0.0  ;;  %v5123_v3 = vmul.f32 0.01, %v4993_v14 }
 0x51d   : > { %v4057_v29 = vpop.permute.xlu0 %4056  ;;  %vm5090_vm4 = vcmp.gt.f32.partialorder %v4988_v18, 0.0  ;;  %v5122_v33 = vmul.f32 0.01, %v4988_v18 }
 0x51e   : > { %v5155_v8 = vsel %vm5091_vm3, %v4993_v14, %v5123_v3  ;;  %v4638_v12 = vsel %vm4607_vm10, %v4605_v6, %v4057_v29  ;;  %v10001_v14 = vpack.i.bf16 %v14817_v39, %v14811_v44  ;;  %v5205_v29 = vld [vmem:[#allocation4] sm:$0xff] }
 0x51f   : > { %5188 = vst.msk [vmem:[#allocation4 + $0xfb] sm:$0xff] %vm445_vm6, %v5155_v8  ;;  %v5154_v10 = vsel %vm5090_vm4, %v4988_v18, %v5122_v33  ;;  %v3931_v4 = vpop.permute.xlu1 %3930 }
 0x520   : > { %5187 = vst.msk [vmem:[#allocation4 + $0xf3] sm:$0xff] %vm445_vm6, %v5154_v10 }
 0x521   : > { %v4185_v45 = vpop.permute.xlu0 %4184 }
 0x522   : > { %v4671_v32 = vsel %vm4640_vm12, %v4638_v12, %v4185_v45 }
 0x523   : > { %v4059_v5 = vpop.permute.xlu1 %4058 }
 0x525   : > { %v4313_v13 = vpop.permute.xlu0 %4312 }
 0x526   : > { %v4704_v35 = vsel %vm4673_vm13, %v4671_v32, %v4313_v13  ;;  %v5439_v46 = vld [vmem:[#allocation4 + $0xfb] sm:$0xff] }
 0x527   : > { %v4187_v57 = vpop.permute.xlu1 %4186  ;;  %v5438_v30 = vld [vmem:[#allocation4 + $0xf3] sm:$0xff]  ;;  %v9996_v9 = vpack.i.bf16 %v14662_v48, %v5439_v46 }
 0x528   : > { %v14786_v62 = vld [vmem:[#allocation4 + $0xf0] sm:$0xff]  ;;  %v9981_v59 = vpack.i.bf16 %v14659_v36, %v5438_v30  ;;  %v14794_v15 = vld [vmem:[#allocation4 + $0xf8] sm:$0xff]  ;;  %v4573_v36 = vsel %vm4541_vm9, %v4540_v23, %v3803_v28 }
 0x529   : > { %v4441_v20 = vpop.permute.xlu0 %4440  ;;  %v9976_v56 = vpack.i.bf16 %v14624_v50, %v14786_v62  ;;  %v4606_v47 = vsel %vm4574_vm11, %v4573_v36, %v3931_v4  ;;  %v9991_v25 = vpack.i.bf16 %v14664_v60, %v14794_v15 }
 0x52a   : > { %v4736_v58 = vsel %vm445_vm6, %v4704_v35, %v4441_v20  ;;  %9982 = vrot.lane.b32.xlu0 %v9981_v59, %s10683_s27  ;;  %v4639_v52 = vsel %vm4607_vm10, %v4606_v47, %v4059_v5 }
 0x52b   : > { %9977 = vrot.lane.b32.xlu1 %v9976_v56, %s10684_s18  ;;  %9418 = vmatprep.mubr.msk.f32.mxu0 %vm4750_vm14, %v4736_v58  ;;  %v4315_v50 = vpop.permute.xlu1 %4314  ;;  %v4672_v34 = vsel %vm4640_vm12, %v4639_v52, %v4187_v57  ;;  %v14854_v52 = vld [vmem:[#allocation4 + $0xde] sm:$0xff] }
 0x52c   : > { %v4705_v21 = vsel %vm4673_vm13, %v4672_v34, %v4315_v50 }
 0x52d   : > { %v9853_v1 = vpop.permute.xlu0 %9852 }
 0x52e   : > { %9992 = vrot.lane.b32.xlu0 %v9991_v25, %s10684_s18  ;;  %v9855_v18 = vunpack.i.h.bf16 %v9853_v1  ;;  %v9854_v28 = vunpack.i.l.bf16 %v9853_v1 }
 0x52f   : > { %9987 = vrot.lane.b32.xlu1 %v9986_v19, %s10681_s22  ;;  %v4443_v55 = vpop.permute.xlu1 %4442  ;;  %v14850_v19 = vld [vmem:[#allocation4 + $0xce] sm:$0xff] }
 0x530   : > { %v4737_v60 = vsel %vm445_vm6, %v4705_v21, %v4443_v55  ;;  %v6359_v11 = vsel %vm445_vm6, %v14715_v0, %v9854_v28  ;;  %v6262_v45 = vsel %vm445_vm6, %v5205_v29, %v9855_v18  ;;  %v5206_v0 = vld [vmem:[#allocation4 + $0x8] sm:$0xff]  ;;  %v14874_v28 = vld [vmem:[#allocation4 + $0xfe] sm:$0xff] }
 0x531   : > { %9419 = vmatmul.mubr.msk.f32.gmra.mrb[30].mxu0 %vm4750_vm14, %v4737_v60  ;;  %v9863_v3 = vpop.permute.xlu0 %9862  ;;  %v14862_v55 = vld [vmem:[#allocation4 + $0xe6] sm:$0xff]  ;;  %v14866_v60 = vld [vmem:[#allocation4 + $0xf6] sm:$0xff] }
 0x532   : > { %10002 = vrot.lane.b32.xlu0 %v10001_v14, %s10681_s22  ;;  %9429 = vmatprep.mubr.msk.f32.mxu0 %vm445_vm6, %v14711_v2  ;;  %v9865_v4 = vunpack.i.h.bf16 %v9863_v3  ;;  %v9864_v22 = vunpack.i.l.bf16 %v9863_v3 }
 0x533   : > { %9997 = vrot.lane.b32.xlu1 %v9996_v9, %s10683_s27  ;;  %v9858_v33 = vpop.permute.xlu1 %9857 }
 0x534   : > { %v9860_v8 = vunpack.i.h.bf16 %v9858_v33  ;;  %v9859_v10 = vunpack.i.l.bf16 %v9858_v33 }
 0x535   : > { %v9399_v48 = vpop.f32.mrb[16].mxu0  ;;  %9430 = vmatmul.mubr.msk.f32.vlgmr.msra.gmra.mrb[32].mxu0 %vm445_vm6, %v14754_v41  ;;  %v9873_v30 = vpop.permute.xlu0 %9872 }
 0x536   : > { %v5003_v61 = vadd.f32 %v14724_v49, %v9399_v48  ;;  %v4997_v5 = vpop.f32.mrb[17].mxu0  ;;  %9432 = vmatprep.mubr.msk.f32.mxu0 %vm445_vm6, %v14765_v16  ;;  %v6391_v27 = vsel %vm513_vm1, %v6359_v11, %v9859_v10  ;;  %v6294_v13 = vsel %vm513_vm1, %v6262_v45, %v9860_v8  ;;  %v9875_v23 = vunpack.i.h.bf16 %v9873_v30 }
 0x537   : > { %v4998_v6 = vadd.f32 %v14724_v49, %v4997_v5  ;;  %v9868_v12 = vpop.permute.xlu1 %9867  ;;  %v6423_v32 = vsel %vm6326_vm8, %v6391_v27, %v9864_v22  ;;  %v6327_v57 = vsel %vm6326_vm8, %v6294_v13, %v9865_v4  ;;  %v9874_v36 = vunpack.i.l.bf16 %v9873_v30  ;;  %v5207_v22 = vld [vmem:[#allocation4 + $0x18] sm:$0xff] }
 0x538   : > { %vm5093_vm9 = vcmp.gt.f32.partialorder %v5003_v61, 0.0  ;;  %v5125_v35 = vmul.f32 0.01, %v5003_v61  ;;  %v9870_v20 = vunpack.i.h.bf16 %v9868_v12  ;;  %v9869_v59 = vunpack.i.l.bf16 %v9868_v12  ;;  %6658 = vmatprep.mubr.f32.mxu1 %v6423_v32 }
 0x539   : > { %vm5092_vm10 = vcmp.gt.f32.partialorder %v4998_v6, 0.0  ;;  %v5124_v56 = vmul.f32 0.01, %v4998_v6  ;;  %6659 = vmatmul.mubr.f32.vlgmr.msra.gmra.mrb[0].mxu1 %v6327_v57  ;;  %9433 = vmatmul.mubr.msk.f32.gmra.mrb[34].mxu0 %vm445_vm6, %v14796_v31  ;;  %v9883_v14 = vpop.permute.xlu0 %9882 }
 0x53a   : > { %v5157_v17 = vsel %vm5093_vm9, %v5003_v61, %v5125_v35  ;;  %9435 = vmatprep.mubr.msk.f32.mxu0 %vm445_vm6, %v14811_v44  ;;  %v6360_v26 = vsel %vm445_vm6, %v14759_v63, %v9869_v59  ;;  %v6263_v58 = vsel %vm445_vm6, %v5206_v0, %v9870_v20  ;;  %v9885_v8 = vunpack.i.h.bf16 %v9883_v14  ;;  %v14908_v0 = vld [vmem:[#allocation4 + $0x93] sm:$0xff] }
 0x53b   : > { %5190 = vst.msk [vmem:[#allocation4 + $0x113] sm:$0xff] %vm445_vm6, %v5157_v17  ;;  %v5156_v50 = vsel %vm5092_vm10, %v4998_v6, %v5124_v56  ;;  %v9878_v47 = vpop.permute.xlu1 %9877  ;;  %v6392_v63 = vsel %vm513_vm1, %v6360_v26, %v9874_v36  ;;  %v6295_v46 = vsel %vm513_vm1, %v6263_v58, %v9875_v23  ;;  %v9884_v10 = vunpack.i.l.bf16 %v9883_v14  ;;  %v5208_v26 = vld [vmem:[#allocation4 + $0x20] sm:$0xff] }
 0x53c   : > { %5189 = vst.msk [vmem:[#allocation4 + $0x10b] sm:$0xff] %vm445_vm6, %v5156_v50  ;;  %v9880_v1 = vunpack.i.h.bf16 %v9878_v47  ;;  %v9879_v25 = vunpack.i.l.bf16 %v9878_v47  ;;  %v10031_v56 = vpack.i.bf16 %v14908_v0, %v14854_v52 }
 0x53d   : > { %9436 = vmatmul.mubr.msk.f32.gmra.mrb[36].mxu0 %vm445_vm6, %v14850_v19  ;;  %v6361_v32 = vsel %vm445_vm6, %v14769_v40, %v9884_v10 }
 0x53e   : > { %9438 = vmatprep.mubr.msk.f32.mxu0 %vm445_vm6, %v14854_v52  ;;  %v6424_v34 = vsel %vm6326_vm8, %v6392_v63, %v9879_v25  ;;  %v6328_v21 = vsel %vm6326_vm8, %v6295_v46, %v9880_v1 }
 0x53f   : > { %6663 = vmatprep.mubr.f32.mxu1 %v6424_v34 }
 0x540   : > { %6664 = vmatmul.mubr.f32.gmra.mrb[2].mxu1 %v6328_v21 }
 0x541   : > { %9439 = vmatmul.mubr.msk.f32.gmra.mrb[38].mxu0 %vm445_vm6, %v14862_v55 }
 0x542   : > { %9441 = vmatprep.mubr.msk.f32.mxu0 %vm445_vm6, %v14866_v60  ;;  %v14892_v11 = vld [vmem:[#allocation4 + $0x116] sm:$0xff] }
 0x543   : > { %v14870_v9 = vld [vmem:[#allocation4 + $0x10b] sm:$0xff]  ;;  %v14900_v12 = vld [vmem:[#allocation4 + $0x113] sm:$0xff] }
 0x544   : > { %v14872_v18 = vld [vmem:[#allocation4 + $0x108] sm:$0xff]  ;;  %v10011_v3 = vpack.i.bf16 %v14700_v37, %v14870_v9  ;;  %v14882_v33 = vld [vmem:[#allocation4 + $0x110] sm:$0xff]  ;;  %v10026_v17 = vpack.i.bf16 %v14703_v53, %v14900_v12 }
 0x545   : > { %v10006_v29 = vpack.i.bf16 %v14670_v42, %v14872_v18  ;;  %9442 = vmatmul.mubr.msk.f32.gmra.mrb[40].mxu0 %vm445_vm6, %v14874_v28  ;;  %v14886_v4 = vld [vmem:[#allocation4 + $0x10e] sm:$0xff]  ;;  %v14890_v37 = vld [vmem:[#allocation4 + $0x83] sm:$0xff]  ;;  %v10021_v45 = vpack.i.bf16 %v14705_v43, %v14882_v33  ;;  %v6264_v43 = vsel %vm445_vm6, %v5207_v22, %v9885_v8 }
 0x546   : > { %10012 = vrot.lane.b32.xlu0 %v10011_v3, %s10683_s27  ;;  %9444 = vmatprep.mubr.msk.f32.mxu0 %vm445_vm6, %v14886_v4  ;;  %v10016_v61 = vpack.i.bf16 %v14890_v37, %v14850_v19 }
 0x547   : > { %10007 = vrot.lane.b32.xlu1 %v10006_v29, %s10684_s18 }
 0x548   : > { %v9893_v42 = vpop.permute.xlu0 %9892 }
 0x549   : > { %v9888_v48 = vpop.permute.xlu1 %9887  ;;  %v9895_v5 = vunpack.i.h.bf16 %v9893_v42  ;;  %v9894_v27 = vunpack.i.l.bf16 %v9893_v42  ;;  %9445 = vmatmul.mubr.msk.f32.gmra.mrb[42].mxu0 %vm445_vm6, %v14892_v11 }
 0x54a   : > { %v9890_v13 = vunpack.i.h.bf16 %v9888_v48  ;;  %v9889_v6 = vunpack.i.l.bf16 %v9888_v48  ;;  %10022 = vrot.lane.b32.xlu0 %v10021_v45, %s10684_s18 }
 0x54b   : > { %10017 = vrot.lane.b32.xlu1 %v10016_v61, %s10681_s22 }
 0x54c   : > { %v6393_v57 = vsel %vm513_vm1, %v6361_v32, %v9889_v6  ;;  %v6296_v30 = vsel %vm513_vm1, %v6264_v43, %v9890_v13  ;;  %v9903_v35 = vpop.permute.xlu0 %9902 }
 0x54d   : > { %v9898_v20 = vpop.permute.xlu1 %9897  ;;  %v6425_v59 = vsel %vm6326_vm8, %v6393_v57, %v9894_v27  ;;  %v6329_v40 = vsel %vm6326_vm8, %v6296_v30, %v9895_v5  ;;  %v9905_v36 = vunpack.i.h.bf16 %v9903_v35  ;;  %v9904_v50 = vunpack.i.l.bf16 %v9903_v35  ;;  %v14950_v35 = vld [vmem:[#allocation4 + $0x9b] sm:$0xff] }
 0x54e   : > { %v9900_v58 = vunpack.i.h.bf16 %v9898_v20  ;;  %v9899_v23 = vunpack.i.l.bf16 %v9898_v20  ;;  %6668 = vmatprep.mubr.f32.mxu1 %v6425_v59  ;;  %10032 = vrot.lane.b32.xlu0 %v10031_v56, %s10681_s22  ;;  %v5209_v20 = vld [vmem:[#allocation4 + $0x30] sm:$0xff] }
 0x54f   : > { %10027 = vrot.lane.b32.xlu1 %v10026_v17, %s10683_s27  ;;  %6669 = vmatmul.mubr.f32.gmra.mrb[4].mxu1 %v6329_v40 }
 0x550   : > { %v6362_v47 = vsel %vm445_vm6, %v14803_v38, %v9899_v23  ;;  %v6265_v1 = vsel %vm445_vm6, %v5208_v26, %v9900_v58  ;;  %v9913_v45 = vpop.permute.xlu0 %9912 }
 0x551   : > { %v9908_v25 = vpop.permute.xlu1 %9907  ;;  %v9402_v46 = vpop.f32.mrb[18].mxu0  ;;  %v6394_v14 = vsel %vm513_vm1, %v6362_v47, %v9904_v50  ;;  %v6297_v3 = vsel %vm513_vm1, %v6265_v1, %v9905_v36  ;;  %v9915_v57 = vunpack.i.h.bf16 %v9913_v45  ;;  %v9914_v30 = vunpack.i.l.bf16 %v9913_v45 }
 0x552   : > { %v9910_v53 = vunpack.i.h.bf16 %v9908_v25  ;;  %v9909_v63 = vunpack.i.l.bf16 %v9908_v25  ;;  %v5013_v34 = vadd.f32 %v14724_v49, %v9402_v46  ;;  %v5007_v21 = vpop.f32.mrb[19].mxu0 }
 0x553   : > { %v5008_v29 = vadd.f32 %v14724_v49, %v5007_v21  ;;  %v6363_v36 = vsel %vm445_vm6, %v14817_v39, %v9914_v30  ;;  %v6266_v50 = vsel %vm445_vm6, %v5209_v20, %v9915_v57  ;;  %v5210_v39 = vld [vmem:[#allocation4 + $0x38] sm:$0xff] }
 0x554   : > { %v6426_v8 = vsel %vm6326_vm8, %v6394_v14, %v9909_v63  ;;  %v6330_v10 = vsel %vm6326_vm8, %v6297_v3, %v9910_v53  ;;  %vm5095_vm11 = vcmp.gt.f32.partialorder %v5013_v34, 0.0  ;;  %v5127_v38 = vmul.f32 0.01, %v5013_v34 }
 0x555   : > { %6673 = vmatprep.mubr.f32.mxu1 %v6426_v8  ;;  %vm5094_vm12 = vcmp.gt.f32.partialorder %v5008_v29, 0.0  ;;  %v5126_v22 = vmul.f32 0.01, %v5008_v29 }
 0x556   : > { %6674 = vmatmul.mubr.f32.gmra.mrb[6].mxu1 %v6330_v10  ;;  %v5159_v42 = vsel %vm5095_vm11, %v5013_v34, %v5127_v38 }
 0x557   : > { %5192 = vst.msk [vmem:[#allocation4 + $0x12b] sm:$0xff] %vm445_vm6, %v5159_v42  ;;  %v5158_v48 = vsel %vm5094_vm12, %v5008_v29, %v5126_v22 }
 0x558   : > { %5191 = vst.msk [vmem:[#allocation4 + $0x123] sm:$0xff] %vm445_vm6, %v5158_v48 }
 0x55e   : > { %v14938_v13 = vld [vmem:[#allocation4 + $0x12e] sm:$0xff] }
 0x55f   : > { %v14930_v61 = vld [vmem:[#allocation4 + $0x126] sm:$0xff] }
 0x560   : > { %v14932_v5 = vld [vmem:[#allocation4 + $0x123] sm:$0xff]  ;;  %9447 = vmatprep.mubr.msk.f32.mxu0 %vm445_vm6, %v14930_v61  ;;  %v5443_v23 = vld [vmem:[#allocation4 + $0x12b] sm:$0xff] }
 0x561   : > { %v14934_v27 = vld [vmem:[#allocation4 + $0x120] sm:$0xff]  ;;  %v10041_v6 = vpack.i.bf16 %v14745_v51, %v14932_v5  ;;  %9448 = vmatmul.mubr.msk.f32.gmra.mrb[44].mxu0 %vm445_vm6, %v14938_v13  ;;  %v14946_v43 = vld [vmem:[#allocation4 + $0x128] sm:$0xff]  ;;  %v10056_v34 = vpack.i.bf16 %v14752_v24, %v5443_v23 }
 0x562   : > { %v10036_v32 = vpack.i.bf16 %v14711_v2, %v14934_v27  ;;  %v10051_v51 = vpack.i.bf16 %v14754_v41, %v14946_v43  ;;  %v10046_v2 = vpack.i.bf16 %v14950_v35, %v14862_v55  ;;  %v14962_v41 = vld [vmem:[#allocation4 + $0xab] sm:$0xff] }
 0x563   : > { %10042 = vrot.lane.b32.xlu0 %v10041_v6, %s10683_s27  ;;  %v10061_v46 = vpack.i.bf16 %v14962_v41, %v14866_v60 }
 0x564   : > { %10037 = vrot.lane.b32.xlu1 %v10036_v32, %s10684_s18  ;;  %v9923_v59 = vpop.permute.xlu0 %9922 }
 0x565   : > { %v9918_v56 = vpop.permute.xlu1 %9917  ;;  %v9925_v17 = vunpack.i.h.bf16 %v9923_v59  ;;  %v9924_v40 = vunpack.i.l.bf16 %v9923_v59 }
 0x566   : > { %v9920_v26 = vunpack.i.h.bf16 %v9918_v56  ;;  %v9919_v58 = vunpack.i.l.bf16 %v9918_v56 }
 0x567   : > { %10052 = vrot.lane.b32.xlu0 %v10051_v51, %s10684_s18 }
 0x568   : > { %10047 = vrot.lane.b32.xlu1 %v10046_v2, %s10681_s22  ;;  %v6395_v47 = vsel %vm513_vm1, %v6363_v36, %v9919_v58  ;;  %v6298_v1 = vsel %vm513_vm1, %v6266_v50, %v9920_v26  ;;  %v9933_v25 = vpop.permute.xlu0 %9932 }
 0x569   : > { %v9928_v53 = vpop.permute.xlu1 %9927  ;;  %v6427_v63 = vsel %vm6326_vm8, %v6395_v47, %v9924_v40  ;;  %v6331_v21 = vsel %vm6326_vm8, %v6298_v1, %v9925_v17  ;;  %v9935_v29 = vunpack.i.h.bf16 %v9933_v25  ;;  %v9934_v8 = vunpack.i.l.bf16 %v9933_v25 }
 0x56a   : > { %v9930_v14 = vunpack.i.h.bf16 %v9928_v53  ;;  %v9929_v3 = vunpack.i.l.bf16 %v9928_v53  ;;  %6678 = vmatprep.mubr.f32.mxu1 %v6427_v63  ;;  %v15003_v53 = vld [vmem:[#allocation4 + $0xb3] sm:$0xff] }
 0x56b   : > { %10062 = vrot.lane.b32.xlu0 %v10061_v46, %s10681_s22  ;;  %6679 = vmatmul.mubr.f32.gmra.mrb[8].mxu1 %v6331_v21 }
 0x56c   : > { %10057 = vrot.lane.b32.xlu1 %v10056_v34, %s10683_s27  ;;  %v6364_v10 = vsel %vm445_vm6, %v14890_v37, %v9929_v3  ;;  %v6267_v38 = vsel %vm445_vm6, %v5210_v39, %v9930_v14  ;;  %v9943_v17 = vpop.permute.xlu0 %9942 }
 0x56d   : > { %v9938_v22 = vpop.permute.xlu1 %9937  ;;  %v9405_v48 = vpop.f32.mrb[20].mxu0  ;;  %v6396_v32 = vsel %vm513_vm1, %v6364_v10, %v9934_v8  ;;  %v6299_v57 = vsel %vm513_vm1, %v6267_v38, %v9935_v29  ;;  %v9945_v1 = vunpack.i.h.bf16 %v9943_v17  ;;  %v9944_v25 = vunpack.i.l.bf16 %v9943_v17  ;;  %v5211_v29 = vld [vmem:[#allocation4 + $0x48] sm:$0xff] }
 0x56e   : > { %v9940_v24 = vunpack.i.h.bf16 %v9938_v22  ;;  %v9939_v42 = vunpack.i.l.bf16 %v9938_v22  ;;  %v5023_v45 = vadd.f32 %v14724_v49, %v9405_v48  ;;  %v5017_v6 = vpop.f32.mrb[21].mxu0  ;;  %v15017_v38 = vld [vmem:[#allocation4 + $0xc3] sm:$0xff] }
 0x56f   : > { %v5018_v30 = vadd.f32 %v14724_v49, %v5017_v6  ;;  %v6365_v8 = vsel %vm445_vm6, %v14908_v0, %v9944_v25  ;;  %v6268_v10 = vsel %vm445_vm6, %v5211_v29, %v9945_v1 }
 0x570   : > { %v6428_v20 = vsel %vm6326_vm8, %v6396_v32, %v9939_v42  ;;  %v6332_v59 = vsel %vm6326_vm8, %v6299_v57, %v9940_v24  ;;  %vm5097_vm13 = vcmp.gt.f32.partialorder %v5023_v45, 0.0  ;;  %v5129_v37 = vmul.f32 0.01, %v5023_v45 }
 0x571   : > { %6683 = vmatprep.mubr.f32.mxu1 %v6428_v20  ;;  %vm5096_vm14 = vcmp.gt.f32.partialorder %v5018_v30, 0.0  ;;  %v5128_v56 = vmul.f32 0.01, %v5018_v30 }
 0x572   : > { %6684 = vmatmul.mubr.f32.gmra.mrb[10].mxu1 %v6332_v59  ;;  %v5161_v51 = vsel %vm5097_vm13, %v5023_v45, %v5129_v37  ;;  %v10091_v45 = vpack.i.bf16 %v15017_v38, %v14886_v4  ;;  %v5212_v59 = vld [vmem:[#allocation4 + $0x50] sm:$0xff] }
 0x573   : > { %5194 = vst.msk [vmem:[#allocation4 + $0x143] sm:$0xff] %vm445_vm6, %v5161_v51  ;;  %v5160_v2 = vsel %vm5096_vm14, %v5018_v30, %v5128_v56 }
 0x574   : > { %5193 = vst.msk [vmem:[#allocation4 + $0x13b] sm:$0xff] %vm445_vm6, %v5160_v2 }
 0x57a   : > { %v14991_v23 = vld [vmem:[#allocation4 + $0x146] sm:$0xff] }
 0x57b   : > { %v14983_v40 = vld [vmem:[#allocation4 + $0x13e] sm:$0xff] }
 0x57c   : > { %v14985_v26 = vld [vmem:[#allocation4 + $0x13b] sm:$0xff]  ;;  %9450 = vmatprep.mubr.msk.f32.mxu0 %vm445_vm6, %v14983_v40  ;;  %v15009_v3 = vld [vmem:[#allocation4 + $0x143] sm:$0xff] }
 0x57d   : > { %v14987_v58 = vld [vmem:[#allocation4 + $0x138] sm:$0xff]  ;;  %v10071_v36 = vpack.i.bf16 %v14786_v62, %v14985_v26  ;;  %9451 = vmatmul.mubr.msk.f32.gmra.mrb[46].mxu0 %vm445_vm6, %v14991_v23  ;;  %v14999_v47 = vld [vmem:[#allocation4 + $0x140] sm:$0xff]  ;;  %v10086_v6 = vpack.i.bf16 %v14794_v15, %v15009_v3 }
 0x57e   : > { %v10066_v50 = vpack.i.bf16 %v14765_v16, %v14987_v58  ;;  %v10081_v62 = vpack.i.bf16 %v14796_v31, %v14999_v47  ;;  %v10076_v16 = vpack.i.bf16 %v15003_v53, %v14874_v28 }
 0x57f   : > { %10072 = vrot.lane.b32.xlu0 %v10071_v36, %s10683_s27 }
 0x580   : > { %10067 = vrot.lane.b32.xlu1 %v10066_v50, %s10684_s18  ;;  %v9953_v63 = vpop.permute.xlu0 %9952 }
 0x581   : > { %v9948_v46 = vpop.permute.xlu1 %9947  ;;  %v9955_v34 = vunpack.i.h.bf16 %v9953_v63  ;;  %v9954_v21 = vunpack.i.l.bf16 %v9953_v63 }
 0x582   : > { %v9950_v39 = vunpack.i.h.bf16 %v9948_v46  ;;  %v9949_v14 = vunpack.i.l.bf16 %v9948_v46 }
 0x583   : > { %10082 = vrot.lane.b32.xlu0 %v10081_v62, %s10684_s18 }
 0x584   : > { %10077 = vrot.lane.b32.xlu1 %v10076_v16, %s10681_s22  ;;  %v6397_v31 = vsel %vm513_vm1, %v6365_v8, %v9949_v14  ;;  %v6300_v22 = vsel %vm513_vm1, %v6268_v10, %v9950_v39  ;;  %v9963_v24 = vpop.permute.xlu0 %9962 }
 0x585   : > { %v9958_v42 = vpop.permute.xlu1 %9957  ;;  %v6429_v48 = vsel %vm6326_vm8, %v6397_v31, %v9954_v21  ;;  %v6333_v0 = vsel %vm6326_vm8, %v6300_v22, %v9955_v34  ;;  %v9965_v30 = vunpack.i.h.bf16 %v9963_v24  ;;  %v9964_v20 = vunpack.i.l.bf16 %v9963_v24 }
 0x586   : > { %v9960_v32 = vunpack.i.h.bf16 %v9958_v42  ;;  %v9959_v57 = vunpack.i.l.bf16 %v9958_v42  ;;  %6688 = vmatprep.mubr.f32.mxu1 %v6429_v48 }
 0x587   : > { %10092 = vrot.lane.b32.xlu0 %v10091_v45, %s10681_s22  ;;  %6689 = vmatmul.mubr.f32.gmra.mrb[12].mxu1 %v6333_v0  ;;  %v15059_v45 = vld [vmem:[#allocation4 + $0xcb] sm:$0xff] }
 0x588   : > { %10087 = vrot.lane.b32.xlu1 %v10086_v6, %s10683_s27  ;;  %v6366_v37 = vsel %vm445_vm6, %v14950_v35, %v9959_v57  ;;  %v6269_v56 = vsel %vm445_vm6, %v5212_v59, %v9960_v32  ;;  %v9973_v39 = vpop.permute.xlu0 %9972 }
 0x589   : > { %v9968_v51 = vpop.permute.xlu1 %9967  ;;  %v9408_v17 = vpop.f32.mrb[22].mxu0  ;;  %v6398_v1 = vsel %vm513_vm1, %v6366_v37, %v9964_v20  ;;  %v6301_v25 = vsel %vm513_vm1, %v6269_v56, %v9965_v30  ;;  %v9975_v42 = vunpack.i.h.bf16 %v9973_v39  ;;  %v9974_v48 = vunpack.i.l.bf16 %v9973_v39  ;;  %v5213_v37 = vld [vmem:[#allocation4 + $0x60] sm:$0xff] }
 0x58a   : > { %v9970_v15 = vunpack.i.h.bf16 %v9968_v51  ;;  %v9969_v2 = vunpack.i.l.bf16 %v9968_v51  ;;  %v5033_v36 = vadd.f32 %v14724_v49, %v9408_v17  ;;  %v5027_v50 = vpop.f32.mrb[23].mxu0 }
 0x58b   : > { %v5028_v63 = vadd.f32 %v14724_v49, %v5027_v50  ;;  %v6367_v56 = vsel %vm445_vm6, %v14962_v41, %v9974_v48  ;;  %v6270_v51 = vsel %vm445_vm6, %v5213_v37, %v9975_v42 }
 0x58c   : > { %v6430_v46 = vsel %vm6326_vm8, %v6398_v1, %v9969_v2  ;;  %v6334_v62 = vsel %vm6326_vm8, %v6301_v25, %v9970_v15  ;;  %vm5099_vm5 = vcmp.gt.f32.partialorder %v5033_v36, 0.0  ;;  %v5131_v35 = vmul.f32 0.01, %v5033_v36  ;;  %v15073_v15 = vld [vmem:[#allocation4 + $0xdb] sm:$0xff] }
 0x58d   : > { %6693 = vmatprep.mubr.f32.mxu1 %v6430_v46  ;;  %vm5098_vm7 = vcmp.gt.f32.partialorder %v5028_v63, 0.0  ;;  %v5130_v16 = vmul.f32 0.01, %v5028_v63  ;;  %v10121_v1 = vpack.i.bf16 %v15073_v15, %v14930_v61 }
 0x58e   : > { %6694 = vmatmul.mubr.f32.gmra.mrb[14].mxu1 %v6334_v62  ;;  %v5163_v34 = vsel %vm5099_vm5, %v5033_v36, %v5131_v35 }
 0x58f   : > { %5196 = vst.msk [vmem:[#allocation4 + $0x15b] sm:$0xff] %vm445_vm6, %v5163_v34  ;;  %v5162_v21 = vsel %vm5098_vm7, %v5028_v63, %v5130_v16  ;;  %v5214_v16 = vld [vmem:[#allocation4 + $0x68] sm:$0xff] }
 0x590   : > { %5195 = vst.msk [vmem:[#allocation4 + $0x153] sm:$0xff] %vm445_vm6, %v5162_v21 }
 0x596   : > { %v15047_v10 = vld [vmem:[#allocation4 + $0x15e] sm:$0xff] }
 0x597   : > { %v15039_v14 = vld [vmem:[#allocation4 + $0x156] sm:$0xff] }
 0x598   : > { %v15041_v29 = vld [vmem:[#allocation4 + $0x153] sm:$0xff]  ;;  %9453 = vmatprep.mubr.msk.f32.mxu0 %vm445_vm6, %v15039_v14  ;;  %v15065_v59 = vld [vmem:[#allocation4 + $0x15b] sm:$0xff] }
 0x599   : > { %v15043_v8 = vld [vmem:[#allocation4 + $0x150] sm:$0xff]  ;;  %v10101_v31 = vpack.i.bf16 %v14872_v18, %v15041_v29  ;;  %9454 = vmatmul.mubr.msk.f32.gmra.mrb[48].mxu0 %vm445_vm6, %v15047_v10  ;;  %v15055_v24 = vld [vmem:[#allocation4 + $0x158] sm:$0xff]  ;;  %v10116_v25 = vpack.i.bf16 %v14882_v33, %v15065_v59 }
 0x59a   : > { %v10096_v22 = vpack.i.bf16 %v14811_v44, %v15043_v8  ;;  %v10111_v18 = vpack.i.bf16 %v14850_v19, %v15055_v24  ;;  %v10106_v44 = vpack.i.bf16 %v15059_v45, %v14892_v11 }
 0x59b   : > { %10102 = vrot.lane.b32.xlu0 %v10101_v31, %s10683_s27 }
 0x59c   : > { %10097 = vrot.lane.b32.xlu1 %v10096_v22, %s10684_s18  ;;  %v9983_v6 = vpop.permute.xlu0 %9982 }
 0x59d   : > { %v9978_v0 = vpop.permute.xlu1 %9977  ;;  %v9985_v32 = vunpack.i.h.bf16 %v9983_v6  ;;  %v9984_v57 = vunpack.i.l.bf16 %v9983_v6 }
 0x59e   : > { %v9980_v30 = vunpack.i.h.bf16 %v9978_v0  ;;  %v9979_v20 = vunpack.i.l.bf16 %v9978_v0 }
 0x59f   : > { %10112 = vrot.lane.b32.xlu0 %v10111_v18, %s10684_s18 }
 0x5a0   : > { %10107 = vrot.lane.b32.xlu1 %v10106_v44, %s10681_s22  ;;  %v6399_v19 = vsel %vm513_vm1, %v6367_v56, %v9979_v20  ;;  %v6302_v2 = vsel %vm513_vm1, %v6270_v51, %v9980_v30  ;;  %v9993_v17 = vpop.permute.xlu0 %9992 }
 0x5a1   : > { %v9988_v36 = vpop.permute.xlu1 %9987  ;;  %v6431_v50 = vsel %vm6326_vm8, %v6399_v19, %v9984_v57  ;;  %v6335_v41 = vsel %vm6326_vm8, %v6302_v2, %v9985_v32  ;;  %v9995_v62 = vunpack.i.h.bf16 %v9993_v17  ;;  %v9994_v35 = vunpack.i.l.bf16 %v9993_v17 }
 0x5a2   : > { %v9990_v63 = vunpack.i.h.bf16 %v9988_v36  ;;  %v9989_v46 = vunpack.i.l.bf16 %v9988_v36  ;;  %6698 = vmatprep.mubr.f32.mxu1 %v6431_v50  ;;  %v15167_v50 = vld [vmem:[#allocation4 + $0xe3] sm:$0xff] }
 0x5a3   : > { %10122 = vrot.lane.b32.xlu0 %v10121_v1, %s10681_s22  ;;  %6699 = vmatmul.mubr.f32.gmra.mrb[16].mxu1 %v6335_v41 }
 0x5a4   : > { %10117 = vrot.lane.b32.xlu1 %v10116_v25, %s10683_s27  ;;  %v6368_v61 = vsel %vm445_vm6, %v15003_v53, %v9989_v46  ;;  %v6271_v34 = vsel %vm445_vm6, %v5214_v16, %v9990_v63  ;;  %v10003_v30 = vpop.permute.xlu0 %10002  ;;  %v5215_v16 = vld [vmem:[#allocation4 + $0x78] sm:$0xff] }
 0x5a5   : > { %v9998_v33 = vpop.permute.xlu1 %9997  ;;  %v9411_v39 = vpop.f32.mrb[24].mxu0  ;;  %v6400_v42 = vsel %vm513_vm1, %v6368_v61, %v9994_v35  ;;  %v6303_v48 = vsel %vm513_vm1, %v6271_v34, %v9995_v62  ;;  %v10005_v17 = vunpack.i.h.bf16 %v10003_v30  ;;  %v10004_v36 = vunpack.i.l.bf16 %v10003_v30 }
 0x5a6   : > { %v10000_v53 = vunpack.i.h.bf16 %v9998_v33  ;;  %v9999_v21 = vunpack.i.l.bf16 %v9998_v33  ;;  %v5043_v31 = vadd.f32 %v14724_v49, %v9411_v39  ;;  %v5037_v22 = vpop.f32.mrb[25].mxu0  ;;  %v15181_v33 = vld [vmem:[#allocation4 + $0xf3] sm:$0xff] }
 0x5a7   : > { %v5038_v6 = vadd.f32 %v14724_v49, %v5037_v22  ;;  %v6369_v61 = vsel %vm445_vm6, %v15017_v38, %v10004_v36  ;;  %v6272_v34 = vsel %vm445_vm6, %v5215_v16, %v10005_v17 }
 0x5a8   : > { %v6432_v0 = vsel %vm6326_vm8, %v6400_v42, %v9999_v21  ;;  %v6336_v18 = vsel %vm6326_vm8, %v6303_v48, %v10000_v53  ;;  %vm5101_vm0 = vcmp.gt.f32.partialorder %v5043_v31, 0.0  ;;  %v5133_v44 = vmul.f32 0.01, %v5043_v31 }
 0x5a9   : > { %6703 = vmatprep.mubr.f32.mxu1 %v6432_v0  ;;  %vm5100_vm3 = vcmp.gt.f32.partialorder %v5038_v6, 0.0  ;;  %v5132_v7 = vmul.f32 0.01, %v5038_v6 }
 0x5aa   : > { %6704 = vmatmul.mubr.f32.gmra.mrb[18].mxu1 %v6336_v18  ;;  %v5165_v32 = vsel %vm5101_vm0, %v5043_v31, %v5133_v44  ;;  %v10151_v31 = vpack.i.bf16 %v15181_v33, %v14983_v40  ;;  %v5216_v18 = vld [vmem:[#allocation4 + $0x80] sm:$0xff] }
 0x5ab   : > { %5198 = vst.msk [vmem:[#allocation4 + $0x173] sm:$0xff] %vm445_vm6, %v5165_v32  ;;  %v5164_v57 = vsel %vm5100_vm3, %v5038_v6, %v5132_v7 }
 0x5ac   : > { %5197 = vst.msk [vmem:[#allocation4 + $0x16b] sm:$0xff] %vm445_vm6, %v5164_v57 }
 0x5b2   : > { %v15155_v56 = vld [vmem:[#allocation4 + $0x176] sm:$0xff] }
 0x5b3   : > { %v15147_v20 = vld [vmem:[#allocation4 + $0x16e] sm:$0xff] }
 0x5b4   : > { %v15149_v49 = vld [vmem:[#allocation4 + $0x16b] sm:$0xff]  ;;  %9456 = vmatprep.mubr.msk.f32.mxu0 %vm445_vm6, %v15147_v20  ;;  %v15173_v35 = vld [vmem:[#allocation4 + $0x173] sm:$0xff] }
 0x5b5   : > { %v15151_v37 = vld [vmem:[#allocation4 + $0x168] sm:$0xff]  ;;  %v10131_v51 = vpack.i.bf16 %v14934_v27, %v15149_v49  ;;  %9457 = vmatmul.mubr.msk.f32.gmra.mrb[50].mxu0 %vm445_vm6, %v15155_v56  ;;  %v15163_v2 = vld [vmem:[#allocation4 + $0x170] sm:$0xff]  ;;  %v10146_v22 = vpack.i.bf16 %v14946_v43, %v15173_v35 }
 0x5b6   : > { %v10126_v19 = vpack.i.bf16 %v14854_v52, %v15151_v37  ;;  %v10141_v27 = vpack.i.bf16 %v14862_v55, %v15163_v2  ;;  %v10136_v52 = vpack.i.bf16 %v15167_v50, %v14938_v13 }
 0x5b7   : > { %10132 = vrot.lane.b32.xlu0 %v10131_v51, %s10683_s27  ;;  %v15198_v51 = vld [vmem:[%s16572_s4] ss:$0 sm:$0xff] }
 0x5b8   : > { %10127 = vrot.lane.b32.xlu1 %v10126_v19, %s10684_s18  ;;  %v10013_v1 = vpop.permute.xlu0 %10012 }
 0x5b9   : > { %v10008_v25 = vpop.permute.xlu1 %10007  ;;  %v10015_v41 = vunpack.i.h.bf16 %v10013_v1  ;;  %v10014_v63 = vunpack.i.l.bf16 %v10013_v1 }
 0x5ba   : > { %v10010_v46 = vunpack.i.h.bf16 %v10008_v25  ;;  %v10009_v62 = vunpack.i.l.bf16 %v10008_v25 }
 0x5bb   : > { %10142 = vrot.lane.b32.xlu0 %v10141_v27, %s10684_s18 }
 0x5bc   : > { %10137 = vrot.lane.b32.xlu1 %v10136_v52, %s10681_s22  ;;  %v6401_v55 = vsel %vm513_vm1, %v6369_v61, %v10009_v62  ;;  %v6304_v13 = vsel %vm513_vm1, %v6272_v34, %v10010_v46  ;;  %v10023_v53 = vpop.permute.xlu0 %10022 }
 0x5bd   : > { %v10018_v21 = vpop.permute.xlu1 %10017  ;;  %v6433_v39 = vsel %vm6326_vm8, %v6401_v55, %v10014_v63  ;;  %v6337_v38 = vsel %vm6326_vm8, %v6304_v13, %v10015_v41  ;;  %v10025_v6 = vunpack.i.h.bf16 %v10023_v53  ;;  %v10024_v0 = vunpack.i.l.bf16 %v10023_v53 }
 0x5be   : > { %v10020_v42 = vunpack.i.h.bf16 %v10018_v21  ;;  %v10019_v48 = vunpack.i.l.bf16 %v10018_v21  ;;  %6708 = vmatprep.mubr.f32.mxu1 %v6433_v39 }
 0x5bf   : > { %10152 = vrot.lane.b32.xlu0 %v10151_v31, %s10681_s22  ;;  %6709 = vmatmul.mubr.f32.gmra.mrb[20].mxu1 %v6337_v38 }
 0x5c0   : > { %10147 = vrot.lane.b32.xlu1 %v10146_v22, %s10683_s27  ;;  %v6370_v44 = vsel %vm445_vm6, %v15059_v45, %v10019_v48  ;;  %v6273_v7 = vsel %vm445_vm6, %v5216_v18, %v10020_v42  ;;  %v10033_v62 = vpop.permute.xlu0 %10032  ;;  %v15225_v22 = vld [vmem:[#allocation4 + $0xfb] sm:$0xff] }
 0x5c1   : > { %v10028_v32 = vpop.permute.xlu1 %10027  ;;  %v6402_v36 = vsel %vm513_vm1, %v6370_v44, %v10024_v0  ;;  %v6305_v1 = vsel %vm513_vm1, %v6273_v7, %v10025_v6  ;;  %v10035_v39 = vunpack.i.h.bf16 %v10033_v62  ;;  %v10034_v31 = vunpack.i.l.bf16 %v10033_v62  ;;  %v5217_v44 = vld [vmem:[#allocation4 + $0x90] sm:$0xff] }
 0x5c2   : > { %v10030_v43 = vunpack.i.h.bf16 %v10028_v32  ;;  %v10029_v57 = vunpack.i.l.bf16 %v10028_v32  ;;  %v9414_v30 = vpop.f32.mrb[26].mxu0 }
 0x5c3   : > { %v5053_v19 = vadd.f32 %v15198_v51, %v9414_v30  ;;  %v5047_v17 = vpop.f32.mrb[27].mxu0  ;;  %v6371_v7 = vsel %vm445_vm6, %v15073_v15, %v10034_v31  ;;  %v6274_v32 = vsel %vm445_vm6, %v5217_v44, %v10035_v39 }
 0x5c4   : > { %v5048_v45 = vadd.f32 %v15198_v51, %v5047_v17  ;;  %v6434_v25 = vsel %vm6326_vm8, %v6402_v36, %v10029_v57  ;;  %v6338_v27 = vsel %vm6326_vm8, %v6305_v1, %v10030_v43  ;;  %v10181_v36 = vpack.i.bf16 %v14870_v9, %v15039_v14 }
 0x5c5   : > { %vm5103_vm4 = vcmp.gt.f32.partialorder %v5053_v19, 0.0  ;;  %v5135_v52 = vmul.f32 0.01, %v5053_v19  ;;  %6713 = vmatprep.mubr.f32.mxu1 %v6434_v25 }
 0x5c6   : > { %vm5102_vm9 = vcmp.gt.f32.partialorder %v5048_v45, 0.0  ;;  %v5134_v41 = vmul.f32 0.01, %v5048_v45  ;;  %6714 = vmatmul.mubr.f32.gmra.mrb[22].mxu1 %v6338_v27 }
 0x5c7   : > { %v5167_v63 = vsel %vm5103_vm4, %v5053_v19, %v5135_v52  ;;  %v5218_v52 = vld [vmem:[#allocation4 + $0x98] sm:$0xff] }
 0x5c8   : > { %5200 = vst.msk [vmem:[#allocation4 + $0x18b] sm:$0xff] %vm445_vm6, %v5167_v63  ;;  %v5166_v46 = vsel %vm5102_vm9, %v5048_v45, %v5134_v41 }
 0x5c9   : > { %5199 = vst.msk [vmem:[#allocation4 + $0x183] sm:$0xff] %vm445_vm6, %v5166_v46 }
 0x5cf   : > { %v15214_v55 = vld [vmem:[#allocation4 + $0x18e] sm:$0xff] }
 0x5d0   : > { %v15208_v16 = vld [vmem:[#allocation4 + $0x186] sm:$0xff] }
 0x5d1   : > { %v5450_v61 = vld [vmem:[#allocation4 + $0x183] sm:$0xff]  ;;  %9459 = vmatprep.mubr.msk.f32.mxu0 %vm445_vm6, %v15208_v16  ;;  %v5451_v43 = vld [vmem:[#allocation4 + $0x18b] sm:$0xff] }
 0x5d2   : > { %v15210_v34 = vld [vmem:[#allocation4 + $0x180] sm:$0xff]  ;;  %v10161_v13 = vpack.i.bf16 %v14987_v58, %v5450_v61  ;;  %9460 = vmatmul.mubr.msk.f32.gmra.mrb[52].mxu0 %vm445_vm6, %v15214_v55  ;;  %v15221_v21 = vld [vmem:[#allocation4 + $0x188] sm:$0xff]  ;;  %v10176_v15 = vpack.i.bf16 %v14999_v47, %v5451_v43 }
 0x5d3   : > { %v10156_v53 = vpack.i.bf16 %v14866_v60, %v15210_v34  ;;  %v10171_v58 = vpack.i.bf16 %v14874_v28, %v15221_v21  ;;  %v10166_v60 = vpack.i.bf16 %v15225_v22, %v14991_v23 }
 0x5d4   : > { %10162 = vrot.lane.b32.xlu0 %v10161_v13, %s10683_s27 }
 0x5d5   : > { %10157 = vrot.lane.b32.xlu1 %v10156_v53, %s10684_s18  ;;  %v10043_v38 = vpop.permute.xlu0 %10042 }
 0x5d6   : > { %v10038_v42 = vpop.permute.xlu1 %10037  ;;  %v10045_v48 = vunpack.i.h.bf16 %v10043_v38  ;;  %v10044_v6 = vunpack.i.l.bf16 %v10043_v38 }
 0x5d7   : > { %v10040_v0 = vunpack.i.h.bf16 %v10038_v42  ;;  %v10039_v18 = vunpack.i.l.bf16 %v10038_v42 }
 0x5d8   : > { %10172 = vrot.lane.b32.xlu0 %v10171_v58, %s10684_s18 }
 0x5d9   : > { %10167 = vrot.lane.b32.xlu1 %v10166_v60, %s10681_s22  ;;  %v6403_v28 = vsel %vm513_vm1, %v6371_v7, %v10039_v18  ;;  %v6306_v57 = vsel %vm513_vm1, %v6274_v32, %v10040_v0  ;;  %v10053_v23 = vpop.permute.xlu0 %10052 }
 0x5da   : > { %v10048_v30 = vpop.permute.xlu1 %10047  ;;  %v6435_v19 = vsel %vm6326_vm8, %v6403_v28, %v10044_v6  ;;  %v6339_v17 = vsel %vm6326_vm8, %v6306_v57, %v10045_v48  ;;  %v10055_v25 = vunpack.i.h.bf16 %v10053_v23  ;;  %v10054_v27 = vunpack.i.l.bf16 %v10053_v23 }
 0x5db   : > { %v10050_v1 = vunpack.i.h.bf16 %v10048_v30  ;;  %v10049_v45 = vunpack.i.l.bf16 %v10048_v30  ;;  %6718 = vmatprep.mubr.f32.mxu1 %v6435_v19 }
 0x5dc   : > { %6719 = vmatmul.mubr.f32.gmra.mrb[24].mxu1 %v6339_v17  ;;  %10182 = vrot.lane.b32.xlu0 %v10181_v36, %s10681_s22  ;;  %v5219_v36 = vld [vmem:[#allocation4 + $0xa8] sm:$0xff] }
 0x5dd   : > { %10177 = vrot.lane.b32.xlu1 %v10176_v15, %s10683_s27  ;;  %v6372_v41 = vsel %vm445_vm6, %v15167_v50, %v10049_v45  ;;  %v6275_v63 = vsel %vm445_vm6, %v5218_v52, %v10050_v1  ;;  %v10063_v6 = vpop.permute.xlu0 %10062 }
 0x5de   : > { %v10058_v46 = vpop.permute.xlu1 %10057  ;;  %v6404_v61 = vsel %vm513_vm1, %v6372_v41, %v10054_v27  ;;  %v6307_v47 = vsel %vm513_vm1, %v6275_v63, %v10055_v25  ;;  %v10065_v0 = vunpack.i.h.bf16 %v10063_v6  ;;  %v10064_v18 = vunpack.i.l.bf16 %v10063_v6 }
 0x5df   : > { %v10060_v9 = vunpack.i.h.bf16 %v10058_v46  ;;  %v10059_v62 = vunpack.i.l.bf16 %v10058_v46 }
 0x5e0   : > { %v6373_v15 = vsel %vm445_vm6, %v15181_v33, %v10064_v18  ;;  %v6276_v25 = vsel %vm445_vm6, %v5219_v36, %v10065_v0  ;;  %v8102_v0 = vld [vmem:[%s16575_s7] sm:$0xff]  ;;  %v8104_v18 = vld [vmem:[%s16575_s7 + $0x10] sm:$0xff] }
 0x5e1   : > { %v6436_v13 = vsel %vm6326_vm8, %v6404_v61, %v10059_v62  ;;  %v6340_v53 = vsel %vm6326_vm8, %v6307_v47, %v10060_v9 }
 0x5e2   : > { %6723 = vmatprep.mubr.f32.mxu1 %v6436_v13  ;;  %v9417_v39 = vpop.f32.mrb[28].mxu0  ;;  %v10196_v13 = vpack.i.bf16 %v14900_v12, %v15047_v10 }
 0x5e3   : > { %6724 = vmatmul.mubr.f32.gmra.mrb[26].mxu1 %v6340_v53  ;;  %v5063_v31 = vadd.f32 %v15198_v51, %v9417_v39  ;;  %v5057_v38 = vpop.f32.mrb[29].mxu0  ;;  %v5220_v53 = vld [vmem:[#allocation4 + $0xb0] sm:$0xff] }
 0x5e4   : > { %v5058_v50 = vadd.f32 %v15198_v51, %v5057_v38 }
 0x5e5   : > { %vm5105_vm10 = vcmp.gt.f32.partialorder %v5063_v31, 0.0  ;;  %v5137_v42 = vmul.f32 0.01, %v5063_v31 }
 0x5e6   : > { %vm5104_vm11 = vcmp.gt.f32.partialorder %v5058_v50, 0.0  ;;  %v5136_v58 = vmul.f32 0.01, %v5058_v50 }
 0x5e7   : > { %v5169_v60 = vsel %vm5105_vm10, %v5063_v31, %v5137_v42 }
 0x5e8   : > { %5202 = vst.msk [vmem:[#allocation4 + $0x1a3] sm:$0xff] %vm445_vm6, %v5169_v60  ;;  %v5168_v48 = vsel %vm5104_vm11, %v5058_v50, %v5136_v58 }
 0x5e9   : > { %5201 = vst.msk [vmem:[#allocation4 + $0x19b] sm:$0xff] %vm445_vm6, %v5168_v48 }
 0x5ef   : > { %v15262_v17 = vld [vmem:[#allocation4 + $0x1a6] sm:$0xff] }
 0x5f0   : > { %v15256_v32 = vld [vmem:[#allocation4 + $0x19e] sm:$0xff] }
 0x5f1   : > { %v10073_v44 = vpop.permute.xlu0 %10072  ;;  %v5452_v43 = vld [vmem:[#allocation4 + $0x19b] sm:$0xff]  ;;  %9462 = vmatprep.mubr.msk.f32.mxu0 %vm445_vm6, %v15256_v32  ;;  %v5453_v39 = vld [vmem:[#allocation4 + $0x1a3] sm:$0xff] }
 0x5f2   : > { %v10068_v7 = vpop.permute.xlu1 %10067  ;;  %v15258_v28 = vld [vmem:[#allocation4 + $0x198] sm:$0xff]  ;;  %v10075_v57 = vunpack.i.h.bf16 %v10073_v44  ;;  %v10074_v23 = vunpack.i.l.bf16 %v10073_v44  ;;  %9463 = vmatmul.mubr.msk.f32.gmra.mrb[54].mxu0 %vm445_vm6, %v15262_v17  ;;  %v10191_v1 = vpack.i.bf16 %v15043_v8, %v5452_v43  ;;  %v15274_v41 = vld [vmem:[#allocation4 + $0x1a0] sm:$0xff]  ;;  %v10206_v60 = vpack.i.bf16 %v15055_v24, %v5453_v39 }
 0x5f3   : > { %v10070_v30 = vunpack.i.h.bf16 %v10068_v7  ;;  %v10069_v19 = vunpack.i.l.bf16 %v10068_v7  ;;  %v10186_v45 = vpack.i.bf16 %v14886_v4, %v15258_v28  ;;  %v10201_v47 = vpack.i.bf16 %v14892_v11, %v15274_v41  ;;  %v8105_v44 = vld [vmem:[%s16575_s7 + $0x18] sm:$0xff] }
 0x5f4   : > { %10192 = vrot.lane.b32.xlu0 %v10191_v1, %s10683_s27  ;;  %v10211_v11 = vpack.i.bf16 %v14932_v5, %v15147_v20  ;;  %v8103_v5 = vld [vmem:[%s16575_s7 + $0x8] sm:$0xff]  ;;  %v9609_v7 = vpack.c.bf16 %v8105_v44, %v8104_v18  ;;  %v8108_v1 = vld [vmem:[%s16575_s7 + $0x30] sm:$0xff] }
 0x5f5   : > { %v6405_v27 = vsel %vm513_vm1, %v6373_v15, %v10069_v19  ;;  %v6308_v52 = vsel %vm513_vm1, %v6276_v25, %v10070_v30  ;;  %10187 = vrot.lane.b32.xlu1 %v10186_v45, %s10684_s18  ;;  %v10083_v63 = vpop.permute.xlu0 %10082  ;;  %v9606_v24 = vpack.c.bf16 %v8103_v5, %v8102_v0  ;;  %v8109_v45 = vld [vmem:[%s16575_s7 + $0x38] sm:$0xff]  ;;  %v8112_v0 = vld [vmem:[%s16575_s7 + $0x50] sm:$0xff] }
 0x5f6   : > { %v10078_v8 = vpop.permute.xlu1 %10077  ;;  %v6437_v46 = vsel %vm6326_vm8, %v6405_v27, %v10074_v23  ;;  %v6341_v4 = vsel %vm6326_vm8, %v6308_v52, %v10075_v57  ;;  %v10085_v62 = vunpack.i.h.bf16 %v10083_v63  ;;  %v10084_v61 = vunpack.i.l.bf16 %v10083_v63  ;;  %v8106_v57 = vld [vmem:[%s16575_s7 + $0x20] sm:$0xff]  ;;  %v8107_v23 = vld [vmem:[%s16575_s7 + $0x28] sm:$0xff]  ;;  %v8113_v5 = vld [vmem:[%s16575_s7 + $0x58] sm:$0xff] }
 0x5f7   : > { %v10080_v9 = vunpack.i.h.bf16 %v10078_v8  ;;  %v10079_v33 = vunpack.i.l.bf16 %v10078_v8  ;;  %6728 = vmatprep.mubr.f32.mxu1 %v6437_v46  ;;  %9607 = vmatpush1.bf16.msra.mxu0 %v9606_v24  ;;  %v9612_v36 = vpack.c.bf16 %v8107_v23, %v8106_v57  ;;  %v9615_v8 = vpack.c.bf16 %v8109_v45, %v8108_v1  ;;  %v5293_v45 = vld [vmem:[#allocation4 + $0x126] sm:$0xff] }
 0x5f8   : > { %6729 = vmatmul.mubr.f32.gmra.mrb[28].mxu1 %v6341_v4  ;;  %10202 = vrot.lane.b32.xlu0 %v10201_v47, %s10684_s18  ;;  %v15340_v47 = vld [vmem:[%s16574_s6] ss:$0 sm:$0xff] }
 0x5f9   : > { %v6374_v31 = vsel %vm445_vm6, %v15225_v22, %v10079_v33  ;;  %v6277_v38 = vsel %vm445_vm6, %v5220_v53, %v10080_v9  ;;  %10197 = vrot.lane.b32.xlu1 %v10196_v13, %s10681_s22  ;;  %9608 = vmatprep.subr.bf16.mxu0 %v10682_v54  ;;  %v10093_v27 = vpop.permute.xlu0 %10092  ;;  %v8110_v9 = vld [vmem:[%s16575_s7 + $0x40] sm:$0xff] }
 0x5fa   : > { %v10088_v50 = vpop.permute.xlu1 %10087  ;;  %v6406_v12 = vsel %vm513_vm1, %v6374_v31, %v10084_v61  ;;  %v6309_v48 = vsel %vm513_vm1, %v6277_v38, %v10085_v62  ;;  %v10095_v62 = vunpack.i.h.bf16 %v10093_v27  ;;  %v10094_v61 = vunpack.i.l.bf16 %v10093_v27 }
 0x5fb   : > { %v10090_v42 = vunpack.i.h.bf16 %v10088_v50  ;;  %v10089_v58 = vunpack.i.l.bf16 %v10088_v50  ;;  %9610 = vmatpush1.bf16.msra.mxu0 %v9609_v7 }
 0x5fc   : > { %10212 = vrot.lane.b32.xlu0 %v10211_v11, %s10681_s22  ;;  %9611 = vmatprep.subr.bf16.mxu0 %v10682_v54 }
 0x5fd   : > { %v6438_v22 = vsel %vm6326_vm8, %v6406_v12, %v10089_v58  ;;  %v6342_v6 = vsel %vm6326_vm8, %v6309_v48, %v10090_v42  ;;  %10207 = vrot.lane.b32.xlu1 %v10206_v60, %s10683_s27  ;;  %v5221_v58 = vld [vmem:[#allocation4 + $0xc0] sm:$0xff] }
 0x5fe   : > { %6733 = vmatprep.mubr.f32.mxu1 %v6438_v22  ;;  %v6278_v18 = vsel %vm445_vm6, %v5221_v58, %v10095_v62 }
 0x5ff   : > { %6734 = vmatmul.mubr.f32.gmra.mrb[30].mxu1 %v6342_v6  ;;  %9613 = vmatpush1.bf16.msra.mxu0 %v9612_v36  ;;  %v5349_v6 = vld [vmem:[#allocation4 + $0x10b] sm:$0xff] }
 0x600   : > { %9614 = vmatprep.subr.bf16.mxu0 %v10682_v54  ;;  %v6375_v24 = vsel %vm445_vm6, %v5349_v6, %v10094_v61 }
 0x603   : > { %9616 = vmatpush1.bf16.msra.mxu0 %v9615_v8 }
 0x604   : > { %v9420_v43 = vpop.f32.mrb[30].mxu0  ;;  %9617 = vmatprep.subr.bf16.mxu0 %v10682_v54 }
 0x605   : > { %v5073_v30 = vadd.f32 %v15198_v51, %v9420_v43  ;;  %v5067_v19 = vpop.f32.mrb[31].mxu0 }
 0x606   : > { %v5068_v15 = vadd.f32 %v15198_v51, %v5067_v19  ;;  %v8111_v51 = vld [vmem:[%s16575_s7 + $0x48] sm:$0xff] }
 0x607   : > { %vm5107_vm12 = vcmp.gt.f32.partialorder %v5073_v30, 0.0  ;;  %v5139_v25 = vmul.f32 0.01, %v5073_v30  ;;  %v9618_v39 = vpack.c.bf16 %v8111_v51, %v8110_v9 }
 0x608   : > { %vm5106_vm13 = vcmp.gt.f32.partialorder %v5068_v15, 0.0  ;;  %v5138_v52 = vmul.f32 0.01, %v5068_v15  ;;  %v15326_v63 = vpop.f32.mrb[32].mxu0 }
 0x609   : > { %v5171_v46 = vsel %vm5107_vm12, %v5073_v30, %v5139_v25  ;;  %v6885_v4 = vpop.f32.mrb[33].mxu0  ;;  %9619 = vmatpush1.bf16.msra.mxu0 %v9618_v39  ;;  %v5350_v39 = vld [vmem:[#allocation4 + $0x113] sm:$0xff] }
 0x60a   : > { %5204 = vst.msk [vmem:[#allocation4 + $0x1bb] sm:$0xff] %vm445_vm6, %v5171_v46  ;;  %v5170_v33 = vsel %vm5106_vm13, %v5068_v15, %v5138_v52  ;;  %9620 = vmatprep.subr.bf16.mxu0 %v10682_v54  ;;  %v9621_v15 = vpack.c.bf16 %v8113_v5, %v8112_v0 }
 0x60b   : > { %5203 = vst.msk [vmem:[#allocation4 + $0x1b3] sm:$0xff] %vm445_vm6, %v5170_v33 }
 0x60c   : > { %v15342_v53 = vpop.f32.mrb[34].mxu0  ;;  %v6660_v42 = vpop.f32.mrb[0].mxu1 }
 0x60d   : > { %v10103_v13 = vpop.permute.xlu0 %10102  ;;  %v6661_v12 = vadd.f32 %v15340_v47, %v6660_v42  ;;  %v6662_v48 = vpop.f32.mrb[1].mxu1  ;;  %9622 = vmatpush1.bf16.msra.mxu0 %v9621_v15 }
 0x60e   : > { %v10105_v31 = vunpack.i.h.bf16 %v10103_v13  ;;  %v10104_v38 = vunpack.i.l.bf16 %v10103_v13  ;;  %v10098_v50 = vpop.permute.xlu1 %10097  ;;  %v15346_v22 = vpop.f32.mrb[35].mxu0  ;;  %9623 = vmatprep.subr.bf16.mxu0 %v10682_v54 }
 0x60f   : > { %v10100_v11 = vunpack.i.h.bf16 %v10098_v50  ;;  %v10099_v60 = vunpack.i.l.bf16 %v10098_v50  ;;  %v6886_v44 = vadd.f32 %v6885_v4, %v6661_v12 }
 0x610   : > { %v15356_v43 = vpop.f32.mrb[36].mxu0 }
 0x611   : > { %v10113_v7 = vpop.permute.xlu0 %10112  ;;  %v6407_v57 = vsel %vm513_vm1, %v6375_v24, %v10099_v60  ;;  %v6310_v23 = vsel %vm513_vm1, %v6278_v18, %v10100_v11  ;;  %v15361_v36 = vpop.f32.mrb[37].mxu0  ;;  %vm7044_vm14 = vcmp.gt.f32.partialorder %v6886_v44, 0.0  ;;  %v7076_v25 = vmul.f32 0.01, %v6886_v44  ;;  %v15371_v62 = vld [vmem:[#allocation4 + $0x1be] sm:$0xff]  ;;  %v5222_v11 = vld [vmem:[#allocation4 + $0xc8] sm:$0xff] }
 0x612   : > { %v10108_v30 = vpop.permute.xlu1 %10107  ;;  %v6439_v19 = vsel %vm6326_vm8, %v6407_v57, %v10104_v38  ;;  %v6343_v1 = vsel %vm6326_vm8, %v6310_v23, %v10105_v31  ;;  %v15365_v8 = vld [vmem:[#allocation4 + $0x1b6] sm:$0xff]  ;;  %v10115_v9 = vunpack.i.h.bf16 %v10113_v7  ;;  %v10114_v51 = vunpack.i.l.bf16 %v10113_v7  ;;  %v5294_v24 = vld [vmem:[#allocation4 + $0x12e] sm:$0xff]  ;;  %v8114_v18 = vld [vmem:[%s16575_s7 + $0x60] sm:$0xff] }
 0x613   : > { %v10110_v27 = vunpack.i.h.bf16 %v10108_v30  ;;  %v10109_v52 = vunpack.i.l.bf16 %v10108_v30  ;;  %6738 = vmatprep.mubr.f32.mxu1 %v6439_v19  ;;  %v5454_v46 = vld [vmem:[#allocation4 + $0x1b3] sm:$0xff]  ;;  %v6665_v33 = vpop.f32.mrb[2].mxu1  ;;  %9465 = vmatprep.mubr.msk.f32.mxu0 %vm445_vm6, %v15365_v8  ;;  %v7108_v31 = vsel %vm7044_vm14, %v6886_v44, %v7076_v25  ;;  %v8115_v44 = vld [vmem:[%s16575_s7 + $0x68] sm:$0xff] }
 0x614   : > { %v15367_v4 = vld [vmem:[#allocation4 + $0x1b0] sm:$0xff]  ;;  %6739 = vmatmul.mubr.f32.gmra.mrb[32].mxu1 %v6343_v1  ;;  %v10221_v61 = vpack.i.bf16 %v15151_v37, %v5454_v46  ;;  %v6666_v38 = vadd.f32 %v15340_v47, %v6665_v33  ;;  %v15377_v50 = vpop.f32.mrb[38].mxu0  ;;  %9466 = vmatmul.mubr.msk.f32.gmra.mrb[56].mxu0 %vm445_vm6, %v15371_v62  ;;  %v15382_v58 = vld [vmem:[#allocation4 + $0x1b8] sm:$0xff]  ;;  %7141 = vst.msk [vmem:[#allocation5 + $0xa5] sm:$0xff] %vm513_vm1, %v7108_v31  ;;  %v6667_v60 = vpop.f32.mrb[3].mxu1 }
 0x615   : > { %v10216_v13 = vpack.i.bf16 %v5293_v45, %v15367_v4  ;;  %v6376_v42 = vsel %vm445_vm6, %v5350_v39, %v10109_v52  ;;  %v6279_v12 = vsel %vm445_vm6, %v5222_v11, %v10110_v27  ;;  %v15389_v5 = vpop.f32.mrb[39].mxu0  ;;  %v10231_v57 = vpack.i.bf16 %v5294_v24, %v15382_v58  ;;  %v10660_v23 = vld [vmem:[#allocation4 + $0x12b] sm:$0xff]  ;;  %v5455_v27 = vld [vmem:[#allocation4 + $0x1bb] sm:$0xff] }
 0x616   : > { %v10118_v37 = vpop.permute.xlu1 %10117  ;;  %10222 = vrot.lane.b32.xlu0 %v10221_v61, %s10683_s27  ;;  %v6891_v48 = vadd.f32 %v15326_v63, %v6666_v38  ;;  %v6408_v7 = vsel %vm513_vm1, %v6376_v42, %v10114_v51  ;;  %v10226_v63 = vpack.i.bf16 %v10660_v23, %v15155_v56  ;;  %v6311_v30 = vsel %vm513_vm1, %v6279_v12, %v10115_v9  ;;  %v8116_v46 = vld [vmem:[%s16575_s7 + $0x70] sm:$0xff]  ;;  %v8117_v9 = vld [vmem:[%s16575_s7 + $0x78] sm:$0xff]  ;;  %v5424_v42 = vld [vmem:[#allocation4 + $0x1c8] sm:$0xff] }
 0x617   : > { %10217 = vrot.lane.b32.xlu1 %v10216_v13, %s10684_s18  ;;  %v10120_v6 = vunpack.i.h.bf16 %v10118_v37  ;;  %v10119_v0 = vunpack.i.l.bf16 %v10118_v37  ;;  %v9624_v52 = vpack.c.bf16 %v8115_v44, %v8114_v18  ;;  %v10241_v33 = vpack.i.bf16 %v14985_v26, %v15208_v16  ;;  %v5456_v31 = vld [vmem:[#allocation4 + $0x1cb] sm:$0xff]  ;;  %v8118_v11 = vld [vmem:[%s16575_s7 + $0x80] sm:$0xff] }
 0x618   : > { %vm7045_vm5 = vcmp.gt.f32.partialorder %v6891_v48, 0.0  ;;  %v7077_v19 = vmul.f32 0.01, %v6891_v48  ;;  %v15403_v45 = vpop.f32.mrb[40].mxu0  ;;  %v9627_v61 = vpack.c.bf16 %v8117_v9, %v8116_v46  ;;  %v10236_v39 = vpack.i.bf16 %v15163_v2, %v5455_v27  ;;  %v8119_v26 = vld [vmem:[%s16575_s7 + $0x88] sm:$0xff]  ;;  %v5425_v16 = vld [vmem:[#allocation4 + $0x1d0] sm:$0xff] }
 0x619   : > { %v6440_v1 = vsel %vm6326_vm8, %v6408_v7, %v10119_v0  ;;  %v6344_v15 = vsel %vm6326_vm8, %v6311_v30, %v10120_v6  ;;  %v15406_v25 = vpop.f32.mrb[41].mxu0  ;;  %9625 = vmatpush1.bf16.msra.mxu0 %v9624_v52  ;;  %v10251_v2 = vpack.i.bf16 %v15210_v34, %v5456_v31  ;;  %v5488_v37 = vld [vmem:[#allocation4 + $0x1ce] sm:$0xff]  ;;  %v9630_v60 = vpack.c.bf16 %v8119_v26, %v8118_v11  ;;  %v8121_v0 = vld [vmem:[%s16575_s7 + $0x98] sm:$0xff]  ;;  %v10123_v34 = vpop.permute.xlu0 %10122  ;;  %v10661_v44 = vld [vmem:[#allocation4 + $0x146] sm:$0xff] }
 0x61a   : > { %6743 = vmatprep.mubr.f32.mxu1 %v6440_v1  ;;  %10232 = vrot.lane.b32.xlu0 %v10231_v57, %s10684_s18  ;;  %v7109_v51 = vsel %vm7045_vm5, %v6891_v48, %v7077_v19  ;;  %v10246_v12 = vpack.i.bf16 %v14983_v40, %v5424_v42  ;;  %v5489_v48 = vld [vmem:[#allocation4 + $0x1d6] sm:$0xff]  ;;  %v10261_v7 = vpack.i.bf16 %v10661_v44, %v5425_v16  ;;  %v8123_v30 = vld [vmem:[%s16575_s7 + $0xa8] sm:$0xff]  ;;  %v10124_v27 = vunpack.i.l.bf16 %v10123_v34 }
 0x61b   : > { %10227 = vrot.lane.b32.xlu1 %v10226_v63, %s10681_s22  ;;  %6744 = vmatmul.mubr.f32.gmra.mrb[34].mxu1 %v6344_v15  ;;  %7142 = vst.msk [vmem:[#allocation5 + $0xad] sm:$0xff] %vm513_vm1, %v7109_v51  ;;  %v8120_v6 = vld [vmem:[%s16575_s7 + $0x90] sm:$0xff]  ;;  %v10256_v23 = vpack.i.bf16 %v15009_v3, %v15214_v55  ;;  %v8122_v63 = vld [vmem:[%s16575_s7 + $0xa0] sm:$0xff]  ;;  %v10125_v15 = vunpack.i.h.bf16 %v10123_v34  ;;  %v10271_v3 = vpack.i.bf16 %v15041_v29, %v15256_v32  ;;  %v8125_v32 = vld [vmem:[%s16575_s7 + $0xb8] sm:$0xff] }
 0x61c   : > { %v15419_v13 = vpop.f32.mrb[42].mxu0  ;;  %9626 = vmatprep.subr.bf16.mxu0 %v10682_v54  ;;  %9468 = vmatprep.mubr.msk.f32.mxu0 %vm445_vm6, %v5488_v37  ;;  %v9633_v57 = vpack.c.bf16 %v8121_v0, %v8120_v6  ;;  %v5457_v1 = vld [vmem:[#allocation4 + $0x1d3] sm:$0xff]  ;;  %v5490_v55 = vld [vmem:[#allocation4 + $0x1e6] sm:$0xff]  ;;  %v9636_v46 = vpack.c.bf16 %v8123_v30, %v8122_v63 }
 0x61d   : > { %v15423_v38 = vpop.f32.mrb[43].mxu0  ;;  %9628 = vmatpush1.bf16.msra.mxu0 %v9627_v61  ;;  %v5491_v9 = vld [vmem:[#allocation4 + $0x1ee] sm:$0xff]  ;;  %v5458_v61 = vld [vmem:[#allocation4 + $0x1e3] sm:$0xff]  ;;  %v5223_v26 = vld [vmem:[#allocation4 + $0xd8] sm:$0xff] }
 0x61e   : > { %10242 = vrot.lane.b32.xlu0 %v10241_v33, %s10681_s22  ;;  %9629 = vmatprep.subr.bf16.mxu0 %v10682_v54  ;;  %v10266_v33 = vpack.i.bf16 %v15221_v21, %v5457_v1  ;;  %v8124_v29 = vld [vmem:[%s16575_s7 + $0xb0] sm:$0xff]  ;;  %v5426_v21 = vld [vmem:[#allocation4 + $0x1e0] sm:$0xff]  ;;  %v6280_v6 = vsel %vm445_vm6, %v5223_v26, %v10125_v15  ;;  %v10281_v0 = vpack.i.bf16 %v15258_v28, %v5458_v61  ;;  %v8127_v30 = vld [vmem:[%s16575_s7 + $0xc8] sm:$0xff] }
 0x61f   : > { %10237 = vrot.lane.b32.xlu1 %v10236_v39, %s10683_s27  ;;  %9469 = vmatmul.mubr.msk.f32.gmra.mrb[58].mxu0 %vm445_vm6, %v5489_v48  ;;  %v5351_v48 = vld [vmem:[#allocation4 + $0x123] sm:$0xff] }
 0x620   : > { %9471 = vmatprep.mubr.msk.f32.mxu0 %vm445_vm6, %v5490_v55  ;;  %v8126_v28 = vld [vmem:[%s16575_s7 + $0xc0] sm:$0xff]  ;;  %v5352_v55 = vld [vmem:[#allocation4 + $0x12b] sm:$0xff] }
 0x621   : > { %9631 = vmatpush1.bf16.msra.mxu0 %v9630_v60 }
 0x622   : > { %10252 = vrot.lane.b32.xlu0 %v10251_v2, %s10683_s27  ;;  %v6670_v40 = vpop.f32.mrb[4].mxu1  ;;  %9632 = vmatprep.subr.bf16.mxu0 %v10682_v54  ;;  %v5427_v2 = vld [vmem:[#allocation4 + $0x1e8] sm:$0xff] }
 0x623   : > { %10247 = vrot.lane.b32.xlu1 %v10246_v12, %s10684_s18  ;;  %v6671_v24 = vadd.f32 %v15340_v47, %v6670_v40  ;;  %v6672_v18 = vpop.f32.mrb[5].mxu1  ;;  %9472 = vmatmul.mubr.msk.f32.gmra.mrb[60].mxu0 %vm445_vm6, %v5491_v9  ;;  %v6377_v40 = vsel %vm445_vm6, %v5351_v48, %v10124_v27  ;;  %v10291_v63 = vpack.i.bf16 %v15047_v10, %v5427_v2  ;;  %v5224_v27 = vld [vmem:[#allocation4 + $0xe0] sm:$0xff] }
 0x624   : > { %v9642_v9 = vpack.c.bf16 %v8127_v30, %v8126_v28  ;;  %v5492_v48 = vld [vmem:[#allocation4 + $0x1fe] sm:$0xff] }
 0x625   : > { %v6896_v19 = vadd.f32 %v15346_v22, %v6671_v24  ;;  %9634 = vmatpush1.bf16.msra.mxu0 %v9633_v57  ;;  %v9639_v24 = vpack.c.bf16 %v8125_v32, %v8124_v29  ;;  %v10276_v57 = vpack.i.bf16 %v15039_v14, %v5426_v21  ;;  %v5459_v32 = vld [vmem:[#allocation4 + $0x1eb] sm:$0xff]  ;;  %9474 = vmatprep.mubr.msk.f32.mxu0 %vm445_vm6, %v5492_v48 }
 0x626   : > { %10262 = vrot.lane.b32.xlu0 %v10261_v7, %s10684_s18  ;;  %9635 = vmatprep.subr.bf16.mxu0 %v10682_v54 }
 0x627   : > { %10257 = vrot.lane.b32.xlu1 %v10256_v23, %s10681_s22  ;;  %vm7046_vm7 = vcmp.gt.f32.partialorder %v6896_v19, 0.0  ;;  %v7078_v52 = vmul.f32 0.01, %v6896_v19 }
 0x629   : > { %v10133_v51 = vpop.permute.xlu0 %10132  ;;  %v7110_v39 = vsel %vm7046_vm7, %v6896_v19, %v7078_v52  ;;  %v6675_v11 = vpop.f32.mrb[6].mxu1  ;;  %9637 = vmatpush1.bf16.msra.mxu0 %v9636_v46 }
 0x62a   : > { %v10128_v22 = vpop.permute.xlu1 %10127  ;;  %v10135_v31 = vunpack.i.h.bf16 %v10133_v51  ;;  %10272 = vrot.lane.b32.xlu0 %v10271_v3, %s10681_s22  ;;  %7143 = vst.msk [vmem:[#allocation5 + $0xc5] sm:$0xff] %vm513_vm1, %v7110_v39  ;;  %v10134_v16 = vunpack.i.l.bf16 %v10133_v51  ;;  %v6676_v60 = vadd.f32 %v15340_v47, %v6675_v11  ;;  %v6677_v12 = vpop.f32.mrb[7].mxu1  ;;  %9638 = vmatprep.subr.bf16.mxu0 %v10682_v54  ;;  %v8128_v39 = vld [vmem:[%s16575_s7 + $0xd0] sm:$0xff]  ;;  %v10301_v11 = vpack.i.bf16 %v15149_v49, %v15365_v8  ;;  %v8130_v49 = vld [vmem:[%s16575_s7 + $0xe0] sm:$0xff]  ;;  %v8131_v8 = vld [vmem:[%s16575_s7 + $0xe8] sm:$0xff] }
 0x62b   : > { %v10130_v42 = vunpack.i.h.bf16 %v10128_v22  ;;  %v10129_v37 = vunpack.i.l.bf16 %v10128_v22  ;;  %10267 = vrot.lane.b32.xlu1 %v10266_v33, %s10683_s27  ;;  %v10286_v33 = vpack.i.bf16 %v15065_v59, %v15262_v17 }
 0x62c   : > { %v6901_v18 = vadd.f32 %v15342_v53, %v6676_v60  ;;  %v5460_v60 = vld [vmem:[#allocation4 + $0x1fb] sm:$0xff] }
 0x62d   : > { %v6312_v34 = vsel %vm513_vm1, %v6280_v6, %v10130_v42  ;;  %v10143_v44 = vpop.permute.xlu0 %10142  ;;  %v6409_v23 = vsel %vm513_vm1, %v6377_v40, %v10129_v37  ;;  %9640 = vmatpush1.bf16.msra.mxu0 %v9639_v24  ;;  %v5428_v37 = vld [vmem:[#allocation4 + $0x1f8] sm:$0xff]  ;;  %v10311_v6 = vpack.i.bf16 %v15367_v4, %v5460_v60  ;;  %v8132_v24 = vld [vmem:[%s16575_s7 + $0xf0] sm:$0xff] }
 0x62e   : > { %v10138_v7 = vpop.permute.xlu1 %10137  ;;  %v10145_v19 = vunpack.i.h.bf16 %v10143_v44  ;;  %10282 = vrot.lane.b32.xlu0 %v10281_v0, %s10683_s27  ;;  %v6345_v14 = vsel %vm6326_vm8, %v6312_v34, %v10135_v31  ;;  %vm7047_vm15 = vcmp.gt.f32.partialorder %v6901_v18, 0.0  ;;  %v7079_v15 = vmul.f32 0.01, %v6901_v18  ;;  %9641 = vmatprep.subr.bf16.mxu0 %v10682_v54  ;;  %v8129_v31 = vld [vmem:[%s16575_s7 + $0xd8] sm:$0xff]  ;;  %v5429_v34 = vld [vmem:[#allocation4 + $0x200] sm:$0xff] }
 0x62f   : > { %v10140_v53 = vunpack.i.h.bf16 %v10138_v7  ;;  %v10139_v1 = vunpack.i.l.bf16 %v10138_v7  ;;  %v10144_v10 = vunpack.i.l.bf16 %v10143_v44  ;;  %10277 = vrot.lane.b32.xlu1 %v10276_v57, %s10684_s18  ;;  %v6441_v3 = vsel %vm6326_vm8, %v6409_v23, %v10134_v16  ;;  %v7205_v7 = vld [vmem:[#allocation5 + $0x5] sm:$0xff]  ;;  %v5461_v23 = vld [vmem:[#allocation4 + $0x203] sm:$0xff] }
 0x630   : > { %6748 = vmatprep.mubr.f32.mxu1 %v6441_v3  ;;  %v7111_v51 = vsel %vm7047_vm15, %v6901_v18, %v7079_v15  ;;  %v9645_v26 = vpack.c.bf16 %v8129_v31, %v8128_v39  ;;  %v10296_v16 = vpack.i.bf16 %v15274_v41, %v5459_v32  ;;  %v5493_v41 = vld [vmem:[#allocation4 + $0x206] sm:$0xff]  ;;  %v9648_v0 = vpack.c.bf16 %v8131_v8, %v8130_v49  ;;  %v8133_v18 = vld [vmem:[%s16575_s7 + $0xf8] sm:$0xff]  ;;  %v7269_v57 = vld [vmem:[#allocation5 + $0xa0] sm:$0xff] }
 0x631   : > { %v6378_v52 = vsel %vm445_vm6, %v5352_v55, %v10139_v1  ;;  %v6281_v46 = vsel %vm445_vm6, %v5224_v27, %v10140_v53  ;;  %6749 = vmatmul.mubr.f32.gmra.mrb[36].mxu1 %v6345_v14  ;;  %7144 = vst.msk [vmem:[#allocation5 + $0xcd] sm:$0xff] %vm513_vm1, %v7111_v51  ;;  %9643 = vmatpush1.bf16.msra.mxu0 %v9642_v9  ;;  %v10153_v28 = vpop.permute.xlu0 %10152  ;;  %v7207_v1 = vld [vmem:[#allocation5 + $0x25] sm:$0xff]  ;;  %v7206_v14 = vld [vmem:[#allocation5 + $0xd] sm:$0xff] }
 0x632   : > { %v10148_v22 = vpop.permute.xlu1 %10147  ;;  %10292 = vrot.lane.b32.xlu0 %v10291_v63, %s10684_s18  ;;  %v6410_v59 = vsel %vm513_vm1, %v6378_v52, %v10144_v10  ;;  %v6313_v17 = vsel %vm513_vm1, %v6281_v46, %v10145_v19  ;;  %9644 = vmatprep.subr.bf16.mxu0 %v10682_v54  ;;  %v10306_v40 = vpack.i.bf16 %v15147_v20, %v5428_v37  ;;  %v7270_v15 = vld [vmem:[#allocation5 + $0xa8] sm:$0xff]  ;;  %v10155_v10 = vunpack.i.h.bf16 %v10153_v28 }
 0x633   : > { %v10150_v61 = vunpack.i.h.bf16 %v10148_v22  ;;  %v10149_v29 = vunpack.i.l.bf16 %v10148_v22  ;;  %10287 = vrot.lane.b32.xlu1 %v10286_v33, %s10681_s22  ;;  %9475 = vmatmul.mubr.msk.f32.gmra.mrb[62].mxu0 %vm445_vm6, %v5493_v41  ;;  %v10321_v4 = vpack.i.bf16 %v15155_v56, %v5429_v34  ;;  %v9651_v20 = vpack.c.bf16 %v8133_v18, %v8132_v24  ;;  %v7209_v24 = vld [vmem:[#allocation5 + $0x45] sm:$0xff]  ;;  %v5354_v18 = vld [vmem:[#allocation4 + $0x143] sm:$0xff] }
 0x634   : > { %v15514_v2 = vpop.f32.mrb[44].mxu0  ;;  %v10316_v44 = vpack.i.bf16 %v15173_v35, %v15371_v62  ;;  %v10331_v56 = vpack.i.bf16 %v7205_v7, %v7269_v57  ;;  %v10326_v53 = vpack.i.bf16 %v15382_v58, %v5461_v23  ;;  %v7271_v35 = vld [vmem:[#allocation5 + $0xc0] sm:$0xff]  ;;  %v10154_v3 = vunpack.i.l.bf16 %v10153_v28 }
 0x635   : > { %v6442_v42 = vsel %vm6326_vm8, %v6410_v59, %v10149_v29  ;;  %v6346_v21 = vsel %vm6326_vm8, %v6313_v17, %v10150_v61  ;;  %v15518_v12 = vpop.f32.mrb[45].mxu0  ;;  %9646 = vmatpush1.bf16.msra.mxu0 %v9645_v26  ;;  %v10341_v27 = vpack.i.bf16 %v7207_v1, %v7271_v35  ;;  %v10336_v58 = vpack.i.bf16 %v7206_v14, %v7270_v15  ;;  %v5353_v59 = vld [vmem:[#allocation4 + $0x13b] sm:$0xff]  ;;  %v5225_v17 = vld [vmem:[#allocation4 + $0xf0] sm:$0xff] }
 0x636   : > { %6753 = vmatprep.mubr.f32.mxu1 %v6442_v42  ;;  %10302 = vrot.lane.b32.xlu0 %v10301_v11, %s10681_s22  ;;  %v6379_v11 = vsel %vm445_vm6, %v5353_v59, %v10154_v3 }
 0x637   : > { %6754 = vmatmul.mubr.f32.gmra.mrb[38].mxu1 %v6346_v21  ;;  %10297 = vrot.lane.b32.xlu1 %v10296_v16, %s10683_s27  ;;  %v6282_v21 = vsel %vm445_vm6, %v5225_v17, %v10155_v10  ;;  %v5227_v17 = vld [vmem:[#allocation4 + $0x108] sm:$0xff] }
 0x638   : > { %9647 = vmatprep.subr.bf16.mxu0 %v10682_v54  ;;  %v7272_v61 = vld [vmem:[#allocation5 + $0xc8] sm:$0xff] }
 0x639   : > { %9649 = vmatpush1.bf16.msra.mxu0 %v9648_v0 }
 0x63a   : > { %10312 = vrot.lane.b32.xlu0 %v10311_v6, %s10683_s27  ;;  %9650 = vmatprep.subr.bf16.mxu0 %v10682_v54 }
 0x63b   : > { %10307 = vrot.lane.b32.xlu1 %v10306_v40, %s10684_s18 }
 0x63d   : > { %9652 = vmatpush1.bf16.msra.mxu0 %v9651_v20 }
 0x63e   : > { %10322 = vrot.lane.b32.xlu0 %v10321_v4, %s10684_s18  ;;  %v6680_v63 = vpop.f32.mrb[8].mxu1  ;;  %9653 = vmatprep.subr.bf16.mxu0 %v10682_v54  ;;  %v5226_v4 = vld [vmem:[#allocation4 + $0xf8] sm:$0xff] }
 0x63f   : > { %10317 = vrot.lane.b32.xlu1 %v10316_v44, %s10681_s22  ;;  %v6681_v30 = vadd.f32 %v15340_v47, %v6680_v63  ;;  %v6682_v19 = vpop.f32.mrb[9].mxu1 }
 0x641   : > { %v6906_v62 = vadd.f32 %v15361_v36, %v6681_v30  ;;  %v7208_v36 = vld [vmem:[#allocation5 + $0x2d] sm:$0xff] }
 0x642   : > { %10332 = vrot.lane.b32.xlu0 %v10331_v56, %s10684_s18  ;;  %v10346_v16 = vpack.i.bf16 %v7208_v36, %v7272_v61 }
 0x643   : > { %10327 = vrot.lane.b32.xlu1 %v10326_v53, %s10683_s27  ;;  %vm7048_vm0 = vcmp.gt.f32.partialorder %v6906_v62, 0.0  ;;  %v7080_v55 = vmul.f32 0.01, %v6906_v62 }
 0x645   : > { %v6685_v52 = vpop.f32.mrb[10].mxu1  ;;  %v7112_v9 = vsel %vm7048_vm0, %v6906_v62, %v7080_v55  ;;  %v7210_v62 = vld [vmem:[#allocation5 + $0x4d] sm:$0xff] }
 0x646   : > { %v10163_v46 = vpop.permute.xlu0 %10162  ;;  %v6686_v51 = vadd.f32 %v15340_v47, %v6685_v52  ;;  %v6687_v33 = vpop.f32.mrb[11].mxu1  ;;  %10342 = vrot.lane.b32.xlu0 %v10341_v27, %s10684_s18  ;;  %7145 = vst.msk [vmem:[#allocation5 + $0xe5] sm:$0xff] %vm513_vm1, %v7112_v9 }
 0x647   : > { %v10158_v22 = vpop.permute.xlu1 %10157  ;;  %v10165_v29 = vunpack.i.h.bf16 %v10163_v46  ;;  %v10164_v32 = vunpack.i.l.bf16 %v10163_v46  ;;  %10337 = vrot.lane.b32.xlu1 %v10336_v58, %s10684_s18 }
 0x648   : > { %v10160_v39 = vunpack.i.h.bf16 %v10158_v22  ;;  %v10159_v31 = vunpack.i.l.bf16 %v10158_v22  ;;  %v6911_v42 = vadd.f32 %v15356_v43, %v6686_v51 }
 0x64a   : > { %v10173_v26 = vpop.permute.xlu0 %10172  ;;  %v6411_v37 = vsel %vm513_vm1, %v6379_v11, %v10159_v31  ;;  %v6314_v60 = vsel %vm513_vm1, %v6282_v21, %v10160_v39  ;;  %vm7049_vm3 = vcmp.gt.f32.partialorder %v6911_v42, 0.0  ;;  %v7081_v48 = vmul.f32 0.01, %v6911_v42 }
 0x64b   : > { %v10168_v49 = vpop.permute.xlu1 %10167  ;;  %10347 = vrot.lane.b32.xlu1 %v10346_v16, %s10684_s18  ;;  %v6443_v6 = vsel %vm6326_vm8, %v6411_v37, %v10164_v32  ;;  %v6347_v43 = vsel %vm6326_vm8, %v6314_v60, %v10165_v29  ;;  %v10175_v40 = vunpack.i.h.bf16 %v10173_v26  ;;  %v10174_v34 = vunpack.i.l.bf16 %v10173_v26  ;;  %v5355_v26 = vld [vmem:[#allocation4 + $0x153] sm:$0xff] }
 0x64c   : > { %v10170_v8 = vunpack.i.h.bf16 %v10168_v49  ;;  %v10169_v41 = vunpack.i.l.bf16 %v10168_v49  ;;  %v7113_v0 = vsel %vm7049_vm3, %v6911_v42, %v7081_v48  ;;  %6758 = vmatprep.mubr.f32.mxu1 %v6443_v6  ;;  %v7211_v42 = vld [vmem:[#allocation5 + $0x65] sm:$0xff] }
 0x64d   : > { %7146 = vst.msk [vmem:[#allocation5 + $0xed] sm:$0xff] %vm513_vm1, %v7113_v0  ;;  %6759 = vmatmul.mubr.f32.gmra.mrb[40].mxu1 %v6347_v43  ;;  %v7273_v57 = vld [vmem:[#allocation5 + $0xe0] sm:$0xff] }
 0x64e   : > { %v6380_v20 = vsel %vm445_vm6, %v5354_v18, %v10169_v41  ;;  %v6283_v44 = vsel %vm445_vm6, %v5226_v4, %v10170_v8  ;;  %v10351_v28 = vpack.i.bf16 %v7209_v24, %v7273_v57  ;;  %v10183_v58 = vpop.permute.xlu0 %10182  ;;  %v5356_v4 = vld [vmem:[#allocation4 + $0x15b] sm:$0xff] }
 0x64f   : > { %v10178_v7 = vpop.permute.xlu1 %10177  ;;  %v6412_v30 = vsel %vm513_vm1, %v6380_v20, %v10174_v34  ;;  %v6315_v19 = vsel %vm513_vm1, %v6283_v44, %v10175_v40  ;;  %v10185_v36 = vunpack.i.h.bf16 %v10183_v58  ;;  %v10184_v61 = vunpack.i.l.bf16 %v10183_v58  ;;  %v5228_v20 = vld [vmem:[#allocation4 + $0x110] sm:$0xff] }
 0x650   : > { %v10180_v23 = vunpack.i.h.bf16 %v10178_v7  ;;  %v10179_v63 = vunpack.i.l.bf16 %v10178_v7  ;;  %10352 = vrot.lane.b32.xlu0 %v10351_v28, %s10684_s18  ;;  %v15571_v56 = vpop.f32.mrb[46].mxu0 }
 0x651   : > { %v15575_v35 = vpop.f32.mrb[47].mxu0  ;;  %v6284_v16 = vsel %vm445_vm6, %v5227_v17, %v10185_v36 }
 0x652   : > { %v6444_v53 = vsel %vm6326_vm8, %v6412_v30, %v10179_v63  ;;  %v6348_v1 = vsel %vm6326_vm8, %v6315_v19, %v10180_v23  ;;  %v7212_v23 = vld [vmem:[#allocation5 + $0x6d] sm:$0xff] }
 0x653   : > { %6763 = vmatprep.mubr.f32.mxu1 %v6444_v53 }
 0x654   : > { %6764 = vmatmul.mubr.f32.gmra.mrb[42].mxu1 %v6348_v1  ;;  %v7274_v14 = vld [vmem:[#allocation5 + $0xe8] sm:$0xff] }
 0x655   : > { %v10356_v15 = vpack.i.bf16 %v7210_v62, %v7274_v14 }
 0x657   : > { %10357 = vrot.lane.b32.xlu1 %v10356_v15, %s10684_s18 }
 0x65a   : > { %v6690_v10 = vpop.f32.mrb[12].mxu1 }
 0x65b   : > { %v6691_v3 = vadd.f32 %v15340_v47, %v6690_v10  ;;  %v6692_v55 = vpop.f32.mrb[13].mxu1 }
 0x65d   : > { %v6916_v27 = vadd.f32 %v15389_v5, %v6691_v3 }
 0x65f   : > { %vm7050_vm4 = vcmp.gt.f32.partialorder %v6916_v27, 0.0  ;;  %v7082_v52 = vmul.f32 0.01, %v6916_v27 }
 0x661   : > { %v6695_v46 = vpop.f32.mrb[14].mxu1  ;;  %v7114_v9 = vsel %vm7050_vm4, %v6916_v27, %v7082_v52 }
 0x662   : > { %v6696_v51 = vadd.f32 %v15340_v47, %v6695_v46  ;;  %v6697_v22 = vpop.f32.mrb[15].mxu1  ;;  %7147 = vst.msk [vmem:[#allocation5 + $0x105] sm:$0xff] %vm513_vm1, %v7114_v9 }
 0x664   : > { %v6921_v33 = vadd.f32 %v15377_v50, %v6696_v51  ;;  %v6381_v50 = vsel %vm445_vm6, %v5355_v26, %v10184_v61  ;;  %v5357_v26 = vld [vmem:[#allocation4 + $0x16b] sm:$0xff] }
 0x666   : > { %vm7051_vm9 = vcmp.gt.f32.partialorder %v6921_v33, 0.0  ;;  %v7083_v29 = vmul.f32 0.01, %v6921_v33  ;;  %v10193_v32 = vpop.permute.xlu0 %10192 }
 0x667   : > { %v10188_v39 = vpop.permute.xlu1 %10187  ;;  %v10195_v5 = vunpack.i.h.bf16 %v10193_v32  ;;  %v10194_v11 = vunpack.i.l.bf16 %v10193_v32 }
 0x668   : > { %v7115_v31 = vsel %vm7051_vm9, %v6921_v33, %v7083_v29  ;;  %v10190_v59 = vunpack.i.h.bf16 %v10188_v39  ;;  %v10189_v21 = vunpack.i.l.bf16 %v10188_v39  ;;  %v7213_v29 = vld [vmem:[#allocation5 + $0x85] sm:$0xff] }
 0x669   : > { %7148 = vst.msk [vmem:[#allocation5 + $0x10d] sm:$0xff] %vm513_vm1, %v7115_v31  ;;  %v7275_v60 = vld [vmem:[#allocation5 + $0x100] sm:$0xff] }
 0x66a   : > { %v6316_v37 = vsel %vm513_vm1, %v6284_v16, %v10190_v59  ;;  %v10203_v48 = vpop.permute.xlu0 %10202  ;;  %v6413_v8 = vsel %vm513_vm1, %v6381_v50, %v10189_v21  ;;  %v10361_v41 = vpack.i.bf16 %v7211_v42, %v7275_v60  ;;  %v5229_v16 = vld [vmem:[#allocation4 + $0x120] sm:$0xff] }
 0x66b   : > { %v10198_v49 = vpop.permute.xlu1 %10197  ;;  %v6349_v0 = vsel %vm6326_vm8, %v6316_v37, %v10195_v5  ;;  %v10205_v40 = vunpack.i.h.bf16 %v10203_v48  ;;  %v10204_v34 = vunpack.i.l.bf16 %v10203_v48  ;;  %v6445_v24 = vsel %vm6326_vm8, %v6413_v8, %v10194_v11  ;;  %v7214_v48 = vld [vmem:[#allocation5 + $0x8d] sm:$0xff] }
 0x66c   : > { %v10200_v6 = vunpack.i.h.bf16 %v10198_v49  ;;  %v10199_v43 = vunpack.i.l.bf16 %v10198_v49  ;;  %10362 = vrot.lane.b32.xlu0 %v10361_v41, %s10684_s18  ;;  %v15591_v18 = vpop.f32.mrb[48].mxu0  ;;  %6768 = vmatprep.mubr.f32.mxu1 %v6445_v24 }
 0x66d   : > { %v15593_v44 = vpop.f32.mrb[49].mxu0  ;;  %6769 = vmatmul.mubr.f32.gmra.mrb[44].mxu1 %v6349_v0 }
 0x66e   : > { %v6382_v7 = vsel %vm445_vm6, %v5356_v4, %v10199_v43  ;;  %v6285_v57 = vsel %vm445_vm6, %v5228_v20, %v10200_v6  ;;  %v10213_v36 = vpop.permute.xlu0 %10212 }
 0x66f   : > { %v10208_v63 = vpop.permute.xlu1 %10207  ;;  %v6414_v53 = vsel %vm513_vm1, %v6382_v7, %v10204_v34  ;;  %v6317_v1 = vsel %vm513_vm1, %v6285_v57, %v10205_v40  ;;  %v10215_v32 = vunpack.i.h.bf16 %v10213_v36  ;;  %v5358_v57 = vld [vmem:[#allocation4 + $0x173] sm:$0xff] }
 0x670   : > { %v10210_v28 = vunpack.i.h.bf16 %v10208_v63  ;;  %v10209_v30 = vunpack.i.l.bf16 %v10208_v63  ;;  %v7276_v19 = vld [vmem:[#allocation5 + $0x108] sm:$0xff] }
 0x671   : > { %v10366_v62 = vpack.i.bf16 %v7212_v23, %v7276_v19  ;;  %v6286_v60 = vsel %vm445_vm6, %v5229_v16, %v10215_v32  ;;  %v5230_v23 = vld [vmem:[#allocation4 + $0x128] sm:$0xff]  ;;  %v5231_v32 = vld [vmem:[#allocation4 + $0x138] sm:$0xff] }
 0x672   : > { %v6446_v14 = vsel %vm6326_vm8, %v6414_v53, %v10209_v30  ;;  %v6350_v15 = vsel %vm6326_vm8, %v6317_v1, %v10210_v28 }
 0x673   : > { %6773 = vmatprep.mubr.f32.mxu1 %v6446_v14  ;;  %10367 = vrot.lane.b32.xlu1 %v10366_v62, %s10684_s18 }
 0x674   : > { %6774 = vmatmul.mubr.f32.gmra.mrb[46].mxu1 %v6350_v15 }
 0x676   : > { %v6700_v10 = vpop.f32.mrb[16].mxu1 }
 0x677   : > { %v6701_v3 = vadd.f32 %v15340_v47, %v6700_v10  ;;  %v6702_v55 = vpop.f32.mrb[17].mxu1 }
 0x679   : > { %v6926_v27 = vadd.f32 %v15406_v25, %v6701_v3  ;;  %v10214_v25 = vunpack.i.l.bf16 %v10213_v36 }
 0x67b   : > { %vm7052_vm10 = vcmp.gt.f32.partialorder %v6926_v27, 0.0  ;;  %v7084_v52 = vmul.f32 0.01, %v6926_v27  ;;  %v6383_v37 = vsel %vm445_vm6, %v5357_v26, %v10214_v25 }
 0x67d   : > { %v6705_v46 = vpop.f32.mrb[18].mxu1  ;;  %v7116_v58 = vsel %vm7052_vm10, %v6926_v27, %v7084_v52 }
 0x67e   : > { %v6706_v9 = vadd.f32 %v15340_v47, %v6705_v46  ;;  %v6707_v51 = vpop.f32.mrb[19].mxu1  ;;  %7149 = vst.msk [vmem:[#allocation5 + $0x125] sm:$0xff] %vm513_vm1, %v7116_v58 }
 0x680   : > { %v6931_v22 = vadd.f32 %v15403_v45, %v6706_v9 }
 0x682   : > { %vm7053_vm11 = vcmp.gt.f32.partialorder %v6931_v22, 0.0  ;;  %v7085_v33 = vmul.f32 0.01, %v6931_v22 }
 0x684   : > { %v7117_v61 = vsel %vm7053_vm11, %v6931_v22, %v7085_v33 }
 0x685   : > { %7150 = vst.msk [vmem:[#allocation5 + $0x12d] sm:$0xff] %vm513_vm1, %v7117_v61  ;;  %v7277_v39 = vld [vmem:[#allocation5 + $0x120] sm:$0xff] }
 0x686   : > { %v10371_v31 = vpack.i.bf16 %v7213_v29, %v7277_v39  ;;  %v5359_v29 = vld [vmem:[#allocation4 + $0x183] sm:$0xff] }
 0x688   : > { %v10223_v5 = vpop.permute.xlu0 %10222  ;;  %10372 = vrot.lane.b32.xlu0 %v10371_v31, %s10684_s18  ;;  %v15609_v45 = vpop.f32.mrb[50].mxu0 }
 0x689   : > { %v10218_v59 = vpop.permute.xlu1 %10217  ;;  %v10225_v17 = vunpack.i.h.bf16 %v10223_v5  ;;  %v10224_v42 = vunpack.i.l.bf16 %v10223_v5  ;;  %v15611_v50 = vpop.f32.mrb[51].mxu0 }
 0x68a   : > { %v10220_v11 = vunpack.i.h.bf16 %v10218_v59  ;;  %v10219_v21 = vunpack.i.l.bf16 %v10218_v59 }
 0x68c   : > { %v6415_v49 = vsel %vm513_vm1, %v6383_v37, %v10219_v21  ;;  %v6318_v8 = vsel %vm513_vm1, %v6286_v60, %v10220_v11  ;;  %v10233_v41 = vpop.permute.xlu0 %10232  ;;  %v7278_v0 = vld [vmem:[#allocation5 + $0x128] sm:$0xff] }
 0x68d   : > { %v6447_v6 = vsel %vm6326_vm8, %v6415_v49, %v10224_v42  ;;  %v6351_v43 = vsel %vm6326_vm8, %v6318_v8, %v10225_v17  ;;  %v10228_v40 = vpop.permute.xlu1 %10227  ;;  %v10376_v34 = vpack.i.bf16 %v7214_v48, %v7278_v0  ;;  %v10235_v20 = vunpack.i.h.bf16 %v10233_v41 }
 0x68e   : > { %6778 = vmatprep.mubr.f32.mxu1 %v6447_v6  ;;  %v10230_v24 = vunpack.i.h.bf16 %v10228_v40  ;;  %v10229_v4 = vunpack.i.l.bf16 %v10228_v40  ;;  %v10234_v7 = vunpack.i.l.bf16 %v10233_v41  ;;  %v5360_v41 = vld [vmem:[#allocation4 + $0x18b] sm:$0xff]  ;;  %v5232_v6 = vld [vmem:[#allocation4 + $0x140] sm:$0xff] }
 0x68f   : > { %6779 = vmatmul.mubr.f32.gmra.mrb[48].mxu1 %v6351_v43  ;;  %10377 = vrot.lane.b32.xlu1 %v10376_v34, %s10684_s18 }
 0x690   : > { %v10243_v63 = vpop.permute.xlu0 %10242  ;;  %v6384_v28 = vsel %vm445_vm6, %v5358_v57, %v10229_v4  ;;  %v6287_v30 = vsel %vm445_vm6, %v5230_v23, %v10230_v24 }
 0x691   : > { %v10238_v19 = vpop.permute.xlu1 %10237  ;;  %v10245_v62 = vunpack.i.h.bf16 %v10243_v63  ;;  %v10244_v14 = vunpack.i.l.bf16 %v10243_v63  ;;  %v6416_v10 = vsel %vm513_vm1, %v6384_v28, %v10234_v7  ;;  %v6319_v3 = vsel %vm513_vm1, %v6287_v30, %v10235_v20 }
 0x692   : > { %v10240_v53 = vunpack.i.h.bf16 %v10238_v19  ;;  %v10239_v1 = vunpack.i.l.bf16 %v10238_v19  ;;  %v6710_v15 = vpop.f32.mrb[20].mxu1 }
 0x693   : > { %v6711_v55 = vadd.f32 %v15340_v47, %v6710_v15  ;;  %v6712_v27 = vpop.f32.mrb[21].mxu1  ;;  %v6385_v25 = vsel %vm445_vm6, %v5359_v29, %v10244_v14  ;;  %v6288_v39 = vsel %vm445_vm6, %v5231_v32, %v10245_v62  ;;  %v5233_v14 = vld [vmem:[#allocation4 + $0x150] sm:$0xff] }
 0x694   : > { %v10253_v52 = vpop.permute.xlu0 %10252  ;;  %v6448_v46 = vsel %vm6326_vm8, %v6416_v10, %v10239_v1  ;;  %v6352_v58 = vsel %vm6326_vm8, %v6319_v3, %v10240_v53  ;;  %v7215_v3 = vld [vmem:[#allocation5 + $0xa5] sm:$0xff] }
 0x695   : > { %v10255_v9 = vunpack.i.h.bf16 %v10253_v52  ;;  %v10254_v51 = vunpack.i.l.bf16 %v10253_v52  ;;  %v10248_v22 = vpop.permute.xlu1 %10247  ;;  %6783 = vmatprep.mubr.f32.mxu1 %v6448_v46  ;;  %v6936_v33 = vadd.f32 %v15423_v38, %v6711_v55  ;;  %v5361_v27 = vld [vmem:[#allocation4 + $0x19b] sm:$0xff] }
 0x696   : > { %v10250_v36 = vunpack.i.h.bf16 %v10248_v22  ;;  %v10249_v61 = vunpack.i.l.bf16 %v10248_v22  ;;  %6784 = vmatmul.mubr.f32.gmra.mrb[50].mxu1 %v6352_v58 }
 0x697   : > { %vm7054_vm12 = vcmp.gt.f32.partialorder %v6936_v33, 0.0  ;;  %v7086_v31 = vmul.f32 0.01, %v6936_v33 }
 0x698   : > { %v10263_v5 = vpop.permute.xlu0 %10262  ;;  %v6417_v59 = vsel %vm513_vm1, %v6385_v25, %v10249_v61  ;;  %v6320_v17 = vsel %vm513_vm1, %v6288_v39, %v10250_v36 }
 0x699   : > { %v10258_v42 = vpop.permute.xlu1 %10257  ;;  %v6715_v11 = vpop.f32.mrb[22].mxu1  ;;  %v6449_v38 = vsel %vm6326_vm8, %v6417_v59, %v10254_v51  ;;  %v6353_v21 = vsel %vm6326_vm8, %v6320_v17, %v10255_v9  ;;  %v7118_v26 = vsel %vm7054_vm12, %v6936_v33, %v7086_v31  ;;  %v10265_v49 = vunpack.i.h.bf16 %v10263_v5  ;;  %v5362_v59 = vld [vmem:[#allocation4 + $0x1a3] sm:$0xff]  ;;  %v5234_v17 = vld [vmem:[#allocation4 + $0x158] sm:$0xff] }
 0x69a   : > { %v10260_v16 = vunpack.i.h.bf16 %v10258_v42  ;;  %v10259_v37 = vunpack.i.l.bf16 %v10258_v42  ;;  %v6716_v60 = vadd.f32 %v15340_v47, %v6715_v11  ;;  %6788 = vmatprep.mubr.f32.mxu1 %v6449_v38  ;;  %v6717_v48 = vpop.f32.mrb[23].mxu1  ;;  %7151 = vst.msk [vmem:[#allocation5 + $0x145] sm:$0xff] %vm513_vm1, %v7118_v26  ;;  %v10264_v8 = vunpack.i.l.bf16 %v10263_v5  ;;  %v7216_v11 = vld [vmem:[#allocation5 + $0xad] sm:$0xff] }
 0x69b   : > { %6789 = vmatmul.mubr.f32.gmra.mrb[52].mxu1 %v6353_v21 }
 0x69c   : > { %v6941_v43 = vadd.f32 %v15419_v13, %v6716_v60  ;;  %v10273_v0 = vpop.permute.xlu0 %10272  ;;  %v6386_v40 = vsel %vm445_vm6, %v5360_v41, %v10259_v37  ;;  %v6289_v34 = vsel %vm445_vm6, %v5232_v6, %v10260_v16 }
 0x69d   : > { %v10268_v24 = vpop.permute.xlu1 %10267  ;;  %v10275_v7 = vunpack.i.h.bf16 %v10273_v0  ;;  %v10274_v57 = vunpack.i.l.bf16 %v10273_v0  ;;  %v6418_v23 = vsel %vm513_vm1, %v6386_v40, %v10264_v8  ;;  %v6321_v63 = vsel %vm513_vm1, %v6289_v34, %v10265_v49 }
 0x69e   : > { %vm7055_vm13 = vcmp.gt.f32.partialorder %v6941_v43, 0.0  ;;  %v7087_v4 = vmul.f32 0.01, %v6941_v43  ;;  %v10270_v47 = vunpack.i.h.bf16 %v10268_v24  ;;  %v10269_v20 = vunpack.i.l.bf16 %v10268_v24 }
 0x69f   : > { %v6387_v46 = vsel %vm445_vm6, %v5361_v27, %v10274_v57  ;;  %v6290_v58 = vsel %vm445_vm6, %v5233_v14, %v10275_v7  ;;  %v5363_v57 = vld [vmem:[#allocation4 + $0x1b3] sm:$0xff] }
 0x6a0   : > { %v7119_v28 = vsel %vm7055_vm13, %v6941_v43, %v7087_v4  ;;  %v10283_v30 = vpop.permute.xlu0 %10282  ;;  %v6450_v13 = vsel %vm6326_vm8, %v6418_v23, %v10269_v20  ;;  %v6354_v19 = vsel %vm6326_vm8, %v6321_v63, %v10270_v47  ;;  %v5235_v23 = vld [vmem:[#allocation4 + $0x168] sm:$0xff]  ;;  %v15665_v63 = vld [vmem:[%s16574_s6] ss:$0 sm:$0xff] }
 0x6a1   : > { %7152 = vst.msk [vmem:[#allocation5 + $0x14d] sm:$0xff] %vm513_vm1, %v7119_v28  ;;  %v10285_v53 = vunpack.i.h.bf16 %v10283_v30  ;;  %v10284_v1 = vunpack.i.l.bf16 %v10283_v30  ;;  %v10278_v62 = vpop.permute.xlu1 %10277  ;;  %6793 = vmatprep.mubr.f32.mxu1 %v6450_v13  ;;  %v7279_v55 = vld [vmem:[#allocation5 + $0x140] sm:$0xff] }
 0x6a2   : > { %v10280_v15 = vunpack.i.h.bf16 %v10278_v62  ;;  %v10279_v10 = vunpack.i.l.bf16 %v10278_v62  ;;  %6794 = vmatmul.mubr.f32.gmra.mrb[54].mxu1 %v6354_v19  ;;  %v10381_v52 = vpack.i.bf16 %v7215_v3, %v7279_v55 }
 0x6a4   : > { %v10293_v9 = vpop.permute.xlu0 %10292  ;;  %v6419_v51 = vsel %vm513_vm1, %v6387_v46, %v10279_v10  ;;  %v6322_v22 = vsel %vm513_vm1, %v6290_v58, %v10280_v15  ;;  %10382 = vrot.lane.b32.xlu0 %v10381_v52, %s10684_s18 }
 0x6a5   : > { %v10288_v33 = vpop.permute.xlu1 %10287  ;;  %v6451_v36 = vsel %vm6326_vm8, %v6419_v51, %v10284_v1  ;;  %v6355_v61 = vsel %vm6326_vm8, %v6322_v22, %v10285_v53  ;;  %v15651_v29 = vpop.f32.mrb[52].mxu0  ;;  %v10295_v31 = vunpack.i.h.bf16 %v10293_v9  ;;  %v10294_v5 = vunpack.i.l.bf16 %v10293_v9  ;;  %v5364_v9 = vld [vmem:[#allocation4 + $0x1bb] sm:$0xff]  ;;  %v5236_v51 = vld [vmem:[#allocation4 + $0x170] sm:$0xff] }
 0x6a6   : > { %v10290_v32 = vunpack.i.h.bf16 %v10288_v33  ;;  %v10289_v25 = vunpack.i.l.bf16 %v10288_v33  ;;  %6798 = vmatprep.mubr.f32.mxu1 %v6451_v36  ;;  %v15653_v39 = vpop.f32.mrb[53].mxu0  ;;  %v7237_v36 = vld [vmem:[#allocation5 + $0xa] sm:$0xff] }
 0x6a7   : > { %6799 = vmatmul.mubr.f32.gmra.mrb[56].mxu1 %v6355_v61  ;;  %v7173_v61 = vld [vmem:[#allocation5] sm:$0xff] }
 0x6a8   : > { %v10303_v42 = vpop.permute.xlu0 %10302  ;;  %v7280_v38 = vld [vmem:[#allocation5 + $0x148] sm:$0xff]  ;;  %v6388_v21 = vsel %vm445_vm6, %v5362_v59, %v10289_v25  ;;  %v6291_v26 = vsel %vm445_vm6, %v5234_v17, %v10290_v32 }
 0x6a9   : > { %v10298_v16 = vpop.permute.xlu1 %10297  ;;  %v10386_v37 = vpack.i.bf16 %v7216_v11, %v7280_v38  ;;  %v10305_v49 = vunpack.i.h.bf16 %v10303_v42  ;;  %v10304_v8 = vunpack.i.l.bf16 %v10303_v42  ;;  %v6420_v41 = vsel %vm513_vm1, %v6388_v21, %v10294_v5 }
 0x6aa   : > { %v10300_v60 = vunpack.i.h.bf16 %v10298_v16  ;;  %v10299_v48 = vunpack.i.l.bf16 %v10298_v16  ;;  %v6323_v6 = vsel %vm513_vm1, %v6291_v26, %v10295_v31 }
 0x6ab   : > { %10387 = vrot.lane.b32.xlu1 %v10386_v37, %s10684_s18  ;;  %v6389_v13 = vsel %vm445_vm6, %v5363_v57, %v10304_v8  ;;  %v6292_v19 = vsel %vm445_vm6, %v5235_v23, %v10305_v49  ;;  %v7217_v23 = vld [vmem:[#allocation5 + $0xc5] sm:$0xff] }
 0x6ac   : > { %v10313_v43 = vpop.permute.xlu0 %10312  ;;  %v6452_v0 = vsel %vm6326_vm8, %v6420_v41, %v10299_v48  ;;  %v6356_v40 = vsel %vm6326_vm8, %v6323_v6, %v10300_v60 }
 0x6ad   : > { %v10314_v34 = vunpack.i.l.bf16 %v10313_v43  ;;  %v10308_v24 = vpop.permute.xlu1 %10307  ;;  %6803 = vmatprep.mubr.f32.mxu1 %v6452_v0  ;;  %v10315_v4 = vunpack.i.h.bf16 %v10313_v43  ;;  %v7238_v43 = vld [vmem:[#allocation5 + $0x12] sm:$0xff]  ;;  %v7174_v0 = vld [vmem:[#allocation5 + $0x8] sm:$0xff] }
 0x6ae   : > { %v10310_v47 = vunpack.i.h.bf16 %v10308_v24  ;;  %v10309_v20 = vunpack.i.l.bf16 %v10308_v24  ;;  %6804 = vmatmul.mubr.f32.gmra.mrb[58].mxu1 %v6356_v40 }
 0x6af   : > { %v6720_v7 = vpop.f32.mrb[24].mxu1 }
 0x6b0   : > { %v6721_v28 = vadd.f32 %v15665_v63, %v6720_v7  ;;  %v6722_v30 = vpop.f32.mrb[25].mxu1  ;;  %v10323_v53 = vpop.permute.xlu0 %10322  ;;  %v6421_v1 = vsel %vm513_vm1, %v6389_v13, %v10309_v20  ;;  %v6324_v62 = vsel %vm513_vm1, %v6292_v19, %v10310_v47 }
 0x6b1   : > { %v10318_v15 = vpop.permute.xlu1 %10317  ;;  %v6453_v10 = vsel %vm6326_vm8, %v6421_v1, %v10314_v34  ;;  %v6357_v27 = vsel %vm6326_vm8, %v6324_v62, %v10315_v4  ;;  %v10325_v46 = vunpack.i.h.bf16 %v10323_v53  ;;  %v10324_v58 = vunpack.i.l.bf16 %v10323_v53  ;;  %v7239_v4 = vld [vmem:[#allocation5 + $0x2a] sm:$0xff]  ;;  %v7175_v53 = vld [vmem:[#allocation5 + $0x20] sm:$0xff]  ;;  %v7240_v1 = vld [vmem:[#allocation5 + $0x32] sm:$0xff] }
 0x6b2   : > { %v6946_v14 = vadd.f32 %v15518_v12, %v6721_v28  ;;  %v10320_v3 = vunpack.i.h.bf16 %v10318_v15  ;;  %v10319_v55 = vunpack.i.l.bf16 %v10318_v15  ;;  %6808 = vmatprep.mubr.f32.mxu1 %v6453_v10  ;;  %v7176_v10 = vld [vmem:[#allocation5 + $0x28] sm:$0xff] }
 0x6b3   : > { %6809 = vmatmul.mubr.f32.gmra.mrb[60].mxu1 %v6357_v27 }
 0x6b4   : > { %vm7056_vm14 = vcmp.gt.f32.partialorder %v6946_v14, 0.0  ;;  %v7088_v52 = vmul.f32 0.01, %v6946_v14  ;;  %v10333_v22 = vpop.permute.xlu0 %10332  ;;  %v6390_v33 = vsel %vm445_vm6, %v5364_v9, %v10319_v55  ;;  %v6293_v12 = vsel %vm445_vm6, %v5236_v51, %v10320_v3  ;;  %v7241_v55 = vld [vmem:[#allocation5 + $0x4a] sm:$0xff] }
 0x6b5   : > { %v10328_v25 = vpop.permute.xlu1 %10327  ;;  %v10335_v31 = vunpack.i.h.bf16 %v10333_v22  ;;  %v10334_v5 = vunpack.i.l.bf16 %v10333_v22  ;;  %v6422_v21 = vsel %vm513_vm1, %v6390_v33, %v10324_v58  ;;  %v6325_v16 = vsel %vm513_vm1, %v6293_v12, %v10325_v46 }
 0x6b6   : > { %v7120_v32 = vsel %vm7056_vm14, %v6946_v14, %v7088_v52  ;;  %v6725_v59 = vpop.f32.mrb[26].mxu1  ;;  %v10330_v17 = vunpack.i.h.bf16 %v10328_v25  ;;  %v10329_v42 = vunpack.i.l.bf16 %v10328_v25  ;;  %v7218_v52 = vld [vmem:[#allocation5 + $0xcd] sm:$0xff] }
 0x6b7   : > { %7153 = vst.msk [vmem:[#allocation5 + $0x165] sm:$0xff] %vm513_vm1, %v7120_v32  ;;  %v6726_v11 = vadd.f32 %v15665_v63, %v6725_v59  ;;  %v6727_v38 = vpop.f32.mrb[27].mxu1  ;;  %v8006_v26 = vsel %vm513_vm1, %v7237_v36, %v10334_v5  ;;  %v7974_v37 = vsel %vm513_vm1, %v7173_v61, %v10335_v31  ;;  %v7177_v36 = vld [vmem:[#allocation5 + $0x40] sm:$0xff]  ;;  %v7242_v25 = vld [vmem:[#allocation5 + $0x52] sm:$0xff]  ;;  %v7178_v31 = vld [vmem:[#allocation5 + $0x48] sm:$0xff] }
 0x6b8   : > { %v6454_v48 = vsel %vm6326_vm8, %v6422_v21, %v10329_v42  ;;  %v10343_v49 = vpop.permute.xlu0 %10342  ;;  %8341 = vmatprep.mubr.f32.mxu0 %v8006_v26  ;;  %v6358_v8 = vsel %vm6326_vm8, %v6325_v16, %v10330_v17 }
 0x6b9   : > { %v6951_v60 = vadd.f32 %v15514_v2, %v6726_v11  ;;  %6813 = vmatprep.mubr.f32.mxu1 %v6454_v48  ;;  %v10338_v41 = vpop.permute.xlu1 %10337  ;;  %v10344_v6 = vunpack.i.l.bf16 %v10343_v49  ;;  %8342 = vmatmul.mubr.f32.vlgmr.msra.gmra.mrb[64].mxu0 %v7974_v37  ;;  %v10345_v7 = vunpack.i.h.bf16 %v10343_v49 }
 0x6ba   : > { %v10340_v34 = vunpack.i.h.bf16 %v10338_v41  ;;  %v10339_v24 = vunpack.i.l.bf16 %v10338_v41  ;;  %6814 = vmatmul.mubr.f32.gmra.mrb[62].mxu1 %v6358_v8 }
 0x6bb   : > { %vm7057_vm6 = vcmp.gt.f32.partialorder %v6951_v60, 0.0  ;;  %v7089_v40 = vmul.f32 0.01, %v6951_v60  ;;  %v8008_v13 = vsel %vm513_vm1, %v7239_v4, %v10344_v6  ;;  %v7976_v14 = vsel %vm513_vm1, %v7175_v53, %v10345_v7 }
 0x6bc   : > { %v8007_v2 = vsel %vm513_vm1, %v7238_v43, %v10339_v24  ;;  %v7975_v20 = vsel %vm513_vm1, %v7174_v0, %v10340_v34  ;;  %v7219_v43 = vld [vmem:[#allocation5 + $0xe5] sm:$0xff] }
 0x6bd   : > { %v7121_v47 = vsel %vm7057_vm6, %v6951_v60, %v7089_v40  ;;  %v10348_v57 = vpop.permute.xlu1 %10347  ;;  %8346 = vmatprep.mubr.f32.mxu0 %v8007_v2  ;;  %v7243_v34 = vld [vmem:[#allocation5 + $0x6a] sm:$0xff]  ;;  %v7179_v24 = vld [vmem:[#allocation5 + $0x60] sm:$0xff] }
 0x6be   : > { %7154 = vst.msk [vmem:[#allocation5 + $0x16d] sm:$0xff] %vm513_vm1, %v7121_v47  ;;  %v7281_v28 = vld [vmem:[#allocation5 + $0x160] sm:$0xff]  ;;  %v10349_v30 = vunpack.i.l.bf16 %v10348_v57  ;;  %8347 = vmatmul.mubr.f32.gmra.mrb[66].mxu0 %v7975_v20  ;;  %v10350_v62 = vunpack.i.h.bf16 %v10348_v57  ;;  %v7220_v2 = vld [vmem:[#allocation5 + $0xed] sm:$0xff] }
 0x6bf   : > { %v10391_v19 = vpack.i.bf16 %v7217_v23, %v7281_v28  ;;  %8351 = vmatprep.mubr.f32.mxu0 %v8008_v13  ;;  %v7244_v28 = vld [vmem:[#allocation5 + $0x72] sm:$0xff] }
 0x6c0   : > { %v8009_v15 = vsel %vm513_vm1, %v7240_v1, %v10349_v30  ;;  %v7977_v9 = vsel %vm513_vm1, %v7176_v10, %v10350_v62  ;;  %v7180_v30 = vld [vmem:[#allocation5 + $0x68] sm:$0xff] }
 0x6c1   : > { %10392 = vrot.lane.b32.xlu0 %v10391_v19, %s10684_s18 }
 0x6c2   : > { %8352 = vmatmul.mubr.f32.gmra.mrb[68].mxu0 %v7976_v14  ;;  %v10353_v3 = vpop.permute.xlu0 %10352 }
 0x6c3   : > { %8356 = vmatprep.mubr.f32.mxu0 %v8009_v15  ;;  %v10354_v27 = vunpack.i.l.bf16 %v10353_v3  ;;  %v10355_v58 = vunpack.i.h.bf16 %v10353_v3 }
 0x6c5   : > { %v7282_v46 = vld [vmem:[#allocation5 + $0x168] sm:$0xff]  ;;  %v15694_v22 = vpop.f32.mrb[54].mxu0  ;;  %v8010_v33 = vsel %vm513_vm1, %v7241_v55, %v10354_v27  ;;  %v7978_v32 = vsel %vm513_vm1, %v7177_v36, %v10355_v58 }
 0x6c6   : > { %v10396_v51 = vpack.i.bf16 %v7218_v52, %v7282_v46  ;;  %8357 = vmatmul.mubr.f32.gmra.mrb[70].mxu0 %v7977_v9  ;;  %v15697_v12 = vpop.f32.mrb[55].mxu0 }
 0x6c7   : > { %8361 = vmatprep.mubr.f32.mxu0 %v8010_v33 }
 0x6c8   : > { %10397 = vrot.lane.b32.xlu1 %v10396_v51, %s10684_s18 }
 0x6c9   : > { %v10358_v61 = vpop.permute.xlu1 %10357 }
 0x6ca   : > { %v10360_v5 = vunpack.i.h.bf16 %v10358_v61  ;;  %v10359_v59 = vunpack.i.l.bf16 %v10358_v61  ;;  %8362 = vmatmul.mubr.f32.gmra.mrb[72].mxu0 %v7978_v32 }
 0x6cb   : > { %v6730_v17 = vpop.f32.mrb[28].mxu1 }
 0x6cc   : > { %v6731_v42 = vadd.f32 %v15665_v63, %v6730_v17  ;;  %v6732_v11 = vpop.f32.mrb[29].mxu1  ;;  %v8011_v38 = vsel %vm513_vm1, %v7242_v25, %v10359_v59  ;;  %v7979_v21 = vsel %vm513_vm1, %v7178_v31, %v10360_v5  ;;  %v7245_v59 = vld [vmem:[#allocation5 + $0x8a] sm:$0xff]  ;;  %v7181_v17 = vld [vmem:[#allocation5 + $0x80] sm:$0xff] }
 0x6cd   : > { %8366 = vmatprep.mubr.f32.mxu0 %v8011_v38 }
 0x6ce   : > { %v6956_v26 = vadd.f32 %v15575_v35, %v6731_v42  ;;  %8367 = vmatmul.mubr.f32.gmra.mrb[74].mxu0 %v7979_v21 }
 0x6d0   : > { %vm7058_vm8 = vcmp.gt.f32.partialorder %v6956_v26, 0.0  ;;  %v7090_v16 = vmul.f32 0.01, %v6956_v26 }
 0x6d2   : > { %v7122_v37 = vsel %vm7058_vm8, %v6956_v26, %v7090_v16  ;;  %v6735_v60 = vpop.f32.mrb[30].mxu1 }
 0x6d3   : > { %7155 = vst.msk [vmem:[#allocation5 + $0x185] sm:$0xff] %vm513_vm1, %v7122_v37  ;;  %v6736_v48 = vadd.f32 %v15665_v63, %v6735_v60  ;;  %v6737_v49 = vpop.f32.mrb[31].mxu1 }
 0x6d4   : > { %v7246_v49 = vld [vmem:[#allocation5 + $0x92] sm:$0xff] }
 0x6d5   : > { %v6961_v8 = vadd.f32 %v15571_v56, %v6736_v48 }
 0x6d7   : > { %vm7059_vm5 = vcmp.gt.f32.partialorder %v6961_v8, 0.0  ;;  %v7091_v41 = vmul.f32 0.01, %v6961_v8 }
 0x6d9   : > { %v7123_v6 = vsel %vm7059_vm5, %v6961_v8, %v7091_v41  ;;  %v7182_v8 = vld [vmem:[#allocation5 + $0x88] sm:$0xff] }
 0x6da   : > { %v7283_v0 = vld [vmem:[#allocation5 + $0x180] sm:$0xff]  ;;  %7156 = vst.msk [vmem:[#allocation5 + $0x18d] sm:$0xff] %vm513_vm1, %v7123_v6 }
 0x6db   : > { %v10401_v35 = vpack.i.bf16 %v7219_v43, %v7283_v0  ;;  %v8134_v43 = vld [vmem:[%s16575_s7 + $0x100] sm:$0xff]  ;;  %v8135_v0 = vld [vmem:[%s16575_s7 + $0x108] sm:$0xff] }
 0x6dd   : > { %10402 = vrot.lane.b32.xlu0 %v10401_v35, %s10684_s18  ;;  %v9654_v35 = vpack.c.bf16 %v8135_v0, %v8134_v43 }
 0x6de   : > { %v10363_v40 = vpop.permute.xlu0 %10362 }
 0x6df   : > { %v10365_v4 = vunpack.i.h.bf16 %v10363_v40  ;;  %v10364_v47 = vunpack.i.l.bf16 %v10363_v40  ;;  %9733 = vmatpush1.bf16.msra.mxu1 %v9654_v35  ;;  %9655 = vmatpush1.bf16.msra.mxu0 %v9654_v35 }
 0x6e0   : > { %9718 = vmatprep.subr.bf16.mxu1 %v10682_v54  ;;  %9656 = vmatprep.subr.bf16.mxu0 %v10682_v54 }
 0x6e1   : > { %v7284_v20 = vld [vmem:[#allocation5 + $0x188] sm:$0xff]  ;;  %v8012_v7 = vsel %vm513_vm1, %v7243_v34, %v10364_v47  ;;  %v7980_v56 = vsel %vm513_vm1, %v7179_v24, %v10365_v4 }
 0x6e2   : > { %v10411_v57 = vpack.i.bf16 %v7220_v2, %v7284_v20  ;;  %8371 = vmatprep.mubr.f32.mxu0 %v8012_v7 }
 0x6e3   : > { %8372 = vmatmul.mubr.f32.gmra.mrb[76].mxu0 %v7980_v56  ;;  %v8136_v56 = vld [vmem:[%s16575_s7 + $0x110] sm:$0xff] }
 0x6e4   : > { %10412 = vrot.lane.b32.xlu0 %v10411_v57, %s10684_s18  ;;  %v8137_v57 = vld [vmem:[%s16575_s7 + $0x118] sm:$0xff] }
 0x6e5   : > { %v10368_v23 = vpop.permute.xlu1 %10367 }
 0x6e6   : > { %v10370_v13 = vunpack.i.h.bf16 %v10368_v23  ;;  %v10369_v19 = vunpack.i.l.bf16 %v10368_v23 }
 0x6e7   : > { %v6740_v53 = vpop.f32.mrb[32].mxu1  ;;  %v15714_v14 = vpop.f32.mrb[56].mxu0 }
 0x6e8   : > { %v6741_v1 = vadd.f32 %v15665_v63, %v6740_v53  ;;  %v6742_v62 = vpop.f32.mrb[33].mxu1  ;;  %v8013_v15 = vsel %vm513_vm1, %v7244_v28, %v10369_v19  ;;  %v7981_v10 = vsel %vm513_vm1, %v7180_v30, %v10370_v13  ;;  %v15718_v3 = vpop.f32.mrb[57].mxu0  ;;  %v9657_v30 = vpack.c.bf16 %v8137_v57, %v8136_v56  ;;  %v8146_v57 = vld [vmem:[%s16575_s7 + $0x160] sm:$0xff] }
 0x6e9   : > { %8376 = vmatprep.mubr.f32.mxu0 %v8013_v15  ;;  %v7223_v15 = vld [vmem:[#allocation5 + $0x125] sm:$0xff] }
 0x6ea   : > { %v6966_v55 = vadd.f32 %v15593_v44, %v6741_v1  ;;  %8377 = vmatmul.mubr.f32.gmra.mrb[78].mxu0 %v7981_v10  ;;  %v7221_v44 = vld [vmem:[#allocation5 + $0x105] sm:$0xff]  ;;  %9734 = vmatpush1.bf16.msra.mxu1 %v9657_v30 }
 0x6eb   : > { %9658 = vmatpush1.bf16.msra.mxu0 %v9657_v30  ;;  %9719 = vmatprep.subr.bf16.mxu1 %v10682_v54 }
 0x6ec   : > { %vm7060_vm7 = vcmp.gt.f32.partialorder %v6966_v55, 0.0  ;;  %v7092_v27 = vmul.f32 0.01, %v6966_v55  ;;  %9659 = vmatprep.subr.bf16.mxu0 %v10682_v54 }
 0x6ee   : > { %v7124_v52 = vsel %vm7060_vm7, %v6966_v55, %v7092_v27  ;;  %v6745_v46 = vpop.f32.mrb[34].mxu1  ;;  %v8139_v27 = vld [vmem:[%s16575_s7 + $0x128] sm:$0xff] }
 0x6ef   : > { %7157 = vst.msk [vmem:[#allocation5 + $0x1a5] sm:$0xff] %vm513_vm1, %v7124_v52  ;;  %v6746_v58 = vadd.f32 %v15665_v63, %v6745_v46  ;;  %v6747_v9 = vpop.f32.mrb[35].mxu1  ;;  %v8140_v52 = vld [vmem:[%s16575_s7 + $0x130] sm:$0xff] }
 0x6f1   : > { %v6971_v51 = vadd.f32 %v15591_v18, %v6746_v58  ;;  %v7222_v18 = vld [vmem:[#allocation5 + $0x10d] sm:$0xff] }
 0x6f2   : > { %v15724_v61 = vpop.f32.mrb[58].mxu0  ;;  %v8141_v58 = vld [vmem:[%s16575_s7 + $0x138] sm:$0xff] }
 0x6f3   : > { %vm7061_vm15 = vcmp.gt.f32.partialorder %v6971_v51, 0.0  ;;  %v7093_v33 = vmul.f32 0.01, %v6971_v51  ;;  %v15727_v25 = vpop.f32.mrb[59].mxu0 }
 0x6f5   : > { %v7125_v36 = vsel %vm7061_vm15, %v6971_v51, %v7093_v33 }
 0x6f6   : > { %7158 = vst.msk [vmem:[#allocation5 + $0x1ad] sm:$0xff] %vm513_vm1, %v7125_v36  ;;  %v7285_v32 = vld [vmem:[#allocation5 + $0x1a0] sm:$0xff]  ;;  %v15730_v21 = vpop.f32.mrb[60].mxu0  ;;  %v7224_v36 = vld [vmem:[#allocation5 + $0x12d] sm:$0xff] }
 0x6f7   : > { %v10421_v31 = vpack.i.bf16 %v7221_v44, %v7285_v32  ;;  %v15734_v60 = vpop.f32.mrb[61].mxu0  ;;  %v7183_v32 = vld [vmem:[#allocation5 + $0xa0] sm:$0xff] }
 0x6f9   : > { %10422 = vrot.lane.b32.xlu0 %v10421_v31, %s10684_s18  ;;  %v9663_v31 = vpack.c.bf16 %v8141_v58, %v8140_v52 }
 0x6fa   : > { %v10373_v5 = vpop.permute.xlu0 %10372 }
 0x6fb   : > { %v10375_v42 = vunpack.i.h.bf16 %v10373_v5  ;;  %v10374_v11 = vunpack.i.l.bf16 %v10373_v5  ;;  %v15778_v5 = vld [vmem:[#allocation5 + $0xaa] sm:$0xff] }
 0x6fd   : > { %v7286_v38 = vld [vmem:[#allocation5 + $0x1a8] sm:$0xff]  ;;  %v8014_v26 = vsel %vm513_vm1, %v7245_v59, %v10374_v11  ;;  %v7982_v16 = vsel %vm513_vm1, %v7181_v17, %v10375_v42  ;;  %v8142_v17 = vld [vmem:[%s16575_s7 + $0x140] sm:$0xff]  ;;  %v8143_v42 = vld [vmem:[%s16575_s7 + $0x148] sm:$0xff] }
 0x6fe   : > { %v10431_v37 = vpack.i.bf16 %v7222_v18, %v7286_v38  ;;  %8381 = vmatprep.mubr.f32.mxu0 %v8014_v26  ;;  %v9666_v38 = vpack.c.bf16 %v8143_v42, %v8142_v17  ;;  %v8150_v17 = vld [vmem:[%s16575_s7 + $0x180] sm:$0xff]  ;;  %v8151_v42 = vld [vmem:[%s16575_s7 + $0x188] sm:$0xff] }
 0x6ff   : > { %8382 = vmatmul.mubr.f32.gmra.mrb[80].mxu0 %v7982_v16 }
 0x700   : > { %10432 = vrot.lane.b32.xlu0 %v10431_v37, %s10684_s18 }
 0x701   : > { %v10378_v48 = vpop.permute.xlu1 %10377 }
 0x702   : > { %v10380_v41 = vunpack.i.h.bf16 %v10378_v48  ;;  %v10379_v6 = vunpack.i.l.bf16 %v10378_v48  ;;  %v15794_v48 = vld [vmem:[#allocation5 + $0xb2] sm:$0xff] }
 0x704   : > { %v6750_v40 = vpop.f32.mrb[36].mxu1  ;;  %v8015_v34 = vsel %vm513_vm1, %v7246_v49, %v10379_v6  ;;  %v7983_v24 = vsel %vm513_vm1, %v7182_v8, %v10380_v41  ;;  %v7184_v49 = vld [vmem:[#allocation5 + $0xa8] sm:$0xff] }
 0x705   : > { %v6751_v4 = vadd.f32 %v15665_v63, %v6750_v40  ;;  %v6752_v47 = vpop.f32.mrb[37].mxu1  ;;  %8386 = vmatprep.mubr.f32.mxu0 %v8015_v34  ;;  %v8144_v34 = vld [vmem:[%s16575_s7 + $0x150] sm:$0xff] }
 0x706   : > { %8387 = vmatmul.mubr.f32.gmra.mrb[82].mxu0 %v7983_v24  ;;  %v15758_v19 = vpop.f32.mrb[62].mxu0  ;;  %v8145_v24 = vld [vmem:[%s16575_s7 + $0x158] sm:$0xff] }
 0x707   : > { %v6976_v2 = vadd.f32 %v15611_v50, %v6751_v4  ;;  %v15760_v53 = vpop.f32.mrb[63].mxu0  ;;  %v9669_v47 = vpack.c.bf16 %v8145_v24, %v8144_v34 }
 0x709   : > { %vm7062_vm0 = vcmp.gt.f32.partialorder %v6976_v2, 0.0  ;;  %v7094_v20 = vmul.f32 0.01, %v6976_v2 }
 0x70a   : > { %v6755_v7 = vpop.f32.mrb[38].mxu1 }
 0x70b   : > { %v6756_v23 = vadd.f32 %v15665_v63, %v6755_v7  ;;  %v6757_v28 = vpop.f32.mrb[39].mxu1  ;;  %v7126_v13 = vsel %vm7062_vm0, %v6976_v2, %v7094_v20 }
 0x70c   : > { %7159 = vst.msk [vmem:[#allocation5 + $0x1c5] sm:$0xff] %vm513_vm1, %v7126_v13 }
 0x70d   : > { %v6981_v50 = vadd.f32 %v15609_v45, %v6756_v23  ;;  %v8138_v45 = vld [vmem:[%s16575_s7 + $0x120] sm:$0xff]  ;;  %v8147_v23 = vld [vmem:[%s16575_s7 + $0x168] sm:$0xff] }
 0x70e   : > { %v9660_v46 = vpack.c.bf16 %v8139_v27, %v8138_v45  ;;  %v9672_v28 = vpack.c.bf16 %v8147_v23, %v8146_v57  ;;  %v15833_v45 = vld [vmem:[#allocation5 + $0xca] sm:$0xff]  ;;  %v7185_v27 = vld [vmem:[#allocation5 + $0xc0] sm:$0xff] }
 0x70f   : > { %vm7063_vm3 = vcmp.gt.f32.partialorder %v6981_v50, 0.0  ;;  %v7095_v1 = vmul.f32 0.01, %v6981_v50  ;;  %v7187_v57 = vld [vmem:[#allocation5 + $0xe0] sm:$0xff] }
 0x710   : > { %9735 = vmatpush1.bf16.msra.mxu1 %v9660_v46  ;;  %9661 = vmatpush1.bf16.msra.mxu0 %v9660_v46  ;;  %v15881_v23 = vld [vmem:[#allocation5 + $0x165] sm:$0xff] }
 0x711   : > { %v7127_v62 = vsel %vm7063_vm3, %v6981_v50, %v7095_v1  ;;  %9720 = vmatprep.subr.bf16.mxu1 %v10682_v54  ;;  %9662 = vmatprep.subr.bf16.mxu0 %v10682_v54 }
 0x712   : > { %7160 = vst.msk [vmem:[#allocation5 + $0x1cd] sm:$0xff] %vm513_vm1, %v7127_v62 }
 0x713   : > { %v7287_v10 = vld [vmem:[#allocation5 + $0x1c0] sm:$0xff] }
 0x714   : > { %v10441_v55 = vpack.i.bf16 %v7223_v15, %v7287_v10  ;;  %9736 = vmatpush1.bf16.msra.mxu1 %v9663_v31  ;;  %9664 = vmatpush1.bf16.msra.mxu0 %v9663_v31  ;;  %v8148_v10 = vld [vmem:[%s16575_s7 + $0x170] sm:$0xff]  ;;  %v15844_v31 = vld [vmem:[#allocation5 + $0xd2] sm:$0xff] }
 0x715   : > { %9721 = vmatprep.subr.bf16.mxu1 %v10682_v54  ;;  %9665 = vmatprep.subr.bf16.mxu0 %v10682_v54 }
 0x716   : > { %10442 = vrot.lane.b32.xlu0 %v10441_v55, %s10684_s18  ;;  %v10383_v9 = vpop.permute.xlu0 %10382  ;;  %v8149_v55 = vld [vmem:[%s16575_s7 + $0x178] sm:$0xff] }
 0x717   : > { %v10385_v51 = vunpack.i.h.bf16 %v10383_v9  ;;  %v10384_v33 = vunpack.i.l.bf16 %v10383_v9  ;;  %v9675_v52 = vpack.c.bf16 %v8149_v55, %v8148_v10  ;;  %v15838_v9 = vld [vmem:[#allocation5 + $0x14d] sm:$0xff] }
 0x718   : > { %9737 = vmatpush1.bf16.msra.mxu1 %v9666_v38  ;;  %9667 = vmatpush1.bf16.msra.mxu0 %v9666_v38  ;;  %v9678_v38 = vpack.c.bf16 %v8151_v42, %v8150_v17  ;;  %v15894_v55 = vld [vmem:[#allocation5 + $0x16d] sm:$0xff] }
 0x719   : > { %v7288_v44 = vld [vmem:[#allocation5 + $0x1c8] sm:$0xff]  ;;  %v8016_v11 = vsel %vm513_vm1, %v15778_v5, %v10384_v33  ;;  %v7984_v18 = vsel %vm513_vm1, %v7183_v32, %v10385_v51  ;;  %9722 = vmatprep.subr.bf16.mxu1 %v10682_v54  ;;  %9668 = vmatprep.subr.bf16.mxu0 %v10682_v54 }
 0x71a   : > { %v10451_v59 = vpack.i.bf16 %v7224_v36, %v7288_v44  ;;  %8391 = vmatprep.mubr.f32.mxu0 %v8016_v11 }
 0x71b   : > { %8392 = vmatmul.mubr.f32.gmra.mrb[84].mxu0 %v7984_v18 }
 0x71c   : > { %10452 = vrot.lane.b32.xlu0 %v10451_v59, %s10684_s18  ;;  %9738 = vmatpush1.bf16.msra.mxu1 %v9669_v47  ;;  %v7186_v59 = vld [vmem:[#allocation5 + $0xc8] sm:$0xff] }
 0x71d   : > { %v10388_v26 = vpop.permute.xlu1 %10387  ;;  %9670 = vmatpush1.bf16.msra.mxu0 %v9669_v47  ;;  %9723 = vmatprep.subr.bf16.mxu1 %v10682_v54  ;;  %v8155_v47 = vld [vmem:[%s16575_s7 + $0x1a8] sm:$0xff] }
 0x71e   : > { %v10390_v16 = vunpack.i.h.bf16 %v10388_v26  ;;  %v10389_v37 = vunpack.i.l.bf16 %v10388_v26  ;;  %9671 = vmatprep.subr.bf16.mxu0 %v10682_v54 }
 0x720   : > { %v6760_v8 = vpop.f32.mrb[40].mxu1  ;;  %v8017_v41 = vsel %vm513_vm1, %v15794_v48, %v10389_v37  ;;  %v7985_v6 = vsel %vm513_vm1, %v7184_v49, %v10390_v16  ;;  %9739 = vmatpush1.bf16.msra.mxu1 %v9672_v28 }
 0x721   : > { %v6761_v43 = vadd.f32 %v15665_v63, %v6760_v8  ;;  %v6762_v0 = vpop.f32.mrb[41].mxu1  ;;  %8396 = vmatprep.mubr.f32.mxu0 %v8017_v41  ;;  %9673 = vmatpush1.bf16.msra.mxu0 %v9672_v28 }
 0x722   : > { %8397 = vmatmul.mubr.f32.gmra.mrb[86].mxu0 %v7985_v6  ;;  %9724 = vmatprep.subr.bf16.mxu1 %v10682_v54  ;;  %v8152_v6 = vld [vmem:[%s16575_s7 + $0x190] sm:$0xff] }
 0x723   : > { %v6986_v35 = vadd.f32 %v15653_v39, %v6761_v43  ;;  %9674 = vmatprep.subr.bf16.mxu0 %v10682_v54  ;;  %v8153_v43 = vld [vmem:[%s16575_s7 + $0x198] sm:$0xff] }
 0x724   : > { %9740 = vmatpush1.bf16.msra.mxu1 %v9675_v52 }
 0x725   : > { %vm7064_vm4 = vcmp.gt.f32.partialorder %v6986_v35, 0.0  ;;  %v7096_v40 = vmul.f32 0.01, %v6986_v35  ;;  %9725 = vmatprep.subr.bf16.mxu1 %v10682_v54  ;;  %9676 = vmatpush1.bf16.msra.mxu0 %v9675_v52 }
 0x726   : > { %9677 = vmatprep.subr.bf16.mxu0 %v10682_v54 }
 0x727   : > { %v6765_v4 = vpop.f32.mrb[42].mxu1  ;;  %v7128_v2 = vsel %vm7064_vm4, %v6986_v35, %v7096_v40  ;;  %v9681_v40 = vpack.c.bf16 %v8153_v43, %v8152_v6 }
 0x728   : > { %v6766_v20 = vadd.f32 %v15665_v63, %v6765_v4  ;;  %v6767_v7 = vpop.f32.mrb[43].mxu1  ;;  %7161 = vst.msk [vmem:[#allocation5 + $0x1e5] sm:$0xff] %vm513_vm1, %v7128_v2  ;;  %9741 = vmatpush1.bf16.msra.mxu1 %v9678_v38  ;;  %v8154_v4 = vld [vmem:[%s16575_s7 + $0x1a0] sm:$0xff] }
 0x729   : > { %9726 = vmatprep.subr.bf16.mxu1 %v10682_v54  ;;  %9679 = vmatpush1.bf16.msra.mxu0 %v9678_v38  ;;  %v9684_v2 = vpack.c.bf16 %v8155_v47, %v8154_v4  ;;  %v8160_v38 = vld [vmem:[%s16575_s7 + $0x1d0] sm:$0xff]  ;;  %v15932_v4 = vld [vmem:[#allocation5 + $0x10a] sm:$0xff] }
 0x72a   : > { %v6991_v39 = vadd.f32 %v15651_v29, %v6766_v20  ;;  %v15821_v29 = vld [vmem:[#allocation5 + $0x145] sm:$0xff]  ;;  %9680 = vmatprep.subr.bf16.mxu0 %v10682_v54 }
 0x72b   : > { %v7189_v47 = vld [vmem:[#allocation5 + $0x100] sm:$0xff] }
 0x72c   : > { %vm7065_vm9 = vcmp.gt.f32.partialorder %v6991_v39, 0.0  ;;  %v7097_v56 = vmul.f32 0.01, %v6991_v39  ;;  %9742 = vmatpush1.bf16.msra.mxu1 %v9681_v40 }
 0x72d   : > { %9682 = vmatpush1.bf16.msra.mxu0 %v9681_v40  ;;  %9727 = vmatprep.subr.bf16.mxu1 %v10682_v54 }
 0x72e   : > { %v7129_v30 = vsel %vm7065_vm9, %v6991_v39, %v7097_v56  ;;  %9683 = vmatprep.subr.bf16.mxu0 %v10682_v54  ;;  %v15877_v56 = vld [vmem:[#allocation5 + $0xea] sm:$0xff] }
 0x72f   : > { %7162 = vst.msk [vmem:[#allocation5 + $0x1ed] sm:$0xff] %vm513_vm1, %v7129_v30  ;;  %v7289_v13 = vld [vmem:[#allocation5 + $0x1e0] sm:$0xff] }
 0x730   : > { %v10461_v50 = vpack.i.bf16 %v15821_v29, %v7289_v13  ;;  %9743 = vmatpush1.bf16.msra.mxu1 %v9684_v2 }
 0x731   : > { %9685 = vmatpush1.bf16.msra.mxu0 %v9684_v2  ;;  %9728 = vmatprep.subr.bf16.mxu1 %v10682_v54 }
 0x732   : > { %10462 = vrot.lane.b32.xlu0 %v10461_v50, %s10684_s18  ;;  %9686 = vmatprep.subr.bf16.mxu0 %v10682_v54 }
 0x733   : > { %v10393_v1 = vpop.permute.xlu0 %10392 }
 0x734   : > { %v10395_v62 = vunpack.i.h.bf16 %v10393_v1  ;;  %v10394_v15 = vunpack.i.l.bf16 %v10393_v1  ;;  %v8156_v1 = vld [vmem:[%s16575_s7 + $0x1b0] sm:$0xff] }
 0x736   : > { %v8018_v46 = vsel %vm513_vm1, %v15833_v45, %v10394_v15  ;;  %v7986_v58 = vsel %vm513_vm1, %v7185_v27, %v10395_v62  ;;  %v7290_v51 = vld [vmem:[#allocation5 + $0x1e8] sm:$0xff] }
 0x737   : > { %8401 = vmatprep.mubr.f32.mxu0 %v8018_v46  ;;  %v10471_v33 = vpack.i.bf16 %v15838_v9, %v7290_v51  ;;  %v8157_v62 = vld [vmem:[%s16575_s7 + $0x1b8] sm:$0xff]  ;;  %v15899_v51 = vld [vmem:[#allocation5 + $0xf2] sm:$0xff] }
 0x738   : > { %8402 = vmatmul.mubr.f32.gmra.mrb[88].mxu0 %v7986_v58  ;;  %v9687_v15 = vpack.c.bf16 %v8157_v62, %v8156_v1 }
 0x739   : > { %10472 = vrot.lane.b32.xlu0 %v10471_v33, %s10684_s18  ;;  %v7188_v33 = vld [vmem:[#allocation5 + $0xe8] sm:$0xff] }
 0x73a   : > { %v10398_v36 = vpop.permute.xlu1 %10397  ;;  %9744 = vmatpush1.bf16.msra.mxu1 %v9687_v15  ;;  %9688 = vmatpush1.bf16.msra.mxu0 %v9687_v15 }
 0x73b   : > { %v10400_v44 = vunpack.i.h.bf16 %v10398_v36  ;;  %v10399_v32 = vunpack.i.l.bf16 %v10398_v36  ;;  %9729 = vmatprep.subr.bf16.mxu1 %v10682_v54  ;;  %9689 = vmatprep.subr.bf16.mxu0 %v10682_v54 }
 0x73d   : > { %v8019_v11 = vsel %vm513_vm1, %v15844_v31, %v10399_v32  ;;  %v7987_v18 = vsel %vm513_vm1, %v7186_v59, %v10400_v44  ;;  %v8158_v32 = vld [vmem:[%s16575_s7 + $0x1c0] sm:$0xff]  ;;  %v8159_v59 = vld [vmem:[%s16575_s7 + $0x1c8] sm:$0xff] }
 0x73e   : > { %8406 = vmatprep.mubr.f32.mxu0 %v8019_v11  ;;  %v9690_v17 = vpack.c.bf16 %v8159_v59, %v8158_v32 }
 0x73f   : > { %8407 = vmatmul.mubr.f32.gmra.mrb[90].mxu0 %v7987_v18 }
 0x740   : > { %v6770_v26 = vpop.f32.mrb[44].mxu1  ;;  %9745 = vmatpush1.bf16.msra.mxu1 %v9690_v17  ;;  %9691 = vmatpush1.bf16.msra.mxu0 %v9690_v17  ;;  %v15959_v17 = vld [vmem:[#allocation5 + $0x192] sm:$0xff] }
 0x741   : > { %v6771_v16 = vadd.f32 %v15665_v63, %v6770_v26  ;;  %v6772_v37 = vpop.f32.mrb[45].mxu1  ;;  %9730 = vmatprep.subr.bf16.mxu1 %v10682_v54  ;;  %9692 = vmatprep.subr.bf16.mxu0 %v10682_v54  ;;  %v8161_v26 = vld [vmem:[%s16575_s7 + $0x1d8] sm:$0xff] }
 0x742   : > { %v9693_v37 = vpack.c.bf16 %v8161_v26, %v8160_v38 }
 0x743   : > { %v6996_v49 = vadd.f32 %v15697_v12, %v6771_v16 }
 0x744   : > { %9746 = vmatpush1.bf16.msra.mxu1 %v9693_v37  ;;  %9694 = vmatpush1.bf16.msra.mxu0 %v9693_v37 }
 0x745   : > { %vm7066_vm10 = vcmp.gt.f32.partialorder %v6996_v49, 0.0  ;;  %v7098_v8 = vmul.f32 0.01, %v6996_v49  ;;  %9731 = vmatprep.subr.bf16.mxu1 %v10682_v54  ;;  %9695 = vmatprep.subr.bf16.mxu0 %v10682_v54 }
 0x747   : > { %v6775_v41 = vpop.f32.mrb[46].mxu1  ;;  %v7130_v34 = vsel %vm7066_vm10, %v6996_v49, %v7098_v8 }
 0x748   : > { %v6776_v0 = vadd.f32 %v15665_v63, %v6775_v41  ;;  %v6777_v35 = vpop.f32.mrb[47].mxu1  ;;  %7163 = vst.msk [vmem:[#allocation5 + $0x205] sm:$0xff] %vm513_vm1, %v7130_v34 }
 0x74a   : > { %v7001_v12 = vadd.f32 %v15694_v22, %v6776_v0  ;;  %v8163_v0 = vld [vmem:[%s16575_s7 + $0x1e8] sm:$0xff] }
 0x74c   : > { %vm7067_vm11 = vcmp.gt.f32.partialorder %v7001_v12, 0.0  ;;  %v7099_v24 = vmul.f32 0.01, %v7001_v12 }
 0x74e   : > { %v7131_v20 = vsel %vm7067_vm11, %v7001_v12, %v7099_v24 }
 0x74f   : > { %v10403_v7 = vpop.permute.xlu0 %10402  ;;  %7164 = vst.msk [vmem:[#allocation5 + $0x20d] sm:$0xff] %vm513_vm1, %v7131_v20  ;;  %v7291_v28 = vld [vmem:[#allocation5 + $0x200] sm:$0xff] }
 0x750   : > { %v10405_v22 = vunpack.i.h.bf16 %v10403_v7  ;;  %v10404_v39 = vunpack.i.l.bf16 %v10403_v7  ;;  %v10481_v50 = vpack.i.bf16 %v15881_v23, %v7291_v28 }
 0x752   : > { %v8020_v30 = vsel %vm513_vm1, %v15877_v56, %v10404_v39  ;;  %v7988_v13 = vsel %vm513_vm1, %v7187_v57, %v10405_v22  ;;  %10482 = vrot.lane.b32.xlu0 %v10481_v50, %s10684_s18  ;;  %v8165_v39 = vld [vmem:[%s16575_s7 + $0x1f8] sm:$0xff] }
 0x753   : > { %8411 = vmatprep.mubr.f32.mxu0 %v8020_v30  ;;  %v15946_v50 = vld [vmem:[#allocation5 + $0x185] sm:$0xff] }
 0x754   : > { %8412 = vmatmul.mubr.f32.gmra.mrb[92].mxu0 %v7988_v13 }
 0x756   : > { %v10413_v10 = vpop.permute.xlu0 %10412  ;;  %v7292_v27 = vld [vmem:[#allocation5 + $0x208] sm:$0xff] }
 0x757   : > { %v10415_v52 = vunpack.i.h.bf16 %v10413_v10  ;;  %v10414_v46 = vunpack.i.l.bf16 %v10413_v10  ;;  %v10491_v58 = vpack.i.bf16 %v15894_v55, %v7292_v27 }
 0x759   : > { %10492 = vrot.lane.b32.xlu0 %v10491_v58, %s10684_s18  ;;  %v8021_v36 = vsel %vm513_vm1, %v15899_v51, %v10414_v46  ;;  %v7989_v44 = vsel %vm513_vm1, %v7188_v33, %v10415_v52  ;;  %v15952_v46 = vld [vmem:[#allocation5 + $0x112] sm:$0xff]  ;;  %v7190_v58 = vld [vmem:[#allocation5 + $0x108] sm:$0xff] }
 0x75a   : > { %8416 = vmatprep.mubr.f32.mxu0 %v8021_v36 }
 0x75b   : > { %8417 = vmatmul.mubr.f32.gmra.mrb[94].mxu0 %v7989_v44 }
 0x762   : > { %v6780_v42 = vpop.f32.mrb[48].mxu1 }
 0x763   : > { %v6781_v11 = vadd.f32 %v15665_v63, %v6780_v42  ;;  %v6782_v18 = vpop.f32.mrb[49].mxu1 }
 0x764   : > { %v15962_v18 = vld [vmem:[#allocation5 + $0x18d] sm:$0xff] }
 0x765   : > { %v7006_v16 = vadd.f32 %v15718_v3, %v6781_v11  ;;  %v8162_v3 = vld [vmem:[%s16575_s7 + $0x1e0] sm:$0xff] }
 0x766   : > { %v9696_v40 = vpack.c.bf16 %v8163_v0, %v8162_v3 }
 0x767   : > { %vm7068_vm12 = vcmp.gt.f32.partialorder %v7006_v16, 0.0  ;;  %v7100_v49 = vmul.f32 0.01, %v7006_v16 }
 0x768   : > { %9747 = vmatpush1.bf16.msra.mxu1 %v9696_v40  ;;  %9697 = vmatpush1.bf16.msra.mxu0 %v9696_v40 }
 0x769   : > { %v7132_v8 = vsel %vm7068_vm12, %v7006_v16, %v7100_v49  ;;  %v6785_v41 = vpop.f32.mrb[50].mxu1  ;;  %9732 = vmatprep.subr.bf16.mxu1 %v10682_v54  ;;  %9698 = vmatprep.subr.bf16.mxu0 %v10682_v54 }
 0x76a   : > { %7165 = vst.msk [vmem:[#allocation5 + $0x225] sm:$0xff] %vm513_vm1, %v7132_v8  ;;  %v6786_v6 = vadd.f32 %v15665_v63, %v6785_v41  ;;  %v6787_v43 = vpop.f32.mrb[51].mxu1 }
 0x76b   : > { %v10423_v35 = vpop.permute.xlu0 %10422  ;;  %v15974_v43 = vld [vmem:[#allocation5 + $0x1a5] sm:$0xff] }
 0x76c   : > { %v7011_v34 = vadd.f32 %v15714_v14, %v6786_v6  ;;  %v10425_v12 = vunpack.i.h.bf16 %v10423_v35  ;;  %v10424_v24 = vunpack.i.l.bf16 %v10423_v35  ;;  %v8164_v14 = vld [vmem:[%s16575_s7 + $0x1f0] sm:$0xff]  ;;  %v15972_v6 = vld [vmem:[#allocation5 + $0x1aa] sm:$0xff] }
 0x76d   : > { %v9699_v30 = vpack.c.bf16 %v8165_v39, %v8164_v14  ;;  %v15998_v14 = vld [vmem:[#allocation5 + $0x1b2] sm:$0xff] }
 0x76e   : > { %vm7069_vm13 = vcmp.gt.f32.partialorder %v7011_v34, 0.0  ;;  %v7101_v2 = vmul.f32 0.01, %v7011_v34  ;;  %v6790_v20 = vpop.f32.mrb[52].mxu1  ;;  %v8022_v7 = vsel %vm513_vm1, %v15932_v4, %v10424_v24  ;;  %v7990_v22 = vsel %vm513_vm1, %v7189_v47, %v10425_v12  ;;  %v8167_v12 = vld [vmem:[%s16575_s7 + $0x208] sm:$0xff] }
 0x76f   : > { %v6791_v57 = vadd.f32 %v15665_v63, %v6790_v20  ;;  %v6792_v28 = vpop.f32.mrb[53].mxu1  ;;  %8421 = vmatprep.mubr.f32.mxu0 %v8022_v7  ;;  %9748 = vmatpush1.bf16.msra.mxu1 %v9699_v30  ;;  %v10663_v20 = vld [vmem:[%s16574_s6] ss:$0 sm:$0xff] }
 0x770   : > { %v7133_v13 = vsel %vm7069_vm13, %v7011_v34, %v7101_v2  ;;  %8422 = vmatmul.mubr.f32.gmra.mrb[96].mxu0 %v7990_v22  ;;  %v16001_v28 = vld [vmem:[#allocation5 + $0x1ad] sm:$0xff] }
 0x771   : > { %v7293_v1 = vld [vmem:[#allocation5 + $0x220] sm:$0xff]  ;;  %7166 = vst.msk [vmem:[#allocation5 + $0x22d] sm:$0xff] %vm513_vm1, %v7133_v13  ;;  %v7016_v62 = vadd.f32 %v15727_v25, %v6791_v57  ;;  %9700 = vmatpush1.bf16.msra.mxu0 %v9699_v30 }
 0x772   : > { %v10501_v15 = vpack.i.bf16 %v15946_v50, %v7293_v1  ;;  %v10433_v10 = vpop.permute.xlu0 %10432 }
 0x773   : > { %vm7070_vm14 = vcmp.gt.f32.partialorder %v7016_v62, 0.0  ;;  %v7102_v54 = vmul.f32 0.01, %v7016_v62  ;;  %v10435_v27 = vunpack.i.h.bf16 %v10433_v10  ;;  %v10434_v52 = vunpack.i.l.bf16 %v10433_v10 }
 0x774   : > { %10502 = vrot.lane.b32.xlu0 %v10501_v15, %s10684_s18 }
 0x775   : > { %v7134_v33 = vsel %vm7070_vm14, %v7016_v62, %v7102_v54  ;;  %v6795_v36 = vpop.f32.mrb[54].mxu1  ;;  %v8023_v44 = vsel %vm513_vm1, %v15952_v46, %v10434_v52  ;;  %v7991_v25 = vsel %vm513_vm1, %v7190_v58, %v10435_v27  ;;  %v16010_v52 = vld [vmem:[#allocation5 + $0x1c5] sm:$0xff] }
 0x776   : > { %7167 = vst.msk [vmem:[#allocation5 + $0x245] sm:$0xff] %vm513_vm1, %v7134_v33  ;;  %v6796_v32 = vadd.f32 %v15665_v63, %v6795_v36  ;;  %v6797_v59 = vpop.f32.mrb[55].mxu1  ;;  %8426 = vmatprep.mubr.f32.mxu0 %v8023_v44  ;;  %v16014_v44 = vld [vmem:[#allocation5 + $0x1ca] sm:$0xff] }
 0x777   : > { %8427 = vmatmul.mubr.f32.gmra.mrb[98].mxu0 %v7991_v25  ;;  %v16018_v59 = vld [vmem:[#allocation5 + $0x12a] sm:$0xff] }
 0x778   : > { %v7021_v42 = vadd.f32 %v15724_v61, %v6796_v32  ;;  %v7413_v11 = vld [vmem:[#allocation5 + $0x22d] sm:$0xff] }
 0x779   : > { %v15964_v38 = vld [vmem:[#allocation5 + $0x228] sm:$0xff]  ;;  %v10406_v26 = vpack.i.bf16 %v15959_v17, %v7413_v11 }
 0x77a   : > { %v10511_v16 = vpack.i.bf16 %v15962_v18, %v15964_v38  ;;  %vm7071_vm6 = vcmp.gt.f32.partialorder %v7021_v42, 0.0  ;;  %v7103_v37 = vmul.f32 0.01, %v7021_v42  ;;  %v6800_v49 = vpop.f32.mrb[56].mxu1 }
 0x77b   : > { %v6801_v8 = vadd.f32 %v15665_v63, %v6800_v49  ;;  %v6802_v41 = vpop.f32.mrb[57].mxu1  ;;  %10407 = vrot.lane.b32.xlu1 %v10406_v26, %s10684_s18  ;;  %v8166_v63 = vld [vmem:[%s16575_s7 + $0x200] sm:$0xff]  ;;  %v7191_v26 = vld [vmem:[#allocation5 + $0x120] sm:$0xff] }
 0x77c   : > { %10512 = vrot.lane.b32.xlu0 %v10511_v16, %s10684_s18  ;;  %v7135_v61 = vsel %vm7071_vm6, %v7021_v42, %v7103_v37  ;;  %v15989_v47 = vpack.c.bf16 %v8167_v12, %v8166_v63  ;;  %v7192_v12 = vld [vmem:[#allocation5 + $0x128] sm:$0xff] }
 0x77d   : > { %7168 = vst.msk [vmem:[#allocation5 + $0x24d] sm:$0xff] %vm513_vm1, %v7135_v61  ;;  %v7026_v3 = vadd.f32 %v15734_v60, %v6801_v8  ;;  %v7414_v0 = vld [vmem:[#allocation5 + $0x245] sm:$0xff] }
 0x77e   : > { %v15978_v35 = vld [vmem:[#allocation5 + $0x240] sm:$0xff]  ;;  %v10416_v40 = vpack.i.bf16 %v15972_v6, %v7414_v0  ;;  %9702 = vmatprep.subr.bf16.mxu1 %v15989_v47 }
 0x77f   : > { %v10521_v34 = vpack.i.bf16 %v15974_v43, %v15978_v35  ;;  %vm7072_vm8 = vcmp.gt.f32.partialorder %v7026_v3, 0.0  ;;  %v7104_v24 = vmul.f32 0.01, %v7026_v3 }
 0x780   : > { %10417 = vrot.lane.b32.xlu1 %v10416_v40, %s10684_s18  ;;  %v16029_v40 = vld [vmem:[#allocation5 + $0x132] sm:$0xff] }
 0x781   : > { %10522 = vrot.lane.b32.xlu0 %v10521_v34, %s10684_s18  ;;  %v7136_v60 = vsel %vm7072_vm8, %v7026_v3, %v7104_v24  ;;  %v6805_v2 = vpop.f32.mrb[58].mxu1  ;;  %v16031_v34 = vld [vmem:[#allocation5 + $0x1d2] sm:$0xff] }
 0x782   : > { %7169 = vst.msk [vmem:[#allocation5 + $0x265] sm:$0xff] %vm513_vm1, %v7136_v60  ;;  %v6806_v7 = vadd.f32 %v10663_v20, %v6805_v2  ;;  %v6807_v22 = vpop.f32.mrb[59].mxu1 }
 0x784   : > { %v7031_v39 = vadd.f32 %v15730_v21, %v6806_v7  ;;  %v7415_v57 = vld [vmem:[#allocation5 + $0x24d] sm:$0xff] }
 0x785   : > { %v16003_v30 = vld [vmem:[#allocation5 + $0x248] sm:$0xff]  ;;  %v10426_v13 = vpack.i.bf16 %v15998_v14, %v7415_v57 }
 0x786   : > { %v10531_v1 = vpack.i.bf16 %v16001_v28, %v16003_v30  ;;  %vm7073_vm5 = vcmp.gt.f32.partialorder %v7031_v39, 0.0  ;;  %v7105_v62 = vmul.f32 0.01, %v7031_v39  ;;  %v6810_v15 = vpop.f32.mrb[60].mxu1  ;;  %v16038_v7 = vld [vmem:[#allocation5 + $0x1cd] sm:$0xff] }
 0x787   : > { %v6811_v10 = vadd.f32 %v10663_v20, %v6810_v15  ;;  %v6812_v54 = vpop.f32.mrb[61].mxu1  ;;  %10427 = vrot.lane.b32.xlu1 %v10426_v13, %s10684_s18 }
 0x788   : > { %10532 = vrot.lane.b32.xlu0 %v10531_v1, %s10684_s18  ;;  %v7137_v21 = vsel %vm7073_vm5, %v7031_v39, %v7105_v62  ;;  %v10443_v27 = vpop.permute.xlu0 %10442  ;;  %v16049_v1 = vld [vmem:[#allocation5 + $0x1e5] sm:$0xff] }
 0x789   : > { %7170 = vst.msk [vmem:[#allocation5 + $0x26d] sm:$0xff] %vm513_vm1, %v7137_v21  ;;  %v10445_v58 = vunpack.i.h.bf16 %v10443_v27  ;;  %v10444_v33 = vunpack.i.l.bf16 %v10443_v27  ;;  %v7036_v36 = vadd.f32 %v15760_v53, %v6811_v10  ;;  %v7416_v25 = vld [vmem:[#allocation5 + $0x265] sm:$0xff]  ;;  %v16064_v27 = vld [vmem:[#allocation5 + $0x1f2] sm:$0xff] }
 0x78a   : > { %v16016_v32 = vld [vmem:[#allocation5 + $0x260] sm:$0xff]  ;;  %v10436_v42 = vpack.i.bf16 %v16014_v44, %v7416_v25  ;;  %v16052_v62 = vld [vmem:[#allocation5 + $0x1ea] sm:$0xff] }
 0x78b   : > { %v10541_v11 = vpack.i.bf16 %v16010_v52, %v16016_v32  ;;  %vm7074_vm7 = vcmp.gt.f32.partialorder %v7036_v36, 0.0  ;;  %v7106_v16 = vmul.f32 0.01, %v7036_v36  ;;  %v8024_v37 = vsel %vm513_vm1, %v16018_v59, %v10444_v33  ;;  %v16068_v33 = vld [vmem:[#allocation5 + $0x1ed] sm:$0xff] }
 0x78c   : > { %v7992_v53 = vsel %vm513_vm1, %v7191_v26, %v10445_v58  ;;  %8431 = vmatprep.mubr.f32.mxu0 %v8024_v37  ;;  %10437 = vrot.lane.b32.xlu1 %v10436_v42, %s10684_s18  ;;  %v7420_v26 = vld [vmem:[#allocation5 + $0x2a5] sm:$0xff]  ;;  %v10581_v37 = vpack.i.bf16 %v15794_v48, %v15838_v9 }
 0x78d   : > { %v7138_v49 = vsel %vm7074_vm7, %v7036_v36, %v7106_v16  ;;  %10542 = vrot.lane.b32.xlu0 %v10541_v11, %s10684_s18  ;;  %8432 = vmatmul.mubr.f32.gmra.mrb[100].mxu0 %v7992_v53  ;;  %v6815_v8 = vpop.f32.mrb[62].mxu1  ;;  %v7355_v11 = vld [vmem:[#allocation5 + $0x20a] sm:$0xff]  ;;  %v7356_v53 = vld [vmem:[#allocation5 + $0x212] sm:$0xff] }
 0x78e   : > { %v10453_v41 = vpop.permute.xlu0 %10452  ;;  %7171 = vst.msk [vmem:[#allocation5 + $0x285] sm:$0xff] %vm513_vm1, %v7138_v49  ;;  %v6816_v61 = vadd.f32 %v10663_v20, %v6815_v8  ;;  %v6817_v3 = vpop.f32.mrb[63].mxu1  ;;  %v10476_v16 = vpack.i.bf16 %v7355_v11, %v7420_v26  ;;  %v7421_v49 = vld [vmem:[#allocation5 + $0x2ad] sm:$0xff] }
 0x78f   : > { %v10455_v0 = vunpack.i.h.bf16 %v10453_v41  ;;  %v10454_v63 = vunpack.i.l.bf16 %v10453_v41  ;;  %v10486_v3 = vpack.i.bf16 %v7356_v53, %v7421_v49  ;;  %v7359_v26 = vld [vmem:[#allocation5 + $0x24a] sm:$0xff]  ;;  %v10621_v53 = vpack.i.bf16 %v16029_v40, %v16038_v7  ;;  %v7360_v49 = vld [vmem:[#allocation5 + $0x252] sm:$0xff] }
 0x790   : > { %v7041_v24 = vadd.f32 %v15758_v19, %v6816_v61  ;;  %v16036_v2 = vld [vmem:[#allocation5 + $0x26d] sm:$0xff] }
 0x791   : > { %v8025_v60 = vsel %vm513_vm1, %v16029_v40, %v10454_v63  ;;  %v16040_v22 = vld [vmem:[#allocation5 + $0x268] sm:$0xff]  ;;  %v7993_v20 = vsel %vm513_vm1, %v7192_v12, %v10455_v0  ;;  %v10446_v39 = vpack.i.bf16 %v16031_v34, %v16036_v2  ;;  %v10591_v0 = vpack.i.bf16 %v15844_v31, %v15894_v55  ;;  %v16084_v63 = vld [vmem:[#allocation5 + $0x140] sm:$0xff] }
 0x792   : > { %8436 = vmatprep.mubr.f32.mxu0 %v8025_v60  ;;  %v10551_v57 = vpack.i.bf16 %v16038_v7, %v16040_v22  ;;  %vm7075_vm15 = vcmp.gt.f32.partialorder %v7041_v24, 0.0  ;;  %v7107_v19 = vmul.f32 0.01, %v7041_v24  ;;  %v16086_v12 = vld [vmem:[#allocation5 + $0x14a] sm:$0xff]  ;;  %v10601_v31 = vpack.i.bf16 %v15899_v51, %v15962_v18 }
 0x793   : > { %8437 = vmatmul.mubr.f32.gmra.mrb[102].mxu0 %v7993_v20  ;;  %10447 = vrot.lane.b32.xlu1 %v10446_v39, %s10684_s18  ;;  %v7422_v60 = vld [vmem:[#allocation5 + $0x2c5] sm:$0xff]  ;;  %v7358_v39 = vld [vmem:[#allocation5 + $0x232] sm:$0xff] }
 0x794   : > { %10552 = vrot.lane.b32.xlu0 %v10551_v57, %s10684_s18  ;;  %v7139_v13 = vsel %vm7075_vm15, %v7041_v24, %v7107_v19  ;;  %v7357_v24 = vld [vmem:[#allocation5 + $0x22a] sm:$0xff] }
 0x795   : > { %7172 = vst.msk [vmem:[#allocation5 + $0x28d] sm:$0xff] %vm513_vm1, %v7139_v13  ;;  %v16054_v15 = vld [vmem:[#allocation5 + $0x285] sm:$0xff]  ;;  %v10496_v20 = vpack.i.bf16 %v7357_v24, %v7422_v60  ;;  %v7423_v57 = vld [vmem:[#allocation5 + $0x2cd] sm:$0xff] }
 0x796   : > { %v16056_v10 = vld [vmem:[#allocation5 + $0x280] sm:$0xff]  ;;  %v10456_v54 = vpack.i.bf16 %v16052_v62, %v16054_v15  ;;  %v16120_v24 = vld [vmem:[#allocation5 + $0x172] sm:$0xff] }
 0x797   : > { %v10561_v21 = vpack.i.bf16 %v16049_v1, %v16056_v10 }
 0x798   : > { %10457 = vrot.lane.b32.xlu1 %v10456_v54, %s10684_s18  ;;  %v16098_v54 = vld [vmem:[#allocation5 + $0x152] sm:$0xff] }
 0x799   : > { %10562 = vrot.lane.b32.xlu0 %v10561_v21, %s10684_s18  ;;  %v16100_v21 = vld [vmem:[#allocation5 + $0x148] sm:$0xff] }
 0x79c   : > { %v16066_v58 = vld [vmem:[#allocation5 + $0x28d] sm:$0xff] }
 0x79d   : > { %v16070_v36 = vld [vmem:[#allocation5 + $0x288] sm:$0xff]  ;;  %v10466_v25 = vpack.i.bf16 %v16064_v27, %v16066_v58 }
 0x79e   : > { %v10571_v42 = vpack.i.bf16 %v16068_v33, %v16070_v36 }
 0x79f   : > { %10467 = vrot.lane.b32.xlu1 %v10466_v25, %s10684_s18  ;;  %v10506_v25 = vpack.i.bf16 %v7358_v39, %v7423_v57  ;;  %v7364_v57 = vld [vmem:[#allocation5 + $0x292] sm:$0xff] }
 0x7a0   : > { %10572 = vrot.lane.b32.xlu0 %v10571_v42, %s10684_s18  ;;  %v10611_v42 = vpack.i.bf16 %v15952_v46, %v16001_v28  ;;  %v7425_v46 = vld [vmem:[#allocation5 + $0x2ed] sm:$0xff] }
 0x7a3   : > { %10477 = vrot.lane.b32.xlu1 %v10476_v16, %s10684_s18  ;;  %v7424_v16 = vld [vmem:[#allocation5 + $0x2e5] sm:$0xff] }
 0x7a4   : > { %10582 = vrot.lane.b32.xlu0 %v10581_v37, %s10684_s18  ;;  %v10463_v8 = vpop.permute.xlu0 %10462  ;;  %v10516_v37 = vpack.i.bf16 %v7359_v26, %v7424_v16  ;;  %v16131_v26 = vld [vmem:[#allocation5 + $0x160] sm:$0xff] }
 0x7a5   : > { %v10465_v41 = vunpack.i.h.bf16 %v10463_v8  ;;  %v10464_v61 = vunpack.i.l.bf16 %v10463_v8  ;;  %v10526_v8 = vpack.i.bf16 %v7360_v49, %v7425_v46 }
 0x7a7   : > { %10487 = vrot.lane.b32.xlu1 %v10486_v3, %s10684_s18  ;;  %v8026_v48 = vsel %vm513_vm1, %v16086_v12, %v10464_v61  ;;  %v7994_v9 = vsel %vm513_vm1, %v16084_v63, %v10465_v41  ;;  %v10631_v41 = vpack.i.bf16 %v16098_v54, %v16068_v33  ;;  %v7361_v61 = vld [vmem:[#allocation5 + $0x26a] sm:$0xff] }
 0x7a8   : > { %10592 = vrot.lane.b32.xlu0 %v10591_v0, %s10684_s18  ;;  %8441 = vmatprep.mubr.f32.mxu0 %v8026_v48  ;;  %v7426_v3 = vld [vmem:[#allocation5 + $0x305] sm:$0xff]  ;;  %v16116_v0 = vld [vmem:[#allocation5 + $0x20d] sm:$0xff] }
 0x7a9   : > { %8442 = vmatmul.mubr.f32.gmra.mrb[104].mxu0 %v7994_v9  ;;  %v10536_v40 = vpack.i.bf16 %v7361_v61, %v7426_v3  ;;  %v10641_v60 = vpack.i.bf16 %v16120_v24, %v16116_v0  ;;  %v7362_v48 = vld [vmem:[#allocation5 + $0x272] sm:$0xff]  ;;  %v16142_v61 = vld [vmem:[#allocation5 + $0x168] sm:$0xff] }
 0x7aa   : > { %v7427_v9 = vld [vmem:[#allocation5 + $0x30d] sm:$0xff] }
 0x7ab   : > { %v10473_v55 = vpop.permute.xlu0 %10472  ;;  %10497 = vrot.lane.b32.xlu1 %v10496_v20, %s10684_s18  ;;  %v10546_v20 = vpack.i.bf16 %v7362_v48, %v7427_v9 }
 0x7ac   : > { %10602 = vrot.lane.b32.xlu0 %v10601_v31, %s10684_s18  ;;  %v10475_v19 = vunpack.i.h.bf16 %v10473_v55  ;;  %v10474_v13 = vunpack.i.l.bf16 %v10473_v55  ;;  %v7363_v31 = vld [vmem:[#allocation5 + $0x28a] sm:$0xff] }
 0x7ad   : > { %v7428_v55 = vld [vmem:[#allocation5 + $0x325] sm:$0xff] }
 0x7ae   : > { %v8027_v51 = vsel %vm513_vm1, %v16098_v54, %v10474_v13  ;;  %v7995_v11 = vsel %vm513_vm1, %v16100_v21, %v10475_v19  ;;  %v10556_v39 = vpack.i.bf16 %v7363_v31, %v7428_v55  ;;  %v7429_v19 = vld [vmem:[#allocation5 + $0x32d] sm:$0xff]  ;;  %v16173_v31 = vld [vmem:[#allocation5 + $0x180] sm:$0xff] }
 0x7af   : > { %8446 = vmatprep.mubr.f32.mxu0 %v8027_v51  ;;  %10507 = vrot.lane.b32.xlu1 %v10506_v25, %s10684_s18  ;;  %v10566_v13 = vpack.i.bf16 %v7364_v57, %v7429_v19  ;;  %v8168_v57 = vld [vmem:[%s16575_s7 + $0x210] sm:$0xff]  ;;  %v8169_v19 = vld [vmem:[%s16575_s7 + $0x218] sm:$0xff] }
 0x7b0   : > { %10612 = vrot.lane.b32.xlu0 %v10611_v42, %s10684_s18  ;;  %8447 = vmatmul.mubr.f32.gmra.mrb[106].mxu0 %v7995_v11  ;;  %v16129_v11 = vld [vmem:[#allocation5 + $0x16a] sm:$0xff] }
 0x7b3   : > { %10517 = vrot.lane.b32.xlu1 %v10516_v37, %s10684_s18 }
 0x7b4   : > { %10622 = vrot.lane.b32.xlu0 %v10621_v53, %s10684_s18  ;;  %v10576_v53 = vpack.i.bf16 %v15778_v5, %v15821_v29  ;;  %v10596_v5 = vpack.i.bf16 %v15877_v56, %v15946_v50  ;;  %v10606_v29 = vpack.i.bf16 %v15932_v4, %v15974_v43  ;;  %v16165_v50 = vld [vmem:[#allocation5 + $0x225] sm:$0xff] }
 0x7b5   : > { %v16168_v4 = vld [vmem:[#allocation5 + $0x18a] sm:$0xff] }
 0x7b7   : > { %10527 = vrot.lane.b32.xlu1 %v10526_v8, %s10684_s18 }
 0x7b8   : > { %10632 = vrot.lane.b32.xlu0 %v10631_v41, %s10684_s18  ;;  %v10586_v41 = vpack.i.bf16 %v15833_v45, %v15881_v23  ;;  %v10616_v45 = vpack.i.bf16 %v16018_v59, %v16010_v52  ;;  %v10626_v23 = vpack.i.bf16 %v16086_v12, %v16049_v1  ;;  %v10646_v59 = vpack.i.bf16 %v16168_v4, %v16165_v50 }
 0x7bb   : > { %10537 = vrot.lane.b32.xlu1 %v10536_v40, %s10684_s18 }
 0x7bc   : > { %10642 = vrot.lane.b32.xlu0 %v10641_v60, %s10684_s18  ;;  %v16160_v60 = vld [vmem:[#allocation5 + $0x205] sm:$0xff] }
 0x7bd   : > { %v10636_v56 = vpack.i.bf16 %v16129_v11, %v16160_v60 }
 0x7bf   : > { %10547 = vrot.lane.b32.xlu1 %v10546_v20, %s10684_s18 }
 0x7c3   : > { %10557 = vrot.lane.b32.xlu1 %v10556_v39, %s10684_s18 }
 0x7c4   : > { %v10483_v25 = vpop.permute.xlu0 %10482 }
 0x7c5   : > { %v10485_v42 = vunpack.i.h.bf16 %v10483_v25  ;;  %v10484_v51 = vunpack.i.l.bf16 %v10483_v25 }
 0x7c7   : > { %10567 = vrot.lane.b32.xlu1 %v10566_v13, %s10684_s18  ;;  %v8028_v16 = vsel %vm513_vm1, %v16129_v11, %v10484_v51  ;;  %v7996_v37 = vsel %vm513_vm1, %v16131_v26, %v10485_v42 }
 0x7c8   : > { %8451 = vmatprep.mubr.f32.mxu0 %v8028_v16 }
 0x7c9   : > { %8452 = vmatmul.mubr.f32.gmra.mrb[108].mxu0 %v7996_v37 }
 0x7cb   : > { %10577 = vrot.lane.b32.xlu1 %v10576_v53, %s10684_s18  ;;  %v10493_v49 = vpop.permute.xlu0 %10492  ;;  %v16185_v53 = vld [vmem:[#allocation5 + $0x188] sm:$0xff] }
 0x7cc   : > { %v10495_v46 = vunpack.i.h.bf16 %v10493_v49  ;;  %v10494_v8 = vunpack.i.l.bf16 %v10493_v49  ;;  %v9705_v49 = vpack.c.bf16 %v8169_v19, %v8168_v57 }
 0x7ce   : > { %v8029_v3 = vsel %vm513_vm1, %v16120_v24, %v10494_v8  ;;  %v7997_v40 = vsel %vm513_vm1, %v16142_v61, %v10495_v46 }
 0x7cf   : > { %10587 = vrot.lane.b32.xlu1 %v10586_v41, %s10684_s18  ;;  %8456 = vmatprep.mubr.f32.mxu0 %v8029_v3 }
 0x7d0   : > { %8457 = vmatmul.mubr.f32.gmra.mrb[110].mxu0 %v7997_v40  ;;  %v8170_v40 = vld [vmem:[%s16575_s7 + $0x220] sm:$0xff] }
 0x7d3   : > { %10597 = vrot.lane.b32.xlu1 %v10596_v5, %s10684_s18  ;;  %v8171_v5 = vld [vmem:[%s16575_s7 + $0x228] sm:$0xff] }
 0x7d7   : > { %10607 = vrot.lane.b32.xlu1 %v10606_v29, %s10684_s18 }
 0x7db   : > { %10617 = vrot.lane.b32.xlu1 %v10616_v45, %s10684_s18 }
 0x7df   : > { %10627 = vrot.lane.b32.xlu1 %v10626_v23, %s10684_s18 }
 0x7e3   : > { %10637 = vrot.lane.b32.xlu1 %v10636_v56, %s10684_s18  ;;  %v16202_v56 = vld [vmem:[#allocation5 + $0x1a0] sm:$0xff] }
 0x7e6   : > { %v10503_v48 = vpop.permute.xlu0 %10502 }
 0x7e7   : > { %v10505_v9 = vunpack.i.h.bf16 %v10503_v48  ;;  %v10504_v20 = vunpack.i.l.bf16 %v10503_v48  ;;  %10647 = vrot.lane.b32.xlu1 %v10646_v59, %s10684_s18  ;;  %v9709_v48 = vpack.c.bf16 %v8171_v5, %v8170_v40 }
 0x7e9   : > { %v8030_v55 = vsel %vm513_vm1, %v16168_v4, %v10504_v20  ;;  %v7998_v39 = vsel %vm513_vm1, %v16173_v31, %v10505_v9 }
 0x7ea   : > { %8461 = vmatprep.mubr.f32.mxu0 %v8030_v55 }
 0x7eb   : > { %8462 = vmatmul.mubr.f32.gmra.mrb[112].mxu0 %v7998_v39 }
 0x7ed   : > { %v10408_v13 = vpop.permute.xlu1 %10407 }
 0x7ee   : > { %v10513_v25 = vpop.permute.xlu0 %10512  ;;  %v10410_v42 = vunpack.i.h.bf16 %v10408_v13  ;;  %v10409_v51 = vunpack.i.l.bf16 %v10408_v13 }
 0x7ef   : > { %v10515_v16 = vunpack.i.h.bf16 %v10513_v25  ;;  %v10514_v37 = vunpack.i.l.bf16 %v10513_v25  ;;  %v16218_v25 = vld [vmem:[#allocation5 + $0x1a8] sm:$0xff] }
 0x7f0   : > { %v8085_v8 = vsel %vm513_vm1, %v15964_v38, %v10409_v51  ;;  %v8053_v41 = vsel %vm513_vm1, %v15962_v18, %v10410_v42 }
 0x7f1   : > { %v8031_v46 = vsel %vm513_vm1, %v15959_v17, %v10514_v37  ;;  %v7999_v3 = vsel %vm513_vm1, %v16185_v53, %v10515_v16  ;;  %8641 = vmatprep.mubr.f32.mxu1 %v8085_v8 }
 0x7f2   : > { %8466 = vmatprep.mubr.f32.mxu0 %v8031_v46  ;;  %v10418_v17 = vpop.permute.xlu1 %10417  ;;  %8642 = vmatmul.mubr.f32.vlgmr.msra.gmra.mrb[64].mxu1 %v8053_v41 }
 0x7f3   : > { %v10523_v29 = vpop.permute.xlu0 %10522  ;;  %8467 = vmatmul.mubr.f32.gmra.mrb[114].mxu0 %v7999_v3  ;;  %v10420_v38 = vunpack.i.h.bf16 %v10418_v17  ;;  %v10419_v45 = vunpack.i.l.bf16 %v10418_v17  ;;  %9704 = vmatpush3.bf16.msra.mxu1 %v15989_v47  ;;  %v8172_v47 = vld [vmem:[%s16575_s7 + $0x230] sm:$0xff] }
 0x7f4   : > { %v10525_v18 = vunpack.i.h.bf16 %v10523_v29  ;;  %v10524_v23 = vunpack.i.l.bf16 %v10523_v29  ;;  %9706 = vmatprep.subr.bf16.mxu1 %v9705_v49 }
 0x7f5   : > { %v8086_v9 = vsel %vm513_vm1, %v15978_v35, %v10419_v45  ;;  %v8054_v55 = vsel %vm513_vm1, %v15974_v43, %v10420_v38 }
 0x7f6   : > { %v8032_v59 = vsel %vm513_vm1, %v15972_v6, %v10524_v23  ;;  %v8000_v20 = vsel %vm513_vm1, %v16202_v56, %v10525_v18  ;;  %8646 = vmatprep.mubr.f32.mxu1 %v8086_v9  ;;  %v8173_v6 = vld [vmem:[%s16575_s7 + $0x238] sm:$0xff] }
 0x7f7   : > { %8471 = vmatprep.mubr.f32.mxu0 %v8032_v59  ;;  %8647 = vmatmul.mubr.f32.gmra.mrb[66].mxu1 %v8054_v55  ;;  %v9713_v42 = vpack.c.bf16 %v8173_v6, %v8172_v47  ;;  %v16238_v59 = vld [vmem:[#allocation5 + $0x1c8] sm:$0xff] }
 0x7f8   : > { %8472 = vmatmul.mubr.f32.gmra.mrb[116].mxu0 %v8000_v20  ;;  %9708 = vmatpush3.bf16.msra.mxu1 %v9705_v49 }
 0x7f9   : > { %v10428_v35 = vpop.permute.xlu1 %10427  ;;  %9710 = vmatprep.subr.bf16.mxu1 %v9709_v48 }
 0x7fa   : > { %v10533_v39 = vpop.permute.xlu0 %10532  ;;  %v10430_v57 = vunpack.i.h.bf16 %v10428_v35  ;;  %v10429_v19 = vunpack.i.l.bf16 %v10428_v35 }
 0x7fb   : > { %v10535_v13 = vunpack.i.h.bf16 %v10533_v39  ;;  %v10534_v43 = vunpack.i.l.bf16 %v10533_v39 }
 0x7fc   : > { %v8087_v16 = vsel %vm513_vm1, %v16003_v30, %v10429_v19  ;;  %v8055_v37 = vsel %vm513_vm1, %v16001_v28, %v10430_v57  ;;  %9712 = vmatpush3.bf16.msra.mxu1 %v9709_v48  ;;  %v16230_v28 = vld [vmem:[#allocation5 + $0x1c0] sm:$0xff] }
 0x7fd   : > { %v8033_v51 = vsel %vm513_vm1, %v15998_v14, %v10534_v43  ;;  %v8001_v49 = vsel %vm513_vm1, %v16218_v25, %v10535_v13  ;;  %8651 = vmatprep.mubr.f32.mxu1 %v8087_v16  ;;  %9714 = vmatprep.subr.bf16.mxu1 %v9713_v42 }
 0x7fe   : > { %8476 = vmatprep.mubr.f32.mxu0 %v8033_v51  ;;  %v10438_v46 = vpop.permute.xlu1 %10437  ;;  %8652 = vmatmul.mubr.f32.gmra.mrb[68].mxu1 %v8055_v37 }
 0x7ff   : > { %8477 = vmatmul.mubr.f32.gmra.mrb[118].mxu0 %v8001_v49  ;;  %v10440_v8 = vunpack.i.h.bf16 %v10438_v46  ;;  %v10439_v41 = vunpack.i.l.bf16 %v10438_v46  ;;  %v10543_v3 = vpop.permute.xlu0 %10542 }
 0x800   : > { %v10545_v14 = vunpack.i.h.bf16 %v10543_v3  ;;  %v10544_v40 = vunpack.i.l.bf16 %v10543_v3  ;;  %9716 = vmatpush3.bf16.msra.mxu1 %v9713_v42  ;;  %v7388_v3 = vld [vmem:[#allocation5 + $0x2a0] sm:$0xff] }
 0x801   : > { %v8088_v30 = vsel %vm513_vm1, %v16016_v32, %v10439_v41  ;;  %v8056_v5 = vsel %vm513_vm1, %v16010_v52, %v10440_v8 }
 0x802   : > { %v8034_v17 = vsel %vm513_vm1, %v16014_v44, %v10544_v40  ;;  %8656 = vmatprep.mubr.f32.mxu1 %v8088_v30  ;;  %v8002_v29 = vsel %vm513_vm1, %v16230_v28, %v10545_v14 }
 0x803   : > { %8481 = vmatprep.mubr.f32.mxu0 %v8034_v17  ;;  %8657 = vmatmul.mubr.f32.gmra.mrb[70].mxu1 %v8056_v5  ;;  %v7389_v5 = vld [vmem:[#allocation5 + $0x2a8] sm:$0xff] }
 0x804   : > { %8482 = vmatmul.mubr.f32.gmra.mrb[120].mxu0 %v8002_v29 }
 0x805   : > { %v10448_v38 = vpop.permute.xlu1 %10447 }
 0x806   : > { %v10553_v45 = vpop.permute.xlu0 %10552  ;;  %v10450_v18 = vunpack.i.h.bf16 %v10448_v38  ;;  %v10449_v23 = vunpack.i.l.bf16 %v10448_v38 }
 0x807   : > { %v10555_v32 = vunpack.i.h.bf16 %v10553_v45  ;;  %v10554_v48 = vunpack.i.l.bf16 %v10553_v45 }
 0x808   : > { %v8089_v44 = vsel %vm513_vm1, %v16040_v22, %v10449_v23  ;;  %v8057_v9 = vsel %vm513_vm1, %v16038_v7, %v10450_v18  ;;  %v7390_v18 = vld [vmem:[#allocation5 + $0x2c0] sm:$0xff] }
 0x809   : > { %v8035_v52 = vsel %vm513_vm1, %v16031_v34, %v10554_v48  ;;  %v8003_v20 = vsel %vm513_vm1, %v16238_v59, %v10555_v32  ;;  %8661 = vmatprep.mubr.f32.mxu1 %v8089_v44  ;;  %v16248_v34 = vld [vmem:[#allocation5 + $0x1e0] sm:$0xff]  ;;  %v7391_v44 = vld [vmem:[#allocation5 + $0x2c8] sm:$0xff] }
 0x80a   : > { %8486 = vmatprep.mubr.f32.mxu0 %v8035_v52  ;;  %v10458_v55 = vpop.permute.xlu1 %10457  ;;  %8662 = vmatmul.mubr.f32.gmra.mrb[72].mxu1 %v8057_v9 }
 0x80b   : > { %v10563_v47 = vpop.permute.xlu0 %10562  ;;  %8487 = vmatmul.mubr.f32.gmra.mrb[122].mxu0 %v8003_v20  ;;  %v10460_v6 = vunpack.i.h.bf16 %v10458_v55  ;;  %v10459_v35 = vunpack.i.l.bf16 %v10458_v55  ;;  %v7326_v55 = vld [vmem:[#allocation5 + $0x22d] sm:$0xff] }
 0x80c   : > { %v10565_v39 = vunpack.i.h.bf16 %v10563_v47  ;;  %v10564_v57 = vunpack.i.l.bf16 %v10563_v47 }
 0x80d   : > { %v8090_v7 = vsel %vm513_vm1, %v16056_v10, %v10459_v35  ;;  %v8058_v13 = vsel %vm513_vm1, %v16049_v1, %v10460_v6  ;;  %v7392_v35 = vld [vmem:[#allocation5 + $0x2e0] sm:$0xff] }
 0x80e   : > { %v8036_v22 = vsel %vm513_vm1, %v16052_v62, %v10564_v57  ;;  %v8004_v19 = vsel %vm513_vm1, %v16248_v34, %v10565_v39  ;;  %8666 = vmatprep.mubr.f32.mxu1 %v8090_v7  ;;  %v16258_v62 = vld [vmem:[#allocation5 + $0x1e8] sm:$0xff] }
 0x80f   : > { %8491 = vmatprep.mubr.f32.mxu0 %v8036_v22  ;;  %8667 = vmatmul.mubr.f32.gmra.mrb[74].mxu1 %v8058_v13  ;;  %v7327_v22 = vld [vmem:[#allocation5 + $0x245] sm:$0xff] }
 0x810   : > { %8492 = vmatmul.mubr.f32.gmra.mrb[124].mxu0 %v8004_v19  ;;  %v7393_v13 = vld [vmem:[#allocation5 + $0x2e8] sm:$0xff] }
 0x811   : > { %v10468_v43 = vpop.permute.xlu1 %10467 }
 0x812   : > { %v10573_v42 = vpop.permute.xlu0 %10572  ;;  %v10470_v51 = vunpack.i.h.bf16 %v10468_v43  ;;  %v10469_v16 = vunpack.i.l.bf16 %v10468_v43 }
 0x813   : > { %v10575_v37 = vunpack.i.h.bf16 %v10573_v42  ;;  %v10574_v49 = vunpack.i.l.bf16 %v10573_v42 }
 0x814   : > { %v8091_v10 = vsel %vm513_vm1, %v16070_v36, %v10469_v16  ;;  %v8059_v8 = vsel %vm513_vm1, %v16068_v33, %v10470_v51  ;;  %v7328_v51 = vld [vmem:[#allocation5 + $0x24d] sm:$0xff] }
 0x815   : > { %v8037_v46 = vsel %vm513_vm1, %v16064_v27, %v10574_v49  ;;  %v8005_v1 = vsel %vm513_vm1, %v16258_v62, %v10575_v37  ;;  %v10478_v41 = vpop.permute.xlu1 %10477  ;;  %8671 = vmatprep.mubr.f32.mxu1 %v8091_v10  ;;  %v7394_v10 = vld [vmem:[#allocation5 + $0x300] sm:$0xff] }
 0x816   : > { %8496 = vmatprep.mubr.f32.mxu0 %v8037_v46  ;;  %v10480_v14 = vunpack.i.h.bf16 %v10478_v41  ;;  %v10479_v40 = vunpack.i.l.bf16 %v10478_v41  ;;  %8672 = vmatmul.mubr.f32.gmra.mrb[76].mxu1 %v8059_v8 }
 0x817   : > { %8497 = vmatmul.mubr.f32.gmra.mrb[126].mxu0 %v8005_v1 }
 0x818   : > { %v8092_v30 = vsel %vm513_vm1, %v7388_v3, %v10479_v40  ;;  %v8060_v36 = vsel %vm513_vm1, %v16160_v60, %v10480_v14  ;;  %v7329_v3 = vld [vmem:[#allocation5 + $0x265] sm:$0xff] }
 0x819   : > { %v10488_v27 = vpop.permute.xlu1 %10487  ;;  %8676 = vmatprep.mubr.f32.mxu1 %v8092_v30 }
 0x81a   : > { %v10490_v17 = vunpack.i.h.bf16 %v10488_v27  ;;  %v10489_v29 = vunpack.i.l.bf16 %v10488_v27  ;;  %8677 = vmatmul.mubr.f32.gmra.mrb[78].mxu1 %v8060_v36  ;;  %v7395_v36 = vld [vmem:[#allocation5 + $0x308] sm:$0xff] }
 0x81c   : > { %v8093_v33 = vsel %vm513_vm1, %v7389_v5, %v10489_v29  ;;  %v8061_v38 = vsel %vm513_vm1, %v16116_v0, %v10490_v17 }
 0x81d   : > { %v10498_v45 = vpop.permute.xlu1 %10497  ;;  %8681 = vmatprep.mubr.f32.mxu1 %v8093_v33 }
 0x81e   : > { %v10500_v23 = vunpack.i.h.bf16 %v10498_v45  ;;  %v10499_v32 = vunpack.i.l.bf16 %v10498_v45  ;;  %8682 = vmatmul.mubr.f32.gmra.mrb[80].mxu1 %v8061_v38  ;;  %v7396_v38 = vld [vmem:[#allocation5 + $0x320] sm:$0xff] }
 0x820   : > { %v8094_v48 = vsel %vm513_vm1, %v7390_v18, %v10499_v32  ;;  %v8062_v60 = vsel %vm513_vm1, %v16165_v50, %v10500_v23 }
 0x821   : > { %v10508_v52 = vpop.permute.xlu1 %10507  ;;  %8686 = vmatprep.mubr.f32.mxu1 %v8094_v48 }
 0x822   : > { %v10510_v9 = vunpack.i.h.bf16 %v10508_v52  ;;  %v10509_v20 = vunpack.i.l.bf16 %v10508_v52  ;;  %8687 = vmatmul.mubr.f32.gmra.mrb[82].mxu1 %v8062_v60  ;;  %v7397_v60 = vld [vmem:[#allocation5 + $0x328] sm:$0xff] }
 0x824   : > { %v8095_v0 = vsel %vm513_vm1, %v7391_v44, %v10509_v20  ;;  %v8063_v47 = vsel %vm513_vm1, %v7326_v55, %v10510_v9  ;;  %v10583_v9 = vpop.permute.xlu0 %10582 }
 0x825   : > { %v10518_v6 = vpop.permute.xlu1 %10517  ;;  %8691 = vmatprep.mubr.f32.mxu1 %v8095_v0  ;;  %v10584_v0 = vunpack.i.l.bf16 %v10583_v9 }
 0x826   : > { %v10520_v39 = vunpack.i.h.bf16 %v10518_v6  ;;  %v10519_v57 = vunpack.i.l.bf16 %v10518_v6  ;;  %8692 = vmatmul.mubr.f32.gmra.mrb[84].mxu1 %v8063_v47 }
 0x828   : > { %v8096_v50 = vsel %vm513_vm1, %v7392_v35, %v10519_v57  ;;  %v8064_v7 = vsel %vm513_vm1, %v7327_v22, %v10520_v39  ;;  %v10585_v57 = vunpack.i.h.bf16 %v10583_v9 }
 0x829   : > { %v10528_v19 = vpop.permute.xlu1 %10527  ;;  %8696 = vmatprep.mubr.f32.mxu1 %v8096_v50 }
 0x82a   : > { %v10530_v43 = vunpack.i.h.bf16 %v10528_v19  ;;  %v10529_v42 = vunpack.i.l.bf16 %v10528_v19  ;;  %8697 = vmatmul.mubr.f32.gmra.mrb[86].mxu1 %v8064_v7  ;;  %v10593_v7 = vpop.permute.xlu0 %10592 }
 0x82c   : > { %v8097_v16 = vsel %vm513_vm1, %v7393_v13, %v10529_v42  ;;  %v8065_v37 = vsel %vm513_vm1, %v7328_v51, %v10530_v43  ;;  %v10594_v42 = vunpack.i.l.bf16 %v10593_v7  ;;  %v7303_v51 = vld [vmem:[#allocation5 + $0xc5] sm:$0xff] }
 0x82d   : > { %v10538_v49 = vpop.permute.xlu1 %10537  ;;  %8701 = vmatprep.mubr.f32.mxu1 %v8097_v16 }
 0x82e   : > { %v10540_v46 = vunpack.i.h.bf16 %v10538_v49  ;;  %v10539_v1 = vunpack.i.l.bf16 %v10538_v49  ;;  %v16283_v8 = vpop.f32.mrb[94].mxu0  ;;  %8702 = vmatmul.mubr.f32.gmra.mrb[88].mxu1 %v8065_v37  ;;  %v7435_v37 = vld [vmem:[#allocation5 + $0x192] sm:$0xff] }
 0x82f   : > { %v8420_v41 = vpop.f32.mrb[95].mxu0 }
 0x830   : > { %v8098_v14 = vsel %vm513_vm1, %v7394_v10, %v10539_v1  ;;  %v8066_v40 = vsel %vm513_vm1, %v7329_v3, %v10540_v46  ;;  %v10603_v46 = vpop.permute.xlu0 %10602 }
 0x831   : > { %v10548_v30 = vpop.permute.xlu1 %10547  ;;  %8706 = vmatprep.mubr.f32.mxu1 %v8098_v14  ;;  %v7437_v14 = vld [vmem:[#allocation5 + $0x1b2] sm:$0xff] }
 0x832   : > { %v10550_v27 = vunpack.i.h.bf16 %v10548_v30  ;;  %v10549_v5 = vunpack.i.l.bf16 %v10548_v30  ;;  %8707 = vmatmul.mubr.f32.gmra.mrb[90].mxu1 %v8066_v40  ;;  %v10604_v40 = vunpack.i.l.bf16 %v10603_v46 }
 0x834   : > { %v8099_v17 = vsel %vm513_vm1, %v7395_v36, %v10549_v5  ;;  %v8067_v29 = vsel %vm513_vm1, %v16036_v2, %v10550_v27  ;;  %v7438_v36 = vld [vmem:[#allocation5 + $0x1ca] sm:$0xff]  ;;  %v10605_v5 = vunpack.i.h.bf16 %v10603_v46 }
 0x835   : > { %v10558_v33 = vpop.permute.xlu1 %10557  ;;  %8711 = vmatprep.mubr.f32.mxu1 %v8099_v17  ;;  %v7305_v27 = vld [vmem:[#allocation5 + $0xe5] sm:$0xff] }
 0x836   : > { %v10560_v45 = vunpack.i.h.bf16 %v10558_v33  ;;  %v10559_v18 = vunpack.i.l.bf16 %v10558_v33  ;;  %8712 = vmatmul.mubr.f32.gmra.mrb[92].mxu1 %v8067_v29  ;;  %v7439_v29 = vld [vmem:[#allocation5 + $0x1d2] sm:$0xff] }
 0x838   : > { %v8100_v23 = vsel %vm513_vm1, %v7396_v38, %v10559_v18  ;;  %v8068_v32 = vsel %vm513_vm1, %v16054_v15, %v10560_v45  ;;  %v7301_v15 = vld [vmem:[#allocation5 + $0xa5] sm:$0xff]  ;;  %v8075_v38 = vsel %vm513_vm1, %v16185_v53, %v10604_v40  ;;  %v10613_v18 = vpop.permute.xlu0 %10612 }
 0x839   : > { %v10568_v48 = vpop.permute.xlu1 %10567  ;;  %8716 = vmatprep.mubr.f32.mxu1 %v8100_v23  ;;  %v7440_v45 = vld [vmem:[#allocation5 + $0x1ea] sm:$0xff] }
 0x83a   : > { %v10570_v52 = vunpack.i.h.bf16 %v10568_v48  ;;  %v10569_v44 = vunpack.i.l.bf16 %v10568_v48  ;;  %8717 = vmatmul.mubr.f32.gmra.mrb[94].mxu1 %v8068_v32  ;;  %v7441_v48 = vld [vmem:[#allocation5 + $0x1f2] sm:$0xff]  ;;  %v7307_v53 = vld [vmem:[#allocation5 + $0x105] sm:$0xff] }
 0x83c   : > { %v8101_v2 = vsel %vm513_vm1, %v7397_v60, %v10569_v44  ;;  %v8069_v20 = vsel %vm513_vm1, %v16066_v58, %v10570_v52  ;;  %v8071_v58 = vsel %vm513_vm1, %v16100_v21, %v10584_v0  ;;  %v10614_v60 = vunpack.i.l.bf16 %v10613_v18  ;;  %v7442_v44 = vld [vmem:[#allocation5 + $0x20a] sm:$0xff] }
 0x83d   : > { %v10578_v55 = vpop.permute.xlu1 %10577  ;;  %8721 = vmatprep.mubr.f32.mxu1 %v8101_v2  ;;  %v10615_v2 = vunpack.i.h.bf16 %v10613_v18 }
 0x83e   : > { %v10580_v47 = vunpack.i.h.bf16 %v10578_v55  ;;  %v10579_v6 = vunpack.i.l.bf16 %v10578_v55  ;;  %8722 = vmatmul.mubr.f32.gmra.mrb[96].mxu1 %v8069_v20  ;;  %v7443_v55 = vld [vmem:[#allocation5 + $0x212] sm:$0xff] }
 0x83f   : > { %9493 = vmatprep.mubr.msk.f32.mxu1 %vm513_vm1, %v16086_v12  ;;  %v7302_v12 = vld [vmem:[#allocation5 + $0xad] sm:$0xff] }
 0x840   : > { %v8070_v35 = vsel %vm513_vm1, %v16084_v63, %v10579_v6  ;;  %v8038_v39 = vsel %vm513_vm1, %v7301_v15, %v10580_v47  ;;  %v8039_v43 = vsel %vm513_vm1, %v7302_v12, %v10585_v57  ;;  %v8077_v47 = vsel %vm513_vm1, %v16218_v25, %v10614_v60  ;;  %v7444_v6 = vld [vmem:[#allocation5 + $0x22a] sm:$0xff]  ;;  %v10623_v15 = vpop.permute.xlu0 %10622  ;;  %v7445_v57 = vld [vmem:[#allocation5 + $0x232] sm:$0xff] }
 0x841   : > { %v10588_v22 = vpop.permute.xlu1 %10587  ;;  %8566 = vmatprep.mubr.f32.mxu0 %v8070_v35  ;;  %v10625_v12 = vunpack.i.h.bf16 %v10623_v15 }
 0x842   : > { %v10589_v50 = vunpack.i.l.bf16 %v10588_v22  ;;  %8567 = vmatmul.mubr.f32.vlgmr.msra.gmra.mrb[64].mxu0 %v8038_v39  ;;  %9494 = vmatmul.mubr.msk.f32.vlgmr.msra.gmra.mrb[98].mxu1 %vm513_vm1, %v16098_v54  ;;  %v10590_v13 = vunpack.i.h.bf16 %v10588_v22  ;;  %v10624_v22 = vunpack.i.l.bf16 %v10623_v15  ;;  %v7459_v15 = vld [vmem:[#allocation5 + $0x312] sm:$0xff] }
 0x843   : > { %v16305_v19 = vpop.f32.mrb[96].mxu0  ;;  %8571 = vmatprep.mubr.f32.mxu0 %v8071_v58  ;;  %9496 = vmatprep.mubr.msk.f32.mxu1 %vm513_vm1, %v16129_v11  ;;  %v10595_v11 = vunpack.i.h.bf16 %v10593_v7  ;;  %v7446_v58 = vld [vmem:[#allocation5 + $0x24a] sm:$0xff] }
 0x844   : > { %v8425_v63 = vpop.f32.mrb[97].mxu0  ;;  %v8072_v54 = vsel %vm513_vm1, %v16131_v26, %v10589_v50  ;;  %v8040_v16 = vsel %vm513_vm1, %v7303_v51, %v10590_v13  ;;  %v7436_v26 = vld [vmem:[#allocation5 + $0x1aa] sm:$0xff]  ;;  %v10633_v51 = vpop.permute.xlu0 %10632 }
 0x845   : > { %v10598_v21 = vpop.permute.xlu1 %10597  ;;  %v7309_v63 = vld [vmem:[#allocation5 + $0x125] sm:$0xff] }
 0x846   : > { %8572 = vmatmul.mubr.f32.gmra.mrb[66].mxu0 %v8039_v43  ;;  %9497 = vmatmul.mubr.msk.f32.gmra.mrb[100].mxu1 %vm513_vm1, %v16120_v24  ;;  %v10599_v49 = vunpack.i.l.bf16 %v10598_v21  ;;  %v8073_v24 = vsel %vm513_vm1, %v16142_v61, %v10594_v42  ;;  %v10600_v41 = vunpack.i.h.bf16 %v10598_v21  ;;  %v7447_v42 = vld [vmem:[#allocation5 + $0x252] sm:$0xff]  ;;  %v7448_v21 = vld [vmem:[#allocation5 + $0x26a] sm:$0xff] }
 0x847   : > { %8576 = vmatprep.mubr.f32.mxu0 %v8072_v54  ;;  %9499 = vmatprep.mubr.msk.f32.mxu1 %vm513_vm1, %v16168_v4  ;;  %v7304_v4 = vld [vmem:[#allocation5 + $0xcd] sm:$0xff] }
 0x848   : > { %v8041_v3 = vsel %vm513_vm1, %v7304_v4, %v10595_v11  ;;  %v8074_v30 = vsel %vm513_vm1, %v16173_v31, %v10599_v49  ;;  %v8042_v17 = vsel %vm513_vm1, %v7305_v27, %v10600_v41  ;;  %v7306_v31 = vld [vmem:[#allocation5 + $0xed] sm:$0xff]  ;;  %v7311_v41 = vld [vmem:[#allocation5 + $0x145] sm:$0xff]  ;;  %v10643_v27 = vpop.permute.xlu0 %10642 }
 0x849   : > { %v10608_v61 = vpop.permute.xlu1 %10607  ;;  %v8043_v32 = vsel %vm513_vm1, %v7306_v31, %v10605_v5  ;;  %v7310_v11 = vld [vmem:[#allocation5 + $0x12d] sm:$0xff] }
 0x84a   : > { %v16317_v10 = vpop.f32.mrb[98].mxu0  ;;  %8577 = vmatmul.mubr.f32.gmra.mrb[68].mxu0 %v8040_v16  ;;  %9500 = vmatmul.mubr.msk.f32.gmra.mrb[102].mxu1 %vm513_vm1, %v7435_v37  ;;  %v10609_v33 = vunpack.i.l.bf16 %v10608_v61  ;;  %v10610_v23 = vunpack.i.h.bf16 %v10608_v61  ;;  %v8047_v49 = vsel %vm513_vm1, %v7310_v11, %v10625_v12  ;;  %v7312_v5 = vld [vmem:[#allocation5 + $0x14d] sm:$0xff] }
 0x84b   : > { %v8430_v1 = vpop.f32.mrb[99].mxu0  ;;  %8581 = vmatprep.mubr.f32.mxu0 %v8073_v24  ;;  %9502 = vmatprep.mubr.msk.f32.mxu1 %vm513_vm1, %v7436_v26  ;;  %v7449_v24 = vld [vmem:[#allocation5 + $0x272] sm:$0xff]  ;;  %v10634_v26 = vunpack.i.l.bf16 %v10633_v51 }
 0x84c   : > { %v8076_v52 = vsel %vm513_vm1, %v16202_v56, %v10609_v33  ;;  %v8044_v20 = vsel %vm513_vm1, %v7307_v53, %v10610_v23  ;;  %v7308_v56 = vld [vmem:[#allocation5 + $0x10d] sm:$0xff]  ;;  %v7313_v23 = vld [vmem:[#allocation5 + $0x165] sm:$0xff] }
 0x84d   : > { %v10618_v9 = vpop.permute.xlu1 %10617  ;;  %v8045_v39 = vsel %vm513_vm1, %v7308_v56, %v10615_v2  ;;  %v7450_v1 = vld [vmem:[#allocation5 + $0x28a] sm:$0xff]  ;;  %v8081_v61 = vsel %vm513_vm1, %v16258_v62, %v10634_v26  ;;  %v7455_v62 = vld [vmem:[#allocation5 + $0x2d2] sm:$0xff] }
 0x84e   : > { %8582 = vmatmul.mubr.f32.gmra.mrb[70].mxu0 %v8041_v3  ;;  %9503 = vmatmul.mubr.msk.f32.gmra.mrb[104].mxu1 %vm513_vm1, %v7437_v14  ;;  %v10619_v0 = vunpack.i.l.bf16 %v10618_v9  ;;  %v10620_v35 = vunpack.i.h.bf16 %v10618_v9  ;;  %v7452_v3 = vld [vmem:[#allocation5 + $0x2aa] sm:$0xff]  ;;  %v10635_v14 = vunpack.i.h.bf16 %v10633_v51  ;;  %v7457_v53 = vld [vmem:[#allocation5 + $0x2f2] sm:$0xff] }
 0x84f   : > { %8586 = vmatprep.mubr.f32.mxu0 %v8074_v30  ;;  %9505 = vmatprep.mubr.msk.f32.mxu1 %vm513_vm1, %v7438_v36  ;;  %v7451_v30 = vld [vmem:[#allocation5 + $0x292] sm:$0xff]  ;;  %v7315_v56 = vld [vmem:[#allocation5 + $0x185] sm:$0xff] }
 0x850   : > { %v8078_v50 = vsel %vm513_vm1, %v16230_v28, %v10619_v0  ;;  %v8046_v43 = vsel %vm513_vm1, %v7309_v63, %v10620_v35  ;;  %v8079_v28 = vsel %vm513_vm1, %v16238_v59, %v10624_v22  ;;  %v8049_v33 = vsel %vm513_vm1, %v7312_v5, %v10635_v14  ;;  %v7314_v2 = vld [vmem:[#allocation5 + $0x16d] sm:$0xff] }
 0x851   : > { %v10628_v7 = vpop.permute.xlu1 %10627  ;;  %v7460_v35 = vld [vmem:[#allocation5 + $0x32a] sm:$0xff] }
 0x852   : > { %8587 = vmatmul.mubr.f32.gmra.mrb[72].mxu0 %v8042_v17  ;;  %9506 = vmatmul.mubr.msk.f32.gmra.mrb[106].mxu1 %vm513_vm1, %v7439_v29  ;;  %v10629_v54 = vunpack.i.l.bf16 %v10628_v7  ;;  %v10630_v16 = vunpack.i.h.bf16 %v10628_v7  ;;  %v7454_v17 = vld [vmem:[#allocation5 + $0x2ca] sm:$0xff] }
 0x853   : > { %8591 = vmatprep.mubr.f32.mxu0 %v8075_v38  ;;  %9508 = vmatprep.mubr.msk.f32.mxu1 %vm513_vm1, %v7440_v45  ;;  %v7378_v38 = vld [vmem:[#allocation5 + $0x200] sm:$0xff]  ;;  %v10644_v45 = vunpack.i.l.bf16 %v10643_v27 }
 0x854   : > { %v8080_v59 = vsel %vm513_vm1, %v16248_v34, %v10629_v54  ;;  %v8048_v40 = vsel %vm513_vm1, %v7311_v41, %v10630_v16  ;;  %v7453_v34 = vld [vmem:[#allocation5 + $0x2b2] sm:$0xff] }
 0x855   : > { %v10638_v4 = vpop.permute.xlu1 %10637 }
 0x856   : > { %8592 = vmatmul.mubr.f32.gmra.mrb[74].mxu0 %v8043_v32  ;;  %9509 = vmatmul.mubr.msk.f32.gmra.mrb[108].mxu1 %vm513_vm1, %v7441_v48  ;;  %v10639_v36 = vunpack.i.l.bf16 %v10638_v4  ;;  %v10640_v29 = vunpack.i.h.bf16 %v10638_v4  ;;  %v7456_v32 = vld [vmem:[#allocation5 + $0x2ea] sm:$0xff]  ;;  %v10645_v48 = vunpack.i.h.bf16 %v10643_v27 }
 0x857   : > { %8596 = vmatprep.mubr.f32.mxu0 %v8076_v52  ;;  %9511 = vmatprep.mubr.msk.f32.mxu1 %vm513_vm1, %v7442_v44  ;;  %v7379_v52 = vld [vmem:[#allocation5 + $0x208] sm:$0xff] }
 0x858   : > { %v8082_v18 = vsel %vm513_vm1, %v7378_v38, %v10639_v36  ;;  %v8050_v60 = vsel %vm513_vm1, %v7313_v23, %v10640_v29  ;;  %v8083_v9 = vsel %vm513_vm1, %v7379_v52, %v10644_v45  ;;  %v8051_v0 = vsel %vm513_vm1, %v7314_v2, %v10645_v48 }
 0x859   : > { %v10648_v31 = vpop.permute.xlu1 %10647 }
 0x85a   : > { %8597 = vmatmul.mubr.f32.gmra.mrb[76].mxu0 %v8044_v20  ;;  %9512 = vmatmul.mubr.msk.f32.gmra.mrb[110].mxu1 %vm513_vm1, %v7443_v55  ;;  %v10649_v44 = vunpack.i.l.bf16 %v10648_v31  ;;  %v7458_v20 = vld [vmem:[#allocation5 + $0x30a] sm:$0xff]  ;;  %v10650_v55 = vunpack.i.h.bf16 %v10648_v31 }
 0x85b   : > { %8601 = vmatprep.mubr.f32.mxu0 %v8077_v47  ;;  %9514 = vmatprep.mubr.msk.f32.mxu1 %vm513_vm1, %v7444_v6  ;;  %v7380_v47 = vld [vmem:[#allocation5 + $0x220] sm:$0xff] }
 0x85c   : > { %v8084_v6 = vsel %vm513_vm1, %v7380_v47, %v10649_v44 }
 0x85e   : > { %8602 = vmatmul.mubr.f32.gmra.mrb[78].mxu0 %v8045_v39  ;;  %9515 = vmatmul.mubr.msk.f32.gmra.mrb[112].mxu1 %vm513_vm1, %v7445_v57  ;;  %v8052_v39 = vsel %vm513_vm1, %v7315_v56, %v10650_v55  ;;  %v7461_v57 = vld [vmem:[#allocation5 + $0x332] sm:$0xff] }
 0x85f   : > { %8606 = vmatprep.mubr.f32.mxu0 %v8078_v50  ;;  %9517 = vmatprep.mubr.msk.f32.mxu1 %vm513_vm1, %v7446_v58 }
 0x860   : > { %v16348_v25 = vpop.f32.mrb[100].mxu0 }
 0x861   : > { %v8435_v13 = vpop.f32.mrb[101].mxu0 }
 0x862   : > { %8607 = vmatmul.mubr.f32.gmra.mrb[80].mxu0 %v8046_v43  ;;  %9518 = vmatmul.mubr.msk.f32.gmra.mrb[114].mxu1 %vm513_vm1, %v7447_v42 }
 0x863   : > { %8611 = vmatprep.mubr.f32.mxu0 %v8079_v28  ;;  %9520 = vmatprep.mubr.msk.f32.mxu1 %vm513_vm1, %v7448_v21  ;;  %v16386_v28 = vld [vmem:[%s16576_s8] ss:$0 sm:$0xff] }
 0x864   : > { %v8419_v21 = vadd.f32 %v16386_v28, %v16283_v8  ;;  %v8424_v26 = vadd.f32 %v16386_v28, %v16305_v19 }
 0x866   : > { %v16355_v37 = vpop.f32.mrb[102].mxu0  ;;  %8612 = vmatmul.mubr.f32.gmra.mrb[82].mxu0 %v8047_v49  ;;  %9521 = vmatmul.mubr.msk.f32.gmra.mrb[116].mxu1 %vm513_vm1, %v7449_v24 }
 0x867   : > { %v8440_v46 = vpop.f32.mrb[103].mxu0  ;;  %8616 = vmatprep.mubr.f32.mxu0 %v8080_v59  ;;  %9523 = vmatprep.mubr.msk.f32.mxu1 %vm513_vm1, %v7450_v1  ;;  %v8439_v29 = vadd.f32 %v16386_v28, %v16355_v37 }
 0x86a   : > { %8617 = vmatmul.mubr.f32.gmra.mrb[84].mxu0 %v8048_v40  ;;  %9524 = vmatmul.mubr.msk.f32.gmra.mrb[118].mxu1 %vm513_vm1, %v7451_v30 }
 0x86b   : > { %8621 = vmatprep.mubr.f32.mxu0 %v8081_v61  ;;  %9526 = vmatprep.mubr.msk.f32.mxu1 %vm513_vm1, %v7452_v3  ;;  %v8429_v3 = vadd.f32 %v16386_v28, %v16317_v10  ;;  %v8434_v61 = vadd.f32 %v16386_v28, %v16348_v25 }
 0x86e   : > { %8622 = vmatmul.mubr.f32.gmra.mrb[86].mxu0 %v8049_v33  ;;  %9527 = vmatmul.mubr.msk.f32.gmra.mrb[120].mxu1 %vm513_vm1, %v7453_v34 }
 0x86f   : > { %8626 = vmatprep.mubr.f32.mxu0 %v8082_v18  ;;  %9529 = vmatprep.mubr.msk.f32.mxu1 %vm513_vm1, %v7454_v17 }
 0x872   : > { %8627 = vmatmul.mubr.f32.gmra.mrb[88].mxu0 %v8050_v60  ;;  %9530 = vmatmul.mubr.msk.f32.gmra.mrb[122].mxu1 %vm513_vm1, %v7455_v62 }
 0x873   : > { %8631 = vmatprep.mubr.f32.mxu0 %v8083_v9  ;;  %9532 = vmatprep.mubr.msk.f32.mxu1 %vm513_vm1, %v7456_v32 }
 0x876   : > { %8632 = vmatmul.mubr.f32.gmra.mrb[90].mxu0 %v8051_v0  ;;  %9533 = vmatmul.mubr.msk.f32.gmra.mrb[124].mxu1 %vm513_vm1, %v7457_v53 }
 0x877   : > { %8636 = vmatprep.mubr.f32.mxu0 %v8084_v6  ;;  %9535 = vmatprep.mubr.msk.f32.mxu1 %vm513_vm1, %v7458_v20 }
 0x87a   : > { %8637 = vmatmul.mubr.f32.gmra.mrb[92].mxu0 %v8052_v39  ;;  %9536 = vmatmul.mubr.msk.f32.gmra.mrb[126].mxu1 %vm513_vm1, %v7459_v15 }
 0x87b   : > { %9538 = vmatprep.mubr.msk.f32.mxu1 %vm513_vm1, %v7460_v35 }
 0x87c   : > { %v8443_v22 = vpop.f32.mrb[104].mxu0 }
 0x87d   : > { %v8445_v50 = vpop.f32.mrb[105].mxu0  ;;  %v8444_v31 = vadd.f32 %v16386_v28, %v8443_v22 }
 0x87e   : > { %9539 = vmatmul.mubr.msk.f32.gmra.mrb[128].mxu1 %vm513_vm1, %v7461_v57 }
 0x883   : > { %v8448_v58 = vpop.f32.mrb[106].mxu0 }
 0x884   : > { %v8450_v7 = vpop.f32.mrb[107].mxu0  ;;  %v8449_v60 = vadd.f32 %v16386_v28, %v8448_v58 }
 0x89c   : > { %v8453_v63 = vpop.f32.mrb[108].mxu0 }
 0x89d   : > { %v8455_v12 = vpop.f32.mrb[109].mxu0  ;;  %v8454_v2 = vadd.f32 %v16386_v28, %v8453_v63 }
 0x8a3   : > { %v8458_v13 = vpop.f32.mrb[110].mxu0 }
 0x8a4   : > { %v8460_v43 = vpop.f32.mrb[111].mxu0  ;;  %v8459_v47 = vadd.f32 %v16386_v28, %v8458_v13 }
 0x8be   : > { %v8463_v42 = vpop.f32.mrb[112].mxu0 }
 0x8bf   : > { %v8465_v54 = vpop.f32.mrb[113].mxu0  ;;  %v8464_v35 = vadd.f32 %v16386_v28, %v8463_v42 }
 0x8c5   : > { %v8643_v11 = vpop.f32.mrb[64].mxu1 }
 0x8c6   : > { %v8468_v51 = vpop.f32.mrb[114].mxu0  ;;  %v16390_v16 = vadd.f32 %v8643_v11, %v8419_v21  ;;  %v8645_v24 = vpop.f32.mrb[65].mxu1 }
 0x8c7   : > { %v8470_v49 = vpop.f32.mrb[115].mxu0  ;;  %v8469_v50 = vadd.f32 %v16386_v28, %v8468_v51 }
 0x8ca   : > { %v8648_v59 = vpop.f32.mrb[66].mxu1 }
 0x8cb   : > { %v8473_v46 = vpop.f32.mrb[116].mxu0  ;;  %v16394_v1 = vadd.f32 %v8648_v59, %v8424_v26  ;;  %v8650_v41 = vpop.f32.mrb[67].mxu1 }
 0x8cc   : > { %v8475_v4 = vpop.f32.mrb[117].mxu0  ;;  %v8474_v12 = vadd.f32 %v16386_v28, %v8473_v46 }
 0x8d1   : > { %v8653_v8 = vpop.f32.mrb[68].mxu1 }
 0x8d2   : > { %v8478_v14 = vpop.f32.mrb[118].mxu0  ;;  %v16398_v40 = vadd.f32 %v8653_v8, %v8429_v3  ;;  %v8655_v36 = vpop.f32.mrb[69].mxu1 }
 0x8d3   : > { %v8480_v30 = vpop.f32.mrb[119].mxu0  ;;  %v8479_v21 = vadd.f32 %v16386_v28, %v8478_v14 }
 0x8d6   : > { %v8658_v27 = vpop.f32.mrb[70].mxu1 }
 0x8d7   : > { %v8483_v19 = vpop.f32.mrb[120].mxu0  ;;  %v16402_v34 = vadd.f32 %v8658_v27, %v8434_v61  ;;  %v8660_v5 = vpop.f32.mrb[71].mxu1 }
 0x8d8   : > { %v8485_v17 = vpop.f32.mrb[121].mxu0  ;;  %v8484_v24 = vadd.f32 %v16386_v28, %v8483_v19 }
 0x8dd   : > { %v8663_v10 = vpop.f32.mrb[72].mxu1 }
 0x8de   : > { %v8488_v33 = vpop.f32.mrb[122].mxu0  ;;  %v16406_v38 = vadd.f32 %v8663_v10, %v8439_v29  ;;  %v8665_v18 = vpop.f32.mrb[73].mxu1 }
 0x8df   : > { %v8490_v45 = vpop.f32.mrb[123].mxu0  ;;  %v8489_v4 = vadd.f32 %v16386_v28, %v8488_v33 }
 0x8e2   : > { %v8668_v23 = vpop.f32.mrb[74].mxu1 }
 0x8e3   : > { %v8493_v62 = vpop.f32.mrb[124].mxu0  ;;  %v16409_v25 = vadd.f32 %v8668_v23, %v8444_v31  ;;  %v8670_v48 = vpop.f32.mrb[75].mxu1 }
 0x8e4   : > { %v8495_v32 = vpop.f32.mrb[125].mxu0  ;;  %v8494_v8 = vadd.f32 %v16386_v28, %v8493_v62 }
 0x8e9   : > { %v8673_v44 = vpop.f32.mrb[76].mxu1 }
 0x8ea   : > { %v8498_v52 = vpop.f32.mrb[126].mxu0  ;;  %v16412_v9 = vadd.f32 %v8673_v44, %v8449_v60  ;;  %v8675_v53 = vpop.f32.mrb[77].mxu1 }
 0x8eb   : > { %v8500_v37 = vpop.f32.mrb[127].mxu0  ;;  %v8499_v61 = vadd.f32 %v16386_v28, %v8498_v52 }
 0x8ed   : > { %v8678_v20 = vpop.f32.mrb[78].mxu1 }
 0x8ee   : > { %v16415_v55 = vadd.f32 %v8678_v20, %v8454_v2  ;;  %v8680_v0 = vpop.f32.mrb[79].mxu1 }
 0x8f1   : > { %v8683_v6 = vpop.f32.mrb[80].mxu1 }
 0x8f2   : > { %v16418_v15 = vadd.f32 %v8683_v6, %v8459_v47  ;;  %v8685_v56 = vpop.f32.mrb[81].mxu1 }
 0x8f5   : > { %v8688_v39 = vpop.f32.mrb[82].mxu1 }
 0x8f6   : > { %v16421_v57 = vadd.f32 %v8688_v39, %v8464_v35  ;;  %v8690_v22 = vpop.f32.mrb[83].mxu1 }
 0x8f9   : > { %v8693_v58 = vpop.f32.mrb[84].mxu1 }
 0x8fa   : > { %v16424_v7 = vadd.f32 %v8693_v58, %v8469_v50  ;;  %v8695_v63 = vpop.f32.mrb[85].mxu1 }
 0x8fd   : > { %v8698_v43 = vpop.f32.mrb[86].mxu1 }
 0x8fe   : > { %v16427_v13 = vadd.f32 %v8698_v43, %v8474_v12  ;;  %v8700_v54 = vpop.f32.mrb[87].mxu1 }
 0x901   : > { %v8703_v11 = vpop.f32.mrb[88].mxu1 }
 0x902   : > { %v16430_v42 = vadd.f32 %v8703_v11, %v8479_v21  ;;  %v8705_v49 = vpop.f32.mrb[89].mxu1 }
 0x905   : > { %v8708_v26 = vpop.f32.mrb[90].mxu1 }
 0x906   : > { %v16433_v51 = vadd.f32 %v8708_v26, %v8484_v24  ;;  %v8710_v59 = vpop.f32.mrb[91].mxu1 }
 0x909   : > { %v8713_v41 = vpop.f32.mrb[92].mxu1 }
 0x90a   : > { %v16436_v46 = vadd.f32 %v8713_v41, %v8489_v4  ;;  %v8715_v3 = vpop.f32.mrb[93].mxu1 }
 0x90d   : > { %v8718_v14 = vpop.f32.mrb[94].mxu1 }
 0x90e   : > { %v16439_v30 = vadd.f32 %v8718_v14, %v8494_v8  ;;  %v8720_v36 = vpop.f32.mrb[95].mxu1 }
 0x911   : > { %v8723_v27 = vpop.f32.mrb[96].mxu1 }
 0x912   : > { %v16442_v19 = vadd.f32 %v8723_v27, %v8499_v61  ;;  %v8725_v5 = vpop.f32.mrb[97].mxu1 }
 0x915   : > { %v8568_v17 = vpop.f32.mrb[64].mxu0  ;;  %v9495_v29 = vpop.f32.mrb[98].mxu1 }
 0x916   : > { %v9749_v33 = vadd.f32 %v16386_v28, %v8568_v17  ;;  %v8570_v10 = vpop.f32.mrb[65].mxu0  ;;  %v8793_v45 = vpop.f32.mrb[99].mxu1 }
 0x918   : > { %v8794_v18 = vadd.f32 %v9749_v33, %v8793_v45 }
 0x919   : > { %v8573_v31 = vpop.f32.mrb[66].mxu0  ;;  %v9498_v62 = vpop.f32.mrb[100].mxu1 }
 0x91a   : > { %vm8952_vm1 = vcmp.gt.f32.partialorder %v8794_v18, 0.0  ;;  %v8984_v23 = vmul.f32 0.01, %v8794_v18  ;;  %v9750_v32 = vadd.f32 %v16386_v28, %v8573_v31  ;;  %v8575_v48 = vpop.f32.mrb[67].mxu0  ;;  %v8803_v60 = vpop.f32.mrb[101].mxu1 }
 0x91c   : > { %v9016_v52 = vsel %vm8952_vm1, %v8794_v18, %v8984_v23  ;;  %v8799_v44 = vadd.f32 %v9750_v32, %v9495_v29 }
 0x91d   : > { %9048 = vst.msk [vmem:[%s16450_s11] sm:$0xff] %vm389_vm2, %v9016_v52  ;;  %v8578_v37 = vpop.f32.mrb[68].mxu0  ;;  %v9501_v53 = vpop.f32.mrb[102].mxu1 }
 0x91e   : > { %vm8953_vm0 = vcmp.gt.f32.partialorder %v8799_v44, 0.0  ;;  %v8985_v2 = vmul.f32 0.01, %v8799_v44  ;;  %v9751_v20 = vadd.f32 %v16386_v28, %v8578_v37  ;;  %v8580_v0 = vpop.f32.mrb[69].mxu0  ;;  %v8813_v47 = vpop.f32.mrb[103].mxu1 }
 0x920   : > { %v9017_v6 = vsel %vm8953_vm0, %v8799_v44, %v8985_v2  ;;  %v8804_v56 = vadd.f32 %v9751_v20, %v8803_v60 }
 0x921   : > { %9049 = vst.msk [vmem:[%s16450_s11 + $0x8] sm:$0xff] %vm389_vm2, %v9017_v6  ;;  %v8583_v35 = vpop.f32.mrb[70].mxu0  ;;  %v9504_v39 = vpop.f32.mrb[104].mxu1 }
 0x922   : > { %vm8954_vm3 = vcmp.gt.f32.partialorder %v8804_v56, 0.0  ;;  %v8986_v22 = vmul.f32 0.01, %v8804_v56  ;;  %v9752_v50 = vadd.f32 %v16386_v28, %v8583_v35  ;;  %v8585_v58 = vpop.f32.mrb[71].mxu0  ;;  %v8823_v63 = vpop.f32.mrb[105].mxu1 }
 0x924   : > { %v9018_v12 = vsel %vm8954_vm3, %v8804_v56, %v8986_v22  ;;  %v8809_v43 = vadd.f32 %v9752_v50, %v9498_v62 }
 0x925   : > { %9050 = vst.msk [vmem:[%s16450_s11 + $0x10] sm:$0xff] %vm389_vm2, %v9018_v12  ;;  %v8588_v54 = vpop.f32.mrb[72].mxu0  ;;  %v16461_v21 = vpop.f32.mrb[106].mxu1 }
 0x926   : > { %vm8955_vm4 = vcmp.gt.f32.partialorder %v8809_v43, 0.0  ;;  %v8987_v11 = vmul.f32 0.01, %v8809_v43  ;;  %v9753_v49 = vadd.f32 %v16386_v28, %v8588_v54  ;;  %v8590_v24 = vpop.f32.mrb[73].mxu0  ;;  %v8833_v26 = vpop.f32.mrb[107].mxu1 }
 0x928   : > { %v9019_v59 = vsel %vm8955_vm4, %v8809_v43, %v8987_v11  ;;  %v8814_v4 = vadd.f32 %v9753_v49, %v8813_v47 }
 0x929   : > { %9051 = vst.msk [vmem:[%s16450_s11 + $0x18] sm:$0xff] %vm389_vm2, %v9019_v59  ;;  %v8593_v41 = vpop.f32.mrb[74].mxu0  ;;  %v16466_v3 = vpop.f32.mrb[108].mxu1 }
 0x92a   : > { %vm8956_vm9 = vcmp.gt.f32.partialorder %v8814_v4, 0.0  ;;  %v8988_v8 = vmul.f32 0.01, %v8814_v4  ;;  %v9754_v14 = vadd.f32 %v16386_v28, %v8593_v41  ;;  %v8595_v36 = vpop.f32.mrb[75].mxu0  ;;  %v16469_v61 = vpop.f32.mrb[109].mxu1 }
 0x92c   : > { %v9020_v27 = vsel %vm8956_vm9, %v8814_v4, %v8988_v8  ;;  %v8819_v5 = vadd.f32 %v9754_v14, %v9501_v53 }
 0x92d   : > { %9052 = vst.msk [vmem:[%s16450_s11 + $0x20] sm:$0xff] %vm389_vm2, %v9020_v27  ;;  %v8598_v17 = vpop.f32.mrb[76].mxu0  ;;  %v16473_v29 = vpop.f32.mrb[110].mxu1 }
 0x92e   : > { %vm8957_vm10 = vcmp.gt.f32.partialorder %v8819_v5, 0.0  ;;  %v8989_v33 = vmul.f32 0.01, %v8819_v5  ;;  %v9755_v10 = vadd.f32 %v16386_v28, %v8598_v17  ;;  %v8600_v45 = vpop.f32.mrb[77].mxu0  ;;  %v16476_v18 = vpop.f32.mrb[111].mxu1 }
 0x930   : > { %v9021_v31 = vsel %vm8957_vm10, %v8819_v5, %v8989_v33  ;;  %v8824_v62 = vadd.f32 %v9755_v10, %v8823_v63 }
 0x931   : > { %9053 = vst.msk [vmem:[%s16450_s11 + $0x28] sm:$0xff] %vm389_vm2, %v9021_v31  ;;  %v8603_v23 = vpop.f32.mrb[78].mxu0  ;;  %v9516_v32 = vpop.f32.mrb[112].mxu1 }
 0x932   : > { %vm8958_vm11 = vcmp.gt.f32.partialorder %v8824_v62, 0.0  ;;  %v8990_v48 = vmul.f32 0.01, %v8824_v62  ;;  %v9756_v60 = vadd.f32 %v16386_v28, %v8603_v23  ;;  %v8869_v52 = vadd.f32 %v9516_v32, %v16390_v16  ;;  %v8605_v44 = vpop.f32.mrb[79].mxu0  ;;  %v16482_v37 = vpop.f32.mrb[113].mxu1 }
 0x934   : > { %v9022_v53 = vsel %vm8958_vm11, %v8824_v62, %v8990_v48  ;;  %v8829_v2 = vadd.f32 %v9756_v60, %v9504_v39  ;;  %vm8967_vm12 = vcmp.gt.f32.partialorder %v8869_v52, 0.0  ;;  %v8999_v20 = vmul.f32 0.01, %v8869_v52 }
 0x935   : > { %9054 = vst.msk [vmem:[%s16450_s11 + $0x30] sm:$0xff] %vm389_vm2, %v9022_v53  ;;  %v8608_v0 = vpop.f32.mrb[80].mxu0  ;;  %v9519_v47 = vpop.f32.mrb[114].mxu1 }
 0x936   : > { %vm8959_vm13 = vcmp.gt.f32.partialorder %v8829_v2, 0.0  ;;  %v8991_v6 = vmul.f32 0.01, %v8829_v2  ;;  %v9031_v56 = vsel %vm8967_vm12, %v8869_v52, %v8999_v20  ;;  %v9757_v35 = vadd.f32 %v16386_v28, %v8608_v0  ;;  %v8610_v22 = vpop.f32.mrb[81].mxu0  ;;  %v8873_v16 = vpop.f32.mrb[115].mxu1 }
 0x937   : > { %9063 = vst.msk [vmem:[%s16450_s11 + $0x78] sm:$0xff] %vm389_vm2, %v9031_v56  ;;  %v8879_v50 = vadd.f32 %v9519_v47, %v16398_v40  ;;  %v8874_v39 = vadd.f32 %v8873_v16, %v16394_v1 }
 0x938   : > { %v9023_v58 = vsel %vm8959_vm13, %v8829_v2, %v8991_v6  ;;  %v8834_v63 = vadd.f32 %v9757_v35, %v8833_v26 }
 0x939   : > { %9055 = vst.msk [vmem:[%s16450_s11 + $0x38] sm:$0xff] %vm389_vm2, %v9023_v58  ;;  %vm8969_vm14 = vcmp.gt.f32.partialorder %v8879_v50, 0.0  ;;  %v9001_v12 = vmul.f32 0.01, %v8879_v50  ;;  %vm8968_vm6 = vcmp.gt.f32.partialorder %v8874_v39, 0.0  ;;  %v8613_v11 = vpop.f32.mrb[82].mxu0 }
 0x93a   : > { %v9000_v43 = vmul.f32 0.01, %v8874_v39  ;;  %vm8960_vm8 = vcmp.gt.f32.partialorder %v8834_v63, 0.0  ;;  %v8992_v54 = vmul.f32 0.01, %v8834_v63  ;;  %v9522_v49 = vpop.f32.mrb[116].mxu1  ;;  %v9758_v40 = vadd.f32 %v16386_v28, %v8613_v11 }
 0x93b   : > { %v9033_v24 = vsel %vm8969_vm14, %v8879_v50, %v9001_v12  ;;  %v8889_v1 = vadd.f32 %v9522_v49, %v16406_v38  ;;  %v8615_v26 = vpop.f32.mrb[83].mxu0  ;;  %v8883_v4 = vpop.f32.mrb[117].mxu1 }
 0x93c   : > { %v9032_v59 = vsel %vm8968_vm6, %v8874_v39, %v9000_v43  ;;  %v9024_v41 = vsel %vm8960_vm8, %v8834_v63, %v8992_v54  ;;  %9065 = vst.msk [vmem:[%s16450_s11 + $0x88] sm:$0xff] %vm389_vm2, %v9033_v24  ;;  %v8884_v8 = vadd.f32 %v8883_v4, %v16402_v34  ;;  %v8839_v14 = vadd.f32 %v9758_v40, %v16461_v21 }
 0x93d   : > { %9064 = vst.msk [vmem:[%s16450_s11 + $0x80] sm:$0xff] %vm389_vm2, %v9032_v59  ;;  %9056 = vst.msk [vmem:[%s16450_s11 + $0x40] sm:$0xff] %vm389_vm2, %v9024_v41  ;;  %vm8971_vm5 = vcmp.gt.f32.partialorder %v8889_v1, 0.0  ;;  %v9003_v36 = vmul.f32 0.01, %v8889_v1  ;;  %v8618_v27 = vpop.f32.mrb[84].mxu0 }
 0x93e   : > { %v9525_v5 = vpop.f32.mrb[118].mxu1  ;;  %vm8970_vm7 = vcmp.gt.f32.partialorder %v8884_v8, 0.0  ;;  %v9002_v38 = vmul.f32 0.01, %v8884_v8  ;;  %v9759_v17 = vadd.f32 %v16386_v28, %v8618_v27  ;;  %v8620_v10 = vpop.f32.mrb[85].mxu0  ;;  %vm8961_vm15 = vcmp.gt.f32.partialorder %v8839_v14, 0.0 }
 0x93f   : > { %v8899_v33 = vadd.f32 %v9525_v5, %v16412_v9  ;;  %v8893_v45 = vpop.f32.mrb[119].mxu1  ;;  %v8993_v34 = vmul.f32 0.01, %v8839_v14  ;;  %v9035_v31 = vsel %vm8971_vm5, %v8889_v1, %v9003_v36 }
 0x940   : > { %v8894_v62 = vadd.f32 %v8893_v45, %v16409_v25  ;;  %9067 = vst.msk [vmem:[%s16450_s11 + $0x98] sm:$0xff] %vm389_vm2, %v9035_v31  ;;  %v9034_v21 = vsel %vm8970_vm7, %v8884_v8, %v9002_v38  ;;  %v8844_v23 = vadd.f32 %v9759_v17, %v16469_v61 }
 0x941   : > { %vm8973_vm1 = vcmp.gt.f32.partialorder %v8899_v33, 0.0  ;;  %v9005_v32 = vmul.f32 0.01, %v8899_v33  ;;  %v9025_v48 = vsel %vm8961_vm15, %v8839_v14, %v8993_v34  ;;  %9066 = vst.msk [vmem:[%s16450_s11 + $0x90] sm:$0xff] %vm389_vm2, %v9034_v21  ;;  %v8623_v60 = vpop.f32.mrb[86].mxu0  ;;  %v9528_v52 = vpop.f32.mrb[120].mxu1 }
 0x942   : > { %vm8972_vm0 = vcmp.gt.f32.partialorder %v8894_v62, 0.0  ;;  %v9004_v9 = vmul.f32 0.01, %v8894_v62  ;;  %9057 = vst.msk [vmem:[%s16450_s11 + $0x48] sm:$0xff] %vm389_vm2, %v9025_v48  ;;  %vm8962_vm3 = vcmp.gt.f32.partialorder %v8844_v23, 0.0  ;;  %v9760_v53 = vadd.f32 %v16386_v28, %v8623_v60  ;;  %v8625_v61 = vpop.f32.mrb[87].mxu0 }
 0x943   : > { %v8994_v25 = vmul.f32 0.01, %v8844_v23  ;;  %v9037_v44 = vsel %vm8973_vm1, %v8899_v33, %v9005_v32  ;;  %v8903_v2 = vpop.f32.mrb[121].mxu1  ;;  %v8909_v0 = vadd.f32 %v9528_v52, %v16418_v15 }
 0x944   : > { %9069 = vst.msk [vmem:[%s16450_s11 + $0xa8] sm:$0xff] %vm389_vm2, %v9037_v44  ;;  %v9036_v20 = vsel %vm8972_vm0, %v8894_v62, %v9004_v9  ;;  %v8904_v47 = vadd.f32 %v8903_v2, %v16415_v55  ;;  %v8849_v56 = vadd.f32 %v9760_v53, %v16466_v3 }
 0x945   : > { %v9026_v6 = vsel %vm8962_vm3, %v8844_v23, %v8994_v25  ;;  %9068 = vst.msk [vmem:[%s16450_s11 + $0xa0] sm:$0xff] %vm389_vm2, %v9036_v20  ;;  %vm8975_vm4 = vcmp.gt.f32.partialorder %v8909_v0, 0.0  ;;  %v9007_v35 = vmul.f32 0.01, %v8909_v0  ;;  %v8628_v50 = vpop.f32.mrb[88].mxu0  ;;  %v9531_v15 = vpop.f32.mrb[122].mxu1 }
 0x946   : > { %9058 = vst.msk [vmem:[%s16450_s11 + $0x50] sm:$0xff] %vm389_vm2, %v9026_v6  ;;  %vm8974_vm9 = vcmp.gt.f32.partialorder %v8904_v47, 0.0  ;;  %v9006_v22 = vmul.f32 0.01, %v8904_v47  ;;  %vm8963_vm10 = vcmp.gt.f32.partialorder %v8849_v56, 0.0  ;;  %v9761_v58 = vadd.f32 %v16386_v28, %v8628_v50  ;;  %v8630_v3 = vpop.f32.mrb[89].mxu0 }
 0x947   : > { %v8995_v16 = vmul.f32 0.01, %v8849_v56  ;;  %v9039_v39 = vsel %vm8975_vm4, %v8909_v0, %v9007_v35  ;;  %v8919_v63 = vadd.f32 %v9531_v15, %v16424_v7  ;;  %v8913_v12 = vpop.f32.mrb[123].mxu1 }
 0x948   : > { %v9038_v55 = vsel %vm8974_vm9, %v8904_v47, %v9006_v22  ;;  %9071 = vst.msk [vmem:[%s16450_s11 + $0xb8] sm:$0xff] %vm389_vm2, %v9039_v39  ;;  %v8914_v54 = vadd.f32 %v8913_v12, %v16421_v57  ;;  %v8854_v11 = vadd.f32 %v9761_v58, %v16476_v18 }
 0x949   : > { %v9027_v43 = vsel %vm8963_vm10, %v8849_v56, %v8995_v16  ;;  %9070 = vst.msk [vmem:[%s16450_s11 + $0xb0] sm:$0xff] %vm389_vm2, %v9038_v55  ;;  %vm8977_vm11 = vcmp.gt.f32.partialorder %v8919_v63, 0.0  ;;  %v9009_v49 = vmul.f32 0.01, %v8919_v63  ;;  %v8633_v24 = vpop.f32.mrb[90].mxu0  ;;  %v9534_v59 = vpop.f32.mrb[124].mxu1 }
 0x94a   : > { %9059 = vst.msk [vmem:[%s16450_s11 + $0x58] sm:$0xff] %vm389_vm2, %v9027_v43  ;;  %vm8976_vm12 = vcmp.gt.f32.partialorder %v8914_v54, 0.0  ;;  %v9008_v7 = vmul.f32 0.01, %v8914_v54  ;;  %v9762_v40 = vadd.f32 %v16386_v28, %v8633_v24  ;;  %v8929_v1 = vadd.f32 %v9534_v59, %v16430_v42  ;;  %v8635_v26 = vpop.f32.mrb[91].mxu0  ;;  %v8923_v4 = vpop.f32.mrb[125].mxu1 }
 0x94b   : > { %vm8964_vm13 = vcmp.gt.f32.partialorder %v8854_v11, 0.0  ;;  %v8996_v57 = vmul.f32 0.01, %v8854_v11  ;;  %v9041_v41 = vsel %vm8977_vm11, %v8919_v63, %v9009_v49  ;;  %v8924_v8 = vadd.f32 %v8923_v4, %v16427_v13 }
 0x94c   : > { %9073 = vst.msk [vmem:[%s16450_s11 + $0xc8] sm:$0xff] %vm389_vm2, %v9041_v41  ;;  %v9040_v18 = vsel %vm8976_vm12, %v8914_v54, %v9008_v7  ;;  %v8859_v14 = vadd.f32 %v9762_v40, %v16473_v29  ;;  %vm8979_vm14 = vcmp.gt.f32.partialorder %v8929_v1, 0.0  ;;  %v9011_v36 = vmul.f32 0.01, %v8929_v1 }
 0x94d   : > { %v9028_v27 = vsel %vm8964_vm13, %v8854_v11, %v8996_v57  ;;  %9072 = vst.msk [vmem:[%s16450_s11 + $0xc0] sm:$0xff] %vm389_vm2, %v9040_v18  ;;  %vm8978_vm6 = vcmp.gt.f32.partialorder %v8924_v8, 0.0  ;;  %v9010_v42 = vmul.f32 0.01, %v8924_v8  ;;  %v8638_v5 = vpop.f32.mrb[92].mxu0  ;;  %v9537_v38 = vpop.f32.mrb[126].mxu1 }
 0x94e   : > { %9060 = vst.msk [vmem:[%s16450_s11 + $0x60] sm:$0xff] %vm389_vm2, %v9028_v27  ;;  %vm8965_vm8 = vcmp.gt.f32.partialorder %v8859_v14, 0.0  ;;  %v8997_v13 = vmul.f32 0.01, %v8859_v14  ;;  %v9043_v17 = vsel %vm8979_vm14, %v8929_v1, %v9011_v36  ;;  %v9763_v33 = vadd.f32 %v16386_v28, %v8638_v5  ;;  %v8640_v29 = vpop.f32.mrb[93].mxu0  ;;  %v8933_v10 = vpop.f32.mrb[127].mxu1 }
 0x94f   : > { %9075 = vst.msk [vmem:[%s16450_s11 + $0xd8] sm:$0xff] %vm389_vm2, %v9043_v17  ;;  %v9042_v45 = vsel %vm8978_vm6, %v8924_v8, %v9010_v42  ;;  %v8939_v34 = vadd.f32 %v9537_v38, %v16436_v46  ;;  %v8934_v31 = vadd.f32 %v8933_v10, %v16433_v51 }
 0x950   : > { %v9029_v62 = vsel %vm8965_vm8, %v8859_v14, %v8997_v13  ;;  %9074 = vst.msk [vmem:[%s16450_s11 + $0xd0] sm:$0xff] %vm389_vm2, %v9042_v45  ;;  %v8864_v21 = vadd.f32 %v9763_v33, %v16482_v37 }
 0x951   : > { %9061 = vst.msk [vmem:[%s16450_s11 + $0x68] sm:$0xff] %vm389_vm2, %v9029_v62  ;;  %vm8981_vm5 = vcmp.gt.f32.partialorder %v8939_v34, 0.0  ;;  %v9013_v28 = vmul.f32 0.01, %v8939_v34  ;;  %vm8980_vm7 = vcmp.gt.f32.partialorder %v8934_v31, 0.0  ;;  %v9540_v46 = vpop.f32.mrb[128].mxu1 }
 0x952   : > { %v9012_v23 = vmul.f32 0.01, %v8934_v31  ;;  %vm8966_vm15 = vcmp.gt.f32.partialorder %v8864_v21, 0.0  ;;  %v8998_v32 = vmul.f32 0.01, %v8864_v21  ;;  %v8949_v9 = vadd.f32 %v9540_v46, %v16442_v19  ;;  %v8943_v60 = vpop.f32.mrb[129].mxu1 }
 0x953   : > { %v9045_v48 = vsel %vm8981_vm5, %v8939_v34, %v9013_v28  ;;  %v8944_v37 = vadd.f32 %v8943_v60, %v16439_v30 }
 0x954   : > { %v9044_v51 = vsel %vm8980_vm7, %v8934_v31, %v9012_v23  ;;  %v9030_v52 = vsel %vm8966_vm15, %v8864_v21, %v8998_v32  ;;  %9077 = vst.msk [vmem:[%s16450_s11 + $0xe8] sm:$0xff] %vm389_vm2, %v9045_v48  ;;  %vm8983_vm1 = vcmp.gt.f32.partialorder %v8949_v9, 0.0  ;;  %v9015_v25 = vmul.f32 0.01, %v8949_v9 }
 0x955   : > { %9076 = vst.msk [vmem:[%s16450_s11 + $0xe0] sm:$0xff] %vm389_vm2, %v9044_v51  ;;  %9062 = vst.msk [vmem:[%s16450_s11 + $0x70] sm:$0xff] %vm389_vm2, %v9030_v52  ;;  %vm8982_vm0 = vcmp.gt.f32.partialorder %v8944_v37, 0.0  ;;  %v9014_v44 = vmul.f32 0.01, %v8944_v37 }
 0x956   : > { %v9047_v53 = vsel %vm8983_vm1, %v8949_v9, %v9015_v25 }
 0x957   : > { %9079 = vst.msk [vmem:[%s16450_s11 + $0xf8] sm:$0xff] %vm389_vm2, %v9047_v53  ;;  %v9046_v61 = vsel %vm8982_vm0, %v8944_v37, %v9014_v44 }
 0x958   : > { %9078 = vst.msk [vmem:[%s16450_s11 + $0xf0] sm:$0xff] %vm389_vm2, %v9046_v61 }
 0x959 PF: > { %s19_s30 = sadd.s32 1, %s10670_s30  }
 0x95a   : > { %p16_p4 = scmp.ge.s32.totalorder %s19_s30, 4  }
 0x95c   :  { %18 = sbr.rel (!%p16_p4) target bundleno = 1 (0x1), region = 94 }

</bundles_post_ra>
